<compile_context>
chip_gen: v5e
topology: v5e:2x2
jax: 0.10.0
libtpu: 0.0.40
codegen_flags: <defaults>
</compile_context>

<pallas_src>
import numpy as np
import jax
import jax.numpy as jnp
from jax.experimental import pallas as pl
from jax.experimental.pallas import tpu as pltpu


# ------------------------------ fused kernel --------------------------------

def _make_unet_kernel(L, meta):
    """meta: tuple of (row_offset, cin, cout, bias_row) per conv (execution order)."""

    def kernel(x_ref, w_ref, b_ref, o_ref):
        # ---- helpers ---------------------------------------------------------
        def shift_prev(x, seg):
            # y[r] = x[r-1] within each length-`seg` sample segment, 0 at segment
            # start (per-sample zero padding; the iota mask stops cross-sample
            # bleed when TB > 1).
            rows, c = x.shape
            y = jnp.concatenate(
                [jnp.zeros((1, c), x.dtype), x[:rows - 1, :]], axis=0)
            r = jax.lax.broadcasted_iota(jnp.int32, (rows, c), 0)
            return jnp.where(r % seg == 0, 0.0, y)

        def shift_next(x, seg):
            rows, c = x.shape
            y = jnp.concatenate(
                [x[1:, :], jnp.zeros((1, c), x.dtype)], axis=0)
            r = jax.lax.broadcasted_iota(jnp.int32, (rows, c), 0)
            return jnp.where(r % seg == seg - 1, 0.0, y)

        def conv3_relu(x, idx, seg):
            # Conv1d(kernel=3, pad=1, stride=1) + ReLU on a (rows, cin) slab.
            off, cin, cout, brow = meta[idx]
            xm = shift_prev(x, seg)        # x[l-1]
            xp = shift_next(x, seg)        # x[l+1]
            b = b_ref[brow:brow + 1, :cout]
            if 3 * cin <= 128:
                # tiny Cin (first layer): one im2col MXU matmul
                cols = jnp.concatenate([xm, x, xp], axis=-1).astype(jnp.bfloat16)
                acc = jnp.dot(cols, w_ref[off:off + 3 * cin, :cout],
                              preferred_element_type=jnp.float32)
            else:
                # wide convs: 3 accumulating matmuls, K already lane-aligned
                acc = jnp.dot(xm.astype(jnp.bfloat16),
                              w_ref[off:off + cin, :cout],
                              preferred_element_type=jnp.float32)
                acc = acc + jnp.dot(x.astype(jnp.bfloat16),
                                    w_ref[off + cin:off + 2 * cin, :cout],
                                    preferred_element_type=jnp.float32)
                acc = acc + jnp.dot(xp.astype(jnp.bfloat16),
                                    w_ref[off + 2 * cin:off + 3 * cin, :cout],
                                    preferred_element_type=jnp.float32)
            return jnp.maximum(acc + b, 0.0)      # f32 epilogue (v5e-safe)

        def conv3_relu_folded(xe, xo, idx, seg_half):
            # Same conv, but input/output are length-folded: xe[r] = x[2r],
            # xo[r] = x[2r+1]; per-sample folded length is `seg_half`.
            off, cin, cout, brow = meta[idx]
            w0 = w_ref[off:off + cin, :cout]
            w1 = w_ref[off + cin:off + 2 * cin, :cout]
            w2 = w_ref[off + 2 * cin:off + 3 * cin, :cout]
            b = b_ref[brow:brow + 1, :cout]
            prev_odd = shift_prev(xo, seg_half).astype(jnp.bfloat16)   # x[2r-1]
            next_even = shift_next(xe, seg_half).astype(jnp.bfloat16)  # x[2r+2]
            xeb = xe.astype(jnp.bfloat16)
            xob = xo.astype(jnp.bfloat16)
            ye = jnp.dot(prev_odd, w0, preferred_element_type=jnp.float32)
            ye = ye + jnp.dot(xeb, w1, preferred_element_type=jnp.float32)
            ye = ye + jnp.dot(xob, w2, preferred_element_type=jnp.float32)
            yo = jnp.dot(xeb, w0, preferred_element_type=jnp.float32)
            yo = yo + jnp.dot(xob, w1, preferred_element_type=jnp.float32)
            yo = yo + jnp.dot(next_even, w2, preferred_element_type=jnp.float32)
            return jnp.maximum(ye + b, 0.0), jnp.maximum(yo + b, 0.0)

        def deinterleave(f):
            # f[2r], f[2r+1] as two separate slabs (even/odd length positions).
            rows, c = f.shape
            fr = f.reshape(rows // 2, 2, c)
            fe = fr[:, 0:1, :].reshape(rows // 2, c)
            fo = fr[:, 1:2, :].reshape(rows // 2, c)
            return fe, fo

        # ---- forward ---------------------------------------------------------
        x = x_ref[...]                                   # (TB*L, Cin) f32
        seg1, seg2, seg3 = L, L // 2, L // 4

        # encoder level 1
        f1 = conv3_relu(conv3_relu(x, 0, seg1), 1, seg1)            # (R, 64)
        f1e, f1o = deinterleave(f1)
        m1 = f1e >= f1o                     # pool "indices" (first-max-wins)
        f1p = jnp.maximum(f1e, f1o)                                  # (R/2, 64)

        # encoder level 2
        f2 = conv3_relu(conv3_relu(f1p, 2, seg2), 3, seg2)           # (R/2, 128)
        f2e, f2o = deinterleave(f2)
        m2 = f2e >= f2o
        f2p = jnp.maximum(f2e, f2o)                                  # (R/4, 128)

        # bottleneck
        d2 = conv3_relu(conv3_relu(f2p, 4, seg3), 5, seg3)           # (R/4, 128)

        # decoder level 2: unpool (mask scatter) + skip add, then conv block
        ua2 = jnp.where(m2, d2, 0.0)
        ub2 = d2 - ua2
        h2, c2 = ua2.shape
        up2 = jnp.concatenate([ua2.reshape(h2, 1, c2),
                               ub2.reshape(h2, 1, c2)],
                              axis=1).reshape(2 * h2, c2)
        t2 = f2 + up2                                                # (R/2, 128)
        d1 = conv3_relu(conv3_relu(t2, 6, seg2), 7, seg2)            # (R/2, 64)

        # decoder level 1: stay length-folded so the final store is a dense
        # 128-lane slab (no masked vst, no sublane interleave).
        ua1 = jnp.where(m1, d1, 0.0)
        ub1 = d1 - ua1
        t1e = f1e + ua1
        t1o = f1o + ub1
        ye, yo = conv3_relu_folded(t1e, t1o, 8, seg2)
        ze, zo = conv3_relu_folded(ye, yo, 9, seg2)
        o_ref[...] = jnp.concatenate([ze, zo], axis=-1)              # (R/2, 128)

    return kernel


# --------------------------------- wrapper -----------------------------------

def _conv_channels(set_in):
    # execution order: l1a, l1b, l2a, l2b, l3a, l3b, r2a, r2b, r1a, r1b
    return [(set_in, 64), (64, 64), (64, 128), (128, 128), (128, 256),
            (256, 128), (128, 128), (128, 64), (64, 64), (64, 64)]


def _pack_params(params):
    """Pack 10 (w (3*cin, cout) f32, b (1, cout) f32) into one bf16 weight slab,
    one f32 bias slab and static (offset, cin, cout, bias_row) metadata."""
    max_cout = max(w.shape[1] for w, _ in params)            # 256
    w_parts, b_parts, meta = [], [], []
    off = 0
    for i, (w, b) in enumerate(params):
        rows, cout = w.shape
        cin = rows // 3
        rpad = ((rows + 7) // 8) * 8                         # sublane-align segments
        w_parts.append(jnp.pad(w, ((0, rpad - rows), (0, max_cout - cout))))
        b_parts.append(jnp.pad(b, ((0, 0), (0, max_cout - cout))))
        meta.append((off, cin, cout, i))
        off += rpad
    n_b = len(b_parts)
    b_pad = ((n_b + 7) // 8) * 8 - n_b
    if b_pad:
        b_parts.append(jnp.zeros((b_pad, max_cout), jnp.float32))
    w_slab = jnp.concatenate(w_parts, axis=0).astype(jnp.bfloat16)
    b_slab = jnp.concatenate(b_parts, axis=0)
    return w_slab, b_slab, tuple(meta)


def _pick_block_batch(N, L, max_rows=512):
    """Largest TB dividing N with TB*L <= max_rows rows per step, keeping the
    grid >= 2 steps whenever N > 1 (v7x has 2 TensorCores to feed)."""
    best = 1
    for tb in range(1, N + 1):
        if N % tb:
            continue
        if tb * L > max_rows:
            continue
        if N > 1 and N // tb < 2:
            continue
        best = tb
    return best


def unet_forward(x_nlc, params):
    """x_nlc: (N, L, Cin) f32 (channels-last).  params: list of 10 (w, b)."""
    N, L, Cin = x_nlc.shape
    assert L % 4 == 0, "two MaxPool1d(k=2, s=2) stages require L % 4 == 0"
    TB = _pick_block_batch(N, L)
    R = TB * L
    assert R % 8 == 0 and (R // 2) % 8 == 0

    w_slab, b_slab, meta = _pack_params(params)
    c_out = params[-1][0].shape[1]                 # 64
    assert (2 * c_out) % 128 == 0

    x2d = x_nlc.reshape(N * L, Cin)                # free XLA reshape

    out_flat = pl.pallas_call(
        _make_unet_kernel(L, meta),
        out_shape=jax.ShapeDtypeStruct((N * L // 2, 2 * c_out), jnp.float32),
        grid=(N // TB,),
        in_specs=[
            pl.BlockSpec((R, Cin), lambda g: (g, 0)),
            pl.BlockSpec(w_slab.shape, lambda g: (0, 0)),   # fetched once
            pl.BlockSpec(b_slab.shape, lambda g: (0, 0)),
        ],
        out_specs=pl.BlockSpec((R // 2, 2 * c_out), lambda g: (g, 0)),
        compiler_params=pltpu.CompilerParams(
            dimension_semantics=("parallel",),     # v7x: shard batch across 2 TCs
            # Plenty for these shapes.  If L is scaled up: raise toward ~100 MiB
            # on v5e/v6e (128 MiB physical); on v7x (64 MiB) add a length-tiled
            # grid axis instead.
            vmem_limit_bytes=32 * 1024 * 1024),
    )(x2d, w_slab, b_slab)

    # lane-folded rows: row r of sample n = [out[n, 2r, :64] | out[n, 2r+1, :64]]
    # -> row-major contiguous, so this reshape is free.
    return out_flat.reshape(N, L, c_out)


# ----------------------------- pure-JAX reference ----------------------------
# Mirrors PyTorch semantics and the kernel's numerics (bf16 dot operands, f32
# accumulation, same per-tap accumulation order).

def _conv3_relu_ref(x, w, b):
    N, L, C = x.shape
    wb = w.astype(jnp.bfloat16)
    z = jnp.zeros((N, 1, C), x.dtype)
    xm = jnp.concatenate([z, x[:, :L - 1, :]], axis=1).astype(jnp.bfloat16)
    xc = x.astype(jnp.bfloat16)
    xp = jnp.concatenate([x[:, 1:, :], z], axis=1).astype(jnp.bfloat16)
    if 3 * C <= 128:
        cols = jnp.concatenate([xm, xc, xp], axis=-1)
        acc = jnp.einsum("nlk,ko->nlo", cols, wb,
                         preferred_element_type=jnp.float32)
    else:
        acc = jnp.einsum("nlc,co->nlo", xm, wb[:C],
                         preferred_element_type=jnp.float32)
        acc = acc + jnp.einsum("nlc,co->nlo", xc, wb[C:2 * C],
                               preferred_element_type=jnp.float32)
        acc = acc + jnp.einsum("nlc,co->nlo", xp, wb[2 * C:3 * C],
                               preferred_element_type=jnp.float32)
    return jnp.maximum(acc + b, 0.0)


def _pool_ref(x):
    N, L, C = x.shape
    xr = x.reshape(N, L // 2, 2, C)
    a, b = xr[:, :, 0, :], xr[:, :, 1, :]
    return jnp.maximum(a, b), a >= b


def _unpool_add_ref(de, mask_a, feat):
    ua = jnp.where(mask_a, de, 0.0)
    ub = de - ua
    up = jnp.stack([ua, ub], axis=2).reshape(feat.shape)
    return feat + up


def unet_forward_ref(x, params):
    cv = lambda t, i: _conv3_relu_ref(t, *params[i])
    f1 = cv(cv(x, 0), 1)
    f1p, m1 = _pool_ref(f1)
    f2 = cv(cv(f1p, 2), 3)
    f2p, m2 = _pool_ref(f2)
    d2 = cv(cv(f2p, 4), 5)
    t2 = _unpool_add_ref(d2, m2, f2)
    d1 = cv(cv(t2, 6), 7)
    t1 = _unpool_add_ref(d1, m1, f1)
    return cv(cv(t1, 8), 9)


# ------------------------------- parameter init ------------------------------

def init_conv(key, cin, cout):
    kw, kb = jax.random.split(key)
    bound = 1.0 / np.sqrt(cin * 3)   # PyTorch Conv1d default-style bound
    w = jax.random.uniform(kw, (3, cin, cout), jnp.float32, -bound, bound)
    b = jax.random.uniform(kb, (1, cout), jnp.float32, -bound, bound)
    # rows = [tap l-1 ; tap l ; tap l+1], each (cin, cout)
    return w.reshape(3 * cin, cout), b


# ------------------------------------ main ------------------------------------

if __name__ == "__main__":
    key = jax.random.PRNGKey(0)
    N, set_in, L = 8, 4, 16

    kx, kp = jax.random.split(key)
    x_ncl = jax.random.normal(kx, (N, set_in, L), jnp.float32)   # PyTorch NCL
    x = jnp.transpose(x_ncl, (0, 2, 1))                          # -> NLC

    chans = _conv_channels(set_in)
    keys = jax.random.split(kp, len(chans))
    params = [init_conv(k, cin, cout) for k, (cin, cout) in zip(keys, chans)]

    out = jax.block_until_ready(unet_forward(x, params))
    ref = jax.block_until_ready(unet_forward_ref(x, params))

    assert out.shape == (N, L, 64), out.shape
    np.testing.assert_allclose(np.asarray(out), np.asarray(ref),
                               rtol=2e-2, atol=2e-2)
    print("KERNEL_OK")
</pallas_src>

<mosaic_0001>
module attributes {stable_mosaic.version = 11 : i64} {
  func.func @kernel(%arg0: i32, %arg1: memref<64x4xf32, #tpu.memory_space<vmem>>, %arg2: memref<3088x256xbf16, #tpu.memory_space<vmem>>, %arg3: memref<16x256xf32, #tpu.memory_space<vmem>>, %arg4: memref<32x128xf32, #tpu.memory_space<vmem>>) attributes {dimension_semantics = [#tpu.dimension_semantics<parallel>], iteration_bounds = array<i64: 2>, scalar_prefetch = 0 : i64, scratch_operands = 0 : i64, tpu.core_type = #tpu.core_type<tc>, window_params = [{transform_indices = @transform_0, window_bounds = array<i64: 64, 4>}, {pipeline_mode = #tpu.pipeline_mode<synchronous>, transform_indices = @transform_1, window_bounds = array<i64: 3088, 256>}, {pipeline_mode = #tpu.pipeline_mode<synchronous>, transform_indices = @transform_2, window_bounds = array<i64: 16, 256>}, {transform_indices = @transform_3, window_bounds = array<i64: 32, 128>}]} {
    %c0 = arith.constant 0 : index
    %c0_0 = arith.constant 0 : index
    %0 = vector.load %arg1[%c0, %c0_0] : memref<64x4xf32, #tpu.memory_space<vmem>>, vector<64x4xf32>
    %cst = arith.constant 0.000000e+00 : f32
    %1 = vector.broadcast %cst : f32 to vector<1x4xf32>
    %2 = vector.extract_strided_slice %0 {offsets = [0, 0], sizes = [63, 4], strides = [1, 1]} : vector<64x4xf32> to vector<63x4xf32>
    %3 = tpu.concatenate %1, %2 in 0 : vector<1x4xf32>, vector<63x4xf32> -> vector<64x4xf32>
    %4 = tpu.iota {dimensions = array<i32: 0>} : vector<64x4xi32>
    %c16_i32 = arith.constant 16 : i32
    %c0_i32 = arith.constant 0 : i32
    %5 = arith.cmpi eq, %c16_i32, %c0_i32 : i32
    %c1_i32 = arith.constant 1 : i32
    %6 = arith.select %5, %c1_i32, %c16_i32 : i32
    %7 = vector.broadcast %6 : i32 to vector<64x4xi32>
    %8 = arith.remsi %4, %7 : vector<64x4xi32>
    %c0_i32_1 = arith.constant 0 : i32
    %9 = vector.broadcast %c0_i32_1 : i32 to vector<64x4xi32>
    %10 = arith.cmpi ne, %8, %9 : vector<64x4xi32>
    %c0_i32_2 = arith.constant 0 : i32
    %11 = vector.broadcast %c0_i32_2 : i32 to vector<64x4xi32>
    %12 = arith.cmpi slt, %8, %11 : vector<64x4xi32>
    %c0_i32_3 = arith.constant 0 : i32
    %13 = arith.cmpi slt, %6, %c0_i32_3 : i32
    %14 = vector.broadcast %13 : i1 to vector<64x4xi1>
    %15 = vector.broadcast %14 : vector<64x4xi1> to vector<64x4xi1>
    %16 = arith.xori %12, %15 : vector<64x4xi1>
    %17 = arith.andi %16, %10 : vector<64x4xi1>
    %18 = vector.broadcast %6 : i32 to vector<64x4xi32>
    %19 = arith.addi %8, %18 : vector<64x4xi32>
    %20 = arith.select %17, %19, %8 : vector<64x4xi1>, vector<64x4xi32>
    %c0_i32_4 = arith.constant 0 : i32
    %21 = vector.broadcast %c0_i32_4 : i32 to vector<64x4xi32>
    %22 = arith.cmpi eq, %20, %21 : vector<64x4xi32>
    %cst_5 = arith.constant 0.000000e+00 : f32
    %23 = vector.broadcast %cst_5 : f32 to vector<64x4xf32>
    %24 = arith.select %22, %23, %3 : vector<64x4xi1>, vector<64x4xf32>
    %25 = vector.extract_strided_slice %0 {offsets = [1, 0], sizes = [63, 4], strides = [1, 1]} : vector<64x4xf32> to vector<63x4xf32>
    %cst_6 = arith.constant 0.000000e+00 : f32
    %26 = vector.broadcast %cst_6 : f32 to vector<1x4xf32>
    %27 = tpu.concatenate %25, %26 in 0 : vector<63x4xf32>, vector<1x4xf32> -> vector<64x4xf32>
    %28 = tpu.iota {dimensions = array<i32: 0>} : vector<64x4xi32>
    %c16_i32_7 = arith.constant 16 : i32
    %c0_i32_8 = arith.constant 0 : i32
    %29 = arith.cmpi eq, %c16_i32_7, %c0_i32_8 : i32
    %c1_i32_9 = arith.constant 1 : i32
    %30 = arith.select %29, %c1_i32_9, %c16_i32_7 : i32
    %31 = vector.broadcast %30 : i32 to vector<64x4xi32>
    %32 = arith.remsi %28, %31 : vector<64x4xi32>
    %c0_i32_10 = arith.constant 0 : i32
    %33 = vector.broadcast %c0_i32_10 : i32 to vector<64x4xi32>
    %34 = arith.cmpi ne, %32, %33 : vector<64x4xi32>
    %c0_i32_11 = arith.constant 0 : i32
    %35 = vector.broadcast %c0_i32_11 : i32 to vector<64x4xi32>
    %36 = arith.cmpi slt, %32, %35 : vector<64x4xi32>
    %c0_i32_12 = arith.constant 0 : i32
    %37 = arith.cmpi slt, %30, %c0_i32_12 : i32
    %38 = vector.broadcast %37 : i1 to vector<64x4xi1>
    %39 = vector.broadcast %38 : vector<64x4xi1> to vector<64x4xi1>
    %40 = arith.xori %36, %39 : vector<64x4xi1>
    %41 = arith.andi %40, %34 : vector<64x4xi1>
    %42 = vector.broadcast %30 : i32 to vector<64x4xi32>
    %43 = arith.addi %32, %42 : vector<64x4xi32>
    %44 = arith.select %41, %43, %32 : vector<64x4xi1>, vector<64x4xi32>
    %c15_i32 = arith.constant 15 : i32
    %45 = vector.broadcast %c15_i32 : i32 to vector<64x4xi32>
    %46 = arith.cmpi eq, %44, %45 : vector<64x4xi32>
    %cst_13 = arith.constant 0.000000e+00 : f32
    %47 = vector.broadcast %cst_13 : f32 to vector<64x4xf32>
    %48 = arith.select %46, %47, %27 : vector<64x4xi1>, vector<64x4xf32>
    %c0_14 = arith.constant 0 : index
    %c0_15 = arith.constant 0 : index
    %49 = vector.load %arg3[%c0_14, %c0_15] : memref<16x256xf32, #tpu.memory_space<vmem>>, vector<1x64xf32>
    %50 = tpu.concatenate %24, %0, %48 in 1 : vector<64x4xf32>, vector<64x4xf32>, vector<64x4xf32> -> vector<64x12xf32>
    %51 = arith.truncf %50 : vector<64x12xf32> to vector<64x12xbf16>
    %c0_16 = arith.constant 0 : index
    %c0_17 = arith.constant 0 : index
    %52 = vector.load %arg2[%c0_16, %c0_17] : memref<3088x256xbf16, #tpu.memory_space<vmem>>, vector<12x64xbf16>
    %cst_18 = arith.constant dense<0.000000e+00> : vector<64x64xf32>
    %53 = tpu.matmul %51, %52, %cst_18 {dimension_numbers = #tpu.dot_dimension_numbers<[1], [0], [0], [1], [0, 0, 1, 1], [], []>} : vector<64x12xbf16>, vector<12x64xbf16>, vector<64x64xf32> -> vector<64x64xf32>
    %54 = vector.broadcast %49 : vector<1x64xf32> to vector<64x64xf32>
    %55 = arith.addf %53, %54 : vector<64x64xf32>
    %cst_19 = arith.constant 0.000000e+00 : f32
    %56 = vector.broadcast %cst_19 : f32 to vector<64x64xf32>
    %57 = arith.maximumf %55, %56 : vector<64x64xf32>
    %cst_20 = arith.constant 0.000000e+00 : f32
    %58 = vector.broadcast %cst_20 : f32 to vector<1x64xf32>
    %59 = vector.extract_strided_slice %57 {offsets = [0, 0], sizes = [63, 64], strides = [1, 1]} : vector<64x64xf32> to vector<63x64xf32>
    %60 = tpu.concatenate %58, %59 in 0 : vector<1x64xf32>, vector<63x64xf32> -> vector<64x64xf32>
    %61 = tpu.iota {dimensions = array<i32: 0>} : vector<64x64xi32>
    %c16_i32_21 = arith.constant 16 : i32
    %c0_i32_22 = arith.constant 0 : i32
    %62 = arith.cmpi eq, %c16_i32_21, %c0_i32_22 : i32
    %c1_i32_23 = arith.constant 1 : i32
    %63 = arith.select %62, %c1_i32_23, %c16_i32_21 : i32
    %64 = vector.broadcast %63 : i32 to vector<64x64xi32>
    %65 = arith.remsi %61, %64 : vector<64x64xi32>
    %c0_i32_24 = arith.constant 0 : i32
    %66 = vector.broadcast %c0_i32_24 : i32 to vector<64x64xi32>
    %67 = arith.cmpi ne, %65, %66 : vector<64x64xi32>
    %c0_i32_25 = arith.constant 0 : i32
    %68 = vector.broadcast %c0_i32_25 : i32 to vector<64x64xi32>
    %69 = arith.cmpi slt, %65, %68 : vector<64x64xi32>
    %c0_i32_26 = arith.constant 0 : i32
    %70 = arith.cmpi slt, %63, %c0_i32_26 : i32
    %71 = vector.broadcast %70 : i1 to vector<64x64xi1>
    %72 = vector.broadcast %71 : vector<64x64xi1> to vector<64x64xi1>
    %73 = arith.xori %69, %72 : vector<64x64xi1>
    %74 = arith.andi %73, %67 : vector<64x64xi1>
    %75 = vector.broadcast %63 : i32 to vector<64x64xi32>
    %76 = arith.addi %65, %75 : vector<64x64xi32>
    %77 = arith.select %74, %76, %65 : vector<64x64xi1>, vector<64x64xi32>
    %c0_i32_27 = arith.constant 0 : i32
    %78 = vector.broadcast %c0_i32_27 : i32 to vector<64x64xi32>
    %79 = arith.cmpi eq, %77, %78 : vector<64x64xi32>
    %cst_28 = arith.constant 0.000000e+00 : f32
    %80 = vector.broadcast %cst_28 : f32 to vector<64x64xf32>
    %81 = arith.select %79, %80, %60 : vector<64x64xi1>, vector<64x64xf32>
    %82 = vector.extract_strided_slice %57 {offsets = [1, 0], sizes = [63, 64], strides = [1, 1]} : vector<64x64xf32> to vector<63x64xf32>
    %cst_29 = arith.constant 0.000000e+00 : f32
    %83 = vector.broadcast %cst_29 : f32 to vector<1x64xf32>
    %84 = tpu.concatenate %82, %83 in 0 : vector<63x64xf32>, vector<1x64xf32> -> vector<64x64xf32>
    %85 = tpu.iota {dimensions = array<i32: 0>} : vector<64x64xi32>
    %c16_i32_30 = arith.constant 16 : i32
    %c0_i32_31 = arith.constant 0 : i32
    %86 = arith.cmpi eq, %c16_i32_30, %c0_i32_31 : i32
    %c1_i32_32 = arith.constant 1 : i32
    %87 = arith.select %86, %c1_i32_32, %c16_i32_30 : i32
    %88 = vector.broadcast %87 : i32 to vector<64x64xi32>
    %89 = arith.remsi %85, %88 : vector<64x64xi32>
    %c0_i32_33 = arith.constant 0 : i32
    %90 = vector.broadcast %c0_i32_33 : i32 to vector<64x64xi32>
    %91 = arith.cmpi ne, %89, %90 : vector<64x64xi32>
    %c0_i32_34 = arith.constant 0 : i32
    %92 = vector.broadcast %c0_i32_34 : i32 to vector<64x64xi32>
    %93 = arith.cmpi slt, %89, %92 : vector<64x64xi32>
    %c0_i32_35 = arith.constant 0 : i32
    %94 = arith.cmpi slt, %87, %c0_i32_35 : i32
    %95 = vector.broadcast %94 : i1 to vector<64x64xi1>
    %96 = vector.broadcast %95 : vector<64x64xi1> to vector<64x64xi1>
    %97 = arith.xori %93, %96 : vector<64x64xi1>
    %98 = arith.andi %97, %91 : vector<64x64xi1>
    %99 = vector.broadcast %87 : i32 to vector<64x64xi32>
    %100 = arith.addi %89, %99 : vector<64x64xi32>
    %101 = arith.select %98, %100, %89 : vector<64x64xi1>, vector<64x64xi32>
    %c15_i32_36 = arith.constant 15 : i32
    %102 = vector.broadcast %c15_i32_36 : i32 to vector<64x64xi32>
    %103 = arith.cmpi eq, %101, %102 : vector<64x64xi32>
    %cst_37 = arith.constant 0.000000e+00 : f32
    %104 = vector.broadcast %cst_37 : f32 to vector<64x64xf32>
    %105 = arith.select %103, %104, %84 : vector<64x64xi1>, vector<64x64xf32>
    %c1 = arith.constant 1 : index
    %c0_38 = arith.constant 0 : index
    %106 = vector.load %arg3[%c1, %c0_38] : memref<16x256xf32, #tpu.memory_space<vmem>>, vector<1x64xf32>
    %107 = arith.truncf %81 : vector<64x64xf32> to vector<64x64xbf16>
    %c16 = arith.constant 16 : index
    %c0_39 = arith.constant 0 : index
    %108 = vector.load %arg2[%c16, %c0_39] : memref<3088x256xbf16, #tpu.memory_space<vmem>>, vector<64x64xbf16>
    %cst_40 = arith.constant dense<0.000000e+00> : vector<64x64xf32>
    %109 = tpu.matmul %107, %108, %cst_40 {dimension_numbers = #tpu.dot_dimension_numbers<[1], [0], [0], [1], [0, 0, 1, 1], [], []>} : vector<64x64xbf16>, vector<64x64xbf16>, vector<64x64xf32> -> vector<64x64xf32>
    %110 = arith.truncf %57 : vector<64x64xf32> to vector<64x64xbf16>
    %c80 = arith.constant 80 : index
    %c0_41 = arith.constant 0 : index
    %111 = vector.load %arg2[%c80, %c0_41] : memref<3088x256xbf16, #tpu.memory_space<vmem>>, vector<64x64xbf16>
    %cst_42 = arith.constant dense<0.000000e+00> : vector<64x64xf32>
    %112 = tpu.matmul %110, %111, %cst_42 {dimension_numbers = #tpu.dot_dimension_numbers<[1], [0], [0], [1], [0, 0, 1, 1], [], []>} : vector<64x64xbf16>, vector<64x64xbf16>, vector<64x64xf32> -> vector<64x64xf32>
    %113 = arith.addf %109, %112 : vector<64x64xf32>
    %114 = arith.truncf %105 : vector<64x64xf32> to vector<64x64xbf16>
    %c144 = arith.constant 144 : index
    %c0_43 = arith.constant 0 : index
    %115 = vector.load %arg2[%c144, %c0_43] : memref<3088x256xbf16, #tpu.memory_space<vmem>>, vector<64x64xbf16>
    %cst_44 = arith.constant dense<0.000000e+00> : vector<64x64xf32>
    %116 = tpu.matmul %114, %115, %cst_44 {dimension_numbers = #tpu.dot_dimension_numbers<[1], [0], [0], [1], [0, 0, 1, 1], [], []>} : vector<64x64xbf16>, vector<64x64xbf16>, vector<64x64xf32> -> vector<64x64xf32>
    %117 = arith.addf %113, %116 : vector<64x64xf32>
    %118 = vector.broadcast %106 : vector<1x64xf32> to vector<64x64xf32>
    %119 = arith.addf %117, %118 : vector<64x64xf32>
    %cst_45 = arith.constant 0.000000e+00 : f32
    %120 = vector.broadcast %cst_45 : f32 to vector<64x64xf32>
    %121 = arith.maximumf %119, %120 : vector<64x64xf32>
    %122 = vector.shape_cast %121 : vector<64x64xf32> to vector<32x2x64xf32>
    %123 = vector.extract_strided_slice %122 {offsets = [0, 0, 0], sizes = [32, 1, 64], strides = [1, 1, 1]} : vector<32x2x64xf32> to vector<32x1x64xf32>
    %124 = vector.shape_cast %123 : vector<32x1x64xf32> to vector<32x64xf32>
    %125 = vector.extract_strided_slice %122 {offsets = [0, 1, 0], sizes = [32, 1, 64], strides = [1, 1, 1]} : vector<32x2x64xf32> to vector<32x1x64xf32>
    %126 = vector.shape_cast %125 : vector<32x1x64xf32> to vector<32x64xf32>
    %127 = arith.cmpf oge, %124, %126 : vector<32x64xf32>
    %128 = arith.maximumf %124, %126 : vector<32x64xf32>
    %cst_46 = arith.constant 0.000000e+00 : f32
    %129 = vector.broadcast %cst_46 : f32 to vector<1x64xf32>
    %130 = vector.extract_strided_slice %128 {offsets = [0, 0], sizes = [31, 64], strides = [1, 1]} : vector<32x64xf32> to vector<31x64xf32>
    %131 = tpu.concatenate %129, %130 in 0 : vector<1x64xf32>, vector<31x64xf32> -> vector<32x64xf32>
    %132 = tpu.iota {dimensions = array<i32: 0>} : vector<32x64xi32>
    %c8_i32 = arith.constant 8 : i32
    %c0_i32_47 = arith.constant 0 : i32
    %133 = arith.cmpi eq, %c8_i32, %c0_i32_47 : i32
    %c1_i32_48 = arith.constant 1 : i32
    %134 = arith.select %133, %c1_i32_48, %c8_i32 : i32
    %135 = vector.broadcast %134 : i32 to vector<32x64xi32>
    %136 = arith.remsi %132, %135 : vector<32x64xi32>
    %c0_i32_49 = arith.constant 0 : i32
    %137 = vector.broadcast %c0_i32_49 : i32 to vector<32x64xi32>
    %138 = arith.cmpi ne, %136, %137 : vector<32x64xi32>
    %c0_i32_50 = arith.constant 0 : i32
    %139 = vector.broadcast %c0_i32_50 : i32 to vector<32x64xi32>
    %140 = arith.cmpi slt, %136, %139 : vector<32x64xi32>
    %c0_i32_51 = arith.constant 0 : i32
    %141 = arith.cmpi slt, %134, %c0_i32_51 : i32
    %142 = vector.broadcast %141 : i1 to vector<32x64xi1>
    %143 = vector.broadcast %142 : vector<32x64xi1> to vector<32x64xi1>
    %144 = arith.xori %140, %143 : vector<32x64xi1>
    %145 = arith.andi %144, %138 : vector<32x64xi1>
    %146 = vector.broadcast %134 : i32 to vector<32x64xi32>
    %147 = arith.addi %136, %146 : vector<32x64xi32>
    %148 = arith.select %145, %147, %136 : vector<32x64xi1>, vector<32x64xi32>
    %c0_i32_52 = arith.constant 0 : i32
    %149 = vector.broadcast %c0_i32_52 : i32 to vector<32x64xi32>
    %150 = arith.cmpi eq, %148, %149 : vector<32x64xi32>
    %cst_53 = arith.constant 0.000000e+00 : f32
    %151 = vector.broadcast %cst_53 : f32 to vector<32x64xf32>
    %152 = arith.select %150, %151, %131 : vector<32x64xi1>, vector<32x64xf32>
    %153 = vector.extract_strided_slice %128 {offsets = [1, 0], sizes = [31, 64], strides = [1, 1]} : vector<32x64xf32> to vector<31x64xf32>
    %cst_54 = arith.constant 0.000000e+00 : f32
    %154 = vector.broadcast %cst_54 : f32 to vector<1x64xf32>
    %155 = tpu.concatenate %153, %154 in 0 : vector<31x64xf32>, vector<1x64xf32> -> vector<32x64xf32>
    %156 = tpu.iota {dimensions = array<i32: 0>} : vector<32x64xi32>
    %c8_i32_55 = arith.constant 8 : i32
    %c0_i32_56 = arith.constant 0 : i32
    %157 = arith.cmpi eq, %c8_i32_55, %c0_i32_56 : i32
    %c1_i32_57 = arith.constant 1 : i32
    %158 = arith.select %157, %c1_i32_57, %c8_i32_55 : i32
    %159 = vector.broadcast %158 : i32 to vector<32x64xi32>
    %160 = arith.remsi %156, %159 : vector<32x64xi32>
    %c0_i32_58 = arith.constant 0 : i32
    %161 = vector.broadcast %c0_i32_58 : i32 to vector<32x64xi32>
    %162 = arith.cmpi ne, %160, %161 : vector<32x64xi32>
    %c0_i32_59 = arith.constant 0 : i32
    %163 = vector.broadcast %c0_i32_59 : i32 to vector<32x64xi32>
    %164 = arith.cmpi slt, %160, %163 : vector<32x64xi32>
    %c0_i32_60 = arith.constant 0 : i32
    %165 = arith.cmpi slt, %158, %c0_i32_60 : i32
    %166 = vector.broadcast %165 : i1 to vector<32x64xi1>
    %167 = vector.broadcast %166 : vector<32x64xi1> to vector<32x64xi1>
    %168 = arith.xori %164, %167 : vector<32x64xi1>
    %169 = arith.andi %168, %162 : vector<32x64xi1>
    %170 = vector.broadcast %158 : i32 to vector<32x64xi32>
    %171 = arith.addi %160, %170 : vector<32x64xi32>
    %172 = arith.select %169, %171, %160 : vector<32x64xi1>, vector<32x64xi32>
    %c7_i32 = arith.constant 7 : i32
    %173 = vector.broadcast %c7_i32 : i32 to vector<32x64xi32>
    %174 = arith.cmpi eq, %172, %173 : vector<32x64xi32>
    %cst_61 = arith.constant 0.000000e+00 : f32
    %175 = vector.broadcast %cst_61 : f32 to vector<32x64xf32>
    %176 = arith.select %174, %175, %155 : vector<32x64xi1>, vector<32x64xf32>
    %c2 = arith.constant 2 : index
    %c0_62 = arith.constant 0 : index
    %177 = vector.load %arg3[%c2, %c0_62] : memref<16x256xf32, #tpu.memory_space<vmem>>, vector<1x128xf32>
    %178 = arith.truncf %152 : vector<32x64xf32> to vector<32x64xbf16>
    %c208 = arith.constant 208 : index
    %c0_63 = arith.constant 0 : index
    %179 = vector.load %arg2[%c208, %c0_63] : memref<3088x256xbf16, #tpu.memory_space<vmem>>, vector<64x128xbf16>
    %cst_64 = arith.constant dense<0.000000e+00> : vector<32x128xf32>
    %180 = tpu.matmul %178, %179, %cst_64 {dimension_numbers = #tpu.dot_dimension_numbers<[1], [0], [0], [1], [0, 0, 1, 1], [], []>} : vector<32x64xbf16>, vector<64x128xbf16>, vector<32x128xf32> -> vector<32x128xf32>
    %181 = arith.truncf %128 : vector<32x64xf32> to vector<32x64xbf16>
    %c272 = arith.constant 272 : index
    %c0_65 = arith.constant 0 : index
    %182 = vector.load %arg2[%c272, %c0_65] : memref<3088x256xbf16, #tpu.memory_space<vmem>>, vector<64x128xbf16>
    %cst_66 = arith.constant dense<0.000000e+00> : vector<32x128xf32>
    %183 = tpu.matmul %181, %182, %cst_66 {dimension_numbers = #tpu.dot_dimension_numbers<[1], [0], [0], [1], [0, 0, 1, 1], [], []>} : vector<32x64xbf16>, vector<64x128xbf16>, vector<32x128xf32> -> vector<32x128xf32>
    %184 = arith.addf %180, %183 : vector<32x128xf32>
    %185 = arith.truncf %176 : vector<32x64xf32> to vector<32x64xbf16>
    %c336 = arith.constant 336 : index
    %c0_67 = arith.constant 0 : index
    %186 = vector.load %arg2[%c336, %c0_67] : memref<3088x256xbf16, #tpu.memory_space<vmem>>, vector<64x128xbf16>
    %cst_68 = arith.constant dense<0.000000e+00> : vector<32x128xf32>
    %187 = tpu.matmul %185, %186, %cst_68 {dimension_numbers = #tpu.dot_dimension_numbers<[1], [0], [0], [1], [0, 0, 1, 1], [], []>} : vector<32x64xbf16>, vector<64x128xbf16>, vector<32x128xf32> -> vector<32x128xf32>
    %188 = arith.addf %184, %187 : vector<32x128xf32>
    %189 = vector.broadcast %177 : vector<1x128xf32> to vector<32x128xf32>
    %190 = arith.addf %188, %189 : vector<32x128xf32>
    %cst_69 = arith.constant 0.000000e+00 : f32
    %191 = vector.broadcast %cst_69 : f32 to vector<32x128xf32>
    %192 = arith.maximumf %190, %191 : vector<32x128xf32>
    %cst_70 = arith.constant 0.000000e+00 : f32
    %193 = vector.broadcast %cst_70 : f32 to vector<1x128xf32>
    %194 = vector.extract_strided_slice %192 {offsets = [0, 0], sizes = [31, 128], strides = [1, 1]} : vector<32x128xf32> to vector<31x128xf32>
    %195 = tpu.concatenate %193, %194 in 0 : vector<1x128xf32>, vector<31x128xf32> -> vector<32x128xf32>
    %196 = tpu.iota {dimensions = array<i32: 0>} : vector<32x128xi32>
    %c8_i32_71 = arith.constant 8 : i32
    %c0_i32_72 = arith.constant 0 : i32
    %197 = arith.cmpi eq, %c8_i32_71, %c0_i32_72 : i32
    %c1_i32_73 = arith.constant 1 : i32
    %198 = arith.select %197, %c1_i32_73, %c8_i32_71 : i32
    %199 = vector.broadcast %198 : i32 to vector<32x128xi32>
    %200 = arith.remsi %196, %199 : vector<32x128xi32>
    %c0_i32_74 = arith.constant 0 : i32
    %201 = vector.broadcast %c0_i32_74 : i32 to vector<32x128xi32>
    %202 = arith.cmpi ne, %200, %201 : vector<32x128xi32>
    %c0_i32_75 = arith.constant 0 : i32
    %203 = vector.broadcast %c0_i32_75 : i32 to vector<32x128xi32>
    %204 = arith.cmpi slt, %200, %203 : vector<32x128xi32>
    %c0_i32_76 = arith.constant 0 : i32
    %205 = arith.cmpi slt, %198, %c0_i32_76 : i32
    %206 = vector.broadcast %205 : i1 to vector<32x128xi1>
    %207 = vector.broadcast %206 : vector<32x128xi1> to vector<32x128xi1>
    %208 = arith.xori %204, %207 : vector<32x128xi1>
    %209 = arith.andi %208, %202 : vector<32x128xi1>
    %210 = vector.broadcast %198 : i32 to vector<32x128xi32>
    %211 = arith.addi %200, %210 : vector<32x128xi32>
    %212 = arith.select %209, %211, %200 : vector<32x128xi1>, vector<32x128xi32>
    %c0_i32_77 = arith.constant 0 : i32
    %213 = vector.broadcast %c0_i32_77 : i32 to vector<32x128xi32>
    %214 = arith.cmpi eq, %212, %213 : vector<32x128xi32>
    %cst_78 = arith.constant 0.000000e+00 : f32
    %215 = vector.broadcast %cst_78 : f32 to vector<32x128xf32>
    %216 = arith.select %214, %215, %195 : vector<32x128xi1>, vector<32x128xf32>
    %217 = vector.extract_strided_slice %192 {offsets = [1, 0], sizes = [31, 128], strides = [1, 1]} : vector<32x128xf32> to vector<31x128xf32>
    %cst_79 = arith.constant 0.000000e+00 : f32
    %218 = vector.broadcast %cst_79 : f32 to vector<1x128xf32>
    %219 = tpu.concatenate %217, %218 in 0 : vector<31x128xf32>, vector<1x128xf32> -> vector<32x128xf32>
    %220 = tpu.iota {dimensions = array<i32: 0>} : vector<32x128xi32>
    %c8_i32_80 = arith.constant 8 : i32
    %c0_i32_81 = arith.constant 0 : i32
    %221 = arith.cmpi eq, %c8_i32_80, %c0_i32_81 : i32
    %c1_i32_82 = arith.constant 1 : i32
    %222 = arith.select %221, %c1_i32_82, %c8_i32_80 : i32
    %223 = vector.broadcast %222 : i32 to vector<32x128xi32>
    %224 = arith.remsi %220, %223 : vector<32x128xi32>
    %c0_i32_83 = arith.constant 0 : i32
    %225 = vector.broadcast %c0_i32_83 : i32 to vector<32x128xi32>
    %226 = arith.cmpi ne, %224, %225 : vector<32x128xi32>
    %c0_i32_84 = arith.constant 0 : i32
    %227 = vector.broadcast %c0_i32_84 : i32 to vector<32x128xi32>
    %228 = arith.cmpi slt, %224, %227 : vector<32x128xi32>
    %c0_i32_85 = arith.constant 0 : i32
    %229 = arith.cmpi slt, %222, %c0_i32_85 : i32
    %230 = vector.broadcast %229 : i1 to vector<32x128xi1>
    %231 = vector.broadcast %230 : vector<32x128xi1> to vector<32x128xi1>
    %232 = arith.xori %228, %231 : vector<32x128xi1>
    %233 = arith.andi %232, %226 : vector<32x128xi1>
    %234 = vector.broadcast %222 : i32 to vector<32x128xi32>
    %235 = arith.addi %224, %234 : vector<32x128xi32>
    %236 = arith.select %233, %235, %224 : vector<32x128xi1>, vector<32x128xi32>
    %c7_i32_86 = arith.constant 7 : i32
    %237 = vector.broadcast %c7_i32_86 : i32 to vector<32x128xi32>
    %238 = arith.cmpi eq, %236, %237 : vector<32x128xi32>
    %cst_87 = arith.constant 0.000000e+00 : f32
    %239 = vector.broadcast %cst_87 : f32 to vector<32x128xf32>
    %240 = arith.select %238, %239, %219 : vector<32x128xi1>, vector<32x128xf32>
    %c3 = arith.constant 3 : index
    %c0_88 = arith.constant 0 : index
    %241 = vector.load %arg3[%c3, %c0_88] : memref<16x256xf32, #tpu.memory_space<vmem>>, vector<1x128xf32>
    %242 = arith.truncf %216 : vector<32x128xf32> to vector<32x128xbf16>
    %c400 = arith.constant 400 : index
    %c0_89 = arith.constant 0 : index
    %243 = vector.load %arg2[%c400, %c0_89] : memref<3088x256xbf16, #tpu.memory_space<vmem>>, vector<128x128xbf16>
    %cst_90 = arith.constant dense<0.000000e+00> : vector<32x128xf32>
    %244 = tpu.matmul %242, %243, %cst_90 {dimension_numbers = #tpu.dot_dimension_numbers<[1], [0], [0], [1], [0, 0, 1, 1], [], []>} : vector<32x128xbf16>, vector<128x128xbf16>, vector<32x128xf32> -> vector<32x128xf32>
    %245 = arith.truncf %192 : vector<32x128xf32> to vector<32x128xbf16>
    %c528 = arith.constant 528 : index
    %c0_91 = arith.constant 0 : index
    %246 = vector.load %arg2[%c528, %c0_91] : memref<3088x256xbf16, #tpu.memory_space<vmem>>, vector<128x128xbf16>
    %cst_92 = arith.constant dense<0.000000e+00> : vector<32x128xf32>
    %247 = tpu.matmul %245, %246, %cst_92 {dimension_numbers = #tpu.dot_dimension_numbers<[1], [0], [0], [1], [0, 0, 1, 1], [], []>} : vector<32x128xbf16>, vector<128x128xbf16>, vector<32x128xf32> -> vector<32x128xf32>
    %248 = arith.addf %244, %247 : vector<32x128xf32>
    %249 = arith.truncf %240 : vector<32x128xf32> to vector<32x128xbf16>
    %c656 = arith.constant 656 : index
    %c0_93 = arith.constant 0 : index
    %250 = vector.load %arg2[%c656, %c0_93] : memref<3088x256xbf16, #tpu.memory_space<vmem>>, vector<128x128xbf16>
    %cst_94 = arith.constant dense<0.000000e+00> : vector<32x128xf32>
    %251 = tpu.matmul %249, %250, %cst_94 {dimension_numbers = #tpu.dot_dimension_numbers<[1], [0], [0], [1], [0, 0, 1, 1], [], []>} : vector<32x128xbf16>, vector<128x128xbf16>, vector<32x128xf32> -> vector<32x128xf32>
    %252 = arith.addf %248, %251 : vector<32x128xf32>
    %253 = vector.broadcast %241 : vector<1x128xf32> to vector<32x128xf32>
    %254 = arith.addf %252, %253 : vector<32x128xf32>
    %cst_95 = arith.constant 0.000000e+00 : f32
    %255 = vector.broadcast %cst_95 : f32 to vector<32x128xf32>
    %256 = arith.maximumf %254, %255 : vector<32x128xf32>
    %257 = vector.shape_cast %256 : vector<32x128xf32> to vector<16x2x128xf32>
    %258 = vector.extract_strided_slice %257 {offsets = [0, 0, 0], sizes = [16, 1, 128], strides = [1, 1, 1]} : vector<16x2x128xf32> to vector<16x1x128xf32>
    %259 = vector.shape_cast %258 : vector<16x1x128xf32> to vector<16x128xf32>
    %260 = vector.extract_strided_slice %257 {offsets = [0, 1, 0], sizes = [16, 1, 128], strides = [1, 1, 1]} : vector<16x2x128xf32> to vector<16x1x128xf32>
    %261 = vector.shape_cast %260 : vector<16x1x128xf32> to vector<16x128xf32>
    %262 = arith.cmpf oge, %259, %261 : vector<16x128xf32>
    %263 = arith.maximumf %259, %261 : vector<16x128xf32>
    %cst_96 = arith.constant 0.000000e+00 : f32
    %264 = vector.broadcast %cst_96 : f32 to vector<1x128xf32>
    %265 = vector.extract_strided_slice %263 {offsets = [0, 0], sizes = [15, 128], strides = [1, 1]} : vector<16x128xf32> to vector<15x128xf32>
    %266 = tpu.concatenate %264, %265 in 0 : vector<1x128xf32>, vector<15x128xf32> -> vector<16x128xf32>
    %267 = tpu.iota {dimensions = array<i32: 0>} : vector<16x128xi32>
    %c4_i32 = arith.constant 4 : i32
    %c0_i32_97 = arith.constant 0 : i32
    %268 = arith.cmpi eq, %c4_i32, %c0_i32_97 : i32
    %c1_i32_98 = arith.constant 1 : i32
    %269 = arith.select %268, %c1_i32_98, %c4_i32 : i32
    %270 = vector.broadcast %269 : i32 to vector<16x128xi32>
    %271 = arith.remsi %267, %270 : vector<16x128xi32>
    %c0_i32_99 = arith.constant 0 : i32
    %272 = vector.broadcast %c0_i32_99 : i32 to vector<16x128xi32>
    %273 = arith.cmpi ne, %271, %272 : vector<16x128xi32>
    %c0_i32_100 = arith.constant 0 : i32
    %274 = vector.broadcast %c0_i32_100 : i32 to vector<16x128xi32>
    %275 = arith.cmpi slt, %271, %274 : vector<16x128xi32>
    %c0_i32_101 = arith.constant 0 : i32
    %276 = arith.cmpi slt, %269, %c0_i32_101 : i32
    %277 = vector.broadcast %276 : i1 to vector<16x128xi1>
    %278 = vector.broadcast %277 : vector<16x128xi1> to vector<16x128xi1>
    %279 = arith.xori %275, %278 : vector<16x128xi1>
    %280 = arith.andi %279, %273 : vector<16x128xi1>
    %281 = vector.broadcast %269 : i32 to vector<16x128xi32>
    %282 = arith.addi %271, %281 : vector<16x128xi32>
    %283 = arith.select %280, %282, %271 : vector<16x128xi1>, vector<16x128xi32>
    %c0_i32_102 = arith.constant 0 : i32
    %284 = vector.broadcast %c0_i32_102 : i32 to vector<16x128xi32>
    %285 = arith.cmpi eq, %283, %284 : vector<16x128xi32>
    %cst_103 = arith.constant 0.000000e+00 : f32
    %286 = vector.broadcast %cst_103 : f32 to vector<16x128xf32>
    %287 = arith.select %285, %286, %266 : vector<16x128xi1>, vector<16x128xf32>
    %288 = vector.extract_strided_slice %263 {offsets = [1, 0], sizes = [15, 128], strides = [1, 1]} : vector<16x128xf32> to vector<15x128xf32>
    %cst_104 = arith.constant 0.000000e+00 : f32
    %289 = vector.broadcast %cst_104 : f32 to vector<1x128xf32>
    %290 = tpu.concatenate %288, %289 in 0 : vector<15x128xf32>, vector<1x128xf32> -> vector<16x128xf32>
    %291 = tpu.iota {dimensions = array<i32: 0>} : vector<16x128xi32>
    %c4_i32_105 = arith.constant 4 : i32
    %c0_i32_106 = arith.constant 0 : i32
    %292 = arith.cmpi eq, %c4_i32_105, %c0_i32_106 : i32
    %c1_i32_107 = arith.constant 1 : i32
    %293 = arith.select %292, %c1_i32_107, %c4_i32_105 : i32
    %294 = vector.broadcast %293 : i32 to vector<16x128xi32>
    %295 = arith.remsi %291, %294 : vector<16x128xi32>
    %c0_i32_108 = arith.constant 0 : i32
    %296 = vector.broadcast %c0_i32_108 : i32 to vector<16x128xi32>
    %297 = arith.cmpi ne, %295, %296 : vector<16x128xi32>
    %c0_i32_109 = arith.constant 0 : i32
    %298 = vector.broadcast %c0_i32_109 : i32 to vector<16x128xi32>
    %299 = arith.cmpi slt, %295, %298 : vector<16x128xi32>
    %c0_i32_110 = arith.constant 0 : i32
    %300 = arith.cmpi slt, %293, %c0_i32_110 : i32
    %301 = vector.broadcast %300 : i1 to vector<16x128xi1>
    %302 = vector.broadcast %301 : vector<16x128xi1> to vector<16x128xi1>
    %303 = arith.xori %299, %302 : vector<16x128xi1>
    %304 = arith.andi %303, %297 : vector<16x128xi1>
    %305 = vector.broadcast %293 : i32 to vector<16x128xi32>
    %306 = arith.addi %295, %305 : vector<16x128xi32>
    %307 = arith.select %304, %306, %295 : vector<16x128xi1>, vector<16x128xi32>
    %c3_i32 = arith.constant 3 : i32
    %308 = vector.broadcast %c3_i32 : i32 to vector<16x128xi32>
    %309 = arith.cmpi eq, %307, %308 : vector<16x128xi32>
    %cst_111 = arith.constant 0.000000e+00 : f32
    %310 = vector.broadcast %cst_111 : f32 to vector<16x128xf32>
    %311 = arith.select %309, %310, %290 : vector<16x128xi1>, vector<16x128xf32>
    %c4 = arith.constant 4 : index
    %c0_112 = arith.constant 0 : index
    %312 = vector.load %arg3[%c4, %c0_112] : memref<16x256xf32, #tpu.memory_space<vmem>>, vector<1x256xf32>
    %313 = arith.truncf %287 : vector<16x128xf32> to vector<16x128xbf16>
    %c784 = arith.constant 784 : index
    %c0_113 = arith.constant 0 : index
    %314 = vector.load %arg2[%c784, %c0_113] : memref<3088x256xbf16, #tpu.memory_space<vmem>>, vector<128x256xbf16>
    %cst_114 = arith.constant dense<0.000000e+00> : vector<16x256xf32>
    %315 = tpu.matmul %313, %314, %cst_114 {dimension_numbers = #tpu.dot_dimension_numbers<[1], [0], [0], [1], [0, 0, 1, 1], [], []>} : vector<16x128xbf16>, vector<128x256xbf16>, vector<16x256xf32> -> vector<16x256xf32>
    %316 = arith.truncf %263 : vector<16x128xf32> to vector<16x128xbf16>
    %c912 = arith.constant 912 : index
    %c0_115 = arith.constant 0 : index
    %317 = vector.load %arg2[%c912, %c0_115] : memref<3088x256xbf16, #tpu.memory_space<vmem>>, vector<128x256xbf16>
    %cst_116 = arith.constant dense<0.000000e+00> : vector<16x256xf32>
    %318 = tpu.matmul %316, %317, %cst_116 {dimension_numbers = #tpu.dot_dimension_numbers<[1], [0], [0], [1], [0, 0, 1, 1], [], []>} : vector<16x128xbf16>, vector<128x256xbf16>, vector<16x256xf32> -> vector<16x256xf32>
    %319 = arith.addf %315, %318 : vector<16x256xf32>
    %320 = arith.truncf %311 : vector<16x128xf32> to vector<16x128xbf16>
    %c1040 = arith.constant 1040 : index
    %c0_117 = arith.constant 0 : index
    %321 = vector.load %arg2[%c1040, %c0_117] : memref<3088x256xbf16, #tpu.memory_space<vmem>>, vector<128x256xbf16>
    %cst_118 = arith.constant dense<0.000000e+00> : vector<16x256xf32>
    %322 = tpu.matmul %320, %321, %cst_118 {dimension_numbers = #tpu.dot_dimension_numbers<[1], [0], [0], [1], [0, 0, 1, 1], [], []>} : vector<16x128xbf16>, vector<128x256xbf16>, vector<16x256xf32> -> vector<16x256xf32>
    %323 = arith.addf %319, %322 : vector<16x256xf32>
    %324 = vector.broadcast %312 : vector<1x256xf32> to vector<16x256xf32>
    %325 = arith.addf %323, %324 : vector<16x256xf32>
    %cst_119 = arith.constant 0.000000e+00 : f32
    %326 = vector.broadcast %cst_119 : f32 to vector<16x256xf32>
    %327 = arith.maximumf %325, %326 : vector<16x256xf32>
    %cst_120 = arith.constant 0.000000e+00 : f32
    %328 = vector.broadcast %cst_120 : f32 to vector<1x256xf32>
    %329 = vector.extract_strided_slice %327 {offsets = [0, 0], sizes = [15, 256], strides = [1, 1]} : vector<16x256xf32> to vector<15x256xf32>
    %330 = tpu.concatenate %328, %329 in 0 : vector<1x256xf32>, vector<15x256xf32> -> vector<16x256xf32>
    %331 = tpu.iota {dimensions = array<i32: 0>} : vector<16x256xi32>
    %c4_i32_121 = arith.constant 4 : i32
    %c0_i32_122 = arith.constant 0 : i32
    %332 = arith.cmpi eq, %c4_i32_121, %c0_i32_122 : i32
    %c1_i32_123 = arith.constant 1 : i32
    %333 = arith.select %332, %c1_i32_123, %c4_i32_121 : i32
    %334 = vector.broadcast %333 : i32 to vector<16x256xi32>
    %335 = arith.remsi %331, %334 : vector<16x256xi32>
    %c0_i32_124 = arith.constant 0 : i32
    %336 = vector.broadcast %c0_i32_124 : i32 to vector<16x256xi32>
    %337 = arith.cmpi ne, %335, %336 : vector<16x256xi32>
    %c0_i32_125 = arith.constant 0 : i32
    %338 = vector.broadcast %c0_i32_125 : i32 to vector<16x256xi32>
    %339 = arith.cmpi slt, %335, %338 : vector<16x256xi32>
    %c0_i32_126 = arith.constant 0 : i32
    %340 = arith.cmpi slt, %333, %c0_i32_126 : i32
    %341 = vector.broadcast %340 : i1 to vector<16x256xi1>
    %342 = vector.broadcast %341 : vector<16x256xi1> to vector<16x256xi1>
    %343 = arith.xori %339, %342 : vector<16x256xi1>
    %344 = arith.andi %343, %337 : vector<16x256xi1>
    %345 = vector.broadcast %333 : i32 to vector<16x256xi32>
    %346 = arith.addi %335, %345 : vector<16x256xi32>
    %347 = arith.select %344, %346, %335 : vector<16x256xi1>, vector<16x256xi32>
    %c0_i32_127 = arith.constant 0 : i32
    %348 = vector.broadcast %c0_i32_127 : i32 to vector<16x256xi32>
    %349 = arith.cmpi eq, %347, %348 : vector<16x256xi32>
    %cst_128 = arith.constant 0.000000e+00 : f32
    %350 = vector.broadcast %cst_128 : f32 to vector<16x256xf32>
    %351 = arith.select %349, %350, %330 : vector<16x256xi1>, vector<16x256xf32>
    %352 = vector.extract_strided_slice %327 {offsets = [1, 0], sizes = [15, 256], strides = [1, 1]} : vector<16x256xf32> to vector<15x256xf32>
    %cst_129 = arith.constant 0.000000e+00 : f32
    %353 = vector.broadcast %cst_129 : f32 to vector<1x256xf32>
    %354 = tpu.concatenate %352, %353 in 0 : vector<15x256xf32>, vector<1x256xf32> -> vector<16x256xf32>
    %355 = tpu.iota {dimensions = array<i32: 0>} : vector<16x256xi32>
    %c4_i32_130 = arith.constant 4 : i32
    %c0_i32_131 = arith.constant 0 : i32
    %356 = arith.cmpi eq, %c4_i32_130, %c0_i32_131 : i32
    %c1_i32_132 = arith.constant 1 : i32
    %357 = arith.select %356, %c1_i32_132, %c4_i32_130 : i32
    %358 = vector.broadcast %357 : i32 to vector<16x256xi32>
    %359 = arith.remsi %355, %358 : vector<16x256xi32>
    %c0_i32_133 = arith.constant 0 : i32
    %360 = vector.broadcast %c0_i32_133 : i32 to vector<16x256xi32>
    %361 = arith.cmpi ne, %359, %360 : vector<16x256xi32>
    %c0_i32_134 = arith.constant 0 : i32
    %362 = vector.broadcast %c0_i32_134 : i32 to vector<16x256xi32>
    %363 = arith.cmpi slt, %359, %362 : vector<16x256xi32>
    %c0_i32_135 = arith.constant 0 : i32
    %364 = arith.cmpi slt, %357, %c0_i32_135 : i32
    %365 = vector.broadcast %364 : i1 to vector<16x256xi1>
    %366 = vector.broadcast %365 : vector<16x256xi1> to vector<16x256xi1>
    %367 = arith.xori %363, %366 : vector<16x256xi1>
    %368 = arith.andi %367, %361 : vector<16x256xi1>
    %369 = vector.broadcast %357 : i32 to vector<16x256xi32>
    %370 = arith.addi %359, %369 : vector<16x256xi32>
    %371 = arith.select %368, %370, %359 : vector<16x256xi1>, vector<16x256xi32>
    %c3_i32_136 = arith.constant 3 : i32
    %372 = vector.broadcast %c3_i32_136 : i32 to vector<16x256xi32>
    %373 = arith.cmpi eq, %371, %372 : vector<16x256xi32>
    %cst_137 = arith.constant 0.000000e+00 : f32
    %374 = vector.broadcast %cst_137 : f32 to vector<16x256xf32>
    %375 = arith.select %373, %374, %354 : vector<16x256xi1>, vector<16x256xf32>
    %c5 = arith.constant 5 : index
    %c0_138 = arith.constant 0 : index
    %376 = vector.load %arg3[%c5, %c0_138] : memref<16x256xf32, #tpu.memory_space<vmem>>, vector<1x128xf32>
    %377 = arith.truncf %351 : vector<16x256xf32> to vector<16x256xbf16>
    %c1168 = arith.constant 1168 : index
    %c0_139 = arith.constant 0 : index
    %378 = vector.load %arg2[%c1168, %c0_139] : memref<3088x256xbf16, #tpu.memory_space<vmem>>, vector<256x128xbf16>
    %cst_140 = arith.constant dense<0.000000e+00> : vector<16x128xf32>
    %379 = tpu.matmul %377, %378, %cst_140 {dimension_numbers = #tpu.dot_dimension_numbers<[1], [0], [0], [1], [0, 0, 1, 1], [], []>} : vector<16x256xbf16>, vector<256x128xbf16>, vector<16x128xf32> -> vector<16x128xf32>
    %380 = arith.truncf %327 : vector<16x256xf32> to vector<16x256xbf16>
    %c1424 = arith.constant 1424 : index
    %c0_141 = arith.constant 0 : index
    %381 = vector.load %arg2[%c1424, %c0_141] : memref<3088x256xbf16, #tpu.memory_space<vmem>>, vector<256x128xbf16>
    %cst_142 = arith.constant dense<0.000000e+00> : vector<16x128xf32>
    %382 = tpu.matmul %380, %381, %cst_142 {dimension_numbers = #tpu.dot_dimension_numbers<[1], [0], [0], [1], [0, 0, 1, 1], [], []>} : vector<16x256xbf16>, vector<256x128xbf16>, vector<16x128xf32> -> vector<16x128xf32>
    %383 = arith.addf %379, %382 : vector<16x128xf32>
    %384 = arith.truncf %375 : vector<16x256xf32> to vector<16x256xbf16>
    %c1680 = arith.constant 1680 : index
    %c0_143 = arith.constant 0 : index
    %385 = vector.load %arg2[%c1680, %c0_143] : memref<3088x256xbf16, #tpu.memory_space<vmem>>, vector<256x128xbf16>
    %cst_144 = arith.constant dense<0.000000e+00> : vector<16x128xf32>
    %386 = tpu.matmul %384, %385, %cst_144 {dimension_numbers = #tpu.dot_dimension_numbers<[1], [0], [0], [1], [0, 0, 1, 1], [], []>} : vector<16x256xbf16>, vector<256x128xbf16>, vector<16x128xf32> -> vector<16x128xf32>
    %387 = arith.addf %383, %386 : vector<16x128xf32>
    %388 = vector.broadcast %376 : vector<1x128xf32> to vector<16x128xf32>
    %389 = arith.addf %387, %388 : vector<16x128xf32>
    %cst_145 = arith.constant 0.000000e+00 : f32
    %390 = vector.broadcast %cst_145 : f32 to vector<16x128xf32>
    %391 = arith.maximumf %389, %390 : vector<16x128xf32>
    %cst_146 = arith.constant 0.000000e+00 : f32
    %392 = vector.broadcast %cst_146 : f32 to vector<16x128xf32>
    %393 = arith.select %262, %391, %392 : vector<16x128xi1>, vector<16x128xf32>
    %394 = arith.subf %391, %393 : vector<16x128xf32>
    %395 = vector.shape_cast %393 : vector<16x128xf32> to vector<16x1x128xf32>
    %396 = vector.shape_cast %394 : vector<16x128xf32> to vector<16x1x128xf32>
    %397 = tpu.concatenate %395, %396 in 1 : vector<16x1x128xf32>, vector<16x1x128xf32> -> vector<16x2x128xf32>
    %398 = vector.shape_cast %397 : vector<16x2x128xf32> to vector<32x128xf32>
    %399 = arith.addf %256, %398 : vector<32x128xf32>
    %cst_147 = arith.constant 0.000000e+00 : f32
    %400 = vector.broadcast %cst_147 : f32 to vector<1x128xf32>
    %401 = vector.extract_strided_slice %399 {offsets = [0, 0], sizes = [31, 128], strides = [1, 1]} : vector<32x128xf32> to vector<31x128xf32>
    %402 = tpu.concatenate %400, %401 in 0 : vector<1x128xf32>, vector<31x128xf32> -> vector<32x128xf32>
    %403 = tpu.iota {dimensions = array<i32: 0>} : vector<32x128xi32>
    %c8_i32_148 = arith.constant 8 : i32
    %c0_i32_149 = arith.constant 0 : i32
    %404 = arith.cmpi eq, %c8_i32_148, %c0_i32_149 : i32
    %c1_i32_150 = arith.constant 1 : i32
    %405 = arith.select %404, %c1_i32_150, %c8_i32_148 : i32
    %406 = vector.broadcast %405 : i32 to vector<32x128xi32>
    %407 = arith.remsi %403, %406 : vector<32x128xi32>
    %c0_i32_151 = arith.constant 0 : i32
    %408 = vector.broadcast %c0_i32_151 : i32 to vector<32x128xi32>
    %409 = arith.cmpi ne, %407, %408 : vector<32x128xi32>
    %c0_i32_152 = arith.constant 0 : i32
    %410 = vector.broadcast %c0_i32_152 : i32 to vector<32x128xi32>
    %411 = arith.cmpi slt, %407, %410 : vector<32x128xi32>
    %c0_i32_153 = arith.constant 0 : i32
    %412 = arith.cmpi slt, %405, %c0_i32_153 : i32
    %413 = vector.broadcast %412 : i1 to vector<32x128xi1>
    %414 = vector.broadcast %413 : vector<32x128xi1> to vector<32x128xi1>
    %415 = arith.xori %411, %414 : vector<32x128xi1>
    %416 = arith.andi %415, %409 : vector<32x128xi1>
    %417 = vector.broadcast %405 : i32 to vector<32x128xi32>
    %418 = arith.addi %407, %417 : vector<32x128xi32>
    %419 = arith.select %416, %418, %407 : vector<32x128xi1>, vector<32x128xi32>
    %c0_i32_154 = arith.constant 0 : i32
    %420 = vector.broadcast %c0_i32_154 : i32 to vector<32x128xi32>
    %421 = arith.cmpi eq, %419, %420 : vector<32x128xi32>
    %cst_155 = arith.constant 0.000000e+00 : f32
    %422 = vector.broadcast %cst_155 : f32 to vector<32x128xf32>
    %423 = arith.select %421, %422, %402 : vector<32x128xi1>, vector<32x128xf32>
    %424 = vector.extract_strided_slice %399 {offsets = [1, 0], sizes = [31, 128], strides = [1, 1]} : vector<32x128xf32> to vector<31x128xf32>
    %cst_156 = arith.constant 0.000000e+00 : f32
    %425 = vector.broadcast %cst_156 : f32 to vector<1x128xf32>
    %426 = tpu.concatenate %424, %425 in 0 : vector<31x128xf32>, vector<1x128xf32> -> vector<32x128xf32>
    %427 = tpu.iota {dimensions = array<i32: 0>} : vector<32x128xi32>
    %c8_i32_157 = arith.constant 8 : i32
    %c0_i32_158 = arith.constant 0 : i32
    %428 = arith.cmpi eq, %c8_i32_157, %c0_i32_158 : i32
    %c1_i32_159 = arith.constant 1 : i32
    %429 = arith.select %428, %c1_i32_159, %c8_i32_157 : i32
    %430 = vector.broadcast %429 : i32 to vector<32x128xi32>
    %431 = arith.remsi %427, %430 : vector<32x128xi32>
    %c0_i32_160 = arith.constant 0 : i32
    %432 = vector.broadcast %c0_i32_160 : i32 to vector<32x128xi32>
    %433 = arith.cmpi ne, %431, %432 : vector<32x128xi32>
    %c0_i32_161 = arith.constant 0 : i32
    %434 = vector.broadcast %c0_i32_161 : i32 to vector<32x128xi32>
    %435 = arith.cmpi slt, %431, %434 : vector<32x128xi32>
    %c0_i32_162 = arith.constant 0 : i32
    %436 = arith.cmpi slt, %429, %c0_i32_162 : i32
    %437 = vector.broadcast %436 : i1 to vector<32x128xi1>
    %438 = vector.broadcast %437 : vector<32x128xi1> to vector<32x128xi1>
    %439 = arith.xori %435, %438 : vector<32x128xi1>
    %440 = arith.andi %439, %433 : vector<32x128xi1>
    %441 = vector.broadcast %429 : i32 to vector<32x128xi32>
    %442 = arith.addi %431, %441 : vector<32x128xi32>
    %443 = arith.select %440, %442, %431 : vector<32x128xi1>, vector<32x128xi32>
    %c7_i32_163 = arith.constant 7 : i32
    %444 = vector.broadcast %c7_i32_163 : i32 to vector<32x128xi32>
    %445 = arith.cmpi eq, %443, %444 : vector<32x128xi32>
    %cst_164 = arith.constant 0.000000e+00 : f32
    %446 = vector.broadcast %cst_164 : f32 to vector<32x128xf32>
    %447 = arith.select %445, %446, %426 : vector<32x128xi1>, vector<32x128xf32>
    %c6 = arith.constant 6 : index
    %c0_165 = arith.constant 0 : index
    %448 = vector.load %arg3[%c6, %c0_165] : memref<16x256xf32, #tpu.memory_space<vmem>>, vector<1x128xf32>
    %449 = arith.truncf %423 : vector<32x128xf32> to vector<32x128xbf16>
    %c1936 = arith.constant 1936 : index
    %c0_166 = arith.constant 0 : index
    %450 = vector.load %arg2[%c1936, %c0_166] : memref<3088x256xbf16, #tpu.memory_space<vmem>>, vector<128x128xbf16>
    %cst_167 = arith.constant dense<0.000000e+00> : vector<32x128xf32>
    %451 = tpu.matmul %449, %450, %cst_167 {dimension_numbers = #tpu.dot_dimension_numbers<[1], [0], [0], [1], [0, 0, 1, 1], [], []>} : vector<32x128xbf16>, vector<128x128xbf16>, vector<32x128xf32> -> vector<32x128xf32>
    %452 = arith.truncf %399 : vector<32x128xf32> to vector<32x128xbf16>
    %c2064 = arith.constant 2064 : index
    %c0_168 = arith.constant 0 : index
    %453 = vector.load %arg2[%c2064, %c0_168] : memref<3088x256xbf16, #tpu.memory_space<vmem>>, vector<128x128xbf16>
    %cst_169 = arith.constant dense<0.000000e+00> : vector<32x128xf32>
    %454 = tpu.matmul %452, %453, %cst_169 {dimension_numbers = #tpu.dot_dimension_numbers<[1], [0], [0], [1], [0, 0, 1, 1], [], []>} : vector<32x128xbf16>, vector<128x128xbf16>, vector<32x128xf32> -> vector<32x128xf32>
    %455 = arith.addf %451, %454 : vector<32x128xf32>
    %456 = arith.truncf %447 : vector<32x128xf32> to vector<32x128xbf16>
    %c2192 = arith.constant 2192 : index
    %c0_170 = arith.constant 0 : index
    %457 = vector.load %arg2[%c2192, %c0_170] : memref<3088x256xbf16, #tpu.memory_space<vmem>>, vector<128x128xbf16>
    %cst_171 = arith.constant dense<0.000000e+00> : vector<32x128xf32>
    %458 = tpu.matmul %456, %457, %cst_171 {dimension_numbers = #tpu.dot_dimension_numbers<[1], [0], [0], [1], [0, 0, 1, 1], [], []>} : vector<32x128xbf16>, vector<128x128xbf16>, vector<32x128xf32> -> vector<32x128xf32>
    %459 = arith.addf %455, %458 : vector<32x128xf32>
    %460 = vector.broadcast %448 : vector<1x128xf32> to vector<32x128xf32>
    %461 = arith.addf %459, %460 : vector<32x128xf32>
    %cst_172 = arith.constant 0.000000e+00 : f32
    %462 = vector.broadcast %cst_172 : f32 to vector<32x128xf32>
    %463 = arith.maximumf %461, %462 : vector<32x128xf32>
    %cst_173 = arith.constant 0.000000e+00 : f32
    %464 = vector.broadcast %cst_173 : f32 to vector<1x128xf32>
    %465 = vector.extract_strided_slice %463 {offsets = [0, 0], sizes = [31, 128], strides = [1, 1]} : vector<32x128xf32> to vector<31x128xf32>
    %466 = tpu.concatenate %464, %465 in 0 : vector<1x128xf32>, vector<31x128xf32> -> vector<32x128xf32>
    %467 = tpu.iota {dimensions = array<i32: 0>} : vector<32x128xi32>
    %c8_i32_174 = arith.constant 8 : i32
    %c0_i32_175 = arith.constant 0 : i32
    %468 = arith.cmpi eq, %c8_i32_174, %c0_i32_175 : i32
    %c1_i32_176 = arith.constant 1 : i32
    %469 = arith.select %468, %c1_i32_176, %c8_i32_174 : i32
    %470 = vector.broadcast %469 : i32 to vector<32x128xi32>
    %471 = arith.remsi %467, %470 : vector<32x128xi32>
    %c0_i32_177 = arith.constant 0 : i32
    %472 = vector.broadcast %c0_i32_177 : i32 to vector<32x128xi32>
    %473 = arith.cmpi ne, %471, %472 : vector<32x128xi32>
    %c0_i32_178 = arith.constant 0 : i32
    %474 = vector.broadcast %c0_i32_178 : i32 to vector<32x128xi32>
    %475 = arith.cmpi slt, %471, %474 : vector<32x128xi32>
    %c0_i32_179 = arith.constant 0 : i32
    %476 = arith.cmpi slt, %469, %c0_i32_179 : i32
    %477 = vector.broadcast %476 : i1 to vector<32x128xi1>
    %478 = vector.broadcast %477 : vector<32x128xi1> to vector<32x128xi1>
    %479 = arith.xori %475, %478 : vector<32x128xi1>
    %480 = arith.andi %479, %473 : vector<32x128xi1>
    %481 = vector.broadcast %469 : i32 to vector<32x128xi32>
    %482 = arith.addi %471, %481 : vector<32x128xi32>
    %483 = arith.select %480, %482, %471 : vector<32x128xi1>, vector<32x128xi32>
    %c0_i32_180 = arith.constant 0 : i32
    %484 = vector.broadcast %c0_i32_180 : i32 to vector<32x128xi32>
    %485 = arith.cmpi eq, %483, %484 : vector<32x128xi32>
    %cst_181 = arith.constant 0.000000e+00 : f32
    %486 = vector.broadcast %cst_181 : f32 to vector<32x128xf32>
    %487 = arith.select %485, %486, %466 : vector<32x128xi1>, vector<32x128xf32>
    %488 = vector.extract_strided_slice %463 {offsets = [1, 0], sizes = [31, 128], strides = [1, 1]} : vector<32x128xf32> to vector<31x128xf32>
    %cst_182 = arith.constant 0.000000e+00 : f32
    %489 = vector.broadcast %cst_182 : f32 to vector<1x128xf32>
    %490 = tpu.concatenate %488, %489 in 0 : vector<31x128xf32>, vector<1x128xf32> -> vector<32x128xf32>
    %491 = tpu.iota {dimensions = array<i32: 0>} : vector<32x128xi32>
    %c8_i32_183 = arith.constant 8 : i32
    %c0_i32_184 = arith.constant 0 : i32
    %492 = arith.cmpi eq, %c8_i32_183, %c0_i32_184 : i32
    %c1_i32_185 = arith.constant 1 : i32
    %493 = arith.select %492, %c1_i32_185, %c8_i32_183 : i32
    %494 = vector.broadcast %493 : i32 to vector<32x128xi32>
    %495 = arith.remsi %491, %494 : vector<32x128xi32>
    %c0_i32_186 = arith.constant 0 : i32
    %496 = vector.broadcast %c0_i32_186 : i32 to vector<32x128xi32>
    %497 = arith.cmpi ne, %495, %496 : vector<32x128xi32>
    %c0_i32_187 = arith.constant 0 : i32
    %498 = vector.broadcast %c0_i32_187 : i32 to vector<32x128xi32>
    %499 = arith.cmpi slt, %495, %498 : vector<32x128xi32>
    %c0_i32_188 = arith.constant 0 : i32
    %500 = arith.cmpi slt, %493, %c0_i32_188 : i32
    %501 = vector.broadcast %500 : i1 to vector<32x128xi1>
    %502 = vector.broadcast %501 : vector<32x128xi1> to vector<32x128xi1>
    %503 = arith.xori %499, %502 : vector<32x128xi1>
    %504 = arith.andi %503, %497 : vector<32x128xi1>
    %505 = vector.broadcast %493 : i32 to vector<32x128xi32>
    %506 = arith.addi %495, %505 : vector<32x128xi32>
    %507 = arith.select %504, %506, %495 : vector<32x128xi1>, vector<32x128xi32>
    %c7_i32_189 = arith.constant 7 : i32
    %508 = vector.broadcast %c7_i32_189 : i32 to vector<32x128xi32>
    %509 = arith.cmpi eq, %507, %508 : vector<32x128xi32>
    %cst_190 = arith.constant 0.000000e+00 : f32
    %510 = vector.broadcast %cst_190 : f32 to vector<32x128xf32>
    %511 = arith.select %509, %510, %490 : vector<32x128xi1>, vector<32x128xf32>
    %c7 = arith.constant 7 : index
    %c0_191 = arith.constant 0 : index
    %512 = vector.load %arg3[%c7, %c0_191] : memref<16x256xf32, #tpu.memory_space<vmem>>, vector<1x64xf32>
    %513 = arith.truncf %487 : vector<32x128xf32> to vector<32x128xbf16>
    %c2320 = arith.constant 2320 : index
    %c0_192 = arith.constant 0 : index
    %514 = vector.load %arg2[%c2320, %c0_192] : memref<3088x256xbf16, #tpu.memory_space<vmem>>, vector<128x64xbf16>
    %cst_193 = arith.constant dense<0.000000e+00> : vector<32x64xf32>
    %515 = tpu.matmul %513, %514, %cst_193 {dimension_numbers = #tpu.dot_dimension_numbers<[1], [0], [0], [1], [0, 0, 1, 1], [], []>} : vector<32x128xbf16>, vector<128x64xbf16>, vector<32x64xf32> -> vector<32x64xf32>
    %516 = arith.truncf %463 : vector<32x128xf32> to vector<32x128xbf16>
    %c2448 = arith.constant 2448 : index
    %c0_194 = arith.constant 0 : index
    %517 = vector.load %arg2[%c2448, %c0_194] : memref<3088x256xbf16, #tpu.memory_space<vmem>>, vector<128x64xbf16>
    %cst_195 = arith.constant dense<0.000000e+00> : vector<32x64xf32>
    %518 = tpu.matmul %516, %517, %cst_195 {dimension_numbers = #tpu.dot_dimension_numbers<[1], [0], [0], [1], [0, 0, 1, 1], [], []>} : vector<32x128xbf16>, vector<128x64xbf16>, vector<32x64xf32> -> vector<32x64xf32>
    %519 = arith.addf %515, %518 : vector<32x64xf32>
    %520 = arith.truncf %511 : vector<32x128xf32> to vector<32x128xbf16>
    %c2576 = arith.constant 2576 : index
    %c0_196 = arith.constant 0 : index
    %521 = vector.load %arg2[%c2576, %c0_196] : memref<3088x256xbf16, #tpu.memory_space<vmem>>, vector<128x64xbf16>
    %cst_197 = arith.constant dense<0.000000e+00> : vector<32x64xf32>
    %522 = tpu.matmul %520, %521, %cst_197 {dimension_numbers = #tpu.dot_dimension_numbers<[1], [0], [0], [1], [0, 0, 1, 1], [], []>} : vector<32x128xbf16>, vector<128x64xbf16>, vector<32x64xf32> -> vector<32x64xf32>
    %523 = arith.addf %519, %522 : vector<32x64xf32>
    %524 = vector.broadcast %512 : vector<1x64xf32> to vector<32x64xf32>
    %525 = arith.addf %523, %524 : vector<32x64xf32>
    %cst_198 = arith.constant 0.000000e+00 : f32
    %526 = vector.broadcast %cst_198 : f32 to vector<32x64xf32>
    %527 = arith.maximumf %525, %526 : vector<32x64xf32>
    %cst_199 = arith.constant 0.000000e+00 : f32
    %528 = vector.broadcast %cst_199 : f32 to vector<32x64xf32>
    %529 = arith.select %127, %527, %528 : vector<32x64xi1>, vector<32x64xf32>
    %530 = arith.subf %527, %529 : vector<32x64xf32>
    %531 = arith.addf %124, %529 : vector<32x64xf32>
    %532 = arith.addf %126, %530 : vector<32x64xf32>
    %c2704 = arith.constant 2704 : index
    %c0_200 = arith.constant 0 : index
    %533 = vector.load %arg2[%c2704, %c0_200] : memref<3088x256xbf16, #tpu.memory_space<vmem>>, vector<64x64xbf16>
    %c2768 = arith.constant 2768 : index
    %c0_201 = arith.constant 0 : index
    %534 = vector.load %arg2[%c2768, %c0_201] : memref<3088x256xbf16, #tpu.memory_space<vmem>>, vector<64x64xbf16>
    %c2832 = arith.constant 2832 : index
    %c0_202 = arith.constant 0 : index
    %535 = vector.load %arg2[%c2832, %c0_202] : memref<3088x256xbf16, #tpu.memory_space<vmem>>, vector<64x64xbf16>
    %c8 = arith.constant 8 : index
    %c0_203 = arith.constant 0 : index
    %536 = vector.load %arg3[%c8, %c0_203] : memref<16x256xf32, #tpu.memory_space<vmem>>, vector<1x64xf32>
    %cst_204 = arith.constant 0.000000e+00 : f32
    %537 = vector.broadcast %cst_204 : f32 to vector<1x64xf32>
    %538 = vector.extract_strided_slice %532 {offsets = [0, 0], sizes = [31, 64], strides = [1, 1]} : vector<32x64xf32> to vector<31x64xf32>
    %539 = tpu.concatenate %537, %538 in 0 : vector<1x64xf32>, vector<31x64xf32> -> vector<32x64xf32>
    %540 = tpu.iota {dimensions = array<i32: 0>} : vector<32x64xi32>
    %c8_i32_205 = arith.constant 8 : i32
    %c0_i32_206 = arith.constant 0 : i32
    %541 = arith.cmpi eq, %c8_i32_205, %c0_i32_206 : i32
    %c1_i32_207 = arith.constant 1 : i32
    %542 = arith.select %541, %c1_i32_207, %c8_i32_205 : i32
    %543 = vector.broadcast %542 : i32 to vector<32x64xi32>
    %544 = arith.remsi %540, %543 : vector<32x64xi32>
    %c0_i32_208 = arith.constant 0 : i32
    %545 = vector.broadcast %c0_i32_208 : i32 to vector<32x64xi32>
    %546 = arith.cmpi ne, %544, %545 : vector<32x64xi32>
    %c0_i32_209 = arith.constant 0 : i32
    %547 = vector.broadcast %c0_i32_209 : i32 to vector<32x64xi32>
    %548 = arith.cmpi slt, %544, %547 : vector<32x64xi32>
    %c0_i32_210 = arith.constant 0 : i32
    %549 = arith.cmpi slt, %542, %c0_i32_210 : i32
    %550 = vector.broadcast %549 : i1 to vector<32x64xi1>
    %551 = vector.broadcast %550 : vector<32x64xi1> to vector<32x64xi1>
    %552 = arith.xori %548, %551 : vector<32x64xi1>
    %553 = arith.andi %552, %546 : vector<32x64xi1>
    %554 = vector.broadcast %542 : i32 to vector<32x64xi32>
    %555 = arith.addi %544, %554 : vector<32x64xi32>
    %556 = arith.select %553, %555, %544 : vector<32x64xi1>, vector<32x64xi32>
    %c0_i32_211 = arith.constant 0 : i32
    %557 = vector.broadcast %c0_i32_211 : i32 to vector<32x64xi32>
    %558 = arith.cmpi eq, %556, %557 : vector<32x64xi32>
    %cst_212 = arith.constant 0.000000e+00 : f32
    %559 = vector.broadcast %cst_212 : f32 to vector<32x64xf32>
    %560 = arith.select %558, %559, %539 : vector<32x64xi1>, vector<32x64xf32>
    %561 = arith.truncf %560 : vector<32x64xf32> to vector<32x64xbf16>
    %562 = vector.extract_strided_slice %531 {offsets = [1, 0], sizes = [31, 64], strides = [1, 1]} : vector<32x64xf32> to vector<31x64xf32>
    %cst_213 = arith.constant 0.000000e+00 : f32
    %563 = vector.broadcast %cst_213 : f32 to vector<1x64xf32>
    %564 = tpu.concatenate %562, %563 in 0 : vector<31x64xf32>, vector<1x64xf32> -> vector<32x64xf32>
    %565 = tpu.iota {dimensions = array<i32: 0>} : vector<32x64xi32>
    %c8_i32_214 = arith.constant 8 : i32
    %c0_i32_215 = arith.constant 0 : i32
    %566 = arith.cmpi eq, %c8_i32_214, %c0_i32_215 : i32
    %c1_i32_216 = arith.constant 1 : i32
    %567 = arith.select %566, %c1_i32_216, %c8_i32_214 : i32
    %568 = vector.broadcast %567 : i32 to vector<32x64xi32>
    %569 = arith.remsi %565, %568 : vector<32x64xi32>
    %c0_i32_217 = arith.constant 0 : i32
    %570 = vector.broadcast %c0_i32_217 : i32 to vector<32x64xi32>
    %571 = arith.cmpi ne, %569, %570 : vector<32x64xi32>
    %c0_i32_218 = arith.constant 0 : i32
    %572 = vector.broadcast %c0_i32_218 : i32 to vector<32x64xi32>
    %573 = arith.cmpi slt, %569, %572 : vector<32x64xi32>
    %c0_i32_219 = arith.constant 0 : i32
    %574 = arith.cmpi slt, %567, %c0_i32_219 : i32
    %575 = vector.broadcast %574 : i1 to vector<32x64xi1>
    %576 = vector.broadcast %575 : vector<32x64xi1> to vector<32x64xi1>
    %577 = arith.xori %573, %576 : vector<32x64xi1>
    %578 = arith.andi %577, %571 : vector<32x64xi1>
    %579 = vector.broadcast %567 : i32 to vector<32x64xi32>
    %580 = arith.addi %569, %579 : vector<32x64xi32>
    %581 = arith.select %578, %580, %569 : vector<32x64xi1>, vector<32x64xi32>
    %c7_i32_220 = arith.constant 7 : i32
    %582 = vector.broadcast %c7_i32_220 : i32 to vector<32x64xi32>
    %583 = arith.cmpi eq, %581, %582 : vector<32x64xi32>
    %cst_221 = arith.constant 0.000000e+00 : f32
    %584 = vector.broadcast %cst_221 : f32 to vector<32x64xf32>
    %585 = arith.select %583, %584, %564 : vector<32x64xi1>, vector<32x64xf32>
    %586 = arith.truncf %585 : vector<32x64xf32> to vector<32x64xbf16>
    %587 = arith.truncf %531 : vector<32x64xf32> to vector<32x64xbf16>
    %588 = arith.truncf %532 : vector<32x64xf32> to vector<32x64xbf16>
    %cst_222 = arith.constant dense<0.000000e+00> : vector<32x64xf32>
    %589 = tpu.matmul %561, %533, %cst_222 {dimension_numbers = #tpu.dot_dimension_numbers<[1], [0], [0], [1], [0, 0, 1, 1], [], []>} : vector<32x64xbf16>, vector<64x64xbf16>, vector<32x64xf32> -> vector<32x64xf32>
    %cst_223 = arith.constant dense<0.000000e+00> : vector<32x64xf32>
    %590 = tpu.matmul %587, %534, %cst_223 {dimension_numbers = #tpu.dot_dimension_numbers<[1], [0], [0], [1], [0, 0, 1, 1], [], []>} : vector<32x64xbf16>, vector<64x64xbf16>, vector<32x64xf32> -> vector<32x64xf32>
    %591 = arith.addf %589, %590 : vector<32x64xf32>
    %cst_224 = arith.constant dense<0.000000e+00> : vector<32x64xf32>
    %592 = tpu.matmul %588, %535, %cst_224 {dimension_numbers = #tpu.dot_dimension_numbers<[1], [0], [0], [1], [0, 0, 1, 1], [], []>} : vector<32x64xbf16>, vector<64x64xbf16>, vector<32x64xf32> -> vector<32x64xf32>
    %593 = arith.addf %591, %592 : vector<32x64xf32>
    %cst_225 = arith.constant dense<0.000000e+00> : vector<32x64xf32>
    %594 = tpu.matmul %587, %533, %cst_225 {dimension_numbers = #tpu.dot_dimension_numbers<[1], [0], [0], [1], [0, 0, 1, 1], [], []>} : vector<32x64xbf16>, vector<64x64xbf16>, vector<32x64xf32> -> vector<32x64xf32>
    %cst_226 = arith.constant dense<0.000000e+00> : vector<32x64xf32>
    %595 = tpu.matmul %588, %534, %cst_226 {dimension_numbers = #tpu.dot_dimension_numbers<[1], [0], [0], [1], [0, 0, 1, 1], [], []>} : vector<32x64xbf16>, vector<64x64xbf16>, vector<32x64xf32> -> vector<32x64xf32>
    %596 = arith.addf %594, %595 : vector<32x64xf32>
    %cst_227 = arith.constant dense<0.000000e+00> : vector<32x64xf32>
    %597 = tpu.matmul %586, %535, %cst_227 {dimension_numbers = #tpu.dot_dimension_numbers<[1], [0], [0], [1], [0, 0, 1, 1], [], []>} : vector<32x64xbf16>, vector<64x64xbf16>, vector<32x64xf32> -> vector<32x64xf32>
    %598 = arith.addf %596, %597 : vector<32x64xf32>
    %599 = vector.broadcast %536 : vector<1x64xf32> to vector<32x64xf32>
    %600 = arith.addf %593, %599 : vector<32x64xf32>
    %cst_228 = arith.constant 0.000000e+00 : f32
    %601 = vector.broadcast %cst_228 : f32 to vector<32x64xf32>
    %602 = arith.maximumf %600, %601 : vector<32x64xf32>
    %603 = vector.broadcast %536 : vector<1x64xf32> to vector<32x64xf32>
    %604 = arith.addf %598, %603 : vector<32x64xf32>
    %cst_229 = arith.constant 0.000000e+00 : f32
    %605 = vector.broadcast %cst_229 : f32 to vector<32x64xf32>
    %606 = arith.maximumf %604, %605 : vector<32x64xf32>
    %c2896 = arith.constant 2896 : index
    %c0_230 = arith.constant 0 : index
    %607 = vector.load %arg2[%c2896, %c0_230] : memref<3088x256xbf16, #tpu.memory_space<vmem>>, vector<64x64xbf16>
    %c2960 = arith.constant 2960 : index
    %c0_231 = arith.constant 0 : index
    %608 = vector.load %arg2[%c2960, %c0_231] : memref<3088x256xbf16, #tpu.memory_space<vmem>>, vector<64x64xbf16>
    %c3024 = arith.constant 3024 : index
    %c0_232 = arith.constant 0 : index
    %609 = vector.load %arg2[%c3024, %c0_232] : memref<3088x256xbf16, #tpu.memory_space<vmem>>, vector<64x64xbf16>
    %c9 = arith.constant 9 : index
    %c0_233 = arith.constant 0 : index
    %610 = vector.load %arg3[%c9, %c0_233] : memref<16x256xf32, #tpu.memory_space<vmem>>, vector<1x64xf32>
    %cst_234 = arith.constant 0.000000e+00 : f32
    %611 = vector.broadcast %cst_234 : f32 to vector<1x64xf32>
    %612 = vector.extract_strided_slice %606 {offsets = [0, 0], sizes = [31, 64], strides = [1, 1]} : vector<32x64xf32> to vector<31x64xf32>
    %613 = tpu.concatenate %611, %612 in 0 : vector<1x64xf32>, vector<31x64xf32> -> vector<32x64xf32>
    %614 = tpu.iota {dimensions = array<i32: 0>} : vector<32x64xi32>
    %c8_i32_235 = arith.constant 8 : i32
    %c0_i32_236 = arith.constant 0 : i32
    %615 = arith.cmpi eq, %c8_i32_235, %c0_i32_236 : i32
    %c1_i32_237 = arith.constant 1 : i32
    %616 = arith.select %615, %c1_i32_237, %c8_i32_235 : i32
    %617 = vector.broadcast %616 : i32 to vector<32x64xi32>
    %618 = arith.remsi %614, %617 : vector<32x64xi32>
    %c0_i32_238 = arith.constant 0 : i32
    %619 = vector.broadcast %c0_i32_238 : i32 to vector<32x64xi32>
    %620 = arith.cmpi ne, %618, %619 : vector<32x64xi32>
    %c0_i32_239 = arith.constant 0 : i32
    %621 = vector.broadcast %c0_i32_239 : i32 to vector<32x64xi32>
    %622 = arith.cmpi slt, %618, %621 : vector<32x64xi32>
    %c0_i32_240 = arith.constant 0 : i32
    %623 = arith.cmpi slt, %616, %c0_i32_240 : i32
    %624 = vector.broadcast %623 : i1 to vector<32x64xi1>
    %625 = vector.broadcast %624 : vector<32x64xi1> to vector<32x64xi1>
    %626 = arith.xori %622, %625 : vector<32x64xi1>
    %627 = arith.andi %626, %620 : vector<32x64xi1>
    %628 = vector.broadcast %616 : i32 to vector<32x64xi32>
    %629 = arith.addi %618, %628 : vector<32x64xi32>
    %630 = arith.select %627, %629, %618 : vector<32x64xi1>, vector<32x64xi32>
    %c0_i32_241 = arith.constant 0 : i32
    %631 = vector.broadcast %c0_i32_241 : i32 to vector<32x64xi32>
    %632 = arith.cmpi eq, %630, %631 : vector<32x64xi32>
    %cst_242 = arith.constant 0.000000e+00 : f32
    %633 = vector.broadcast %cst_242 : f32 to vector<32x64xf32>
    %634 = arith.select %632, %633, %613 : vector<32x64xi1>, vector<32x64xf32>
    %635 = arith.truncf %634 : vector<32x64xf32> to vector<32x64xbf16>
    %636 = vector.extract_strided_slice %602 {offsets = [1, 0], sizes = [31, 64], strides = [1, 1]} : vector<32x64xf32> to vector<31x64xf32>
    %cst_243 = arith.constant 0.000000e+00 : f32
    %637 = vector.broadcast %cst_243 : f32 to vector<1x64xf32>
    %638 = tpu.concatenate %636, %637 in 0 : vector<31x64xf32>, vector<1x64xf32> -> vector<32x64xf32>
    %639 = tpu.iota {dimensions = array<i32: 0>} : vector<32x64xi32>
    %c8_i32_244 = arith.constant 8 : i32
    %c0_i32_245 = arith.constant 0 : i32
    %640 = arith.cmpi eq, %c8_i32_244, %c0_i32_245 : i32
    %c1_i32_246 = arith.constant 1 : i32
    %641 = arith.select %640, %c1_i32_246, %c8_i32_244 : i32
    %642 = vector.broadcast %641 : i32 to vector<32x64xi32>
    %643 = arith.remsi %639, %642 : vector<32x64xi32>
    %c0_i32_247 = arith.constant 0 : i32
    %644 = vector.broadcast %c0_i32_247 : i32 to vector<32x64xi32>
    %645 = arith.cmpi ne, %643, %644 : vector<32x64xi32>
    %c0_i32_248 = arith.constant 0 : i32
    %646 = vector.broadcast %c0_i32_248 : i32 to vector<32x64xi32>
    %647 = arith.cmpi slt, %643, %646 : vector<32x64xi32>
    %c0_i32_249 = arith.constant 0 : i32
    %648 = arith.cmpi slt, %641, %c0_i32_249 : i32
    %649 = vector.broadcast %648 : i1 to vector<32x64xi1>
    %650 = vector.broadcast %649 : vector<32x64xi1> to vector<32x64xi1>
    %651 = arith.xori %647, %650 : vector<32x64xi1>
    %652 = arith.andi %651, %645 : vector<32x64xi1>
    %653 = vector.broadcast %641 : i32 to vector<32x64xi32>
    %654 = arith.addi %643, %653 : vector<32x64xi32>
    %655 = arith.select %652, %654, %643 : vector<32x64xi1>, vector<32x64xi32>
    %c7_i32_250 = arith.constant 7 : i32
    %656 = vector.broadcast %c7_i32_250 : i32 to vector<32x64xi32>
    %657 = arith.cmpi eq, %655, %656 : vector<32x64xi32>
    %cst_251 = arith.constant 0.000000e+00 : f32
    %658 = vector.broadcast %cst_251 : f32 to vector<32x64xf32>
    %659 = arith.select %657, %658, %638 : vector<32x64xi1>, vector<32x64xf32>
    %660 = arith.truncf %659 : vector<32x64xf32> to vector<32x64xbf16>
    %661 = arith.truncf %602 : vector<32x64xf32> to vector<32x64xbf16>
    %662 = arith.truncf %606 : vector<32x64xf32> to vector<32x64xbf16>
    %cst_252 = arith.constant dense<0.000000e+00> : vector<32x64xf32>
    %663 = tpu.matmul %635, %607, %cst_252 {dimension_numbers = #tpu.dot_dimension_numbers<[1], [0], [0], [1], [0, 0, 1, 1], [], []>} : vector<32x64xbf16>, vector<64x64xbf16>, vector<32x64xf32> -> vector<32x64xf32>
    %cst_253 = arith.constant dense<0.000000e+00> : vector<32x64xf32>
    %664 = tpu.matmul %661, %608, %cst_253 {dimension_numbers = #tpu.dot_dimension_numbers<[1], [0], [0], [1], [0, 0, 1, 1], [], []>} : vector<32x64xbf16>, vector<64x64xbf16>, vector<32x64xf32> -> vector<32x64xf32>
    %665 = arith.addf %663, %664 : vector<32x64xf32>
    %cst_254 = arith.constant dense<0.000000e+00> : vector<32x64xf32>
    %666 = tpu.matmul %662, %609, %cst_254 {dimension_numbers = #tpu.dot_dimension_numbers<[1], [0], [0], [1], [0, 0, 1, 1], [], []>} : vector<32x64xbf16>, vector<64x64xbf16>, vector<32x64xf32> -> vector<32x64xf32>
    %667 = arith.addf %665, %666 : vector<32x64xf32>
    %cst_255 = arith.constant dense<0.000000e+00> : vector<32x64xf32>
    %668 = tpu.matmul %661, %607, %cst_255 {dimension_numbers = #tpu.dot_dimension_numbers<[1], [0], [0], [1], [0, 0, 1, 1], [], []>} : vector<32x64xbf16>, vector<64x64xbf16>, vector<32x64xf32> -> vector<32x64xf32>
    %cst_256 = arith.constant dense<0.000000e+00> : vector<32x64xf32>
    %669 = tpu.matmul %662, %608, %cst_256 {dimension_numbers = #tpu.dot_dimension_numbers<[1], [0], [0], [1], [0, 0, 1, 1], [], []>} : vector<32x64xbf16>, vector<64x64xbf16>, vector<32x64xf32> -> vector<32x64xf32>
    %670 = arith.addf %668, %669 : vector<32x64xf32>
    %cst_257 = arith.constant dense<0.000000e+00> : vector<32x64xf32>
    %671 = tpu.matmul %660, %609, %cst_257 {dimension_numbers = #tpu.dot_dimension_numbers<[1], [0], [0], [1], [0, 0, 1, 1], [], []>} : vector<32x64xbf16>, vector<64x64xbf16>, vector<32x64xf32> -> vector<32x64xf32>
    %672 = arith.addf %670, %671 : vector<32x64xf32>
    %673 = vector.broadcast %610 : vector<1x64xf32> to vector<32x64xf32>
    %674 = arith.addf %667, %673 : vector<32x64xf32>
    %cst_258 = arith.constant 0.000000e+00 : f32
    %675 = vector.broadcast %cst_258 : f32 to vector<32x64xf32>
    %676 = arith.maximumf %674, %675 : vector<32x64xf32>
    %677 = vector.broadcast %610 : vector<1x64xf32> to vector<32x64xf32>
    %678 = arith.addf %672, %677 : vector<32x64xf32>
    %cst_259 = arith.constant 0.000000e+00 : f32
    %679 = vector.broadcast %cst_259 : f32 to vector<32x64xf32>
    %680 = arith.maximumf %678, %679 : vector<32x64xf32>
    %681 = tpu.concatenate %676, %680 in 1 : vector<32x64xf32>, vector<32x64xf32> -> vector<32x128xf32>
    %c0_260 = arith.constant 0 : index
    %c0_261 = arith.constant 0 : index
    %682 = vector.load %arg4[%c0_260, %c0_261] : memref<32x128xf32, #tpu.memory_space<vmem>>, vector<32x128xf32>
    tpu.vector_store %arg4[%c0_260, %c0_261], %681 {strides = array<i32>} : memref<32x128xf32, #tpu.memory_space<vmem>>, vector<32x128xf32>,
    return
  }
  func.func @transform_0(%arg0: i32) -> (i32, i32) {
    %c0_i32 = arith.constant 0 : i32
    %c0_i32_0 = arith.constant 0 : i32
    return %arg0, %c0_i32 : i32, i32
  }
  func.func @transform_1(%arg0: i32) -> (i32, i32) {
    %c0_i32 = arith.constant 0 : i32
    %c0_i32_0 = arith.constant 0 : i32
    %c0_i32_1 = arith.constant 0 : i32
    return %c0_i32, %c0_i32_0 : i32, i32
  }
  func.func @transform_2(%arg0: i32) -> (i32, i32) {
    %c0_i32 = arith.constant 0 : i32
    %c0_i32_0 = arith.constant 0 : i32
    %c0_i32_1 = arith.constant 0 : i32
    return %c0_i32, %c0_i32_0 : i32, i32
  }
  func.func @transform_3(%arg0: i32) -> (i32, i32) {
    %c0_i32 = arith.constant 0 : i32
    %c0_i32_0 = arith.constant 0 : i32
    return %arg0, %c0_i32 : i32, i32
  }
}

</mosaic_0001>

<bundles_post_ra>
// kernel: tpu_custom_call.1
= control target key start
LH: loop header
LB: loop body
LE: loop exit
PB: predicated region body
PF: predicated region fallthrough
CT: control target
= control target key end

     0   :  { %8 = vsyncpa [#allocation3], 0  ;;  %s9576_s0 = inlined_call_operand.vmem [shape: f32[128,4], index: 0, kind: input, shape index: {}]   ;;  %s9577_s1 = inlined_call_operand.hbm [shape: bf16[3088,256], index: 1, kind: input, shape index: {}]   ;;  %s9578_s2 = inlined_call_operand.hbm [shape: f32[16,256], index: 2, kind: input, shape index: {}]   ;;  %s9579_s3 = inlined_call_operand.hbm [shape: f32[64,128], index: 3, kind: output, shape index: {}]  }
   0x1   :  { %9 = vsyncpa [#allocation6], 0 }
   0x2   :  { %10 = vsyncpa [#allocation4], 0 }
   0x3   :  { %12 = vsyncpa [#allocation4 + $0x1], 0  ;;  %s6997_s12 = smov 0   ;;  %s6999_s13 = smov 0  }
   0x4   :  { %s7001_s14 = smov 0   ;;  %s7003_s15 = smov 0  }
   0x5 LB: > { %s7018_s16 = sadd.s32 4294967295, %s6965_s15   ;;  %s5475_s17 = sadd.s32 4294967294, %s6965_s15   ;;  %s6965_s15 = sphi %s7003_s15, %s10499_s15   ;;  %s6961_s14 = sphi %s7001_s14, %s10498_s14   ;;  %s6957_s13 = sphi %s6999_s13, %s10497_s13   ;;  %s6953_s12 = sphi %s6997_s12, %s10496_s12  }
   0x6   : > { %s7022_s18 = sadd.s32 1, %s6965_s15   ;;  %s93_s19 = sadd.s32 1, %s6961_s14 }
   0x7   : > { %s90_s20 = ssub.s32 %s6965_s15, %s7022_s18  ;;  %p103_p0 = scmp.ne.s32.totalorder %s6961_s14, %s6957_s13 }
   0x8   : > { %p91_p1 = scmp.eq.s32.totalorder %s90_s20, 0  ;;  %p104_p2 = scmp.eq.s32.totalorder %s7018_s16, 1 }
   0x9   : > { %p109_p3 = scmp.ne.s32.totalorder %s6957_s13, %s6953_s12  ;;  %p110_p4 = scmp.eq.s32.totalorder %s5475_s17, 1 }
   0xa   : > { %s7033_s21 = scalar_select %p91_p1, %s6961_s14, %s93_s19  }
   0xb   : > { %p7035_p5 = por %p104_p2, %p103_p0  ;;  %p7039_p6 = por %p110_p4, %p109_p3 }
   0xc   : > { %p5476_p7 = scmp.ge.s32.totalorder %s6965_s15, 1  ;;  %p117_p8 = scmp.lt.s32.totalorder %s6965_s15, 3 }
   0xd   : > { %p6748_p9 = scmp.eq.s32.totalorder %s7018_s16, 0  ;;  %s128_s27 = sshll.u32 %s9577_s1, 4  ;;  %s129_s27 = int_to_ptr.hbm [resolvable:$true] %s128_s27 }
   0xe   : > { %p7046_p10 = pnand %p5476_p7, %p117_p8  ;;  %s6967_s28 = smov [#allocation2]  }
   0xf   : > { %s130_s29 = sshll.u32 %s6967_s28, 4  ;;  %s142_s5 = sshll.u32 %s9578_s2, 4  ;;  %s131_s29 = int_to_ptr.vmem [resolvable:$true] %s130_s29  ;;  %s143_s5 = int_to_ptr.hbm [resolvable:$true] %s142_s5 }
  0x10   : > { %p6737_p11 = pneg %p7046_p10  ;;  %s6968_s6 = smov 128  }
  0x11   : > { %s6969_s7 = smov 8   ;;  %s6970_s8 = smov [#allocation5]  }
  0x12   : > { %p6738_p12 = pnand %p6748_p9, %p6737_p11  ;;  %s144_s9 = sshll.u32 %s6970_s8, 4  ;;  %s145_s9 = int_to_ptr.vmem [resolvable:$true] %s144_s9 }
  0x13   : > { %s6971_s10 = smov 256   ;;  %s6972_s11 = smov 16  }
  0x14   : > { %6740 = dma.hbm_to_vmem [thread:$0]  (!%p6738_p12), %s129_s27, 49408, %s131_s29, [#allocation3], %s6968_s6, %s6968_s6, %s6969_s7  }
  0x15   : > { %6743 = dma.hbm_to_vmem [thread:$0]  (!%p6738_p12), %s143_s5, 512, %s145_s9, [#allocation6], %s6971_s10, %s6971_s10, %s6972_s11  }
  0x16   : > { %169 = sbr.rel (%p7046_p10) target bundleno = 2186 (0x88a), region = 32 }
  0x1b   : > { %6940 = dma.done.wait (%p6748_p9), [#allocation3], 49408  }
  0x1c   : > { %6942 = vsyncadd (%p6748_p9), [#allocation3], 4294917888 }
  0x1d   : > { %6944 = dma.done.wait (%p6748_p9), [#allocation6], 512  }
  0x1e   : > { %6946 = vsyncadd (%p6748_p9), [#allocation6], 4294966784  ;;  %s5484_s17 = sshll.u32 %s7018_s16, 3  ;;  %v248_v0 = vlaneseq  ;;  %vm9690_vm0 = vcmask 1046528   ;;  %s6973_s26 = smov 4   ;;  %vm9688_vm5 = vcmask 1040384  }
  0x1f   : > { %p200_p13 = scmp.lt.s32.totalorder %s5484_s17, 15  ;;  %s6974_s27 = smov 8   ;;  %v5488_v53 = vld [vmem:[#allocation2] sm:$0xf]  ;;  %v6505_v54 = vld [vmem:[#allocation2 + $0x4] sm:$0x30] }
  0x20   : > { %v7071_v1 = vshrl.u32 %v248_v0, 7  ;;  %v5489_v55 = vor.u32 %v6505_v54, %v5488_v53  ;;  %vm509_vm6 = vcmask 1045504   ;;  %vm467_vm8 = vcmask 31744   ;;  %v6528_v44 = vld [vmem:[#allocation2 + $0x174] sm:$0xf0]  ;;  %s6975_s28 = smov 64  }
  0x21   : > { %s10501_s17 = smov (!%p200_p13, %s5484_s17), 15  ;;  %vm476_vm9 = vcmask 64512   ;;  %vm496_vm12 = vcmask 97280   ;;  %vm9691_vm14 = vcmask 523264   ;;  %vm9697_vm15 = vcmask 1042434   ;;  %s196_s29 = sand.u32 1, %s6957_s13  }
  0x22   : > { %9827 = vst [vmem:[#allocation11_spill] sm:$0xff] %v7071_v1  ;;  %v7074_v2 = vadd.s32 8, %v7071_v1  ;;  %v7077_v3 = vadd.s32 24, %v7071_v1  ;;  %s5485_s19 = sshll.u32 %s10501_s17, 3  ;;  %v254_v9 = vadd.s32 40, %v7071_v1  ;;  %v256_v21 = vadd.s32 56, %v7071_v1 }
  0x23   : > { %s7082_s25 = scalar_lea.vmem %s9576_s0, %s5485_s19  ;;  %v511_v56 = vsel %vm509_vm6, %v5489_v55, 0  ;;  %v253_v57 = vadd.s32 32, %v7071_v1  ;;  %vm9692_vm6 = vcmask 1047559   ;;  %s5483_s30 = sshll.u32 %s196_s29, 5 }
  0x24   : > { %v268_v4 = vand.u32 15, %v7074_v2  ;;  %v7086_v5 = vld [vmem:[%s7082_s25] sm:$0xff]  ;;  %v7089_v6 = vld [vmem:[%s7082_s25 + $0x8] sm:$0xff]  ;;  %v7092_v7 = vld [vmem:[%s7082_s25 + $0x10] sm:$0xff]  ;;  %v282_v8 = vand.u32 15, %v7077_v3  ;;  %v296_v26 = vand.u32 15, %v254_v9  ;;  %520 = vmatpush.bf16.msra.mxu0 %v511_v56 }
  0x25   : > { %v371_v10 = vrot.slane %v7089_v6, 1  ;;  %v6795_v11 = vpack.i.bf16 %v7089_v6, %v7086_v5  ;;  %v7100_v12 = vld [vmem:[%s7082_s25 + $0x18] sm:$0xff]  ;;  %v7103_v13 = vld [vmem:[%s7082_s25 + $0x20] sm:$0xff]  ;;  %v370_v14 = vrot.slane %v7086_v5, 1  ;;  %v373_v15 = vrot.slane %v7092_v7, 1  ;;  %v7117_v20 = vld [vmem:[%s7082_s25 + $0x28] sm:$0xff] }
  0x26   : > { %vm7107_vm1 = vcmp.eq.s32.totalorder %v268_v4, 15  ;;  %v375_v17 = vrot.slane %v7100_v12, 1  ;;  %v6805_v18 = vpack.i.bf16 %v7100_v12, %v7092_v7  ;;  %v377_v19 = vrot.slane %v7103_v13, 1  ;;  %v7127_v25 = vld [vmem:[%s7082_s25 + $0x30] sm:$0xff]  ;;  %v7135_v30 = vld [vmem:[%s7082_s25 + $0x38] sm:$0xff]  ;;  %s198_s4 = scalar_lea.vmem [#allocation7], %s5483_s30 }
  0x27   : > { %6796 = vrot.lane.b32.xlu0 %v6795_v11, %s6973_s26  ;;  %v372_v22 = vsel %vm9690_vm0, %v370_v14, %v371_v10  ;;  %v374_v23 = vsel %vm9690_vm0, %v371_v10, %v373_v15  ;;  %vm7122_vm2 = vcmp.eq.s32.totalorder %v282_v8, 15  ;;  %v379_v29 = vrot.slane %v7117_v20, 1  ;;  %s6722_s5 = sshll.u32 %s7018_s16, 5  ;;  %s5388_s9 = sshll.u32 %s198_s4, 4  ;;  %s5389_s9 = int_to_ptr.vmem [resolvable:$true] %s5388_s9 }
  0x28   : > { %v403_v27 = vsel %vm7107_vm1, 0.0, %v374_v23  ;;  %6806 = vrot.lane.b32.xlu1 %v6805_v18, %s6973_s26  ;;  %v378_v28 = vsel %vm9690_vm0, %v375_v17, %v377_v19  ;;  %v376_v31 = vsel %vm9690_vm0, %v373_v15, %v375_v17  ;;  %v6815_v33 = vpack.i.bf16 %v7117_v20, %v7103_v13  ;;  %s5387_s8 = scalar_lea.hbm %s9579_s3, %s6722_s5  ;;  %s5376_s16 = scalar_lea.sflag [#allocation4], %s196_s29 }
  0x29   : > { %v405_v32 = vsel %vm7122_vm2, 0.0, %v378_v28  ;;  %v6800_v34 = vpack.i.bf16 %v403_v27, %v372_v22  ;;  %v381_v35 = vrot.slane %v7127_v25, 1  ;;  %v310_v36 = vand.u32 15, %v256_v21  ;;  %s5390_s10 = sshll.u32 %s5387_s8, 4  ;;  %s6915_s24 = scalar_lea.hbm %s9579_s3, 64  ;;  %s5391_s10 = int_to_ptr.hbm [resolvable:$true] %s5390_s10 }
  0x2a   : > { %6816 = vrot.lane.b32.xlu2 %v6815_v33, %s6973_s26  ;;  %v383_v37 = vrot.slane %v7135_v30, 1  ;;  %vm7145_vm3 = vcmp.eq.s32.totalorder %v296_v26, 15  ;;  %v6810_v39 = vpack.i.bf16 %v405_v32, %v376_v31  ;;  %v380_v40 = vsel %vm9690_vm0, %v377_v19, %v379_v29  ;;  %s6909_s11 = sshra.s32 %s5391_s10, 4  ;;  %s6910_s11 = int_to_ptr.hbm [resolvable:$true] %s6909_s11 }
  0x2b   : > { %v382_v41 = vsel %vm9690_vm0, %v379_v29, %v381_v35  ;;  %vm7155_vm4 = vcmp.eq.s32.totalorder %v310_v36, 15  ;;  %v6825_v48 = vpack.i.bf16 %v7135_v30, %v7127_v25  ;;  %v225_v50 = vrot.slane %v7089_v6, 7  ;;  %s6911_s17 = scalar_lea.hbm %s6910_s11, 32  ;;  %p6916_p3 = scmp.lt.s32.totalorder %s6910_s11, %s9579_s3 }
  0x2c   : > { %v407_v42 = vsel %vm7145_vm3, 0.0, %v382_v41  ;;  %v393_v43 = vsel %vm9690_vm0, %v383_v37, 0.0  ;;  %v384_v46 = vsel %vm9690_vm0, %v381_v35, %v383_v37  ;;  %v224_v51 = vrot.slane %v7086_v5, 7  ;;  %p6912_p0 = scmp.ne.s32.totalorder %s6910_s11, %s6911_s17  ;;  %p6917_p4 = scmp.lt.s32.totalorder %s6915_s24, %s6911_s17 }
  0x2d   : > { %v6820_v45 = vpack.i.bf16 %v407_v42, %v380_v40  ;;  %v409_v47 = vsel %vm7155_vm4, 0.0, %v393_v43  ;;  %v289_v58 = vand.u32 15, %v253_v57  ;;  %v231_v60 = vrot.slane %v7103_v13, 7 }
  0x2e   : > { %v6830_v49 = vpack.i.bf16 %v409_v47, %v384_v46  ;;  %v226_v52 = vsel %vm9688_vm5, %v224_v51, %v225_v50  ;;  %v229_v61 = vrot.slane %v7100_v12, 7  ;;  %v233_v62 = vrot.slane %v7117_v20, 7  ;;  %p6913_p1 = pnand %p6912_p0, %p7035_p5  ;;  %p6918_p7 = por %p6917_p4, %p6916_p3 }
  0x2f   : > { %6801 = vrot.lane.b32.xlu0 %v6800_v34, %s6974_s27  ;;  %vm7175_vm7 = vcmp.eq.s32.totalorder %v289_v58, 0  ;;  %v7184_v9 = vadd.s32 16, %v7071_v1  ;;  %v261_v15 = vand.u32 15, %v7071_v1  ;;  %v227_v19 = vrot.slane %v7092_v7, 7 }
  0x30   : > { %6811 = vrot.lane.b32.xlu1 %v6810_v39, %s6974_s27  ;;  %v232_v0 = vsel %vm9688_vm5, %v229_v61, %v231_v60  ;;  %v234_v6 = vsel %vm9688_vm5, %v231_v60, %v233_v62  ;;  %v247_v26 = vsel %vm9688_vm5, 0.0, %v224_v51  ;;  %v237_v37 = vrot.slane %v7135_v30, 7  ;;  %p6914_p2 = pneg %p6913_p1 }
  0x31   : > { %v365_v8 = vsel %vm7175_vm7, 0.0, %v232_v0  ;;  %v275_v18 = vand.u32 15, %v7184_v9  ;;  %vm7194_vm10 = vcmp.eq.s32.totalorder %v261_v15, 0  ;;  %v228_v29 = vsel %vm9688_vm5, %v225_v50, %v227_v19  ;;  %v6513_v15 = vld [vmem:[#allocation2 + $0x84] sm:$0xf0] }
  0x32   : > { %6821 = vrot.lane.b32.xlu2 %v6820_v45, %s6974_s27  ;;  %v361_v34 = vsel %vm7194_vm10, 0.0, %v247_v26  ;;  %v230_v35 = vsel %vm9688_vm5, %v227_v19, %v229_v61  ;;  %v235_v40 = vrot.slane %v7127_v25, 7  ;;  %v255_v57 = vadd.s32 48, %v7071_v1  ;;  %v6509_v19 = vld [vmem:[#allocation2 + $0x44] sm:$0xf0]  ;;  %p6919_p8 = pnand %p6918_p7, %p6914_p2 }
  0x33   : > { %vm7198_vm11 = vcmp.eq.s32.totalorder %v275_v18, 0  ;;  %v5528_v18 = vld [vmem:[#allocation2 + $0x40] sm:$0xf] }
  0x34   : > { %v363_v36 = vsel %vm7198_vm11, 0.0, %v228_v29  ;;  %v238_v56 = vsel %vm9688_vm5, %v235_v40, %v237_v37  ;;  %v303_v58 = vand.u32 15, %v255_v57  ;;  %v5524_v29 = vld [vmem:[#allocation2 + $0x30] sm:$0xf]  ;;  %v5586_v0 = vld [vmem:[#allocation2 + $0x100] sm:$0xf] }
  0x35   : > { %v5496_v37 = vld [vmem:[#allocation2 + $0x50] sm:$0xf] }
  0x36   : > { %vm7222_vm13 = vcmp.eq.s32.totalorder %v303_v58, 0 }
  0x37   : > { %6826 = vrot.lane.b32.xlu0 %v6825_v48, %s6973_s26 }
  0x38   : > { %6831 = vrot.lane.b32.xlu1 %v6830_v49, %s6974_s27 }
  0x84   : > { %v6817_v59 = vpop.permute.xlu2 %6816 }
  0x85   : > { %v6819_v4 = vunpack.i.h.bf16 %v6817_v59  ;;  %v6818_v5 = vunpack.i.l.bf16 %v6817_v59 }
  0x87   : > { %v472_v10 = vsel %vm467_vm8, %v365_v8, %v6818_v5  ;;  %v473_v11 = vsel %vm467_vm8, %v234_v6, %v6819_v4 }
  0x8c   : > { %v6822_v12 = vpop.permute.xlu2 %6821 }
  0x8d   : > { %v6824_v13 = vunpack.i.h.bf16 %v6822_v12  ;;  %v6823_v14 = vunpack.i.l.bf16 %v6822_v12 }
  0x8f   : > { %v481_v20 = vsel %vm476_vm9, %v472_v10, %v6823_v14  ;;  %v482_v21 = vsel %vm476_vm9, %v473_v11, %v6824_v13  ;;  %v5508_v14 = vld [vmem:[#allocation2 + $0x80] sm:$0xf] }
  0x90   : > { %v487_v23 = vpack.c.bf16 %v482_v21, %v481_v20  ;;  %v5529_v20 = vor.u32 %v6509_v19, %v5528_v18  ;;  %v5504_v21 = vld [vmem:[#allocation2 + $0x70] sm:$0xf] }
  0x92   : > { %753 = vmatpush.bf16.msra.mxu2 %v5529_v20 }
  0x99   : > { %v6797_v17 = vpop.permute.xlu0 %6796 }
  0x9a   : > { %v6807_v22 = vpop.permute.xlu1 %6806  ;;  %v6799_v7 = vunpack.i.h.bf16 %v6797_v17  ;;  %v6798_v31 = vunpack.i.l.bf16 %v6797_v17  ;;  %v5509_v17 = vor.u32 %v6513_v15, %v5508_v14 }
  0x9b   : > { %v6809_v32 = vunpack.i.h.bf16 %v6807_v22  ;;  %v6808_v33 = vunpack.i.l.bf16 %v6807_v22  ;;  %v6512_v22 = vld [vmem:[#allocation2 + $0x74] sm:$0xf0] }
  0x9c   : > { %v468_v43 = vsel %vm467_vm8, %v361_v34, %v6798_v31  ;;  %v469_v45 = vsel %vm467_vm8, %v226_v52, %v6799_v7  ;;  %v236_v52 = vsel %vm9688_vm5, %v233_v62, %v235_v40  ;;  %688 = vmatpush.bf16.msra.mxu1 %v5509_v17  ;;  %v5505_v26 = vor.u32 %v6512_v22, %v5504_v21  ;;  %v6508_v7 = vld [vmem:[#allocation2 + $0x34] sm:$0xf0]  ;;  %v5520_v34 = vld [vmem:[#allocation2 + $0x20] sm:$0xf] }
  0x9d   : > { %v470_v46 = vsel %vm467_vm8, %v363_v36, %v6808_v33  ;;  %v471_v47 = vsel %vm467_vm8, %v230_v35, %v6809_v32  ;;  %v367_v5 = vsel %vm7222_vm13, 0.0, %v236_v52  ;;  %v5525_v31 = vor.u32 %v6508_v7, %v5524_v29  ;;  %v5500_v32 = vld [vmem:[#allocation2 + $0x60] sm:$0xf]  ;;  %v6511_v33 = vld [vmem:[#allocation2 + $0x64] sm:$0xf0] }
  0x9e   : > { %v6507_v35 = vld [vmem:[#allocation2 + $0x24] sm:$0xf0]  ;;  %v5548_v40 = vld [vmem:[#allocation2 + $0xc0] sm:$0xf]  ;;  %v7235_v52 = vld [vmem:[#allocation5] ss:$0 sm:$0xff] }
  0x9f   : > { %754 = vmatpush.bf16.msra.mxu2 %v5525_v31  ;;  %v5521_v36 = vor.u32 %v6507_v35, %v5520_v34 }
  0xa0   : > { %689 = vmatpush.bf16.msra.mxu1 %v5505_v26 }
  0xa1   : > { %v6802_v39 = vpop.permute.xlu0 %6801 }
  0xa2   : > { %v6804_v41 = vunpack.i.h.bf16 %v6802_v39  ;;  %v6803_v42 = vunpack.i.l.bf16 %v6802_v39  ;;  %v6812_v48 = vpop.permute.xlu1 %6811  ;;  %v6510_v39 = vld [vmem:[#allocation2 + $0x54] sm:$0xf0] }
  0xa3   : > { %v6814_v30 = vunpack.i.h.bf16 %v6812_v48  ;;  %v6813_v51 = vunpack.i.l.bf16 %v6812_v48  ;;  %755 = vmatpush.bf16.msra.mxu2 %v5521_v36  ;;  %v5544_v48 = vld [vmem:[#allocation2 + $0xb0] sm:$0xf] }
  0xa4   : > { %v477_v49 = vsel %vm476_vm9, %v468_v43, %v6803_v42  ;;  %v478_v50 = vsel %vm476_vm9, %v469_v45, %v6804_v41  ;;  %v5497_v41 = vor.u32 %v6510_v39, %v5496_v37  ;;  %v6517_v42 = vld [vmem:[#allocation2 + $0xc4] sm:$0xf0]  ;;  %v5516_v45 = vld [vmem:[#allocation2 + $0x10] sm:$0xf] }
  0xa5   : > { %v485_v53 = vpack.c.bf16 %v478_v50, %v477_v49  ;;  %v479_v25 = vsel %vm476_vm9, %v470_v46, %v6813_v51  ;;  %v480_v54 = vsel %vm476_vm9, %v471_v47, %v6814_v30  ;;  %v5549_v43 = vor.u32 %v6517_v42, %v5548_v40  ;;  %v6506_v46 = vld [vmem:[#allocation2 + $0x14] sm:$0xf0]  ;;  %v5540_v30 = vld [vmem:[#allocation2 + $0xa0] sm:$0xf]  ;;  %v6515_v51 = vld [vmem:[#allocation2 + $0xa4] sm:$0xf0] }
  0xa6   : > { %v486_v55 = vpack.c.bf16 %v480_v54, %v479_v25  ;;  %v5517_v47 = vor.u32 %v6506_v46, %v5516_v45  ;;  %v6516_v49 = vld [vmem:[#allocation2 + $0xb4] sm:$0xf0]  ;;  %v5536_v25 = vld [vmem:[#allocation2 + $0x90] sm:$0xf] }
  0xa7   : > { %5490 = vmatmul.msk.bf16.vlgmr.msra.gmra.mxu0 %vm496_vm12, %v485_v53  ;;  %830 = vmatpush.bf16.msra.mxu3 %v5549_v43  ;;  %v5545_v50 = vor.u32 %v6516_v49, %v5544_v48  ;;  %v5541_v53 = vor.u32 %v6515_v51, %v5540_v30  ;;  %v6514_v54 = vld [vmem:[#allocation2 + $0x94] sm:$0xf0] }
  0xa8   : > { %756 = vmatpush.bf16.msra.mxu2 %v5517_v47 }
  0xa9   : > { %v6827_v59 = vpop.permute.xlu0 %6826 }
  0xaa   : > { %v6829_v60 = vunpack.i.h.bf16 %v6827_v59  ;;  %v6828_v61 = vunpack.i.l.bf16 %v6827_v59  ;;  %v6832_v4 = vpop.permute.xlu1 %6831 }
  0xab   : > { %v6834_v8 = vunpack.i.h.bf16 %v6832_v4  ;;  %v6833_v62 = vunpack.i.l.bf16 %v6832_v4  ;;  %831 = vmatpush.bf16.msra.mxu3 %v5545_v50 }
  0xac   : > { %v475_v6 = vsel %vm467_vm8, %v238_v56, %v6829_v60  ;;  %v474_v10 = vsel %vm467_vm8, %v367_v5, %v6828_v61 }
  0xad   : > { %v483_v11 = vsel %vm476_vm9, %v474_v10, %v6833_v62  ;;  %v484_v12 = vsel %vm476_vm9, %v475_v6, %v6834_v8 }
  0xae   : > { %v488_v13 = vpack.c.bf16 %v484_v12, %v483_v11 }
  0xaf   : > { %832 = vmatpush.bf16.msra.mxu3 %v5541_v53 }
  0xb7   : > { %5491 = vmatmul.msk.bf16.gmra.mxu0 %vm496_vm12, %v486_v55  ;;  %v5537_v55 = vor.u32 %v6514_v54, %v5536_v25 }
  0xb9   : > { %833 = vmatpush.bf16.msra.mxu3 %v5537_v55 }
  0xc7   : > { %5492 = vmatmul.msk.bf16.gmra.mxu0 %vm496_vm12, %v487_v23  ;;  %v5501_v23 = vor.u32 %v6511_v33, %v5500_v32 }
  0xc9   : > { %690 = vmatpush.bf16.msra.mxu1 %v5501_v23 }
  0xcd   : > { %691 = vmatpush.bf16.msra.mxu1 %v5497_v41 }
  0xd7   : > { %5493 = vmatmul.msk.bf16.gmra.mxu0 %vm496_vm12, %v488_v13 }
 0x124   : > { %v522_v56 = vpop.f32.mrf.mxu0 }
 0x125   : > { %v523_v57 = vadd.f32 %v522_v56, %v7235_v52 }
 0x127   : > { %v542_v58 = vmax.f32 %v523_v57, 0.0 }
 0x129   : > { %v558_v59 = vrot.slane %v542_v58, 7  ;;  %v590_v18 = vrot.slane %v542_v58, 1 }
 0x12b   : > { %v581_v5 = vsel %vm9688_vm5, 0.0, %v558_v59 }
 0x12c   : > { %v524_v60 = vpop.f32.mrf.mxu0  ;;  %v582_v10 = vsel %vm7194_vm10, 0.0, %v581_v5 }
 0x12d   : > { %v525_v61 = vadd.f32 %v524_v60, %v7235_v52 }
 0x12f   : > { %v543_v4 = vmax.f32 %v525_v61, 0.0 }
 0x131   : > { %v559_v6 = vrot.slane %v543_v4, 7  ;;  %v635_v8 = vpack.c.bf16 %v543_v4, %v542_v58  ;;  %v591_v15 = vrot.slane %v543_v4, 1 }
 0x133   : > { %5510 = vmatmul.msk.bf16.vlgmr.msra.gmra.mxu1 %vm9691_vm14, %v635_v8  ;;  %v560_v62 = vsel %vm9688_vm5, %v558_v59, %v559_v6  ;;  %v592_v22 = vsel %vm9690_vm0, %v590_v18, %v591_v15  ;;  %v5604_v18 = vld [vmem:[#allocation2 + $0x180] sm:$0xf] }
 0x134   : > { %v527_v11 = vpop.f32.mrf.mxu0  ;;  %v623_v12 = vpack.c.bf16 %v560_v62, %v582_v10 }
 0x135   : > { %v528_v13 = vadd.f32 %v527_v11, %v7235_v52 }
 0x136   : > { %5530 = vmatmul.msk.bf16.vlgmr.msra.gmra.mxu2 %vm9691_vm14, %v623_v12 }
 0x137   : > { %v544_v14 = vmax.f32 %v528_v13, 0.0 }
 0x139   : > { %v593_v17 = vrot.slane %v544_v14, 1  ;;  %v561_v20 = vrot.slane %v544_v14, 7 }
 0x13b   : > { %v594_v19 = vsel %vm9690_vm0, %v591_v15, %v593_v17  ;;  %v562_v31 = vsel %vm9688_vm5, %v559_v6, %v561_v20 }
 0x13c   : > { %v529_v21 = vpop.f32.mrf.mxu0  ;;  %v615_v27 = vsel %vm7107_vm1, 0.0, %v594_v19  ;;  %v584_v34 = vsel %vm7198_vm11, 0.0, %v562_v31  ;;  %v6529_v19 = vld [vmem:[#allocation2 + $0x184] sm:$0xf0]  ;;  %vm9696_vm1 = vcmask 1043459  }
 0x13d   : > { %v530_v26 = vadd.f32 %v529_v21, %v7235_v52  ;;  %v778_v29 = vpack.c.bf16 %v615_v27, %v592_v22  ;;  %v5605_v21 = vor.u32 %v6529_v19, %v5604_v18  ;;  %v6525_v22 = vld [vmem:[#allocation2 + $0x144] sm:$0xf0] }
 0x13e   : > { %v6521_v27 = vld [vmem:[#allocation2 + $0x104] sm:$0xf0] }
 0x13f   : > { %v545_v7 = vmax.f32 %v530_v26, 0.0  ;;  %5550 = vmatmul.msk.bf16.vlgmr.msra.gmra.mxu3 %vm9691_vm14, %v778_v29  ;;  %v5587_v29 = vor.u32 %v6521_v27, %v5586_v0  ;;  %1609 = vmatpush.bf16.msrb.mxu2 %v5605_v21 }
 0x141   : > { %v563_v32 = vrot.slane %v545_v7, 7  ;;  %v636_v33 = vpack.c.bf16 %v545_v7, %v544_v14  ;;  %v595_v39 = vrot.slane %v545_v7, 1  ;;  %1550 = vmatpush.bf16.msrb.mxu1 %v5587_v29 }
 0x143   : > { %5511 = vmatmul.msk.bf16.gmra.mxu1 %vm9691_vm14, %v636_v33  ;;  %v564_v23 = vsel %vm9688_vm5, %v561_v20, %v563_v32  ;;  %v596_v45 = vsel %vm9690_vm0, %v593_v17, %v595_v39  ;;  %v5568_v20 = vld [vmem:[#allocation2 + $0x140] sm:$0xf]  ;;  %v5564_v33 = vld [vmem:[#allocation2 + $0x130] sm:$0xf] }
 0x144   : > { %v532_v35 = vpop.f32.mrf.mxu0  ;;  %v624_v16 = vpack.c.bf16 %v564_v23, %v584_v34  ;;  %v5569_v26 = vor.u32 %v6525_v22, %v5568_v20 }
 0x145   : > { %v533_v36 = vadd.f32 %v532_v35, %v7235_v52  ;;  %v6524_v35 = vld [vmem:[#allocation2 + $0x134] sm:$0xf0] }
 0x146   : > { %5531 = vmatmul.msk.bf16.gmra.mxu2 %vm9691_vm14, %v624_v16  ;;  %1501 = vmatpush.bf16.msrb.mxu0 %v5569_v26  ;;  %v5582_v16 = vld [vmem:[#allocation2 + $0xf0] sm:$0xf] }
 0x147   : > { %v546_v37 = vmax.f32 %v533_v36, 0.0  ;;  %v6520_v36 = vld [vmem:[#allocation2 + $0xf4] sm:$0xf0] }
 0x149   : > { %v597_v40 = vrot.slane %v546_v37, 1  ;;  %v565_v42 = vrot.slane %v546_v37, 7 }
 0x14b   : > { %v598_v41 = vsel %vm9690_vm0, %v595_v39, %v597_v40  ;;  %v566_v49 = vsel %vm9688_vm5, %v563_v32, %v565_v42  ;;  %v5600_v32 = vld [vmem:[#allocation2 + $0x170] sm:$0xf]  ;;  %v5583_v39 = vor.u32 %v6520_v36, %v5582_v16  ;;  %v6522_v16 = vld [vmem:[#allocation2 + $0x114] sm:$0xf0] }
 0x14c   : > { %v534_v43 = vpop.f32.mrf.mxu0  ;;  %v617_v46 = vsel %vm7122_vm2, 0.0, %v598_v41  ;;  %v586_v53 = vsel %vm7175_vm7, 0.0, %v566_v49  ;;  %v5601_v34 = vor.u32 %v6528_v44, %v5600_v32  ;;  %v5556_v44 = vld [vmem:[#allocation2 + $0x110] sm:$0xf]  ;;  %vm9695_vm2 = vcmask 1044484  }
 0x14d   : > { %v535_v28 = vadd.f32 %v534_v43, %v7235_v52  ;;  %v779_v47 = vpack.c.bf16 %v617_v46, %v596_v45  ;;  %1551 = vmatpush.bf16.msrb.mxu1 %v5583_v39  ;;  %vm9689_vm7 = vcmask 1041409  }
 0x14e   : > { %1610 = vmatpush.bf16.msrb.mxu2 %v5601_v34 }
 0x14f   : > { %v547_v48 = vmax.f32 %v535_v28, 0.0  ;;  %5551 = vmatmul.msk.bf16.gmra.mxu3 %vm9691_vm14, %v779_v47  ;;  %v5578_v47 = vld [vmem:[#allocation2 + $0xe0] sm:$0xf] }
 0x151   : > { %v567_v50 = vrot.slane %v547_v48, 7  ;;  %v637_v30 = vpack.c.bf16 %v547_v48, %v546_v37  ;;  %v599_v56 = vrot.slane %v547_v48, 1  ;;  %v5565_v37 = vor.u32 %v6524_v35, %v5564_v33  ;;  %v6519_v48 = vld [vmem:[#allocation2 + $0xe4] sm:$0xf0] }
 0x153   : > { %5512 = vmatmul.msk.bf16.gmra.mxu1 %vm9691_vm14, %v637_v30  ;;  %v568_v51 = vsel %vm9688_vm5, %v565_v42, %v567_v50  ;;  %v600_v61 = vsel %vm9690_vm0, %v597_v40, %v599_v56  ;;  %1502 = vmatpush.bf16.msrb.mxu0 %v5565_v37  ;;  %v7289_v42 = vld [vmem:[#allocation5 + $0x1] ss:$0 sm:$0xff] }
 0x154   : > { %v537_v25 = vpop.f32.mrf.mxu0  ;;  %v625_v24 = vpack.c.bf16 %v568_v51, %v586_v53 }
 0x155   : > { %v538_v54 = vadd.f32 %v537_v25, %v7235_v52 }
 0x156   : > { %5532 = vmatmul.msk.bf16.gmra.mxu2 %vm9691_vm14, %v625_v24 }
 0x157   : > { %v548_v55 = vmax.f32 %v538_v54, 0.0  ;;  %v5596_v54 = vld [vmem:[#allocation2 + $0x160] sm:$0xf] }
 0x159   : > { %v601_v57 = vrot.slane %v548_v55, 1  ;;  %v569_v59 = vrot.slane %v548_v55, 7 }
 0x15b   : > { %v602_v58 = vsel %vm9690_vm0, %v599_v56, %v601_v57  ;;  %v570_v8 = vsel %vm9688_vm5, %v567_v50, %v569_v59  ;;  %v5579_v50 = vor.u32 %v6519_v48, %v5578_v47 }
 0x15c   : > { %v539_v60 = vpop.f32.mrf.mxu0  ;;  %v619_v4 = vsel %vm7145_vm3, 0.0, %v602_v58  ;;  %v588_v13 = vsel %vm7222_vm13, 0.0, %v570_v8  ;;  %v5560_v58 = vld [vmem:[#allocation2 + $0x120] sm:$0xf]  ;;  %vm9694_vm3 = vcmask 1045509  }
 0x15d   : > { %v540_v63 = vadd.f32 %v539_v60, %v7235_v52  ;;  %v780_v5 = vpack.c.bf16 %v619_v4, %v600_v61  ;;  %1552 = vmatpush.bf16.msrb.mxu1 %v5579_v50 }
 0x15f   : > { %v549_v6 = vmax.f32 %v540_v63, 0.0  ;;  %5552 = vmatmul.msk.bf16.gmra.mxu3 %vm9691_vm14, %v780_v5  ;;  %v5574_v63 = vld [vmem:[#allocation2 + $0xd0] sm:$0xf]  ;;  %v6518_v5 = vld [vmem:[#allocation2 + $0xd4] sm:$0xf0] }
 0x160   : > { %v5575_v8 = vor.u32 %v6518_v5, %v5574_v63 }
 0x161   : > { %v571_v62 = vrot.slane %v549_v6, 7  ;;  %v638_v10 = vpack.c.bf16 %v549_v6, %v548_v55  ;;  %v603_v11 = vrot.slane %v549_v6, 1 }
 0x162   : > { %1553 = vmatpush.bf16.msrb.mxu1 %v5575_v8 }
 0x163   : > { %5513 = vmatmul.msk.bf16.gmra.mxu1 %vm9691_vm14, %v638_v10  ;;  %v572_v12 = vsel %vm9688_vm5, %v569_v59, %v571_v62  ;;  %v613_v52 = vsel %vm9690_vm0, %v603_v11, 0.0  ;;  %v604_v14 = vsel %vm9690_vm0, %v601_v57, %v603_v11  ;;  %v6527_v57 = vld [vmem:[#allocation2 + $0x164] sm:$0xf0] }
 0x164   : > { %v626_v38 = vpack.c.bf16 %v572_v12, %v588_v13  ;;  %v621_v15 = vsel %vm7155_vm4, 0.0, %v613_v52  ;;  %v6523_v59 = vld [vmem:[#allocation2 + $0x124] sm:$0xf0]  ;;  %v5597_v61 = vor.u32 %v6527_v57, %v5596_v54  ;;  %vm9693_vm4 = vcmask 1046534  }
 0x165   : > { %v781_v17 = vpack.c.bf16 %v621_v15, %v604_v14  ;;  %v5561_v4 = vor.u32 %v6523_v59, %v5560_v58 }
 0x166   : > { %5533 = vmatmul.msk.bf16.gmra.mxu2 %vm9691_vm14, %v626_v38 }
 0x167   : > { %1611 = vmatpush.bf16.msrb.mxu2 %v5597_v61  ;;  %1503 = vmatpush.bf16.msrb.mxu0 %v5561_v4  ;;  %v6526_v4 = vld [vmem:[#allocation2 + $0x154] sm:$0xf0] }
 0x16f   : > { %5553 = vmatmul.msk.bf16.gmra.mxu3 %vm9691_vm14, %v781_v17 }
 0x1b0   : > { %v693_v7 = vpop.f32.mrf.mxu1 }
 0x1b8   : > { %v695_v23 = vpop.f32.mrf.mxu1 }
 0x1b9   : > { %v758_v31 = vpop.f32.mrf.mxu2 }
 0x1ba   : > { %v759_v40 = vadd.f32 %v758_v31, %v693_v7 }
 0x1c0   : > { %v698_v46 = vpop.f32.mrf.mxu1 }
 0x1c1   : > { %v760_v41 = vpop.f32.mrf.mxu2 }
 0x1c2   : > { %v835_v43 = vpop.f32.mrf.mxu3  ;;  %v761_v30 = vadd.f32 %v760_v41, %v695_v23 }
 0x1c3   : > { %v855_v45 = vadd.f32 %v835_v43, %v759_v40  ;;  %v5557_v40 = vor.u32 %v6522_v16, %v5556_v44 }
 0x1c5   : > { %v863_v28 = vadd.f32 %v855_v45, %v7289_v42  ;;  %1504 = vmatpush.bf16.msrb.mxu0 %v5557_v40 }
 0x1c7   : > { %v7292_v49 = vmax.f32 %v863_v28, 0.0 }
 0x1c8   : > { %v700_v13 = vpop.f32.mrf.mxu1 }
 0x1c9   : > { %9844 = vst [vmem:[#allocation12_spill] sm:$0xff] %v7292_v49  ;;  %v7295_v51 = vrot.slane %v7292_v49, 2  ;;  %v7298_v53 = vrot.slane %v7292_v49, 4  ;;  %v7301_v25 = vrot.slane %v7292_v49, 6  ;;  %v763_v24 = vpop.f32.mrf.mxu2  ;;  %v935_v55 = vrot.slane %v7292_v49, 7 }
 0x1ca   : > { %v837_v56 = vpop.f32.mrf.mxu3  ;;  %v764_v17 = vadd.f32 %v763_v24, %v698_v46 }
 0x1cb   : > { %9845 = vst [vmem:[#allocation13_spill] sm:$0xff] %v7295_v51  ;;  %v856_v60 = vadd.f32 %v837_v56, %v761_v30  ;;  %v7304_v6 = vrot.slane %v935_v55, 2  ;;  %v937_v62 = vrot.slane %v7295_v51, 7  ;;  %v939_v10 = vrot.slane %v7298_v53, 7  ;;  %v5592_v56 = vld [vmem:[#allocation2 + $0x150] sm:$0xf] }
 0x1cc   : > { %9846 = vst [vmem:[#allocation14_spill] sm:$0xff] %v7298_v53  ;;  %v941_v11 = vrot.slane %v7301_v25, 7 }
 0x1cd   : > { %9847 = vst [vmem:[#allocation15_spill] sm:$0xff] %v7301_v25  ;;  %v864_v12 = vadd.f32 %v856_v60, %v7289_v42  ;;  %v7310_v38 = vrot.slane %v937_v62, 2  ;;  %v7312_v52 = vrot.slane %v939_v10, 2  ;;  %v7316_v14 = vmax.f32 %v7292_v49, %v7304_v6  ;;  %v6595_v49 = vld [vmem:[#allocation2 + $0x454] sm:$0xf0] }
 0x1ce   : > { %9848 = vst [vmem:[#allocation16_spill] sm:$0xff] %v7304_v6  ;;  %v7320_v18 = vrot.slane %v941_v11, 2  ;;  %v9580_v10 = vand.u32 7, %v7071_v1  ;;  %v10006_v6 = vand.u32 3, %v7071_v1 }
 0x1cf   : > { %9849 = vst [vmem:[#allocation17_spill] sm:$0xff] %v7310_v38  ;;  %v7318_v15 = vmax.f32 %v864_v12, 0.0  ;;  %v7324_v19 = vmax.f32 %v7295_v51, %v7310_v38  ;;  %v7328_v20 = vmax.f32 %v7298_v53, %v7312_v52  ;;  %v1126_v7 = vperm.slane %v7316_v14, 0 }
 0x1d0   : > { %9850 = vst [vmem:[#allocation18_spill] sm:$0xff] %v7312_v52  ;;  %v7350_v37 = vmax.f32 %v7301_v25, %v7320_v18  ;;  %v703_v50 = vpop.f32.mrf.mxu1  ;;  %vm7438_vm8 = vcmp.eq.s32.totalorder %v9580_v10, 0 }
 0x1d1   : > { %9851 = vst [vmem:[#allocation19_spill] sm:$0xff] %v7318_v15  ;;  %v7331_v21 = vrot.slane %v7318_v15, 6  ;;  %v765_v22 = vpop.f32.mrf.mxu2  ;;  %v7334_v0 = vrot.slane %v7318_v15, 2  ;;  %v7337_v27 = vrot.slane %v7318_v15, 4  ;;  %v943_v26 = vrot.slane %v7318_v15, 7 }
 0x1d2   : > { %9852 = vst [vmem:[#allocation20_spill] sm:$0xff] %v7320_v18  ;;  %v840_v29 = vpop.f32.mrf.mxu3  ;;  %v9585_v31 = vperm.slane %v7324_v19, 0  ;;  %v9584_v32 = vperm.slane %v7328_v20, 0  ;;  %v766_v30 = vadd.f32 %v765_v22, %v700_v13  ;;  %v9583_v54 = vperm.slane %v7350_v37, 0 }
 0x1d3   : > { %9853 = vst [vmem:[#allocation21_spill] sm:$0xff] %v7331_v21  ;;  %v857_v33 = vadd.f32 %v840_v29, %v764_v17  ;;  %v7343_v23 = vrot.slane %v943_v26, 2  ;;  %v945_v34 = vrot.slane %v7334_v0, 7  ;;  %v947_v35 = vrot.slane %v7337_v27, 7 }
 0x1d4   : > { %9854 = vst [vmem:[#allocation22_spill] sm:$0xff] %v7334_v0  ;;  %v949_v36 = vrot.slane %v7331_v21, 7  ;;  %v1158_v39 = vsel %vm9697_vm15, %v9585_v31, %v1126_v7  ;;  %v5593_v7 = vor.u32 %v6526_v4, %v5592_v56  ;;  %v9869_v4 = vmov 0 }
 0x1d5   : > { %9855 = vst [vmem:[#allocation23_spill] sm:$0xff] %v7337_v27  ;;  %v865_v41 = vadd.f32 %v857_v33, %v7289_v42  ;;  %v7356_v43 = vrot.slane %v945_v34, 2  ;;  %v7360_v45 = vmax.f32 %v7318_v15, %v7343_v23  ;;  %v7362_v46 = vrot.slane %v947_v35, 2 }
 0x1d6   : > { %9856 = vst [vmem:[#allocation24_spill] sm:$0xff] %v7343_v23  ;;  %v7364_v28 = vrot.slane %v949_v36, 2  ;;  %v1160_v48 = vsel %vm9696_vm1, %v9584_v32, %v1158_v39  ;;  %v9587_v36 = vand.u32 7, %v7074_v2  ;;  %1612 = vmatpush.bf16.msrb.mxu2 %v5593_v7  ;;  %v9870_v4 = vsel %vm7438_vm8, 4294967295, %v9869_v4 }
 0x1d7   : > { %9857 = vst [vmem:[#allocation25_spill] sm:$0xff] %v7356_v43  ;;  %v7366_v47 = vmax.f32 %v865_v41, 0.0  ;;  %v7373_v24 = vmax.f32 %v7334_v0, %v7356_v43  ;;  %v9582_v55 = vperm.slane %v7360_v45, 0  ;;  %v7389_v5 = vmax.f32 %v7337_v27, %v7362_v46 }
 0x1d8   : > { %9858 = vst [vmem:[#allocation26_spill] sm:$0xff] %v7362_v46  ;;  %v7393_v8 = vmax.f32 %v7331_v21, %v7364_v28  ;;  %v1162_v62 = vsel %vm9695_vm2, %v9583_v54, %v1160_v48  ;;  %vm7460_vm9 = vcmp.eq.s32.totalorder %v9587_v36, 0 }
 0x1d9   : > { %9859 = vst [vmem:[#allocation27_spill] sm:$0xff] %v7364_v28  ;;  %v7378_v57 = vrot.slane %v7366_v47, 2  ;;  %v7381_v58 = vrot.slane %v7366_v47, 4  ;;  %v7384_v59 = vrot.slane %v7366_v47, 6  ;;  %v768_v60 = vpop.f32.mrf.mxu2  ;;  %v951_v61 = vrot.slane %v7366_v47, 7 }
 0x1da   : > { %9860 = vst [vmem:[#allocation28_spill] sm:$0xff] %v7366_v47  ;;  %v842_v63 = vpop.f32.mrf.mxu3  ;;  %v9581_v26 = vperm.slane %v7373_v24, 0  ;;  %v1164_v29 = vsel %vm9694_vm3, %v9582_v55, %v1162_v62  ;;  %v9588_v56 = vperm.slane %v7393_v8, 0  ;;  %v769_v7 = vadd.f32 %v768_v60, %v703_v50 }
 0x1db   : > { %9861 = vst [vmem:[#allocation29_spill] sm:$0xff] %v7378_v57  ;;  %v858_v11 = vadd.f32 %v842_v63, %v766_v30  ;;  %v7399_v12 = vrot.slane %v951_v61, 2  ;;  %v953_v13 = vrot.slane %v7378_v57, 7  ;;  %v955_v17 = vrot.slane %v7381_v58, 7 }
 0x1dc   : > { %9862 = vst [vmem:[#allocation30_spill] sm:$0xff] %v7381_v58  ;;  %v957_v22 = vrot.slane %v7384_v59, 7  ;;  %v9589_v30 = vperm.slane %v7389_v5, 0  ;;  %v1166_v61 = vsel %vm9693_vm4, %v9581_v26, %v1164_v29  ;;  %v705_v29 = vpop.f32.mrf.mxu1  ;;  %v9874_v55 = vmov 0 }
 0x1dd   : > { %9863 = vst [vmem:[#allocation31_spill] sm:$0xff] %v7384_v59  ;;  %v866_v44 = vadd.f32 %v858_v11, %v7289_v42  ;;  %v7409_v33 = vrot.slane %v953_v13, 2  ;;  %v7411_v34 = vrot.slane %v955_v17, 2  ;;  %v7415_v35 = vmax.f32 %v7366_v47, %v7399_v12 }
 0x1de   : > { %9864 = vst [vmem:[#allocation32_spill] sm:$0xff] %v7399_v12  ;;  %v7417_v16 = vrot.slane %v957_v22, 2  ;;  %v9875_v55 = vsel %vm7460_vm9, 4294967295, %v9874_v55 }
 0x1df   : > { %9865 = vst [vmem:[#allocation33_spill] sm:$0xff] %v7409_v33  ;;  %v7420_v39 = vmax.f32 %v866_v44, 0.0  ;;  %v7424_v40 = vmax.f32 %v7378_v57, %v7409_v33  ;;  %v7428_v41 = vmax.f32 %v7381_v58, %v7411_v34  ;;  %v9586_v48 = vperm.slane %v7415_v35, 0 }
 0x1e0   : > { %9866 = vst [vmem:[#allocation34_spill] sm:$0xff] %v7411_v34  ;;  %v7470_v60 = vmax.f32 %v7384_v59, %v7417_v16  ;;  %v1313_v57 = vpack.c.bf16 %v7415_v35, %v7415_v35 }
 0x1e1   : > { %9867 = vst [vmem:[#allocation35_spill] sm:$0xff] %v7417_v16  ;;  %v770_v62 = vpop.f32.mrf.mxu2  ;;  %v7445_v11 = vrot.slane %v7420_v39, 2  ;;  %v7448_v13 = vrot.slane %v7420_v39, 4  ;;  %v959_v17 = vrot.slane %v7420_v39, 7  ;;  %v9590_v22 = vperm.slane %v7424_v40, 0 }
 0x1e2   : > { %9868 = vst [vmem:[#allocation36_spill] sm:$0xff] %v7420_v39  ;;  %v845_v44 = vpop.f32.mrf.mxu3  ;;  %v1170_v26 = vsel %vm9689_vm7, %v9586_v48, %v9588_v56  ;;  %v1168_v48 = vsel %vm9692_vm6, %v9589_v30, %v1166_v61  ;;  %v9881_v61 = vperm.slane %v7428_v41, 0  ;;  %v1307_v30 = vpack.c.bf16 %v7328_v20, %v7328_v20 }
 0x1e3   : > { %9871 = vst [vmem:[#allocation37_spill] sm:$0xff] %v9870_v4  ;;  %v7464_v54 = vrot.slane %v959_v17, 2  ;;  %v961_v32 = vrot.slane %v7445_v11, 7  ;;  %v963_v50 = vrot.slane %v7448_v13, 7  ;;  %v859_v31 = vadd.f32 %v845_v44, %v769_v7 }
 0x1e4   : > { %9872 = vst [vmem:[#allocation38_spill] sm:$0xff] %v7445_v11  ;;  %v1171_v36 = vsel %vm9697_vm15, %v9590_v22, %v1170_v26  ;;  %v7479_v17 = vrot.slane %v7420_v39, 6  ;;  %v1306_v7 = vpack.c.bf16 %v7324_v19, %v7324_v19  ;;  %v9611_v22 = vperm.slane %v7470_v60, 0 }
 0x1e5   : > { %9873 = vst [vmem:[#allocation39_spill] sm:$0xff] %v7448_v13  ;;  %v7481_v56 = vrot.slane %v961_v32, 2  ;;  %v7483_v63 = vrot.slane %v963_v50, 2  ;;  %v7487_v10 = vmax.f32 %v7420_v39, %v7464_v54  ;;  %v1172_v44 = vsel %vm9696_vm1, %v9881_v61, %v1171_v36 }
 0x1e6   : > { %9876 = vst [vmem:[#allocation40_spill] sm:$0xff] %v9875_v55  ;;  %v965_v26 = vrot.slane %v7479_v17, 7  ;;  %v1308_v32 = vpack.c.bf16 %v7350_v37, %v7350_v37  ;;  %v1195_v59 = vsel %vm9688_vm5, 0.0, %v1168_v48  ;;  %v1309_v16 = vpack.c.bf16 %v7360_v45, %v7360_v45 }
 0x1e7   : > { %9877 = vst [vmem:[#allocation41_spill] sm:$0xff] %v7464_v54  ;;  %v7501_v50 = vmax.f32 %v7445_v11, %v7481_v56  ;;  %v867_v36 = vadd.f32 %v859_v31, %v7289_v42  ;;  %v7510_v61 = vmax.f32 %v7448_v13, %v7483_v63  ;;  %v9616_v39 = vperm.slane %v7487_v10, 0 }
 0x1e8   : > { %9878 = vst [vmem:[#allocation42_spill] sm:$0xff] %v7479_v17  ;;  %v7513_v54 = vrot.slane %v965_v26, 2  ;;  %v771_v58 = vadd.f32 %v770_v62, %v705_v29  ;;  %v1173_v48 = vsel %vm9695_vm2, %v9611_v22, %v1172_v44  ;;  %v1311_v62 = vpack.c.bf16 %v7389_v5, %v7389_v5 }
 0x1e9   : > { %9879 = vst [vmem:[#allocation43_spill] sm:$0xff] %v7481_v56  ;;  %v9617_v11 = vperm.slane %v7501_v50, 0  ;;  %v1310_v56 = vpack.c.bf16 %v7373_v24, %v7373_v24  ;;  %v773_v34 = vpop.f32.mrf.mxu2  ;;  %v1174_v13 = vsel %vm9694_vm3, %v9616_v39, %v1173_v48  ;;  %v1312_v29 = vpack.c.bf16 %v7393_v8, %v7393_v8 }
 0x1ea   : > { %9880 = vst [vmem:[#allocation44_spill] sm:$0xff] %v7483_v63  ;;  %v847_v31 = vpop.f32.mrf.mxu3  ;;  %v1248_v22 = vsel %vm7438_vm8, 0.0, %v1195_v59  ;;  %v708_v63 = vpop.f32.mrf.mxu1  ;;  %v7536_v33 = vmax.f32 %v867_v36, 0.0  ;;  %v9884_v48 = vperm.slane %v7510_v61, 0  ;;  %v1316_v36 = vpack.c.bf16 %v7470_v60, %v7470_v60 }
 0x1eb   : > { %9882 = vst [vmem:[#allocation45_spill] sm:$0xff] %v7513_v54  ;;  %v860_v26 = vadd.f32 %v847_v31, %v771_v58  ;;  %v1175_v44 = vsel %vm9693_vm4, %v9617_v11, %v1174_v13  ;;  %v7543_v58 = vmax.f32 %v7479_v17, %v7513_v54  ;;  %v1314_v13 = vpack.c.bf16 %v7424_v40, %v7424_v40 }
 0x1ec   : > { %9883 = vst [vmem:[#allocation46_spill] sm:$0xff] %v7536_v33  ;;  %v1176_v39 = vsel %vm9692_vm6, %v9884_v48, %v1175_v44  ;;  %v774_v31 = vadd.f32 %v773_v34, %v708_v63  ;;  %v1315_v11 = vpack.c.bf16 %v7428_v41, %v7428_v41  ;;  %v1317_v44 = vpack.c.bf16 %v7487_v10, %v7487_v10 }
 0x1ed   : > { %v1249_v59 = vsel %vm7460_vm9, 0.0, %v1176_v39  ;;  %v1318_v48 = vpack.c.bf16 %v7501_v50, %v7501_v50  ;;  %v1378_v17 = vunpack.c.l.b16 %v1306_v7  ;;  %v868_v54 = vadd.f32 %v860_v26, %v7289_v42 }
 0x1ee   : > { %v1295_v47 = vpack.c.bf16 %v1249_v59, %v1248_v22  ;;  %v1319_v34 = vpack.c.bf16 %v7510_v61, %v7510_v61  ;;  %v1379_v39 = vunpack.c.l.b16 %v1307_v30  ;;  %v1381_v63 = vunpack.c.l.b16 %v1309_v16 }
 0x1ef   : > { %v1320_v12 = vpack.c.bf16 %v7543_v58, %v7543_v58  ;;  %v9885_v22 = vpack.c.bf16 %v7316_v14, %v7316_v14  ;;  %v1380_v21 = vunpack.c.l.b16 %v1308_v32  ;;  %v1382_v28 = vunpack.c.l.b16 %v1310_v56 }
 0x1f0   : > { %5588 = vmatmul.msk.bf16.vlgmr.msrb.gmra.mxu1 %vm9691_vm14, %v1295_v47  ;;  %v1383_v25 = vunpack.c.l.b16 %v1311_v62  ;;  %v1384_v7 = vunpack.c.l.b16 %v1312_v29  ;;  %v1386_v18 = vunpack.c.l.b16 %v1314_v13  ;;  %v1387_v26 = vunpack.c.l.b16 %v1315_v11 }
 0x1f1   : > { %v1377_v59 = vunpack.c.l.b16 %v9885_v22  ;;  %v1385_v46 = vunpack.c.l.b16 %v1313_v57  ;;  %v1388_v15 = vunpack.c.l.b16 %v1316_v36  ;;  %v1389_v30 = vunpack.c.l.b16 %v1317_v44  ;;  %v775_v11 = vpop.f32.mrf.mxu2 }
 0x1f2   : > { %v850_v27 = vpop.f32.mrf.mxu3  ;;  %v1409_v16 = vrot.slane %v1378_v17, 7  ;;  %v1390_v47 = vunpack.c.l.b16 %v1318_v48  ;;  %v1411_v53 = vrot.slane %v1379_v39, 6  ;;  %v1415_v52 = vrot.slane %v1381_v63, 4 }
 0x1f3   : > { %v861_v23 = vadd.f32 %v850_v27, %v774_v31  ;;  %v1391_v51 = vunpack.c.l.b16 %v1319_v34  ;;  %v1413_v14 = vrot.slane %v1380_v21, 5  ;;  %v1417_v22 = vrot.slane %v1382_v28, 3  ;;  %v710_v21 = vpop.f32.mrf.mxu1 }
 0x1f4   : > { %v1410_v38 = vsel %vm9689_vm7, %v1409_v16, %v1377_v59  ;;  %v1392_v32 = vunpack.c.l.b16 %v1320_v12  ;;  %v1423_v62 = vrot.slane %v1386_v18, 7  ;;  %v1425_v29 = vrot.slane %v1387_v26, 6 }
 0x1f5   : > { %v1412_v56 = vsel %vm9697_vm15, %v1411_v53, %v1410_v38  ;;  %v869_v57 = vadd.f32 %v861_v23, %v7289_v42  ;;  %v1419_v17 = vrot.slane %v1383_v25, 2  ;;  %v1429_v27 = vrot.slane %v1389_v30, 4 }
 0x1f6   : > { %v1414_v13 = vsel %vm9696_vm1, %v1413_v14, %v1412_v56  ;;  %v1424_v36 = vsel %vm9689_vm7, %v1423_v62, %v1385_v46  ;;  %v1427_v44 = vrot.slane %v1388_v15, 5  ;;  %v1431_v48 = vrot.slane %v1390_v47, 3 }
 0x1f7   : > { %v1416_v31 = vsel %vm9695_vm2, %v1415_v52, %v1414_v13  ;;  %v1426_v53 = vsel %vm9697_vm15, %v1425_v29, %v1424_v36  ;;  %v1433_v38 = vrot.slane %v1391_v51, 2  ;;  %v967_v18 = vrot.slane %v7536_v33, 7 }
 0x1f8   : > { %v1418_v28 = vsel %vm9694_vm3, %v1417_v22, %v1416_v31  ;;  %v7575_v12 = vmax.f32 %v868_v54, 0.0  ;;  %v776_v23 = vadd.f32 %v775_v11, %v710_v21  ;;  %v1421_v34 = vrot.slane %v1384_v7, 1 }
 0x1f9   : > { %v1428_v25 = vsel %vm9696_vm1, %v1427_v44, %v1426_v53  ;;  %v1420_v52 = vsel %vm9693_vm4, %v1419_v17, %v1418_v28  ;;  %v7580_v15 = vrot.slane %v967_v18, 2  ;;  %v9888_v39 = vperm.slane %v7324_v19, 0 }
 0x1fa   : > { %9886 = vst [vmem:[#allocation47_spill] sm:$0xff] %v7575_v12  ;;  %v1430_v46 = vsel %vm9695_vm2, %v1429_v27, %v1428_v25  ;;  %v9889_v63 = vperm.slane %v7328_v20, 0  ;;  %v1435_v54 = vrot.slane %v1392_v32, 1  ;;  %v9890_v26 = vperm.slane %v7350_v37, 0  ;;  %v852_v32 = vpop.f32.mrf.mxu3 }
 0x1fb   : > { %9887 = vst [vmem:[#allocation48_spill] sm:$0xff] %v7580_v15  ;;  %v1432_v59 = vsel %vm9694_vm3, %v1431_v48, %v1430_v46  ;;  %v9891_v30 = vperm.slane %v7424_v40, 0  ;;  %v9892_v16 = vperm.slane %v7428_v41, 0  ;;  %v7596_v14 = vmax.f32 %v869_v57, 0.0 }
 0x1fc   : > { %v1254_v51 = vsel %vm9689_vm7, %v9889_v63, %v9888_v39  ;;  %v1434_v19 = vsel %vm9693_vm4, %v1433_v38, %v1432_v59  ;;  %v7601_v20 = vmax.f32 %v7536_v33, %v7580_v15  ;;  %v9894_v22 = vperm.slane %v7360_v45, 0  ;;  %v5896_v15 = vld [vmem:[#allocation2 + $0x450] sm:$0xf] }
 0x1fd   : > { %v1255_v7 = vsel %vm9697_vm15, %v9890_v26, %v1254_v51  ;;  %v1261_v47 = vsel %vm9689_vm7, %v9892_v16, %v9891_v30  ;;  %9893 = vst [vmem:[#allocation49_spill] sm:$0xff] %v7596_v14  ;;  %v1422_v56 = vsel %vm9692_vm6, %v1421_v34, %v1420_v52  ;;  %v1436_v40 = vsel %vm9692_vm6, %v1435_v54, %v1434_v19 }
 0x1fe   : > { %v1256_v37 = vsel %vm9696_vm1, %v9894_v22, %v1255_v7  ;;  %v9895_v41 = vperm.slane %v7373_v24, 0  ;;  %v9896_v29 = vperm.slane %v7470_v60, 0  ;;  %v1465_v57 = vpack.c.b16 %v1436_v40, %v1422_v56 }
 0x1ff   : > { %v1142_v13 = vperm.slane %v7601_v20, 0  ;;  %v9897_v45 = vperm.slane %v7389_v5, 0  ;;  %v9898_v27 = vperm.slane %v7487_v10, 0  ;;  %v1141_v36 = vperm.slane %v7543_v58, 0 }
 0x200   : > { %v1257_v62 = vsel %vm9695_vm2, %v9895_v41, %v1256_v37  ;;  %v1262_v11 = vsel %vm9697_vm15, %v9896_v29, %v1261_v47  ;;  %v9899_v24 = vperm.slane %v7393_v8, 0  ;;  %v9900_v60 = vperm.slane %v7501_v50, 0  ;;  %5570 = vmatmul.msk.bf16.vlgmr.msrb.gmra.mxu0 %vm9691_vm14, %v1465_v57 }
 0x201   : > { %v1258_v17 = vsel %vm9694_vm3, %v9897_v45, %v1257_v62  ;;  %v1263_v31 = vsel %vm9696_vm1, %v9898_v27, %v1262_v11  ;;  %v862_v21 = vadd.f32 %v852_v32, %v776_v23  ;;  %v9901_v5 = vperm.slane %v7415_v35, 0 }
 0x202   : > { %v1259_v44 = vsel %vm9693_vm4, %v9899_v24, %v1258_v17  ;;  %v1264_v48 = vsel %vm9695_vm2, %v9900_v60, %v1263_v31  ;;  %v9902_v10 = vperm.slane %v7510_v61, 0  ;;  %v9903_v58 = vand.u32 7, %v7071_v1  ;;  %v5882_v1 = vld [vmem:[#allocation2 + $0x438] sm:$0xf0] }
 0x203   : > { %v1260_v28 = vsel %vm9692_vm6, %v9901_v5, %v1259_v44  ;;  %v9904_v8 = vmov 0  ;;  %v9907_v50 = vand.u32 7, %v7074_v2  ;;  %v9908_v38 = vmov 0 }
 0x204   : > { %v1265_v53 = vsel %vm9694_vm3, %v9902_v10, %v1264_v48  ;;  %vm7637_vm10 = vcmp.eq.s32.totalorder %v9903_v58, 7  ;;  %v7648_v35 = vrot.slane %v7536_v33, 2  ;;  %v870_v61 = vadd.f32 %v862_v21, %v7289_v42 }
 0x205   : > { %v9905_v8 = vsel %vm7637_vm10, 4294967295, %v9904_v8  ;;  %vm7643_vm11 = vcmp.eq.s32.totalorder %v9907_v50, 7  ;;  %v1266_v18 = vsel %vm9693_vm4, %v1141_v36, %v1265_v53  ;;  %v7653_v23 = vrot.slane %v7536_v33, 4 }
 0x206   : > { %9906 = vst [vmem:[#allocation50_spill] sm:$0xff] %v9905_v8  ;;  %v9909_v38 = vsel %vm7643_vm11, 4294967295, %v9908_v38  ;;  %v7656_v34 = vrot.slane %v7575_v12, 6  ;;  %v1267_v25 = vsel %vm9692_vm6, %v1142_v13, %v1266_v18  ;;  %v7662_v52 = vrot.slane %v7536_v33, 6 }
 0x207   : > { %9910 = vst [vmem:[#allocation51_spill] sm:$0xff] %v9909_v38  ;;  %v7665_v46 = vrot.slane %v7575_v12, 2  ;;  %v1290_v39 = vsel %vm7637_vm10, 0.0, %v1260_v28  ;;  %v1291_v42 = vsel %vm7643_vm11, 0.0, %v1267_v25  ;;  %v7671_v63 = vmax.f32 %v870_v61, 0.0 }
 0x208   : > { %9911 = vst [vmem:[#allocation52_spill] sm:$0xff] %v7648_v35  ;;  %v7674_v51 = vrot.slane %v7575_v12, 4  ;;  %v7677_v59 = vrot.slane %v7596_v14, 2  ;;  %v1565_v54 = vpack.c.bf16 %v1291_v42, %v1290_v39  ;;  %v7680_v26 = vrot.slane %v7596_v14, 4  ;;  %v6597_v38 = vld [vmem:[#allocation2 + $0x464] sm:$0xf0] }
 0x209   : > { %9912 = vst [vmem:[#allocation53_spill] sm:$0xff] %v7653_v23  ;;  %v7683_v7 = vrot.slane %v7596_v14, 6  ;;  %v7686_v30 = vrot.slane %v7671_v63, 2  ;;  %v969_v16 = vrot.slane %v7648_v35, 7  ;;  %v971_v47 = vrot.slane %v7653_v23, 7 }
 0x20a   : > { %9913 = vst [vmem:[#allocation54_spill] sm:$0xff] %v7656_v34  ;;  %5606 = vmatmul.msk.bf16.vlgmr.msrb.gmra.mxu2 %vm9691_vm14, %v1565_v54  ;;  %v7692_v19 = vrot.slane %v7671_v63, 4  ;;  %v973_v22 = vrot.slane %v7662_v52, 7  ;;  %v975_v37 = vrot.slane %v7575_v12, 7  ;;  %v977_v32 = vrot.slane %v7665_v46, 7 }
 0x20b   : > { %9914 = vst [vmem:[#allocation55_spill] sm:$0xff] %v7662_v52  ;;  %v979_v56 = vrot.slane %v7674_v51, 7  ;;  %v981_v40 = vrot.slane %v7656_v34, 7  ;;  %v983_v41 = vrot.slane %v7596_v14, 7  ;;  %v985_v62 = vrot.slane %v7677_v59, 7 }
 0x20c   : > { %9915 = vst [vmem:[#allocation56_spill] sm:$0xff] %v7665_v46  ;;  %v987_v29 = vrot.slane %v7680_v26, 7  ;;  %v989_v11 = vrot.slane %v7683_v7, 7  ;;  %v7703_v57 = vrot.slane %v969_v16, 2  ;;  %v7705_v45 = vrot.slane %v971_v47, 2 }
 0x20d   : > { %9916 = vst [vmem:[#allocation57_spill] sm:$0xff] %v7671_v63  ;;  %v991_v17 = vrot.slane %v7671_v63, 7  ;;  %v993_v27 = vrot.slane %v7686_v30, 7  ;;  %v7709_v31 = vrot.slane %v973_v22, 2  ;;  %v7711_v24 = vrot.slane %v975_v37, 2 }
 0x20e   : > { %9917 = vst [vmem:[#allocation58_spill] sm:$0xff] %v7674_v51  ;;  %v7713_v44 = vrot.slane %v977_v32, 2  ;;  %v995_v60 = vrot.slane %v7692_v19, 7  ;;  %v7716_v48 = vrot.slane %v979_v56, 2  ;;  %v7718_v21 = vrot.slane %v981_v40, 2 }
 0x20f   : > { %9918 = vst [vmem:[#allocation59_spill] sm:$0xff] %v7677_v59  ;;  %v7720_v5 = vrot.slane %v983_v41, 2  ;;  %v7722_v28 = vrot.slane %v985_v62, 2  ;;  %v7724_v10 = vrot.slane %v987_v29, 2  ;;  %v7726_v53 = vrot.slane %v989_v11, 2 }
 0x210   : > { %9919 = vst [vmem:[#allocation60_spill] sm:$0xff] %v7680_v26  ;;  %v7728_v58 = vrot.slane %v991_v17, 2  ;;  %v7730_v50 = vrot.slane %v993_v27, 2  ;;  %v7733_v61 = vrot.slane %v995_v60, 2  ;;  %v7737_v25 = vmax.f32 %v7648_v35, %v7703_v57 }
 0x211   : > { %9920 = vst [vmem:[#allocation61_spill] sm:$0xff] %v7683_v7  ;;  %v7741_v39 = vmax.f32 %v7653_v23, %v7705_v45  ;;  %v1177_v42 = vsel %vm9689_vm7, %v1142_v13, %v1141_v36  ;;  %v7748_v54 = vmax.f32 %v7662_v52, %v7709_v31  ;;  %v7752_v16 = vmax.f32 %v7575_v12, %v7711_v24 }
 0x212   : > { %9921 = vst [vmem:[#allocation62_spill] sm:$0xff] %v7686_v30  ;;  %v7756_v47 = vmax.f32 %v7665_v46, %v7713_v44  ;;  %v7760_v22 = vmax.f32 %v7674_v51, %v7716_v48  ;;  %v7764_v37 = vmax.f32 %v7656_v34, %v7718_v21  ;;  %v7768_v13 = vmax.f32 %v7596_v14, %v7720_v5 }
 0x213   : > { %9922 = vst [vmem:[#allocation63_spill] sm:$0xff] %v7692_v19  ;;  %v7772_v36 = vmax.f32 %v7677_v59, %v7722_v28  ;;  %v7776_v32 = vmax.f32 %v7680_v26, %v7724_v10  ;;  %v7780_v56 = vmax.f32 %v7683_v7, %v7726_v53  ;;  %v7784_v40 = vmax.f32 %v7671_v63, %v7728_v58 }
 0x214   : > { %9923 = vst [vmem:[#allocation64_spill] sm:$0xff] %v7703_v57  ;;  %v7788_v41 = vmax.f32 %v7686_v30, %v7730_v50  ;;  %v7792_v62 = vmax.f32 %v7692_v19, %v7733_v61  ;;  %v1143_v29 = vperm.slane %v7737_v25, 0  ;;  %v1144_v11 = vperm.slane %v7741_v39, 0 }
 0x215   : > { %9924 = vst [vmem:[#allocation65_spill] sm:$0xff] %v7705_v45  ;;  %v1145_v17 = vperm.slane %v7748_v54, 0  ;;  %v1146_v27 = vperm.slane %v7752_v16, 0  ;;  %v1147_v60 = vperm.slane %v7756_v47, 0  ;;  %v1148_v18 = vperm.slane %v7760_v22, 0 }
 0x216   : > { %9925 = vst [vmem:[#allocation66_spill] sm:$0xff] %v7709_v31  ;;  %v1149_v34 = vperm.slane %v7764_v37, 0  ;;  %v1151_v51 = vperm.slane %v7772_v36, 0  ;;  %v1152_v19 = vperm.slane %v7776_v32, 0  ;;  %v1155_v30 = vperm.slane %v7788_v41, 0 }
 0x217   : > { %9926 = vst [vmem:[#allocation67_spill] sm:$0xff] %v7711_v24  ;;  %v1178_v46 = vsel %vm9697_vm15, %v1143_v29, %v1177_v42  ;;  %v9937_v59 = vand.u32 7, %v7077_v3  ;;  %v1268_v42 = vsel %vm9689_vm7, %v1144_v11, %v1143_v29  ;;  %v9742_v35 = vand.u32 3, %v7074_v2 }
 0x218   : > { %9927 = vst [vmem:[#allocation68_spill] sm:$0xff] %v7713_v44  ;;  %v1179_v44 = vsel %vm9696_vm1, %v1144_v11, %v1178_v46  ;;  %v1275_v11 = vsel %vm9689_vm7, %v1152_v19, %v1151_v51 }
 0x219   : > { %9928 = vst [vmem:[#allocation69_spill] sm:$0xff] %v7716_v48  ;;  %v1154_v48 = vperm.slane %v7784_v40, 0  ;;  %vm7814_vm12 = vcmp.eq.s32.totalorder %v9937_v59, 0  ;;  %v1269_v59 = vsel %vm9697_vm15, %v1145_v17, %v1268_v42 }
 0x21a   : > { %9929 = vst [vmem:[#allocation70_spill] sm:$0xff] %v7718_v21  ;;  %v1150_v21 = vperm.slane %v7768_v13, 0 }
 0x21b   : > { %9930 = vst [vmem:[#allocation71_spill] sm:$0xff] %v7720_v5 }
 0x21c   : > { %9931 = vst [vmem:[#allocation72_spill] sm:$0xff] %v7722_v28  ;;  %v1184_v7 = vsel %vm9689_vm7, %v1150_v21, %v1149_v34  ;;  %v9938_v28 = vmov 0 }
 0x21d   : > { %9932 = vst [vmem:[#allocation73_spill] sm:$0xff] %v7724_v10  ;;  %v9939_v28 = vsel %vm7814_vm12, 4294967295, %v9938_v28  ;;  %v1185_v26 = vsel %vm9697_vm15, %v1151_v51, %v1184_v7  ;;  %v7821_v10 = vrot.slane %v7671_v63, 6  ;;  %v1270_v63 = vsel %vm9696_vm1, %v1146_v27, %v1269_v59 }
 0x21e   : > { %9933 = vst [vmem:[#allocation74_spill] sm:$0xff] %v7726_v53  ;;  %v1214_v53 = vand.u32 7, %v7184_v9  ;;  %v1186_v14 = vsel %vm9696_vm1, %v1152_v19, %v1185_v26  ;;  %v9942_v9 = vmov 0  ;;  %v1271_v26 = vsel %vm9695_vm2, %v1147_v60, %v1270_v63 }
 0x21f   : > { %9934 = vst [vmem:[#allocation75_spill] sm:$0xff] %v7728_v58  ;;  %v1180_v58 = vsel %vm9695_vm2, %v1145_v17, %v1179_v44  ;;  %v997_v7 = vrot.slane %v7821_v10, 7  ;;  %v1272_v17 = vsel %vm9694_vm3, %v1148_v18, %v1271_v26  ;;  %v9949_v59 = vand.u32 7, %v7077_v3 }
 0x220   : > { %9935 = vst [vmem:[#allocation76_spill] sm:$0xff] %v7730_v50  ;;  %v1156_v50 = vperm.slane %v7792_v62, 0  ;;  %v1181_v46 = vsel %vm9694_vm3, %v1146_v27, %v1180_v58  ;;  %vm7826_vm13 = vcmp.eq.s32.totalorder %v1214_v53, 0  ;;  %v1273_v27 = vsel %vm9693_vm4, %v1149_v34, %v1272_v17 }
 0x221   : > { %9936 = vst [vmem:[#allocation77_spill] sm:$0xff] %v7733_v61  ;;  %v1153_v61 = vperm.slane %v7780_v56, 0  ;;  %v9943_v9 = vsel %vm7826_vm13, 4294967295, %v9942_v9  ;;  %v1182_v5 = vsel %vm9693_vm4, %v1147_v60, %v1181_v46  ;;  %v7840_v24 = vrot.slane %v997_v7, 2 }
 0x222   : > { %9940 = vst [vmem:[#allocation78_spill] sm:$0xff] %v9939_v28  ;;  %v1183_v29 = vsel %vm9692_vm6, %v1148_v18, %v1182_v5  ;;  %vm7847_vm5 = vcmp.eq.s32.totalorder %v1214_v53, 7  ;;  %v9946_v5 = vmov 0  ;;  %v1274_v19 = vsel %vm9692_vm6, %v1150_v21, %v1273_v27 }
 0x223   : > { %9941 = vst [vmem:[#allocation79_spill] sm:$0xff] %v7821_v10  ;;  %v1187_v44 = vsel %vm9695_vm2, %v1153_v61, %v1186_v14  ;;  %v1250_v42 = vsel %vm7826_vm13, 0.0, %v1183_v29  ;;  %v9947_v5 = vsel %vm7847_vm5, 4294967295, %v9946_v5  ;;  %v1094_v51 = vmax.f32 %v7821_v10, %v7840_v24 }
 0x224   : > { %9944 = vst [vmem:[#allocation80_spill] sm:$0xff] %v9943_v9  ;;  %v1188_v58 = vsel %vm9694_vm3, %v1154_v48, %v1187_v44  ;;  %v1276_v18 = vsel %vm9697_vm15, %v1153_v61, %v1275_v11  ;;  %vm7863_vm7 = vcmp.eq.s32.totalorder %v9949_v59, 7  ;;  %v9950_v44 = vmov 0 }
 0x225   : > { %v1189_v12 = vsel %vm9693_vm4, %v1155_v30, %v1188_v58  ;;  %9945 = vst [vmem:[#allocation81_spill] sm:$0xff] %v7840_v24  ;;  %v1277_v34 = vsel %vm9696_vm1, %v1154_v48, %v1276_v18  ;;  %v1253_v53 = vperm.slane %v1094_v51, 0  ;;  %v9951_v44 = vsel %vm7863_vm7, 4294967295, %v9950_v44 }
 0x226   : > { %v1190_v14 = vsel %vm9692_vm6, %v1156_v50, %v1189_v12  ;;  %9948 = vst [vmem:[#allocation82_spill] sm:$0xff] %v9947_v5  ;;  %v1321_v12 = vpack.c.bf16 %v7601_v20, %v7601_v20  ;;  %v1278_v46 = vsel %vm9695_vm2, %v1155_v30, %v1277_v34  ;;  %v1292_v21 = vsel %vm7847_vm5, 0.0, %v1274_v19 }
 0x227   : > { %v1251_v63 = vsel %vm7814_vm12, 0.0, %v1190_v14  ;;  %9952 = vst [vmem:[#allocation83_spill] sm:$0xff] %v9951_v44  ;;  %v1279_v61 = vsel %vm9694_vm3, %v1156_v50, %v1278_v46  ;;  %v1322_v20 = vpack.c.bf16 %v7737_v25, %v7737_v25  ;;  %v1323_v48 = vpack.c.bf16 %v7741_v39, %v7741_v39  ;;  %v6556_v44 = vld [vmem:[#allocation2 + $0x324] sm:$0xf] }
 0x228   : > { %v1296_v60 = vpack.c.bf16 %v1251_v63, %v1250_v42  ;;  %v1324_v3 = vpack.c.bf16 %v7748_v54, %v7748_v54  ;;  %v1280_v30 = vsel %vm9693_vm4, %v1253_v53, %v1279_v61  ;;  %v1325_v7 = vpack.c.bf16 %v7752_v16, %v7752_v16 }
 0x229   : > { %v1326_v29 = vpack.c.bf16 %v7756_v47, %v7756_v47  ;;  %v1327_v50 = vpack.c.bf16 %v7760_v22, %v7760_v22  ;;  %v1285_v58 = vsel %vm9690_vm0, %v1280_v30, 0.0  ;;  %v1328_v25 = vpack.c.bf16 %v7764_v37, %v7764_v37 }
 0x22a   : > { %5589 = vmatmul.msk.bf16.gmra.mxu1 %vm9691_vm14, %v1296_v60  ;;  %v1330_v39 = vpack.c.bf16 %v7772_v36, %v7772_v36  ;;  %v1331_v54 = vpack.c.bf16 %v7776_v32, %v7776_v32  ;;  %v1293_v16 = vsel %vm7863_vm7, 0.0, %v1285_v58  ;;  %v1329_v47 = vpack.c.bf16 %v7768_v13, %v7768_v13 }
 0x22b   : > { %v1332_v22 = vpack.c.bf16 %v7780_v56, %v7780_v56  ;;  %v1333_v26 = vpack.c.bf16 %v7784_v40, %v7784_v40  ;;  %v1566_v11 = vpack.c.bf16 %v1293_v16, %v1292_v21  ;;  %v1334_v37 = vpack.c.bf16 %v7788_v41, %v7788_v41 }
 0x22c   : > { %v1394_v36 = vunpack.c.l.b16 %v1322_v20  ;;  %v1395_v17 = vunpack.c.l.b16 %v1323_v48  ;;  %v1335_v32 = vpack.c.bf16 %v7792_v62, %v7792_v62  ;;  %v1336_v14 = vpack.c.bf16 %v1094_v51, %v1094_v51  ;;  %v5638_v20 = vld [vmem:[#allocation2 + $0x280] sm:$0xf]  ;;  %v6545_v48 = vld [vmem:[#allocation2 + $0x284] sm:$0xf0] }
 0x22d   : > { %v1396_v42 = vunpack.c.l.b16 %v1324_v3  ;;  %v1397_v27 = vunpack.c.l.b16 %v1325_v7  ;;  %v1393_v63 = vunpack.c.l.b16 %v1321_v12  ;;  %5607 = vmatmul.msk.bf16.gmra.mxu2 %vm9691_vm14, %v1566_v11  ;;  %v1398_v13 = vunpack.c.l.b16 %v1326_v29  ;;  %v5634_v29 = vld [vmem:[#allocation2 + $0x270] sm:$0xf] }
 0x22e   : > { %v1402_v56 = vunpack.c.l.b16 %v1330_v39  ;;  %v1403_v19 = vunpack.c.l.b16 %v1331_v54  ;;  %v1399_v18 = vunpack.c.l.b16 %v1327_v50  ;;  %v1400_v40 = vunpack.c.l.b16 %v1328_v25  ;;  %v6544_v54 = vld [vmem:[#allocation2 + $0x274] sm:$0xf0] }
 0x22f   : > { %v1404_v60 = vunpack.c.l.b16 %v1332_v22  ;;  %v1405_v34 = vunpack.c.l.b16 %v1333_v26  ;;  %v1401_v53 = vunpack.c.l.b16 %v1329_v47  ;;  %v1406_v41 = vunpack.c.l.b16 %v1334_v37 }
 0x230   : > { %v1437_v46 = vrot.slane %v1394_v36, 7  ;;  %v1439_v59 = vrot.slane %v1395_v17, 6  ;;  %v1407_v21 = vunpack.c.l.b16 %v1335_v32  ;;  %v1408_v61 = vunpack.c.l.b16 %v1336_v14 }
 0x231   : > { %v1441_v62 = vrot.slane %v1396_v42, 5  ;;  %v1443_v51 = vrot.slane %v1397_v27, 4  ;;  %vm9953_vm0 = vcmask 1041409   ;;  %v1445_v3 = vrot.slane %v1398_v13, 3  ;;  %v6543_v13 = vld [vmem:[#allocation2 + $0x264] sm:$0xf0] }
 0x232   : > { %v1438_v12 = vsel %vm9953_vm0, %v1437_v46, %v1393_v63  ;;  %v1451_v30 = vrot.slane %v1402_v56, 7  ;;  %v1453_v7 = vrot.slane %v1403_v19, 6  ;;  %v1447_v58 = vrot.slane %v1399_v18, 2  ;;  %vm9954_vm14 = vmmov %vm9953_vm0  ;;  %v5630_v63 = vld [vmem:[#allocation2 + $0x260] sm:$0xf] }
 0x233   : > { %v1440_v50 = vsel %vm9697_vm15, %v1439_v59, %v1438_v12  ;;  %v1455_v25 = vrot.slane %v1404_v60, 5  ;;  %v1457_v39 = vrot.slane %v1405_v34, 4  ;;  %v1459_v22 = vrot.slane %v1406_v41, 3  ;;  %v5670_v59 = vld [vmem:[#allocation2 + $0x200] sm:$0xf] }
 0x234   : > { %v1442_v16 = vsel %vm9696_vm1, %v1441_v62, %v1440_v50  ;;  %v1452_v47 = vsel %vm9954_vm14, %v1451_v30, %v1401_v53  ;;  %v5639_v26 = vor.u32 %v6545_v48, %v5638_v20  ;;  %v1461_v36 = vrot.slane %v1407_v21, 2  ;;  %v6537_v21 = vld [vmem:[#allocation2 + $0x204] sm:$0xf0]  ;;  %v5666_v20 = vld [vmem:[#allocation2 + $0x1f0] sm:$0xf]  ;;  %vm5672_vm14 = vmneg %vm7460_vm9 }
 0x235   : > { %v1444_v11 = vsel %vm9695_vm2, %v1443_v51, %v1442_v16  ;;  %v1454_v37 = vsel %vm9697_vm15, %v1453_v7, %v1452_v47  ;;  %v5635_v14 = vor.u32 %v6544_v54, %v5634_v29  ;;  %v1449_v56 = vrot.slane %v1400_v40, 1  ;;  %v5626_v40 = vld [vmem:[#allocation2 + $0x250] sm:$0xf]  ;;  %v6542_v51 = vld [vmem:[#allocation2 + $0x254] sm:$0xf0]  ;;  %vm5719_vm15 = vmneg %vm7863_vm7 }
 0x236   : > { %v1446_v17 = vsel %vm9694_vm3, %v1445_v3, %v1444_v11  ;;  %v1456_v32 = vsel %vm9696_vm1, %v1455_v25, %v1454_v37  ;;  %1757 = vmatpush.bf16.msrb.mxu3 %v5639_v26  ;;  %v1463_v18 = vrot.slane %v1408_v61, 1  ;;  %v5631_v41 = vor.u32 %v6543_v13, %v5630_v63  ;;  %v6536_v48 = vld [vmem:[#allocation2 + $0x1f4] sm:$0xf0]  ;;  %v5662_v12 = vld [vmem:[#allocation2 + $0x1e0] sm:$0xf]  ;;  %vm5677_vm1 = vmneg %vm7814_vm12 }
 0x237   : > { %v1448_v42 = vsel %vm9693_vm4, %v1447_v58, %v1446_v17  ;;  %v1458_v27 = vsel %vm9695_vm2, %v1457_v39, %v1456_v32  ;;  %vm9955_vm0 = vcmask 523264   ;;  %v5671_v62 = vor.u32 %v6537_v21, %v5670_v59  ;;  %v6535_v3 = vld [vmem:[#allocation2 + $0x1e4] sm:$0xf0]  ;;  %v5622_v29 = vld [vmem:[#allocation2 + $0x240] sm:$0xf] }
 0x238   : > { %v1460_v19 = vsel %vm9694_vm3, %v1459_v22, %v1458_v27  ;;  %v1450_v34 = vsel %vm9692_vm6, %v1449_v56, %v1448_v42  ;;  %v5627_v61 = vor.u32 %v6542_v51, %v5626_v40  ;;  %v5667_v30 = vor.u32 %v6536_v48, %v5666_v20  ;;  %v6541_v50 = vld [vmem:[#allocation2 + $0x244] sm:$0xf0]  ;;  %v5658_v58 = vld [vmem:[#allocation2 + $0x1d0] sm:$0xf]  ;;  %v6534_v39 = vld [vmem:[#allocation2 + $0x1d4] sm:$0xf0] }
 0x239   : > { %v1462_v60 = vsel %vm9693_vm4, %v1461_v36, %v1460_v19  ;;  %1824 = vmatpush.bf16.msra.mxu0 %v5671_v62  ;;  %v5663_v7 = vor.u32 %v6535_v3, %v5662_v12  ;;  %v5623_v25 = vor.u32 %v6541_v50, %v5622_v29  ;;  %v5654_v54 = vld [vmem:[#allocation2 + $0x1c0] sm:$0xf]  ;;  %v6533_v16 = vld [vmem:[#allocation2 + $0x1c4] sm:$0xf0]  ;;  %v5659_v47 = vor.u32 %v6534_v39, %v5658_v58  ;;  %v5618_v22 = vld [vmem:[#allocation2 + $0x230] sm:$0xf] }
 0x23a   : > { %v1464_v53 = vsel %vm9692_vm6, %v1463_v18, %v1462_v60  ;;  %1758 = vmatpush.bf16.msrb.mxu3 %v5635_v14  ;;  %v6540_v26 = vld [vmem:[#allocation2 + $0x234] sm:$0xf0]  ;;  %v5655_v37 = vor.u32 %v6533_v16, %v5654_v54  ;;  %v5650_v36 = vld [vmem:[#allocation2 + $0x1b0] sm:$0xf]  ;;  %v5712_v32 = vld [vmem:[#allocation2 + $0x300] sm:$0xf] }
 0x23b   : > { %v1466_v46 = vpack.c.b16 %v1464_v53, %v1450_v34  ;;  %v5619_v11 = vor.u32 %v6540_v26, %v5618_v22  ;;  %v6532_v17 = vld [vmem:[#allocation2 + $0x1b4] sm:$0xf0]  ;;  %v6553_v14 = vld [vmem:[#allocation2 + $0x304] sm:$0xf0]  ;;  %v5614_v42 = vld [vmem:[#allocation2 + $0x220] sm:$0xf] }
 0x23c   : > { %v6539_v27 = vld [vmem:[#allocation2 + $0x224] sm:$0xf0]  ;;  %v5651_v63 = vor.u32 %v6532_v17, %v5650_v36  ;;  %v5713_v13 = vor.u32 %v6553_v14, %v5712_v32  ;;  %v5646_v19 = vld [vmem:[#allocation2 + $0x1a0] sm:$0xf]  ;;  %v5708_v60 = vld [vmem:[#allocation2 + $0x2f0] sm:$0xf] }
 0x23d   : > { %5571 = vmatmul.msk.bf16.gmra.mxu0 %vm9955_vm0, %v1466_v46  ;;  %v5615_v56 = vor.u32 %v6539_v27, %v5614_v42  ;;  %v6531_v18 = vld [vmem:[#allocation2 + $0x1a4] sm:$0xf0]  ;;  %v6552_v34 = vld [vmem:[#allocation2 + $0x2f4] sm:$0xf0]  ;;  %v5610_v53 = vld [vmem:[#allocation2 + $0x210] sm:$0xf] }
 0x23e   : > { %1759 = vmatpush.bf16.msrb.mxu3 %v5631_v41  ;;  %1825 = vmatpush.bf16.msra.mxu0 %v5667_v30  ;;  %v6538_v41 = vld [vmem:[#allocation2 + $0x214] sm:$0xf0]  ;;  %v5709_v46 = vor.u32 %v6552_v34, %v5708_v60  ;;  %v5704_v21 = vld [vmem:[#allocation2 + $0x2e0] sm:$0xf]  ;;  %v6551_v62 = vld [vmem:[#allocation2 + $0x2e4] sm:$0xf0]  ;;  %v5647_v40 = vor.u32 %v6531_v18, %v5646_v19 }
 0x23f   : > { %1909 = vmatpush.bf16.msra.mxu1 %v5713_v13  ;;  %v5611_v59 = vor.u32 %v6538_v41, %v5610_v53  ;;  %v5642_v51 = vld [vmem:[#allocation2 + $0x190] sm:$0xf]  ;;  %v6530_v20 = vld [vmem:[#allocation2 + $0x194] sm:$0xf0]  ;;  %v5696_v36 = vld [vmem:[#allocation2 + $0x2c0] sm:$0xf] }
 0x240   : > { %v5700_v48 = vld [vmem:[#allocation2 + $0x2d0] sm:$0xf]  ;;  %v6550_v12 = vld [vmem:[#allocation2 + $0x2d4] sm:$0xf0]  ;;  %v5643_v3 = vor.u32 %v6530_v20, %v5642_v51  ;;  %v6549_v17 = vld [vmem:[#allocation2 + $0x2c4] sm:$0xf0] }
 0x241   : > { %v1294_v39 = vld [vmem:[#allocation5 + $0x2] ss:$0 sm:$0xff]  ;;  %v5697_v32 = vor.u32 %v6549_v17, %v5696_v36  ;;  %vm5673_vm0 = vmneg %vm7438_vm8  ;;  %vm9956_vm6 = vcmask 1040384   ;;  %v9958_v18 = vmov 0  ;;  %v6548_v53 = vld [vmem:[#allocation2 + $0x2b4] sm:$0xf0] }
 0x242   : > { %1760 = vmatpush.bf16.msrb.mxu3 %v5627_v61  ;;  %1826 = vmatpush.bf16.msra.mxu0 %v5663_v7  ;;  %v5705_v61 = vor.u32 %v6551_v62, %v5704_v21  ;;  %v5701_v7 = vor.u32 %v6550_v12, %v5700_v48  ;;  %vm9957_vm4 = vmmov %vm9956_vm6  ;;  %v5692_v34 = vld [vmem:[#allocation2 + $0x2b0] sm:$0xf]  ;;  %v5688_v41 = vld [vmem:[#allocation2 + $0x2a0] sm:$0xf]  ;;  %v9963_v36 = vmov 0  ;;  %vm10021_vm7 = vcmask 1040384  }
 0x243   : > { %1910 = vmatpush.bf16.msra.mxu1 %v5709_v46  ;;  %vm7925_vm3 = vmpackc.low %vm5672_vm14, %vm5673_vm0  ;;  %v5693_v46 = vor.u32 %v6548_v53, %v5692_v34  ;;  %v5684_v62 = vld [vmem:[#allocation2 + $0x290] sm:$0xf]  ;;  %vm9961_vm14 = vcmask 1046528   ;;  %v9973_v53 = vmov 0 }
 0x244   : > { %v9959_v18 = vsel %vm7925_vm3, 4294967295, %v9958_v18  ;;  %vm9962_vm0 = vmmov %vm9961_vm14 }
 0x245   : > { %9960 = vst [vmem:[#allocation84_spill] sm:$0xff] %v9959_v18 }
 0x246   : > { %1761 = vmatpush.bf16.msrb.mxu3 %v5623_v25  ;;  %1827 = vmatpush.bf16.msra.mxu0 %v5659_v47 }
 0x247   : > { %1911 = vmatpush.bf16.msra.mxu1 %v5705_v61 }
 0x24a   : > { %1762 = vmatpush.bf16.msrb.mxu3 %v5619_v11  ;;  %1828 = vmatpush.bf16.msra.mxu0 %v5655_v37 }
 0x24b   : > { %1912 = vmatpush.bf16.msra.mxu1 %v5701_v7 }
 0x24e   : > { %1763 = vmatpush.bf16.msrb.mxu3 %v5615_v56  ;;  %1829 = vmatpush.bf16.msra.mxu0 %v5651_v63 }
 0x24f   : > { %1913 = vmatpush.bf16.msra.mxu1 %v5697_v32 }
 0x252   : > { %1764 = vmatpush.bf16.msrb.mxu3 %v5611_v59  ;;  %1830 = vmatpush.bf16.msra.mxu0 %v5647_v40  ;;  %v6547_v59 = vld [vmem:[#allocation2 + $0x2a4] sm:$0xf0]  ;;  %v6546_v40 = vld [vmem:[#allocation2 + $0x294] sm:$0xf0] }
 0x253   : > { %1914 = vmatpush.bf16.msra.mxu1 %v5693_v46  ;;  %v5689_v21 = vor.u32 %v6547_v59, %v5688_v41  ;;  %v5685_v51 = vor.u32 %v6546_v40, %v5684_v62  ;;  %v5782_v46 = vld [vmem:[#allocation2 + $0x400] sm:$0xf]  ;;  %v6585_v59 = vld [vmem:[#allocation2 + $0x404] sm:$0xf0]  ;;  %v5784_v40 = vld [vmem:[#allocation2 + $0x408] sm:$0xf0] }
 0x254   : > { %v5783_v62 = vor.u32 %v6585_v59, %v5782_v46  ;;  %v6566_v59 = vld [vmem:[#allocation2 + $0x374] sm:$0xf] }
 0x256   : > { %1831 = vmatpush.bf16.msra.mxu0 %v5643_v3  ;;  %2337 = vmatpush.bf16.msra.mxu2 %v5783_v62  ;;  %v5750_v62 = vld [vmem:[#allocation2 + $0x3c0] sm:$0xf] }
 0x257   : > { %1915 = vmatpush.bf16.msra.mxu1 %v5689_v21  ;;  %v6584_v21 = vld [vmem:[#allocation2 + $0x404] sm:$0xf] }
 0x25b   : > { %1916 = vmatpush.bf16.msra.mxu1 %v5685_v51  ;;  %v5787_v51 = vor.u32 %v6584_v21, %v5784_v40  ;;  %v5840_v21 = vld [vmem:[#allocation2 + $0x378] sm:$0xf0] }
 0x25d   : > { %2351 = vmatpush.bf16.msra.mxu3 %v5787_v51  ;;  %v5843_v51 = vor.u32 %v6566_v59, %v5840_v21  ;;  %v6572_v59 = vld [vmem:[#allocation2 + $0x3a4] sm:$0xf]  ;;  %v5736_v21 = vld [vmem:[#allocation2 + $0x3a8] sm:$0xf0] }
 0x26d   : > { %v1555_v29 = vpop.f32.mrf.mxu1 }
 0x275   : > { %v1557_v47 = vpop.f32.mrf.mxu1 }
 0x27d   : > { %v1506_v30 = vpop.f32.mrf.mxu0 }
 0x27e   : > { %v1556_v50 = vadd.f32 %v1555_v29, %v1506_v30 }
 0x285   : > { %v1508_v54 = vpop.f32.mrf.mxu0 }
 0x286   : > { %v1558_v22 = vadd.f32 %v1557_v47, %v1508_v54 }
 0x28d   : > { %v1614_v58 = vpop.f32.mrf.mxu2 }
 0x28e   : > { %v1624_v25 = vadd.f32 %v1614_v58, %v1556_v50 }
 0x290   : > { %v1628_v16 = vadd.f32 %v1624_v25, %v1294_v39 }
 0x292   : > { %v1632_v11 = vmax.f32 %v1628_v16, 0.0 }
 0x294   : > { %v1640_v42 = vrot.slane %v1632_v11, 7  ;;  %v1656_v54 = vrot.slane %v1632_v11, 1 }
 0x295   : > { %v1616_v26 = vpop.f32.mrf.mxu2 }
 0x296   : > { %v1625_v37 = vadd.f32 %v1616_v26, %v1558_v22  ;;  %v1651_v56 = vsel %vm9956_vm6, 0.0, %v1640_v42  ;;  %vm5715_vm6 = vmneg %vm7637_vm10  ;;  %vm9971_vm10 = vcmask 1046528  }
 0x298   : > { %v1629_v14 = vadd.f32 %v1625_v37, %v1294_v39 }
 0x29a   : > { %v1633_v27 = vmax.f32 %v1629_v14, 0.0 }
 0x29c   : > { %v1641_v63 = vrot.slane %v1633_v27, 7  ;;  %v1691_v13 = vpack.c.bf16 %v1633_v27, %v1632_v11  ;;  %v1657_v7 = vrot.slane %v1633_v27, 1 }
 0x29e   : > { %1765 = vmatmul.bf16.vlgmr.msrb.gmra.mxu3 %v1691_v13  ;;  %v1642_v19 = vsel %vm9957_vm4, %v1640_v42, %v1641_v63  ;;  %vm5714_vm4 = vmneg %vm7643_vm11  ;;  %v1658_v37 = vsel %vm9962_vm0, %v1656_v54, %v1657_v7 }
 0x29f   : > { %v5675_v60 = vpack.c.bf16 %v1642_v19, %v1651_v56  ;;  %vm7937_vm2 = vmpackc.low %vm5714_vm4, %vm5715_vm6  ;;  %vm9966_vm4 = vcmask 1040384  }
 0x2a0   : > { %v9964_v36 = vsel %vm7937_vm2, 4294967295, %v9963_v36  ;;  %vm9967_vm6 = vmmov %vm9966_vm4 }
 0x2a1   : > { %5676 = vmatmul.msk.bf16.vlgmr.msra.gmra.mxu0 %vm7925_vm3, %v5675_v60  ;;  %9965 = vst [vmem:[#allocation85_spill] sm:$0xff] %v9964_v36  ;;  %vm5720_vm11 = vmneg %vm7847_vm5  ;;  %vm10035_vm5 = vcmask 1046534  }
 0x2a7   : > { %v1560_v20 = vpop.f32.mrf.mxu1 }
 0x2af   : > { %v1562_v29 = vpop.f32.mrf.mxu1 }
 0x2b0   : > { %v1619_v61 = vpop.f32.mrf.mxu2 }
 0x2b8   : > { %v1621_v25 = vpop.f32.mrf.mxu2 }
 0x2ba   : > { %v1511_v48 = vpop.f32.mrf.mxu0 }
 0x2bb   : > { %v1561_v12 = vadd.f32 %v1560_v20, %v1511_v48  ;;  %v5774_v20 = vld [vmem:[#allocation2 + $0x3f0] sm:$0xf]  ;;  %v6582_v48 = vld [vmem:[#allocation2 + $0x3f4] sm:$0xf] }
 0x2bd   : > { %v1626_v3 = vadd.f32 %v1619_v61, %v1561_v12  ;;  %v6583_v61 = vld [vmem:[#allocation2 + $0x3f4] sm:$0xf0] }
 0x2be   : > { %v5775_v12 = vor.u32 %v6583_v61, %v5774_v20  ;;  %v6577_v20 = vld [vmem:[#allocation2 + $0x3c4] sm:$0xf0]  ;;  %v6576_v61 = vld [vmem:[#allocation2 + $0x3c4] sm:$0xf] }
 0x2bf   : > { %v1630_v30 = vadd.f32 %v1626_v3, %v1294_v39  ;;  %v5776_v3 = vld [vmem:[#allocation2 + $0x3f8] sm:$0xf0] }
 0x2c0   : > { %2338 = vmatpush.bf16.msra.mxu2 %v5775_v12 }
 0x2c1   : > { %v1634_v50 = vmax.f32 %v1630_v30, 0.0  ;;  %v5766_v30 = vld [vmem:[#allocation2 + $0x3e0] sm:$0xf] }
 0x2c2   : > { %v1513_v58 = vpop.f32.mrf.mxu0 }
 0x2c3   : > { %v1659_v16 = vrot.slane %v1634_v50, 1  ;;  %v1563_v47 = vadd.f32 %v1562_v29, %v1513_v58  ;;  %v1643_v14 = vrot.slane %v1634_v50, 7  ;;  %v5779_v29 = vor.u32 %v6582_v48, %v5776_v3  ;;  %v5768_v58 = vld [vmem:[#allocation2 + $0x3e8] sm:$0xf0] }
 0x2c4   : > { %v5752_v48 = vld [vmem:[#allocation2 + $0x3c8] sm:$0xf0] }
 0x2c5   : > { %v1660_v22 = vsel %vm9961_vm14, %v1657_v7, %v1659_v16  ;;  %v1627_v26 = vadd.f32 %v1621_v25, %v1563_v47  ;;  %vm5678_vm14 = vmneg %vm7826_vm13  ;;  %v1644_v13 = vsel %vm9966_vm4, %v1641_v63, %v1643_v14  ;;  %v6581_v7 = vld [vmem:[#allocation2 + $0x3e4] sm:$0xf0]  ;;  %v5846_v25 = vld [vmem:[#allocation2 + $0x380] sm:$0xf]  ;;  %2352 = vmatpush.bf16.msra.mxu3 %v5779_v29 }
 0x2c6   : > { %v5717_v17 = vpack.c.bf16 %v1660_v22, %v1658_v37  ;;  %vm7949_vm0 = vmpackc.low %vm5677_vm1, %vm5678_vm14  ;;  %v5767_v54 = vor.u32 %v6581_v7, %v5766_v30  ;;  %v6568_v47 = vld [vmem:[#allocation2 + $0x384] sm:$0xf]  ;;  %v5848_v22 = vld [vmem:[#allocation2 + $0x388] sm:$0xf0]  ;;  %v5751_v30 = vor.u32 %v6577_v20, %v5750_v62  ;;  %v5755_v7 = vor.u32 %v6576_v61, %v5752_v48 }
 0x2c7   : > { %v1631_v32 = vadd.f32 %v1627_v26, %v1294_v39  ;;  %v9968_v39 = vmov 0  ;;  %vm9972_vm4 = vmmov %vm9971_vm10  ;;  %v5830_v29 = vld [vmem:[#allocation2 + $0x360] sm:$0xf]  ;;  %v6561_v48 = vld [vmem:[#allocation2 + $0x344] sm:$0xf0]  ;;  %vm10000_vm14 = vcmask 1043459  }
 0x2c8   : > { %5718 = vmatmul.msk.bf16.vlgmr.msra.gmra.mxu1 %vm7937_vm2, %v5717_v17  ;;  %v9969_v39 = vsel %vm7949_vm0, 4294967295, %v9968_v39  ;;  %2339 = vmatpush.bf16.msra.mxu2 %v5767_v54  ;;  %v5832_v54 = vld [vmem:[#allocation2 + $0x368] sm:$0xf0]  ;;  %v5814_v62 = vld [vmem:[#allocation2 + $0x340] sm:$0xf]  ;;  %vm10015_vm1 = vcmask 1044484  }
 0x2c9   : > { %v1635_v42 = vmax.f32 %v1631_v32, 0.0  ;;  %9970 = vst [vmem:[#allocation86_spill] sm:$0xff] %v9969_v39  ;;  %v5851_v32 = vor.u32 %v6568_v47, %v5848_v22  ;;  %v6575_v47 = vld [vmem:[#allocation2 + $0x3b4] sm:$0xf0] }
 0x2cb   : > { %v1645_v11 = vrot.slane %v1635_v42, 7  ;;  %v1692_v27 = vpack.c.bf16 %v1635_v42, %v1634_v50  ;;  %v1661_v60 = vrot.slane %v1635_v42, 1  ;;  %v6580_v50 = vld [vmem:[#allocation2 + $0x3e4] sm:$0xf]  ;;  %2459 = vmatpush.bf16.msrb.mxu1 %v5851_v32  ;;  %v5758_v42 = vld [vmem:[#allocation2 + $0x3d0] sm:$0xf] }
 0x2cc   : > { %v5771_v37 = vor.u32 %v6580_v50, %v5768_v58  ;;  %v6565_v50 = vld [vmem:[#allocation2 + $0x364] sm:$0xf0]  ;;  %v6564_v58 = vld [vmem:[#allocation2 + $0x364] sm:$0xf]  ;;  %v5744_v32 = vld [vmem:[#allocation2 + $0x3b8] sm:$0xf0] }
 0x2cd   : > { %1770 = vmatmul.bf16.gmra.mxu3 %v1692_v27  ;;  %v1646_v56 = vsel %vm9967_vm6, %v1643_v14, %v1645_v11  ;;  %v1662_v34 = vsel %vm9971_vm10, %v1659_v16, %v1661_v60  ;;  %v1667_v63 = vsel %vm9972_vm4, %v1661_v60, 0.0  ;;  %vm7961_vm6 = vmpackc.low %vm5719_vm15, %vm5720_vm11  ;;  %v6569_v16 = vld [vmem:[#allocation2 + $0x384] sm:$0xf0]  ;;  %v6579_v11 = vld [vmem:[#allocation2 + $0x3d4] sm:$0xf0]  ;;  %vm9994_vm10 = vcmask 1042434  }
 0x2ce   : > { %v5680_v19 = vpack.c.bf16 %v1646_v56, %v1644_v13  ;;  %v9974_v53 = vsel %vm7961_vm6, 4294967295, %v9973_v53  ;;  %v5722_v41 = vpack.c.bf16 %v1667_v63, %v1662_v34  ;;  %v5847_v17 = vor.u32 %v6569_v16, %v5846_v25  ;;  %2353 = vmatpush.bf16.msra.mxu3 %v5771_v37  ;;  %v6578_v27 = vld [vmem:[#allocation2 + $0x3d4] sm:$0xf]  ;;  %v7967_v13 = vld [vmem:[#allocation5 + $0x3] ss:$0 sm:$0xff] }
 0x2cf   : > { %9975 = vst [vmem:[#allocation87_spill] sm:$0xff] %v9974_v53  ;;  %v5759_v56 = vor.u32 %v6579_v11, %v5758_v42  ;;  %v5838_v60 = vld [vmem:[#allocation2 + $0x370] sm:$0xf]  ;;  %v6567_v34 = vld [vmem:[#allocation2 + $0x374] sm:$0xf0]  ;;  %2460 = vmatpush.bf16.msrb.mxu1 %v5843_v51  ;;  %v5831_v25 = vor.u32 %v6565_v50, %v5830_v29  ;;  %v5835_v37 = vor.u32 %v6564_v58, %v5832_v54  ;;  %vm9996_vm11 = vcmask 1041409  }
 0x2d0   : > { %5681 = vmatmul.msk.bf16.gmra.mxu0 %vm7949_vm0, %v5680_v19  ;;  %v5760_v19 = vld [vmem:[#allocation2 + $0x3d8] sm:$0xf0]  ;;  %v5839_v46 = vor.u32 %v6567_v34, %v5838_v60  ;;  %v5742_v16 = vld [vmem:[#allocation2 + $0x3b0] sm:$0xf]  ;;  %v6563_v11 = vld [vmem:[#allocation2 + $0x354] sm:$0xf0]  ;;  %v5897_v53 = vor.u32 %v6595_v49, %v5896_v15 }
 0x2d1   : > { %2445 = vmatpush.bf16.msrb.mxu0 %v5847_v17  ;;  %2340 = vmatpush.bf16.msra.mxu2 %v5759_v56  ;;  %v6574_v17 = vld [vmem:[#allocation2 + $0x3b4] sm:$0xf]  ;;  %v5743_v42 = vor.u32 %v6575_v47, %v5742_v16  ;;  %v5824_v56 = vld [vmem:[#allocation2 + $0x358] sm:$0xf0]  ;;  %v6560_v29 = vld [vmem:[#allocation2 + $0x344] sm:$0xf]  ;;  %v5815_v47 = vor.u32 %v6561_v48, %v5814_v62 }
 0x2d2   : > { %v5747_v60 = vor.u32 %v6574_v17, %v5744_v32  ;;  %v5816_v50 = vld [vmem:[#allocation2 + $0x348] sm:$0xf0]  ;;  %v5726_v58 = vld [vmem:[#allocation2 + $0x390] sm:$0xf]  ;;  %v5728_v17 = vld [vmem:[#allocation2 + $0x398] sm:$0xf0] }
 0x2d3   : > { %2461 = vmatpush.bf16.msrb.mxu1 %v5835_v37  ;;  %v5819_v37 = vor.u32 %v6560_v29, %v5816_v50  ;;  %v5806_v32 = vld [vmem:[#allocation2 + $0x330] sm:$0xf]  ;;  %v5798_v29 = vld [vmem:[#allocation2 + $0x320] sm:$0xf]  ;;  %vm10002_vm4 = vcmask 1044484   ;;  %vm8156_vm15 = vcmp.ne.s32.totalorder %v10006_v6, 0 }
 0x2d4   : > { %v5912_v62 = vld [vmem:[#allocation2 + $0x470] sm:$0xf] }
 0x2d5   : > { %2446 = vmatpush.bf16.msrb.mxu0 %v5839_v46  ;;  %2341 = vmatpush.bf16.msra.mxu2 %v5751_v30 }
 0x2d8   : > { %5723 = vmatmul.msk.bf16.gmra.mxu1 %vm7961_vm6, %v5722_v41  ;;  %v5763_v41 = vor.u32 %v6578_v27, %v5760_v19  ;;  %v6562_v27 = vld [vmem:[#allocation2 + $0x354] sm:$0xf] }
 0x2d9   : > { %2447 = vmatpush.bf16.msrb.mxu0 %v5831_v25  ;;  %v5827_v46 = vor.u32 %v6562_v27, %v5824_v56  ;;  %2342 = vmatpush.bf16.msra.mxu2 %v5743_v42 }
 0x2da   : > { %2354 = vmatpush.bf16.msra.mxu3 %v5763_v41  ;;  %v6573_v41 = vld [vmem:[#allocation2 + $0x3a4] sm:$0xf0] }
 0x2db   : > { %2462 = vmatpush.bf16.msrb.mxu1 %v5827_v46  ;;  %v5920_v46 = vld [vmem:[#allocation2 + $0x480] sm:$0xf] }
 0x2de   : > { %2355 = vmatpush.bf16.msra.mxu3 %v5755_v7  ;;  %v5739_v7 = vor.u32 %v6572_v59, %v5736_v21  ;;  %v6601_v59 = vld [vmem:[#allocation2 + $0x484] sm:$0xf0]  ;;  %v6600_v21 = vld [vmem:[#allocation2 + $0x484] sm:$0xf] }
 0x2df   : > { %2463 = vmatpush.bf16.msrb.mxu1 %v5819_v37  ;;  %v5914_v37 = vld [vmem:[#allocation2 + $0x478] sm:$0xf0] }
 0x2e2   : > { %2356 = vmatpush.bf16.msra.mxu3 %v5747_v60 }
 0x2e6   : > { %2357 = vmatpush.bf16.msra.mxu3 %v5739_v7 }
 0x31e   : > { %v1833_v26 = vpop.f32.mrf.mxu0 }
 0x321   : > { %v1766_v14 = vpop.f32.mrf.mxu3 }
 0x322   : > { %v1834_v63 = vadd.f32 %v1833_v26, %v1766_v14  ;;  %v5822_v14 = vld [vmem:[#allocation2 + $0x350] sm:$0xf] }
 0x323   : > { %v5823_v34 = vor.u32 %v6563_v11, %v5822_v14  ;;  %v6559_v14 = vld [vmem:[#allocation2 + $0x334] sm:$0xf0] }
 0x324   : > { %v5807_v48 = vor.u32 %v6559_v14, %v5806_v32  ;;  %v5790_v32 = vld [vmem:[#allocation2 + $0x310] sm:$0xf] }
 0x325   : > { %2448 = vmatpush.bf16.msrb.mxu0 %v5823_v34  ;;  %v6558_v34 = vld [vmem:[#allocation2 + $0x334] sm:$0xf] }
 0x326   : > { %v1835_v12 = vpop.f32.mrf.mxu0 }
 0x329   : > { %v1768_v22 = vpop.f32.mrf.mxu3  ;;  %2449 = vmatpush.bf16.msrb.mxu0 %v5815_v47 }
 0x32d   : > { %2450 = vmatpush.bf16.msrb.mxu0 %v5807_v48 }
 0x345   : > { %v1918_v40 = vpop.f32.mrf.mxu1 }
 0x346   : > { %v1928_v3 = vadd.f32 %v1918_v40, %v1834_v63  ;;  %v5734_v63 = vld [vmem:[#allocation2 + $0x3a0] sm:$0xf]  ;;  %v1836_v40 = vadd.f32 %v1835_v12, %v1768_v22  ;;  %v6571_v22 = vld [vmem:[#allocation2 + $0x394] sm:$0xf0] }
 0x347   : > { %v5735_v30 = vor.u32 %v6573_v41, %v5734_v63  ;;  %v5808_v63 = vld [vmem:[#allocation2 + $0x338] sm:$0xf0]  ;;  %v5727_v41 = vor.u32 %v6571_v22, %v5726_v58 }
 0x348   : > { %v1932_v26 = vadd.f32 %v1928_v3, %v7967_v13  ;;  %v5811_v50 = vor.u32 %v6558_v34, %v5808_v63 }
 0x349   : > { %2343 = vmatpush.bf16.msra.mxu2 %v5735_v30  ;;  %v5800_v30 = vld [vmem:[#allocation2 + $0x328] sm:$0xf0] }
 0x34a   : > { %v7970_v19 = vmax.f32 %v1932_v26, 0.0  ;;  %v6570_v26 = vld [vmem:[#allocation2 + $0x394] sm:$0xf]  ;;  %2464 = vmatpush.bf16.msrb.mxu1 %v5811_v50 }
 0x34c   : > { %9976 = vst [vmem:[#allocation88_spill] sm:$0xff] %v7970_v19  ;;  %v7973_v51 = vrot.slane %v7970_v19, 2  ;;  %v7976_v20 = vrot.slane %v7970_v19, 4  ;;  %v1968_v61 = vrot.slane %v7970_v19, 7  ;;  %v7983_v42 = vrot.slane %v7970_v19, 6 }
 0x34d   : > { %v1920_v3 = vpop.f32.mrf.mxu1  ;;  %v1838_v54 = vpop.f32.mrf.mxu0  ;;  %2344 = vmatpush.bf16.msra.mxu2 %v5727_v41 }
 0x34e   : > { %v7979_v25 = vrot.slane %v1968_v61, 2  ;;  %v1970_v12 = vrot.slane %v7973_v51, 7  ;;  %v1929_v16 = vadd.f32 %v1920_v3, %v1836_v40  ;;  %v5731_v61 = vor.u32 %v6570_v26, %v5728_v17  ;;  %v5922_v3 = vld [vmem:[#allocation2 + $0x488] sm:$0xf0]  ;;  %v6598_v17 = vld [vmem:[#allocation2 + $0x474] sm:$0xf] }
 0x34f   : > { %v5925_v5 = vor.u32 %v6600_v21, %v5922_v3  ;;  %v5917_v21 = vor.u32 %v6598_v17, %v5914_v37 }
 0x350   : > { %9977 = vst [vmem:[#allocation89_spill] sm:$0xff] %v7979_v25  ;;  %v7985_v11 = vrot.slane %v1970_v12, 2  ;;  %v7989_v27 = vmax.f32 %v7970_v19, %v7979_v25  ;;  %v1933_v56 = vadd.f32 %v1929_v16, %v7967_v13  ;;  %v1771_v60 = vpop.f32.mrf.mxu3  ;;  %v5921_v12 = vor.u32 %v6601_v59, %v5920_v46  ;;  %v6557_v16 = vld [vmem:[#allocation2 + $0x324] sm:$0xf0]  ;;  %2358 = vmatpush.bf16.msra.mxu3 %v5731_v61  ;;  %v6554_v46 = vld [vmem:[#allocation2 + $0x314] sm:$0xf] }
 0x351   : > { %v1839_v22 = vadd.f32 %v1838_v54, %v1771_v60  ;;  %v5799_v26 = vor.u32 %v6557_v16, %v5798_v29  ;;  %v5803_v54 = vor.u32 %v6556_v44, %v5800_v30  ;;  %v6555_v60 = vld [vmem:[#allocation2 + $0x314] sm:$0xf0]  ;;  %v5792_v29 = vld [vmem:[#allocation2 + $0x318] sm:$0xf0]  ;;  %v5904_v16 = vld [vmem:[#allocation2 + $0x460] sm:$0xf] }
 0x352   : > { %v7993_v40 = vmax.f32 %v1933_v56, 0.0  ;;  %v6599_v56 = vld [vmem:[#allocation2 + $0x474] sm:$0xf0]  ;;  %v8003_v14 = vmax.f32 %v7973_v51, %v7985_v11  ;;  %2570 = vmatpush.bf16.msrb.mxu2 %v5921_v12  ;;  %v5791_v3 = vor.u32 %v6555_v60, %v5790_v32  ;;  %v5795_v44 = vor.u32 %v6554_v46, %v5792_v29  ;;  %v5888_v19 = vld [vmem:[#allocation2 + $0x440] sm:$0xf] }
 0x353   : > { %v5913_v41 = vor.u32 %v6599_v56, %v5912_v62  ;;  %v5905_v30 = vor.u32 %v6597_v38, %v5904_v16  ;;  %v1972_v62 = vrot.slane %v7976_v20, 7  ;;  %v1974_v12 = vrot.slane %v7983_v42, 7  ;;  %2451 = vmatpush.bf16.msrb.mxu0 %v5799_v26  ;;  %2465 = vmatpush.bf16.msrb.mxu1 %v5803_v54  ;;  %v6593_v25 = vld [vmem:[#allocation2 + $0x444] sm:$0xf0] }
 0x354   : > { %9978 = vst [vmem:[#allocation90_spill] sm:$0xff] %v7993_v40  ;;  %v7996_v58 = vrot.slane %v7993_v40, 6  ;;  %v7999_v7 = vrot.slane %v7993_v40, 2  ;;  %v8007_v59 = vrot.slane %v7993_v40, 4  ;;  %2584 = vmatpush.bf16.msrb.mxu3 %v5925_v5  ;;  %v1976_v17 = vrot.slane %v7993_v40, 7 }
 0x355   : > { %v1923_v47 = vpop.f32.mrf.mxu1  ;;  %v1840_v28 = vpop.f32.mrf.mxu0  ;;  %v8019_v38 = vrot.slane %v1972_v62, 2  ;;  %v8021_v5 = vrot.slane %v1974_v12, 2  ;;  %v9992_v45 = vperm.slane %v7989_v27, 0  ;;  %v9993_v24 = vperm.slane %v8003_v14, 0 }
 0x356   : > { %9979 = vst [vmem:[#allocation91_spill] sm:$0xff] %v7999_v7  ;;  %v1982_v34 = vrot.slane %v7996_v58, 7  ;;  %v1930_v63 = vadd.f32 %v1923_v47, %v1839_v22  ;;  %v6596_v22 = vld [vmem:[#allocation2 + $0x464] sm:$0xf]  ;;  %v5906_v47 = vld [vmem:[#allocation2 + $0x468] sm:$0xf0]  ;;  %2571 = vmatpush.bf16.msrb.mxu2 %v5913_v41 }
 0x357   : > { %9980 = vst [vmem:[#allocation92_spill] sm:$0xff] %v8007_v59  ;;  %v5909_v50 = vor.u32 %v6596_v22, %v5906_v47  ;;  %v1978_v37 = vrot.slane %v7999_v7, 7  ;;  %v1980_v32 = vrot.slane %v8007_v59, 7  ;;  %v8038_v41 = vrot.slane %v1976_v17, 2  ;;  %2452 = vmatpush.bf16.msrb.mxu0 %v5791_v3  ;;  %2466 = vmatpush.bf16.msrb.mxu1 %v5795_v44 }
 0x358   : > { %v8009_v8 = vrot.slane %v1982_v34, 2  ;;  %v1934_v61 = vadd.f32 %v1930_v63, %v7967_v13  ;;  %v1773_v48 = vpop.f32.mrf.mxu3  ;;  %2585 = vmatpush.bf16.msrb.mxu3 %v5917_v21  ;;  %v8059_v12 = vmax.f32 %v7983_v42, %v8021_v5  ;;  %v2078_v55 = vsel %vm9994_vm10, %v9993_v24, %v9992_v45 }
 0x359   : > { %v1841_v9 = vadd.f32 %v1840_v28, %v1773_v48  ;;  %9983 = vst [vmem:[#allocation95_spill] sm:$0xff] %v8038_v41  ;;  %v8040_v29 = vrot.slane %v1978_v37, 2  ;;  %v8042_v16 = vrot.slane %v1980_v32, 2  ;;  %v8074_v37 = vmax.f32 %v7993_v40, %v8038_v41 }
 0x35a   : > { %v8014_v56 = vmax.f32 %v1934_v61, 0.0  ;;  %v8025_v28 = vmax.f32 %v7996_v58, %v8009_v8  ;;  %v8046_v61 = vmax.f32 %v7976_v20, %v8019_v38  ;;  %2572 = vmatpush.bf16.msrb.mxu2 %v5905_v30 }
 0x35b   : > { %9984 = vst [vmem:[#allocation96_spill] sm:$0xff] %v8040_v29  ;;  %v8078_v32 = vmax.f32 %v7999_v7, %v8040_v29 }
 0x35c   : > { %9981 = vst [vmem:[#allocation93_spill] sm:$0xff] %v8014_v56  ;;  %v8029_v26 = vrot.slane %v8014_v56, 2  ;;  %v8032_v63 = vrot.slane %v8014_v56, 4  ;;  %v8035_v60 = vrot.slane %v8014_v56, 6  ;;  %v1984_v54 = vrot.slane %v8014_v56, 7  ;;  %2586 = vmatpush.bf16.msrb.mxu3 %v5909_v50 }
 0x35d   : > { %9982 = vst [vmem:[#allocation94_spill] sm:$0xff] %v8025_v28  ;;  %v1925_v46 = vpop.f32.mrf.mxu1  ;;  %v9740_v4 = vperm.slane %v8025_v28, 0  ;;  %v9999_v45 = vperm.slane %v8046_v61, 0  ;;  %v10012_v18 = vperm.slane %v8078_v32, 0 }
 0x35e   : > { %9985 = vst [vmem:[#allocation97_spill] sm:$0xff] %v8042_v16  ;;  %v8048_v48 = vrot.slane %v1984_v54, 2  ;;  %v1986_v22 = vrot.slane %v8029_v26, 7  ;;  %v1931_v47 = vadd.f32 %v1925_v46, %v1841_v9  ;;  %v1988_v62 = vrot.slane %v8032_v63, 7  ;;  %2573 = vmatpush.bf16.msrb.mxu2 %v5897_v53 }
 0x35f   : > { %v1990_v21 = vrot.slane %v8035_v60, 7  ;;  %v8082_v54 = vmax.f32 %v8007_v59, %v8042_v16  ;;  %v2079_v24 = vsel %vm10000_vm14, %v9999_v45, %v2078_v55  ;;  %v6594_v45 = vld [vmem:[#allocation2 + $0x454] sm:$0xf]  ;;  %v10023_v53 = vmov 0 }
 0x360   : > { %9986 = vst [vmem:[#allocation98_spill] sm:$0xff] %v8048_v48  ;;  %v8061_v17 = vrot.slane %v1986_v22, 2  ;;  %v8065_v9 = vmax.f32 %v8014_v56, %v8048_v48  ;;  %v1935_v3 = vadd.f32 %v1931_v47, %v7967_v13  ;;  %v8068_v44 = vrot.slane %v1988_v62, 2 }
 0x361   : > { %v8070_v30 = vrot.slane %v1990_v21, 2  ;;  %v2169_v55 = vpack.c.bf16 %v8082_v54, %v8082_v54 }
 0x362   : > { %9987 = vst [vmem:[#allocation99_spill] sm:$0xff] %v8065_v9  ;;  %v8085_v13 = vmax.f32 %v1935_v3, 0.0  ;;  %v8089_v50 = vmax.f32 %v8029_v26, %v8061_v17  ;;  %v8093_v22 = vmax.f32 %v8032_v63, %v8068_v44  ;;  %v9995_v62 = vperm.slane %v8065_v9, 0 }
 0x363   : > { %v8097_v47 = vmax.f32 %v8035_v60, %v8070_v30  ;;  %v2217_v7 = vunpack.c.l.b16 %v2169_v55 }
 0x364   : > { %9988 = vst [vmem:[#allocation100_spill] sm:$0xff] %v8085_v13  ;;  %v8103_v3 = vrot.slane %v8085_v13, 2  ;;  %v8106_v34 = vrot.slane %v8085_v13, 4  ;;  %v1992_v10 = vrot.slane %v8085_v13, 7  ;;  %v2084_v21 = vsel %vm9996_vm11, %v9995_v62, %v9740_v4 }
 0x365   : > { %v10001_v62 = vperm.slane %v8059_v12, 0  ;;  %vm8150_vm11 = vcmp.ne.s32.totalorder %v9742_v35, 0  ;;  %v10011_v0 = vperm.slane %v8093_v22, 0  ;;  %v8194_v15 = vrot.slane %v8085_v13, 6 }
 0x366   : > { %9989 = vst [vmem:[#allocation101_spill] sm:$0xff] %v8103_v3  ;;  %v8114_v52 = vrot.slane %v1992_v10, 2  ;;  %v1994_v46 = vrot.slane %v8103_v3, 7  ;;  %v1996_v31 = vrot.slane %v8106_v34, 7  ;;  %v10003_v10 = vperm.slane %v8089_v50, 0 }
 0x367   : > { %9990 = vst [vmem:[#allocation102_spill] sm:$0xff] %v8106_v34  ;;  %v2080_v4 = vsel %vm10002_vm4, %v10001_v62, %v2079_v24  ;;  %v5898_v24 = vld [vmem:[#allocation2 + $0x458] sm:$0xf0]  ;;  %v10009_v62 = vperm.slane %v8074_v37, 0  ;;  %vm10013_vm4 = vcmask 1046534  }
 0x368   : > { %9991 = vst [vmem:[#allocation103_spill] sm:$0xff] %v8114_v52  ;;  %v8131_v57 = vrot.slane %v1994_v46, 2  ;;  %v8133_v33 = vrot.slane %v1996_v31, 2  ;;  %v8137_v23 = vmax.f32 %v8085_v13, %v8114_v52  ;;  %v2085_v46 = vsel %vm9994_vm10, %v10003_v10, %v2084_v21 }
 0x369   : > { %vm10010_vm10 = vcmask 1045509   ;;  %v2086_v43 = vsel %vm10000_vm14, %v10011_v0, %v2085_v46  ;;  %vm10019_vm14 = vcmask 1045509   ;;  %v5901_v0 = vor.u32 %v6594_v45, %v5898_v24  ;;  %10020 = vst [vmem:[#allocation106_spill] sm:$0xff] %v8194_v15 }
 0x36a   : > { %9997 = vst [vmem:[#allocation104_spill] sm:$0xff] %v8131_v57  ;;  %v8166_v21 = vmax.f32 %v8103_v3, %v8131_v57  ;;  %v8170_v10 = vmax.f32 %v8106_v34, %v8133_v33  ;;  %v2081_v35 = vsel %vm10010_vm10, %v10009_v62, %v2080_v4  ;;  %v10014_v34 = vperm.slane %v8097_v47, 0 }
 0x36b   : > { %9998 = vst [vmem:[#allocation105_spill] sm:$0xff] %v8133_v33  ;;  %v2082_v33 = vsel %vm10013_vm4, %v10012_v18, %v2081_v35  ;;  %v10016_v57 = vperm.slane %v8082_v54, 0  ;;  %vm10017_vm10 = vcmask 1047559   ;;  %v10018_v62 = vperm.slane %v8137_v23, 0  ;;  %2587 = vmatpush.bf16.msrb.mxu3 %v5901_v0 }
 0x36c   : > { %v9761_v39 = vperm.slane %v8166_v21, 0  ;;  %v9760_v36 = vperm.slane %v8170_v10, 0  ;;  %v2087_v6 = vsel %vm10015_vm1, %v10014_v34, %v2086_v43  ;;  %v2163_v43 = vpack.c.bf16 %v7989_v27, %v7989_v27  ;;  %vm10022_vm1 = vmmov %vm10017_vm10 }
 0x36d   : > { %v2083_v4 = vsel %vm10017_vm10, %v10016_v57, %v2082_v33  ;;  %v2088_v49 = vsel %vm10019_vm14, %v10018_v62, %v2087_v6  ;;  %v2164_v33 = vpack.c.bf16 %v8003_v14, %v8003_v14  ;;  %vm8211_vm10 = vmpackc.low %vm8150_vm11, %vm8156_vm15  ;;  %v1998_v34 = vrot.slane %v8194_v15, 7 }
 0x36e   : > { %v2089_v35 = vsel %vm10013_vm4, %v9761_v39, %v2088_v49  ;;  %v2093_v18 = vsel %vm10021_vm7, 0.0, %v2083_v4  ;;  %v10024_v53 = vsel %vm8211_vm10, 4294967295, %v10023_v53  ;;  %v2165_v27 = vpack.c.bf16 %v8046_v61, %v8046_v61 }
 0x36f   : > { %v2090_v57 = vsel %vm10022_vm1, %v9760_v36, %v2089_v35  ;;  %10025 = vst [vmem:[#allocation107_spill] sm:$0xff] %v10024_v53  ;;  %v2166_v46 = vpack.c.bf16 %v8059_v12, %v8059_v12  ;;  %v2167_v24 = vpack.c.bf16 %v8074_v37, %v8074_v37  ;;  %v2168_v31 = vpack.c.bf16 %v8078_v32, %v8078_v32 }
 0x370   : > { %v5855_v45 = vpack.c.bf16 %v2090_v57, %v2093_v18  ;;  %v8226_v6 = vrot.slane %v1998_v34, 2  ;;  %v2170_v4 = vpack.c.bf16 %v8025_v28, %v8025_v28  ;;  %v2172_v62 = vpack.c.bf16 %v8089_v50, %v8089_v50  ;;  %v5890_v28 = vld [vmem:[#allocation2 + $0x448] sm:$0xf0] }
 0x371   : > { %v2173_v49 = vpack.c.bf16 %v8093_v22, %v8093_v22  ;;  %v2171_v0 = vpack.c.bf16 %v8065_v9, %v8065_v9  ;;  %v2174_v35 = vpack.c.bf16 %v8097_v47, %v8097_v47  ;;  %v2175_v18 = vpack.c.bf16 %v8137_v23, %v8137_v23  ;;  %v6592_v9 = vld [vmem:[#allocation2 + $0x444] sm:$0xf] }
 0x372   : > { %10026 = vst [vmem:[#allocation108_spill] sm:$0xff] %v8226_v6  ;;  %5856 = vmatmul.msk.bf16.vlgmr.msrb.gmra.mxu0 %vm8211_vm10, %v5855_v45  ;;  %5861 = vmatmul.msk.bf16.vlgmr.msrb.gmra.mxu1 %vm8211_vm10, %v5855_v45  ;;  %v2212_v57 = vunpack.c.l.b16 %v2164_v33  ;;  %v8248_v34 = vmax.f32 %v8194_v15, %v8226_v6  ;;  %v2176_v45 = vpack.c.bf16 %v8166_v21, %v8166_v21  ;;  %v2213_v36 = vunpack.c.l.b16 %v2165_v27 }
 0x373   : > { %v2177_v39 = vpack.c.bf16 %v8170_v10, %v8170_v10  ;;  %v2211_v3 = vunpack.c.l.b16 %v2163_v43  ;;  %v2214_v13 = vunpack.c.l.b16 %v2166_v46  ;;  %v2215_v52 = vunpack.c.l.b16 %v2167_v24 }
 0x374   : > { %v2178_v33 = vpack.c.bf16 %v8248_v34, %v8248_v34  ;;  %v2216_v56 = vunpack.c.l.b16 %v2168_v31  ;;  %v2220_v48 = vunpack.c.l.b16 %v2172_v62  ;;  %v2221_v29 = vunpack.c.l.b16 %v2173_v49 }
 0x375   : > { %v2218_v16 = vunpack.c.l.b16 %v2170_v4  ;;  %v2222_v6 = vunpack.c.l.b16 %v2174_v35  ;;  %v2223_v15 = vunpack.c.l.b16 %v2175_v18  ;;  %v2219_v59 = vunpack.c.l.b16 %v2171_v0  ;;  %v5880_v4 = vld [vmem:[#allocation2 + $0x430] sm:$0xf] }
 0x376   : > { %v2224_v40 = vunpack.c.l.b16 %v2176_v45  ;;  %v2227_v41 = vrot.slane %v2212_v57, 7  ;;  %v2229_v27 = vrot.slane %v2213_v36, 6  ;;  %v2225_v53 = vunpack.c.l.b16 %v2177_v39  ;;  %v6591_v36 = vld [vmem:[#allocation2 + $0x434] sm:$0xf0] }
 0x377   : > { %v2226_v43 = vunpack.c.l.b16 %v2178_v33  ;;  %v2231_v46 = vrot.slane %v2214_v13, 5  ;;  %v2233_v24 = vrot.slane %v2215_v52, 4  ;;  %vm10027_vm15 = vcmask 1041409   ;;  %v6590_v33 = vld [vmem:[#allocation2 + $0x434] sm:$0xf] }
 0x378   : > { %v2228_v31 = vsel %vm10027_vm15, %v2227_v41, %v2211_v3  ;;  %v2235_v62 = vrot.slane %v2216_v56, 3  ;;  %v2241_v49 = vrot.slane %v2220_v48, 7  ;;  %v2243_v55 = vrot.slane %v2221_v29, 6  ;;  %vm10030_vm4 = vmmov %vm10027_vm15 }
 0x379   : > { %vm10028_vm11 = vcmask 1042434   ;;  %v2237_v0 = vrot.slane %v2217_v7, 2  ;;  %v2245_v18 = vrot.slane %v2222_v6, 5  ;;  %v2247_v57 = vrot.slane %v2223_v15, 4 }
 0x37a   : > { %v2230_v35 = vsel %vm10028_vm11, %v2229_v27, %v2228_v31  ;;  %vm10029_vm14 = vcmask 1043459   ;;  %v2242_v39 = vsel %vm10030_vm4, %v2241_v49, %v2219_v59  ;;  %v2249_v13 = vrot.slane %v2224_v40, 3  ;;  %vm10032_vm15 = vmmov %vm10028_vm11  ;;  %v6589_v40 = vld [vmem:[#allocation2 + $0x424] sm:$0xf0] }
 0x37b   : > { %v2232_v45 = vsel %vm10029_vm14, %v2231_v46, %v2230_v35  ;;  %v5889_v52 = vor.u32 %v6593_v25, %v5888_v19  ;;  %vm10031_vm1 = vcmask 1044484   ;;  %v2244_v56 = vsel %vm10032_vm15, %v2243_v55, %v2242_v39  ;;  %vm10034_vm11 = vmmov %vm10029_vm14  ;;  %v5872_v25 = vld [vmem:[#allocation2 + $0x420] sm:$0xf] }
 0x37c   : > { %v2234_v41 = vsel %vm10031_vm1, %v2233_v24, %v2232_v45  ;;  %v2251_v29 = vrot.slane %v2225_v53, 2  ;;  %v5893_v48 = vor.u32 %v6592_v9, %v5890_v28  ;;  %vm10033_vm7 = vcmask 1045509   ;;  %vm10036_vm14 = vmmov %vm10031_vm1  ;;  %v6588_v53 = vld [vmem:[#allocation2 + $0x424] sm:$0xf]  ;;  %v5874_v28 = vld [vmem:[#allocation2 + $0x428] sm:$0xf0] }
 0x37d   : > { %v2236_v3 = vsel %vm10033_vm7, %v2235_v62, %v2234_v41  ;;  %v2246_v7 = vsel %vm10034_vm11, %v2245_v18, %v2244_v56  ;;  %2574 = vmatpush.bf16.msrb.mxu2 %v5889_v52  ;;  %v5881_v15 = vor.u32 %v6591_v36, %v5880_v4  ;;  %v5885_v19 = vor.u32 %v6590_v33, %v5882_v1  ;;  %vm10037_vm4 = vmmov %vm10033_vm7  ;;  %v6586_v18 = vld [vmem:[#allocation2 + $0x414] sm:$0xf] }
 0x37e   : > { %v2238_v6 = vsel %vm10035_vm5, %v2237_v0, %v2236_v3  ;;  %v2248_v59 = vsel %vm10036_vm14, %v2247_v57, %v2246_v7  ;;  %2588 = vmatpush.bf16.msrb.mxu3 %v5893_v48  ;;  %v2239_v27 = vrot.slane %v2218_v16, 1  ;;  %v2253_v24 = vrot.slane %v2226_v43, 1  ;;  %vm10038_vm1 = vmmov %vm10035_vm5  ;;  %v5864_v16 = vld [vmem:[#allocation2 + $0x410] sm:$0xf]  ;;  %v6587_v0 = vld [vmem:[#allocation2 + $0x414] sm:$0xf0] }
 0x37f   : > { %v2250_v46 = vsel %vm10037_vm4, %v2249_v13, %v2248_v59  ;;  %v10039_v31 = vperm.slane %v8089_v50, 0  ;;  %v10040_v62 = vperm.slane %v8093_v22, 0  ;;  %vm10041_vm7 = vcmask 1041409   ;;  %v5866_v57 = vld [vmem:[#allocation2 + $0x418] sm:$0xf0] }
 0x380   : > { %v2252_v9 = vsel %vm10038_vm1, %v2251_v29, %v2250_v46  ;;  %vm10042_vm5 = vcmask 1047559   ;;  %v5873_v4 = vor.u32 %v6589_v40, %v5872_v25  ;;  %v5877_v43 = vor.u32 %v6588_v53, %v5874_v28  ;;  %vm10048_vm14 = vmmov %vm10041_vm7  ;;  %v6625_v28 = vld [vmem:[#allocation2 + $0x604] sm:$0xf0] }
 0x381   : > { %v2131_v49 = vsel %vm10041_vm7, %v10040_v62, %v10039_v31  ;;  %v2240_v55 = vsel %vm10042_vm5, %v2239_v27, %v2238_v6  ;;  %vm10043_vm15 = vmmov %vm10042_vm5  ;;  %2575 = vmatpush.bf16.msrb.mxu2 %v5881_v15  ;;  %v10044_v36 = vperm.slane %v8097_v47, 0  ;;  %vm10045_vm11 = vcmask 1042434   ;;  %v10068_v27 = vld [vmem:[#allocation99_spill] sm:$0xff]  ;;  %v6633_v62 = vld [vmem:[#allocation2 + $0x684] sm:$0xf0] }
 0x382   : > { %v2254_v1 = vsel %vm10043_vm15, %v2253_v24, %v2252_v9  ;;  %2589 = vmatpush.bf16.msrb.mxu3 %v5885_v19  ;;  %v10046_v22 = vperm.slane %v8003_v14, 0  ;;  %v10047_v45 = vperm.slane %v8046_v61, 0  ;;  %v10049_v13 = vperm.slane %v8137_v23, 0  ;;  %v10063_v19 = vld [vmem:[#allocation11_spill] sm:$0xff]  ;;  %v5998_v9 = vld [vmem:[#allocation2 + $0x680] sm:$0xf] }
 0x383   : > { %v2255_v35 = vpack.c.b16 %v2254_v1, %v2240_v55  ;;  %v2132_v50 = vsel %vm10045_vm11, %v10044_v36, %v2131_v49  ;;  %vm10050_vm4 = vcmask 1043459   ;;  %v5865_v14 = vor.u32 %v6587_v0, %v5864_v16  ;;  %v5962_v49 = vld [vmem:[#allocation2 + $0x5f0] sm:$0xf]  ;;  %v6624_v55 = vld [vmem:[#allocation2 + $0x5f4] sm:$0xf0] }
 0x384   : > { %v2124_v39 = vsel %vm10048_vm14, %v10047_v45, %v10046_v22  ;;  %v2133_v52 = vsel %vm10050_vm4, %v10049_v13, %v2132_v50  ;;  %v5869_v61 = vor.u32 %v6586_v18, %v5866_v57  ;;  %v10051_v23 = vperm.slane %v8059_v12, 0  ;;  %vm10055_vm7 = vmmov %vm10050_vm4  ;;  %v6632_v16 = vld [vmem:[#allocation2 + $0x674] sm:$0xf0]  ;;  %v5958_v0 = vld [vmem:[#allocation2 + $0x5e0] sm:$0xf] }
 0x385   : > { %2345 = vmatmul.bf16.vlgmr.msra.gmra.mxu2 %v2255_v35  ;;  %2359 = vmatmul.bf16.vlgmr.msra.gmra.mxu3 %v2255_v35  ;;  %v10052_v33 = vperm.slane %v8166_v21, 0  ;;  %vm10053_vm14 = vcmask 1044484   ;;  %v10054_v56 = vperm.slane %v8074_v37, 0  ;;  %v10056_v12 = vperm.slane %v8170_v10, 0  ;;  %vm10059_vm4 = vmmov %vm10038_vm1  ;;  %v6623_v18 = vld [vmem:[#allocation2 + $0x5e4] sm:$0xf0] }
 0x386   : > { %2576 = vmatpush.bf16.msrb.mxu2 %v5873_v4  ;;  %2590 = vmatpush.bf16.msrb.mxu3 %v5877_v43  ;;  %v2125_v47 = vsel %vm10045_vm11, %v10051_v23, %v2124_v39  ;;  %vm10057_vm11 = vcmask 1045509   ;;  %v2123_v48 = vperm.slane %v8248_v34, 0  ;;  %v10058_v3 = vperm.slane %v8078_v32, 0  ;;  %v10066_v34 = vld [vmem:[#allocation94_spill] sm:$0xff]  ;;  %v5994_v4 = vld [vmem:[#allocation2 + $0x670] sm:$0xf] }
 0x387   : > { %v2134_v41 = vsel %vm10053_vm14, %v10052_v33, %v2133_v52  ;;  %v2126_v29 = vsel %vm10055_vm7, %v10054_v56, %v2125_v47  ;;  %v10060_v37 = vperm.slane %v8082_v54, 0  ;;  %vm10061_vm7 = vmmov %vm10057_vm11  ;;  %v10062_v59 = vand.u32 3, %v7074_v2  ;;  %v5966_v2 = vld [vmem:[#allocation2 + $0x600] sm:$0xf]  ;;  %v6631_v50 = vld [vmem:[#allocation2 + $0x664] sm:$0xf0] }
 0x388   : > { %v2135_v21 = vsel %vm10057_vm11, %v10056_v12, %v2134_v41  ;;  %v2127_v7 = vsel %vm10053_vm14, %v10058_v3, %v2126_v29  ;;  %v10064_v10 = vand.u32 3, %v10063_v19  ;;  %vm10065_vm11 = vcmask 1046528   ;;  %v5990_v57 = vld [vmem:[#allocation2 + $0x660] sm:$0xf]  ;;  %v5954_v45 = vld [vmem:[#allocation2 + $0x5d0] sm:$0xf] }
 0x389   : > { %v2136_v15 = vsel %vm10059_vm4, %v2123_v48, %v2135_v21  ;;  %v2128_v6 = vsel %vm10061_vm7, %v10060_v37, %v2127_v7  ;;  %vm6725_vm15 = vcmp.ne.s32.totalorder %v10062_v59, 3  ;;  %v10067_v40 = vperm.slane %v10066_v34, 0  ;;  %v6622_v39 = vld [vmem:[#allocation2 + $0x5d4] sm:$0xf0]  ;;  %v5986_v13 = vld [vmem:[#allocation2 + $0x650] sm:$0xf] }
 0x38a   : > { %2577 = vmatpush.bf16.msrb.mxu2 %v5865_v14  ;;  %2591 = vmatpush.bf16.msrb.mxu3 %v5869_v61  ;;  %vm6726_vm5 = vcmp.ne.s32.totalorder %v10064_v10, 3  ;;  %v2139_v25 = vsel %vm10065_vm11, %v2136_v15, 0.0  ;;  %v10069_v46 = vperm.slane %v10068_v27, 0  ;;  %vm10070_vm14 = vcmask 1047559   ;;  %v6630_v14 = vld [vmem:[#allocation2 + $0x654] sm:$0xf0] }
 0x38b   : > { %v2129_v32 = vsel %vm10038_vm1, %v10067_v40, %v2128_v6  ;;  %vm8331_vm4 = vmpackc.low %vm6725_vm15, %vm6726_vm5  ;;  %v5967_v31 = vor.u32 %v6625_v28, %v5966_v2  ;;  %v5999_v1 = vor.u32 %v6633_v62, %v5998_v9  ;;  %v5963_v35 = vor.u32 %v6624_v55, %v5962_v49  ;;  %v5950_v61 = vld [vmem:[#allocation2 + $0x5c0] sm:$0xf]  ;;  %v6621_v23 = vld [vmem:[#allocation2 + $0x5c4] sm:$0xf0] }
 0x38c   : > { %v2130_v24 = vsel %vm10070_vm14, %v10069_v46, %v2129_v32  ;;  %v5995_v43 = vor.u32 %v6632_v16, %v5994_v4  ;;  %v5959_v36 = vor.u32 %v6623_v18, %v5958_v0  ;;  %v5991_v22 = vor.u32 %v6631_v50, %v5990_v57  ;;  %v5982_v33 = vld [vmem:[#allocation2 + $0x640] sm:$0xf]  ;;  %v6629_v41 = vld [vmem:[#allocation2 + $0x644] sm:$0xf0]  ;;  %v5946_v37 = vld [vmem:[#allocation2 + $0x5b0] sm:$0xf] }
 0x38d   : > { %v5929_v53 = vpack.c.bf16 %v2139_v25, %v2130_v24  ;;  %2816 = vmatpush.bf16.msra.mxu0 %v5967_v31  ;;  %2830 = vmatpush.bf16.msra.mxu1 %v5999_v1  ;;  %v5955_v52 = vor.u32 %v6622_v39, %v5954_v45  ;;  %v5987_v47 = vor.u32 %v6630_v14, %v5986_v13  ;;  %v6030_v56 = vld [vmem:[#allocation2 + $0x500] sm:$0xf]  ;;  %v6609_v12 = vld [vmem:[#allocation2 + $0x504] sm:$0xf0]  ;;  %v6620_v6 = vld [vmem:[#allocation2 + $0x5b4] sm:$0xf0] }
 0x38e   : > { %v5951_v29 = vor.u32 %v6621_v23, %v5950_v61  ;;  %v6062_v21 = vld [vmem:[#allocation2 + $0x580] sm:$0xf]  ;;  %v6617_v48 = vld [vmem:[#allocation2 + $0x584] sm:$0xf0]  ;;  %v5983_v3 = vor.u32 %v6629_v41, %v5982_v33  ;;  %v6031_v7 = vor.u32 %v6609_v12, %v6030_v56  ;;  %v5978_v59 = vld [vmem:[#allocation2 + $0x630] sm:$0xf]  ;;  %v5947_v19 = vor.u32 %v6620_v6, %v5946_v37 }
 0x38f   : > { %v6063_v15 = vor.u32 %v6617_v48, %v6062_v21  ;;  %v6628_v10 = vld [vmem:[#allocation2 + $0x634] sm:$0xf0]  ;;  %v6026_v25 = vld [vmem:[#allocation2 + $0x4f0] sm:$0xf]  ;;  %v5942_v24 = vld [vmem:[#allocation2 + $0x5a0] sm:$0xf] }
 0x390   : > { %2940 = vmatpush.bf16.msra.mxu2 %v6031_v7  ;;  %v6608_v34 = vld [vmem:[#allocation2 + $0x4f4] sm:$0xf0]  ;;  %v5979_v40 = vor.u32 %v6628_v10, %v5978_v59  ;;  %v6058_v27 = vld [vmem:[#allocation2 + $0x570] sm:$0xf]  ;;  %v6619_v2 = vld [vmem:[#allocation2 + $0x5a4] sm:$0xf0] }
 0x391   : > { %2817 = vmatpush.bf16.msra.mxu0 %v5963_v35  ;;  %2831 = vmatpush.bf16.msra.mxu1 %v5995_v43  ;;  %v6027_v32 = vor.u32 %v6608_v34, %v6026_v25  ;;  %v6616_v46 = vld [vmem:[#allocation2 + $0x574] sm:$0xf0]  ;;  %v5974_v28 = vld [vmem:[#allocation2 + $0x620] sm:$0xf]  ;;  %v6627_v9 = vld [vmem:[#allocation2 + $0x624] sm:$0xf0]  ;;  %v5943_v31 = vor.u32 %v6619_v2, %v5942_v24 }
 0x392   : > { %2954 = vmatpush.bf16.msra.mxu3 %v6063_v15  ;;  %v5975_v62 = vor.u32 %v6627_v9, %v5974_v28  ;;  %v6022_v49 = vld [vmem:[#allocation2 + $0x4e0] sm:$0xf]  ;;  %v6607_v55 = vld [vmem:[#allocation2 + $0x4e4] sm:$0xf0]  ;;  %v5938_v43 = vld [vmem:[#allocation2 + $0x590] sm:$0xf] }
 0x393   : > { %v6054_v1 = vld [vmem:[#allocation2 + $0x560] sm:$0xf]  ;;  %v6023_v4 = vor.u32 %v6607_v55, %v6022_v49  ;;  %v6615_v16 = vld [vmem:[#allocation2 + $0x564] sm:$0xf0]  ;;  %v6618_v0 = vld [vmem:[#allocation2 + $0x594] sm:$0xf0] }
 0x394   : > { %2941 = vmatpush.bf16.msra.mxu2 %v6027_v32  ;;  %v6055_v35 = vor.u32 %v6615_v16, %v6054_v1  ;;  %v5939_v18 = vor.u32 %v6618_v0, %v5938_v43  ;;  %v5970_v57 = vld [vmem:[#allocation2 + $0x610] sm:$0xf]  ;;  %v6606_v45 = vld [vmem:[#allocation2 + $0x4d4] sm:$0xf0]  ;;  %v6104_v61 = vld [vmem:[#allocation2 + $0x700] sm:$0xf] }
 0x395   : > { %5930 = vmatmul.msk.bf16.vlgmr.msrb.gmra.mxu2 %vm8331_vm4, %v5929_v53  ;;  %5935 = vmatmul.msk.bf16.vlgmr.msrb.gmra.mxu3 %vm8331_vm4, %v5929_v53  ;;  %v6059_v53 = vor.u32 %v6616_v46, %v6058_v27  ;;  %v6018_v50 = vld [vmem:[#allocation2 + $0x4d0] sm:$0xf]  ;;  %v6614_v13 = vld [vmem:[#allocation2 + $0x554] sm:$0xf0]  ;;  %v6641_v23 = vld [vmem:[#allocation2 + $0x704] sm:$0xf0] }
 0x396   : > { %2818 = vmatpush.bf16.msra.mxu0 %v5959_v36  ;;  %2832 = vmatpush.bf16.msra.mxu1 %v5991_v22  ;;  %v6626_v36 = vld [vmem:[#allocation2 + $0x614] sm:$0xf0]  ;;  %v6050_v39 = vld [vmem:[#allocation2 + $0x550] sm:$0xf]  ;;  %v6105_v33 = vor.u32 %v6641_v23, %v6104_v61  ;;  %v6649_v41 = vld [vmem:[#allocation2 + $0x784] sm:$0xf0] }
 0x397   : > { %2955 = vmatpush.bf16.msra.mxu3 %v6059_v53  ;;  %v5971_v22 = vor.u32 %v6626_v36, %v5970_v57  ;;  %v6051_v14 = vor.u32 %v6614_v13, %v6050_v39  ;;  %v6014_v56 = vld [vmem:[#allocation2 + $0x4c0] sm:$0xf]  ;;  %v6100_v7 = vld [vmem:[#allocation2 + $0x6f0] sm:$0xf]  ;;  %v6640_v37 = vld [vmem:[#allocation2 + $0x6f4] sm:$0xf0] }
 0x398   : > { %2942 = vmatpush.bf16.msra.mxu2 %v6023_v4  ;;  %v6046_v48 = vld [vmem:[#allocation2 + $0x540] sm:$0xf]  ;;  %v6132_v6 = vld [vmem:[#allocation2 + $0x770] sm:$0xf]  ;;  %v6648_v59 = vld [vmem:[#allocation2 + $0x774] sm:$0xf0]  ;;  %v6101_v25 = vor.u32 %v6640_v37, %v6100_v7 }
 0x399   : > { %v6133_v34 = vor.u32 %v6648_v59, %v6132_v6  ;;  %v6604_v32 = vld [vmem:[#allocation2 + $0x4b4] sm:$0xf0]  ;;  %v6042_v27 = vld [vmem:[#allocation2 + $0x530] sm:$0xf]  ;;  %v6096_v53 = vld [vmem:[#allocation2 + $0x6e0] sm:$0xf] }
 0x39a   : > { %2819 = vmatpush.bf16.msra.mxu0 %v5955_v52  ;;  %2833 = vmatpush.bf16.msra.mxu1 %v5987_v47  ;;  %v6019_v52 = vor.u32 %v6606_v45, %v6018_v50  ;;  %v6136_v47 = vld [vmem:[#allocation2 + $0x780] sm:$0xf]  ;;  %v6612_v24 = vld [vmem:[#allocation2 + $0x534] sm:$0xf0]  ;;  %v6639_v2 = vld [vmem:[#allocation2 + $0x6e4] sm:$0xf0] }
 0x39b   : > { %2956 = vmatpush.bf16.msra.mxu3 %v6055_v35  ;;  %v6137_v12 = vor.u32 %v6649_v41, %v6136_v47  ;;  %v6043_v28 = vor.u32 %v6612_v24, %v6042_v27  ;;  %v6097_v9 = vor.u32 %v6639_v2, %v6096_v53  ;;  %v6006_v49 = vld [vmem:[#allocation2 + $0x4a0] sm:$0xf]  ;;  %v6603_v1 = vld [vmem:[#allocation2 + $0x4a4] sm:$0xf0]  ;;  %v6092_v0 = vld [vmem:[#allocation2 + $0x6d0] sm:$0xf] }
 0x39c   : > { %2943 = vmatpush.bf16.msra.mxu2 %v6019_v52  ;;  %v6038_v4 = vld [vmem:[#allocation2 + $0x520] sm:$0xf]  ;;  %v6611_v16 = vld [vmem:[#allocation2 + $0x524] sm:$0xf0]  ;;  %v6007_v35 = vor.u32 %v6603_v1, %v6006_v49  ;;  %v6124_v57 = vld [vmem:[#allocation2 + $0x750] sm:$0xf] }
 0x39d   : > { %v6039_v43 = vor.u32 %v6611_v16, %v6038_v4  ;;  %v6646_v45 = vld [vmem:[#allocation2 + $0x754] sm:$0xf0]  ;;  %v6002_v39 = vld [vmem:[#allocation2 + $0x490] sm:$0xf]  ;;  %v6088_v23 = vld [vmem:[#allocation2 + $0x6c0] sm:$0xf] }
 0x39e   : > { %2820 = vmatpush.bf16.msra.mxu0 %v5951_v29  ;;  %2834 = vmatpush.bf16.msra.mxu1 %v5983_v3  ;;  %v6605_v29 = vld [vmem:[#allocation2 + $0x4c4] sm:$0xf0]  ;;  %v6602_v13 = vld [vmem:[#allocation2 + $0x494] sm:$0xf0]  ;;  %v6125_v52 = vor.u32 %v6646_v45, %v6124_v57  ;;  %v6120_v41 = vld [vmem:[#allocation2 + $0x740] sm:$0xf] }
 0x39f   : > { %2957 = vmatpush.bf16.msra.mxu3 %v6051_v14  ;;  %v6015_v21 = vor.u32 %v6605_v29, %v6014_v56  ;;  %v6613_v3 = vld [vmem:[#allocation2 + $0x544] sm:$0xf0]  ;;  %v6034_v14 = vld [vmem:[#allocation2 + $0x510] sm:$0xf]  ;;  %v6610_v61 = vld [vmem:[#allocation2 + $0x514] sm:$0xf0]  ;;  %v6003_v47 = vor.u32 %v6602_v13, %v6002_v39 }
 0x3a0   : > { %v6047_v15 = vor.u32 %v6613_v3, %v6046_v48  ;;  %v6645_v56 = vld [vmem:[#allocation2 + $0x744] sm:$0xf0]  ;;  %v6035_v29 = vor.u32 %v6610_v61, %v6034_v14  ;;  %v6084_v7 = vld [vmem:[#allocation2 + $0x6b0] sm:$0xf]  ;;  %v6644_v6 = vld [vmem:[#allocation2 + $0x734] sm:$0xf0] }
 0x3a1   : > { %2944 = vmatpush.bf16.msra.mxu2 %v6015_v21  ;;  %v6121_v3 = vor.u32 %v6645_v56, %v6120_v41  ;;  %v6116_v37 = vld [vmem:[#allocation2 + $0x730] sm:$0xf]  ;;  %v2145_v59 = vld [vmem:[#allocation5 + $0x4] ss:$8 sm:$0x3]  ;;  %vm10073_vm1 = vcmask 1040384   ;;  %vm10078_vm14 = vmmov %vm10065_vm11 }
 0x3a2   : > { %2821 = vmatpush.bf16.msra.mxu0 %v5947_v19  ;;  %2835 = vmatpush.bf16.msra.mxu1 %v5979_v40  ;;  %v6010_v40 = vld [vmem:[#allocation2 + $0x4b0] sm:$0xf]  ;;  %v6080_v24 = vld [vmem:[#allocation2 + $0x6a0] sm:$0xf]  ;;  %v6635_v53 = vld [vmem:[#allocation2 + $0x6a4] sm:$0xf0] }
 0x3a3   : > { %2958 = vmatpush.bf16.msra.mxu3 %v6047_v15  ;;  %v6011_v46 = vor.u32 %v6604_v32, %v6010_v40  ;;  %v6636_v15 = vld [vmem:[#allocation2 + $0x6b4] sm:$0xf0]  ;;  %v2604_v49 = vperm.slane %v2145_v59, 1  ;;  %v6076_v1 = vld [vmem:[#allocation2 + $0x690] sm:$0xf]  ;;  %vm10074_vm5 = vmmov %vm10073_vm1 }
 0x3a4   : > { %v6634_v4 = vld [vmem:[#allocation2 + $0x694] sm:$0xf0]  ;;  %vm10075_vm15 = vmmov %vm10073_vm1  ;;  %v10081_v54 = vld [vmem:[#allocation89_spill] sm:$0xff] }
 0x3a5   : > { %2945 = vmatpush.bf16.msra.mxu2 %v6011_v46  ;;  %v6117_v46 = vor.u32 %v6644_v6, %v6116_v37  ;;  %v6077_v45 = vor.u32 %v6634_v4, %v6076_v1  ;;  %vm10076_vm7 = vmmov %vm10073_vm1 }
 0x3a6   : > { %2822 = vmatpush.bf16.msra.mxu0 %v5943_v31  ;;  %2836 = vmatpush.bf16.msra.mxu1 %v5975_v62  ;;  %v6128_v31 = vld [vmem:[#allocation2 + $0x760] sm:$0xf]  ;;  %v6647_v62 = vld [vmem:[#allocation2 + $0x764] sm:$0xf0] }
 0x3a7   : > { %v6129_v55 = vor.u32 %v6647_v62, %v6128_v31  ;;  %2959 = vmatpush.bf16.msra.mxu3 %v6043_v28  ;;  %v2603_v28 = vperm.slane %v2145_v59, 0  ;;  %v6643_v31 = vld [vmem:[#allocation2 + $0x724] sm:$0xf0] }
 0x3a9   : > { %2946 = vmatpush.bf16.msra.mxu2 %v6007_v35  ;;  %v6642_v35 = vld [vmem:[#allocation2 + $0x714] sm:$0xf0] }
 0x3aa   : > { %2823 = vmatpush.bf16.msra.mxu0 %v5939_v18  ;;  %2837 = vmatpush.bf16.msra.mxu1 %v5971_v22  ;;  %v6638_v18 = vld [vmem:[#allocation2 + $0x6d4] sm:$0xf0] }
 0x3ab   : > { %v6093_v22 = vor.u32 %v6638_v18, %v6092_v0  ;;  %2960 = vmatpush.bf16.msra.mxu3 %v6039_v43 }
 0x3ad   : > { %2947 = vmatpush.bf16.msra.mxu2 %v6003_v47 }
 0x3ae   : > { %3098 = vmatpush.bf16.msrb.mxu0 %v6105_v33  ;;  %3112 = vmatpush.bf16.msrb.mxu1 %v6137_v12  ;;  %v6637_v33 = vld [vmem:[#allocation2 + $0x6c4] sm:$0xf0] }
 0x3af   : > { %v6089_v12 = vor.u32 %v6637_v33, %v6088_v23  ;;  %2961 = vmatpush.bf16.msra.mxu3 %v6035_v29 }
 0x3b2   : > { %3099 = vmatpush.bf16.msrb.mxu0 %v6101_v25  ;;  %3113 = vmatpush.bf16.msrb.mxu1 %v6133_v34  ;;  %v6085_v34 = vor.u32 %v6636_v15, %v6084_v7 }
 0x3b6   : > { %3100 = vmatpush.bf16.msrb.mxu0 %v6097_v9  ;;  %3114 = vmatpush.bf16.msrb.mxu1 %v6129_v55  ;;  %v6112_v9 = vld [vmem:[#allocation2 + $0x720] sm:$0xf]  ;;  %v6081_v55 = vor.u32 %v6635_v53, %v6080_v24 }
 0x3ba   : > { %3101 = vmatpush.bf16.msrb.mxu0 %v6093_v22  ;;  %3115 = vmatpush.bf16.msrb.mxu1 %v6125_v52 }
 0x3be   : > { %3102 = vmatpush.bf16.msrb.mxu0 %v6089_v12  ;;  %3116 = vmatpush.bf16.msrb.mxu1 %v6121_v3 }
 0x3c2   : > { %3103 = vmatpush.bf16.msrb.mxu0 %v6085_v34  ;;  %3117 = vmatpush.bf16.msrb.mxu1 %v6117_v46  ;;  %v10087_v34 = vld [vmem:[#allocation92_spill] sm:$0xff] }
 0x3c6   : > { %3104 = vmatpush.bf16.msrb.mxu0 %v6081_v55 }
 0x3ca   : > { %3105 = vmatpush.bf16.msrb.mxu0 %v6077_v45 }
 0x3ef   : > { %v2454_v21 = vpop.f32.mrf.mxu0  ;;  %v2468_v48 = vpop.f32.mrf.mxu1 }
 0x3f7   : > { %v2456_v43 = vpop.f32.mrf.mxu0  ;;  %v2470_v0 = vpop.f32.mrf.mxu1 }
 0x408   : > { %v8339_v19 = vpop.f32.mrf.mxu2  ;;  %v8341_v10 = vpop.f32.mrf.mxu3 }
 0x409   : > { %v2455_v25 = vadd.f32 %v2454_v21, %v8339_v19  ;;  %v2469_v40 = vadd.f32 %v2468_v48, %v8341_v10  ;;  %v6113_v19 = vor.u32 %v6643_v31, %v6112_v9  ;;  %v6108_v10 = vld [vmem:[#allocation2 + $0x710] sm:$0xf] }
 0x40a   : > { %v6109_v52 = vor.u32 %v6642_v35, %v6108_v10 }
 0x40b   : > { %3118 = vmatpush.bf16.msrb.mxu1 %v6113_v19 }
 0x40f   : > { %3119 = vmatpush.bf16.msrb.mxu1 %v6109_v52 }
 0x410   : > { %v2348_v36 = vpop.f32.mrf.mxu2  ;;  %v2362_v50 = vpop.f32.mrf.mxu3 }
 0x411   : > { %v2457_v57 = vadd.f32 %v2456_v43, %v2348_v36  ;;  %v2471_v22 = vadd.f32 %v2470_v0, %v2362_v50 }
 0x418   : > { %v2579_v32 = vpop.f32.mrf.mxu2  ;;  %v2593_v27 = vpop.f32.mrf.mxu3 }
 0x419   : > { %v2598_v2 = vadd.f32 %v2579_v32, %v2455_v25  ;;  %v2599_v62 = vadd.f32 %v2593_v27, %v2469_v40 }
 0x41b   : > { %v2607_v16 = vadd.f32 %v2603_v28, %v2598_v2  ;;  %v2608_v18 = vadd.f32 %v2604_v49, %v2599_v62 }
 0x41d   : > { %v2611_v14 = vmax.f32 %v2607_v16, 0.0  ;;  %v2612_v47 = vmax.f32 %v2608_v18, 0.0 }
 0x41f   : > { %v2619_v56 = vrot.slane %v2611_v14, 7  ;;  %v2620_v21 = vrot.slane %v2612_v47, 7  ;;  %v2635_v27 = vrot.slane %v2611_v14, 1  ;;  %v2638_v46 = vrot.slane %v2612_v47, 1 }
 0x420   : > { %v2581_v39 = vpop.f32.mrf.mxu2  ;;  %v2595_v13 = vpop.f32.mrf.mxu3 }
 0x421   : > { %v2600_v61 = vadd.f32 %v2581_v39, %v2457_v57  ;;  %v2601_v23 = vadd.f32 %v2595_v13, %v2471_v22  ;;  %v2629_v7 = vsel %vm10073_vm1, 0.0, %v2619_v56  ;;  %v2630_v6 = vsel %vm10076_vm7, 0.0, %v2620_v21  ;;  %vm10079_vm1 = vmmov %vm10065_vm11  ;;  %v2651_v57 = vld [vmem:[#allocation5 + $0x5] ss:$0 sm:$0xff] }
 0x422   : > { %vm10086_vm7 = vcmp.ge.f32.partialorder %v7976_v20, %v8019_v38 }
 0x423   : > { %v2609_v33 = vadd.f32 %v2603_v28, %v2600_v61  ;;  %v2610_v41 = vadd.f32 %v2604_v49, %v2601_v23 }
 0x425   : > { %v2613_v29 = vmax.f32 %v2609_v33, 0.0  ;;  %v2614_v12 = vmax.f32 %v2610_v41, 0.0 }
 0x427   : > { %v2621_v36 = vrot.slane %v2613_v29, 7  ;;  %v2623_v50 = vrot.slane %v2614_v12, 7  ;;  %v2686_v48 = vpack.c.bf16 %v2613_v29, %v2611_v14  ;;  %v2687_v3 = vpack.c.bf16 %v2614_v12, %v2612_v47  ;;  %v10082_v14 = vld [vmem:[#allocation88_spill] sm:$0xff] }
 0x428   : > { %v2636_v40 = vrot.slane %v2613_v29, 1  ;;  %v2639_v32 = vrot.slane %v2614_v12, 1  ;;  %v10083_v12 = vld [vmem:[#allocation95_spill] sm:$0xff] }
 0x429   : > { %v2622_v15 = vsel %vm10074_vm5, %v2619_v56, %v2621_v36  ;;  %v2624_v37 = vsel %vm10075_vm15, %v2620_v21, %v2623_v50  ;;  %2824 = vmatmul.bf16.vlgmr.msra.gmra.mxu0 %v2686_v48  ;;  %2838 = vmatmul.bf16.vlgmr.msra.gmra.mxu1 %v2687_v3  ;;  %vm10080_vm5 = vmmov %vm10079_vm1  ;;  %v10084_v21 = vld [vmem:[#allocation90_spill] sm:$0xff]  ;;  %vm10085_vm15 = vcmp.ge.f32.partialorder %v7973_v51, %v7985_v11  ;;  %v10091_v11 = vld [vmem:[#allocation91_spill] sm:$0xff] }
 0x42a   : > { %v6067_v59 = vpack.c.bf16 %v2622_v15, %v2629_v7  ;;  %v6072_v25 = vpack.c.bf16 %v2624_v37, %v2630_v6  ;;  %v2637_v24 = vsel %vm10065_vm11, %v2635_v27, %v2636_v40  ;;  %v2645_v53 = vsel %vm10078_vm14, %v2636_v40, 0.0  ;;  %v6178_v6 = vld [vmem:[#allocation2 + $0x880] sm:$0xf] }
 0x42b   : > { %v2640_v2 = vsel %vm10079_vm1, %v2638_v46, %v2639_v32  ;;  %v2646_v28 = vsel %vm10080_vm5, %v2639_v32, 0.0  ;;  %v6141_v9 = vpack.c.bf16 %v2645_v53, %v2637_v24  ;;  %v10088_v40 = vld [vmem:[#allocation97_spill] sm:$0xff]  ;;  %v6665_v46 = vld [vmem:[#allocation2 + $0x884] sm:$0xf0]  ;;  %vm10090_vm14 = vcmp.ge.f32.partialorder %v7983_v42, %v8021_v5  ;;  %v10092_v24 = vld [vmem:[#allocation96_spill] sm:$0xff] }
 0x42c   : > { %6068 = vmatmul.msk.bf16.vlgmr.msra.gmra.mxu2 %vm8211_vm10, %v6067_v59  ;;  %6073 = vmatmul.msk.bf16.vlgmr.msra.gmra.mxu3 %vm8211_vm10, %v6072_v25  ;;  %v6146_v31 = vpack.c.bf16 %v2646_v28, %v2640_v2  ;;  %vm2016_vm10 = vcmp.ge.f32.partialorder %v10082_v14, %v10081_v54  ;;  %vm10089_vm11 = vcmp.ge.f32.partialorder %v10087_v34, %v10088_v40  ;;  %v6210_v2 = vld [vmem:[#allocation2 + $0x800] sm:$0xf]  ;;  %v6655_v54 = vld [vmem:[#allocation2 + $0x7e4] sm:$0xf0]  ;;  %v6654_v40 = vld [vmem:[#allocation2 + $0x7d4] sm:$0xf0] }
 0x42d   : > { %vm10093_vm1 = vcmp.ge.f32.partialorder %v10091_v11, %v10092_v24  ;;  %vm10094_vm5 = vcmp.ge.f32.partialorder %v7996_v58, %v8009_v8  ;;  %v6179_v58 = vor.u32 %v6665_v46, %v6178_v6  ;;  %v10104_v46 = vld [vmem:[#allocation103_spill] sm:$0xff]  ;;  %v10105_v11 = vld [vmem:[#allocation100_spill] sm:$0xff] }
 0x42f   : > { %3466 = vmatpush.bf16.msrb.mxu2 %v6179_v58 }
 0x439   : > { %6142 = vmatmul.msk.bf16.vlgmr.msrb.gmra.mxu0 %vm8331_vm4, %v6141_v9  ;;  %6147 = vmatmul.msk.bf16.vlgmr.msrb.gmra.mxu1 %vm8331_vm4, %v6146_v31  ;;  %vm2020_vm4 = vcmp.ge.f32.partialorder %v10084_v21, %v10083_v12  ;;  %v6657_v31 = vld [vmem:[#allocation2 + $0x804] sm:$0xf0] }
 0x4a6   : > { %v2825_v62 = vpop.f32.mrf.mxu0  ;;  %v2839_v49 = vpop.f32.mrf.mxu1 }
 0x4a7   : > { %v2840_v4 = vadd.f32 %v2839_v49, %v2825_v62 }
 0x4ae   : > { %v2827_v55 = vpop.f32.mrf.mxu0  ;;  %v2841_v19 = vpop.f32.mrf.mxu1 }
 0x4af   : > { %v2949_v1 = vpop.f32.mrf.mxu2  ;;  %v2963_v10 = vpop.f32.mrf.mxu3  ;;  %v2842_v13 = vadd.f32 %v2841_v19, %v2827_v55 }
 0x4b0   : > { %v2950_v16 = vadd.f32 %v2949_v1, %v2840_v4  ;;  %v6174_v1 = vld [vmem:[#allocation2 + $0x870] sm:$0xf]  ;;  %v6664_v4 = vld [vmem:[#allocation2 + $0x874] sm:$0xf0] }
 0x4b2   : > { %v2964_v0 = vadd.f32 %v2963_v10, %v2950_v16  ;;  %v6211_v16 = vor.u32 %v6657_v31, %v6210_v2  ;;  %v6206_v10 = vld [vmem:[#allocation2 + $0x7f0] sm:$0xf] }
 0x4b4   : > { %3533 = vmatpush.bf16.msrb.mxu3 %v6211_v16 }
 0x4b6   : > { %v3107_v35 = vpop.f32.mrf.mxu0  ;;  %v3121_v43 = vpop.f32.mrf.mxu1 }
 0x4b7   : > { %v3122_v18 = vadd.f32 %v3121_v43, %v3107_v35  ;;  %v2951_v39 = vpop.f32.mrf.mxu2  ;;  %v2965_v37 = vpop.f32.mrf.mxu3  ;;  %v6656_v35 = vld [vmem:[#allocation2 + $0x7f4] sm:$0xf0]  ;;  %v6170_v43 = vld [vmem:[#allocation2 + $0x860] sm:$0xf] }
 0x4b8   : > { %v2952_v61 = vadd.f32 %v2951_v39, %v2842_v13  ;;  %v6663_v39 = vld [vmem:[#allocation2 + $0x864] sm:$0xf0]  ;;  %v6202_v13 = vld [vmem:[#allocation2 + $0x7e0] sm:$0xf] }
 0x4b9   : > { %v3126_v22 = vadd.f32 %v3122_v18, %v2964_v0  ;;  %v10098_v18 = vld [vmem:[#allocation98_spill] sm:$0xff]  ;;  %v6203_v6 = vor.u32 %v6655_v54, %v6202_v13 }
 0x4ba   : > { %v2966_v27 = vadd.f32 %v2965_v37, %v2952_v61  ;;  %v6171_v37 = vor.u32 %v6663_v39, %v6170_v43 }
 0x4bb   : > { %v3128_v45 = vadd.f32 %v3126_v22, %v2651_v57  ;;  %v10099_v22 = vld [vmem:[#allocation93_spill] sm:$0xff] }
 0x4bd   : > { %v8361_v52 = vmax.f32 %v3128_v45, 0.0 }
 0x4be   : > { %v3109_v23 = vpop.f32.mrf.mxu0  ;;  %v3123_v47 = vpop.f32.mrf.mxu1 }
 0x4bf   : > { %v3134_v33 = vrot.slane %v8361_v52, 2  ;;  %v3135_v41 = vrot.slane %v8361_v52, 4  ;;  %v3136_v56 = vrot.slane %v8361_v52, 6  ;;  %v3140_v29 = vrot.slane %v8361_v52, 1 }
 0x4c0   : > { %v8372_v36 = vsel %vm2016_vm10, %v8361_v52, 0.0  ;;  %v3124_v50 = vadd.f32 %v3123_v47, %v3109_v23  ;;  %vm10095_vm10 = vcmask 1041409   ;;  %v6175_v23 = vor.u32 %v6664_v4, %v6174_v1 }
 0x4c1   : > { %v3141_v48 = vrot.slane %v3134_v33, 1  ;;  %v3142_v3 = vrot.slane %v3135_v41, 1  ;;  %v3143_v7 = vrot.slane %v3136_v56, 1  ;;  %v8377_v15 = vsel %vm10085_vm15, %v3140_v29, 0.0 }
 0x4c2   : > { %v8382_v59 = vsel %vm10086_vm7, %v3134_v33, 0.0  ;;  %v8384_v25 = vsel %vm2020_vm4, %v3135_v41, 0.0  ;;  %v8389_v32 = vsel %vm10089_vm11, %v3136_v56, 0.0  ;;  %v3196_v38 = vperm.slane %v8372_v36, 0  ;;  %v6252_v33 = vld [vmem:[#allocation2 + $0x900] sm:$0xf]  ;;  %3467 = vmatpush.bf16.msrb.mxu2 %v6175_v23 }
 0x4c3   : > { %v8394_v51 = vsel %vm10090_vm14, %v3141_v48, 0.0  ;;  %v8399_v20 = vsel %vm10093_vm1, %v3142_v3, 0.0  ;;  %v3197_v53 = vperm.slane %v8377_v15, 0  ;;  %v8406_v28 = vsel %vm10094_vm5, %v3143_v7, 0.0  ;;  %v6673_v41 = vld [vmem:[#allocation2 + $0x904] sm:$0xf0] }
 0x4c4   : > { %v3198_v9 = vperm.slane %v8382_v59, 0  ;;  %v3199_v42 = vperm.slane %v8394_v51, 0  ;;  %v3200_v5 = vperm.slane %v8384_v25, 0  ;;  %v3201_v62 = vperm.slane %v8399_v20, 0  ;;  %v8419_v56 = vld [vmem:[#allocation2 + $0x850] sm:$0xf] }
 0x4c5   : > { %v3202_v49 = vperm.slane %v8389_v32, 0  ;;  %v3212_v55 = vsel %vm10095_vm10, %v3197_v53, %v3196_v38  ;;  %v3127_v19 = vadd.f32 %v3124_v50, %v2966_v27  ;;  %vm10096_vm4 = vcmask 1042434   ;;  %v6662_v48 = vld [vmem:[#allocation2 + $0x854] sm:$0xf0]  ;;  %v6198_v3 = vld [vmem:[#allocation2 + $0x7d0] sm:$0xf] }
 0x4c6   : > { %v3213_v8 = vsel %vm10096_vm4, %v3198_v9, %v3212_v55  ;;  %vm10097_vm15 = vcmask 1043459   ;;  %vm2024_vm7 = vcmp.ge.f32.partialorder %v10099_v22, %v10098_v18  ;;  %vm10100_vm11 = vcmask 1044484   ;;  %3468 = vmatpush.bf16.msrb.mxu2 %v6171_v37  ;;  %v10123_v37 = vld [vmem:[#allocation106_spill] sm:$0xff] }
 0x4c7   : > { %v3214_v0 = vsel %vm10097_vm15, %v3199_v42, %v3213_v8  ;;  %v3129_v45 = vadd.f32 %v3127_v19, %v2651_v57  ;;  %v6207_v47 = vor.u32 %v6656_v35, %v6206_v10  ;;  %v3203_v29 = vperm.slane %v8406_v28, 0 }
 0x4c8   : > { %v3215_v61 = vsel %vm10100_vm11, %v3200_v5, %v3214_v0  ;;  %vm10101_vm14 = vcmask 1045509   ;;  %v6253_v57 = vor.u32 %v6673_v41, %v6252_v33  ;;  %vm10102_vm1 = vcmask 1046534   ;;  %v6672_v33 = vld [vmem:[#allocation2 + $0x8f4] sm:$0xf0]  ;;  %v6162_v41 = vld [vmem:[#allocation2 + $0x840] sm:$0xf] }
 0x4c9   : > { %v3216_v12 = vsel %vm10101_vm14, %v3201_v62, %v3215_v61  ;;  %v8423_v50 = vmax.f32 %v3129_v45, 0.0  ;;  %v6167_v34 = vor.u32 %v6662_v48, %v8419_v56  ;;  %vm10103_vm5 = vcmask 1047559   ;;  %3534 = vmatpush.bf16.msrb.mxu3 %v6207_v47  ;;  %v6248_v47 = vld [vmem:[#allocation2 + $0x8f0] sm:$0xf]  ;;  %v6661_v56 = vld [vmem:[#allocation2 + $0x844] sm:$0xf0] }
 0x4ca   : > { %v3217_v7 = vsel %vm10102_vm1, %v3202_v49, %v3216_v12  ;;  %vm2028_vm10 = vcmp.ge.f32.partialorder %v10105_v11, %v10104_v46  ;;  %3618 = vmatpush.bf16.msra.mxu0 %v6253_v57  ;;  %v6199_v5 = vor.u32 %v6654_v40, %v6198_v3  ;;  %vm10106_vm4 = vcmp.ge.f32.partialorder %v8032_v63, %v8068_v44  ;;  %v6158_v3 = vld [vmem:[#allocation2 + $0x830] sm:$0xf] }
 0x4cb   : > { %v3218_v27 = vsel %vm10103_vm5, %v3203_v29, %v3217_v7  ;;  %v3137_v24 = vrot.slane %v8423_v50, 2  ;;  %v3138_v38 = vrot.slane %v8423_v50, 4  ;;  %v3139_v53 = vrot.slane %v8423_v50, 6  ;;  %v6653_v29 = vld [vmem:[#allocation2 + $0x7c4] sm:$0xf0]  ;;  %3469 = vmatpush.bf16.msrb.mxu2 %v6167_v34 }
 0x4cc   : > { %v3228_v2 = vsub.f32 %v8361_v52, %v3218_v27  ;;  %v3144_v9 = vrot.slane %v8423_v50, 1  ;;  %v8439_v42 = vsel %vm2024_vm7, %v8423_v50, 0.0  ;;  %vm10107_vm15 = vcmask 1040384   ;;  %v6660_v7 = vld [vmem:[#allocation2 + $0x834] sm:$0xf0] }
 0x4cd   : > { %v3145_v31 = vrot.slane %v3137_v24, 1  ;;  %v3146_v62 = vrot.slane %v3138_v38, 1  ;;  %v3147_v49 = vrot.slane %v3139_v53, 1  ;;  %v8444_v55 = vsel %vm10106_vm4, %v3137_v24, 0.0  ;;  %3535 = vmatpush.bf16.msrb.mxu3 %v6203_v6  ;;  %vm10108_vm7 = vmmov %vm10107_vm15  ;;  %v10124_v6 = vld [vmem:[#allocation108_spill] sm:$0xff] }
 0x4ce   : > { %v3232_v52 = vrot.slane %v3228_v2, 1  ;;  %v3233_v19 = vrot.slane %v3228_v2, 2  ;;  %v3234_v1 = vrot.slane %v3228_v2, 3  ;;  %v3235_v4 = vrot.slane %v3228_v2, 4  ;;  %vm10109_vm11 = vmmov %vm10108_vm7 }
 0x4cf   : > { %v3236_v8 = vrot.slane %v3228_v2, 5  ;;  %v3237_v58 = vrot.slane %v3228_v2, 6  ;;  %v3238_v16 = vrot.slane %v3228_v2, 7  ;;  %v3246_v10 = vperm.slane %v3228_v2, 0  ;;  %vm10110_vm14 = vmmov %vm10108_vm7 }
 0x4d0   : > { %v3247_v35 = vperm.slane %v3232_v52, 0  ;;  %v3248_v43 = vperm.slane %v3233_v19, 0  ;;  %v3249_v0 = vperm.slane %v3234_v1, 0  ;;  %v3250_v18 = vperm.slane %v3235_v4, 0  ;;  %vm10111_vm1 = vmmov %vm10108_vm7  ;;  %v6652_v52 = vld [vmem:[#allocation2 + $0x7b4] sm:$0xf0] }
 0x4d1   : > { %v3251_v45 = vperm.slane %v3236_v8, 0  ;;  %v3252_v39 = vperm.slane %v3237_v58, 0  ;;  %v3253_v13 = vperm.slane %v3238_v16, 0  ;;  %v3278_v63 = vsel %vm10107_vm15, %v8372_v36, %v3246_v10  ;;  %vm10112_vm5 = vmmov %vm10111_vm1  ;;  %3536 = vmatpush.bf16.msrb.mxu3 %v6199_v5  ;;  %v6240_v4 = vld [vmem:[#allocation2 + $0x8d0] sm:$0xf] }
 0x4d2   : > { %v3279_v44 = vsel %vm10108_vm7, %v8377_v15, %v3247_v35  ;;  %v3280_v54 = vsel %vm10109_vm11, %v8382_v59, %v3248_v43  ;;  %v3281_v61 = vsel %vm10110_vm14, %v8394_v51, %v3249_v0  ;;  %v3282_v23 = vsel %vm10111_vm1, %v8384_v25, %v3250_v18  ;;  %3310 = vst [vmem:[#allocation1] ss:$4 sm:$0xff] %v3278_v63  ;;  %vm10113_vm4 = vmmov %vm10111_vm1  ;;  %v6194_v25 = vld [vmem:[#allocation2 + $0x7c0] sm:$0xf]  ;;  %v6670_v8 = vld [vmem:[#allocation2 + $0x8d4] sm:$0xf0] }
 0x4d3   : > { %v3283_v36 = vsel %vm10112_vm5, %v8399_v20, %v3251_v45  ;;  %v3284_v15 = vsel %vm10113_vm4, %v8389_v32, %v3252_v39  ;;  %vm10114_vm15 = vmmov %vm10111_vm1  ;;  %3312 = vst [vmem:[#allocation1 + $0x1] ss:$4 sm:$0xff] %v3279_v44  ;;  %vm10115_vm7 = vcmp.ge.f32.partialorder %v8029_v26, %v8061_v17  ;;  %vm10116_vm11 = vcmp.ge.f32.partialorder %v8035_v60, %v8070_v30  ;;  %v10117_v20 = vld [vmem:[#allocation101_spill] sm:$0xff]  ;;  %v10120_v26 = vld [vmem:[#allocation102_spill] sm:$0xff] }
 0x4d4   : > { %v3285_v59 = vsel %vm10114_vm15, %v8406_v28, %v3253_v13  ;;  %v8465_v51 = vsel %vm10115_vm7, %v3144_v9, 0.0  ;;  %3314 = vst [vmem:[#allocation1 + $0x2] ss:$4 sm:$0xff] %v3280_v54  ;;  %v8470_v12 = vsel %vm10116_vm11, %v3145_v31, 0.0  ;;  %v8475_v32 = vsel %vm2028_vm10, %v3138_v38, 0.0  ;;  %v10118_v28 = vld [vmem:[#allocation104_spill] sm:$0xff] }
 0x4d5   : > { %vm10119_vm14 = vcmp.ge.f32.partialorder %v10117_v20, %v10118_v28  ;;  %v10121_v17 = vld [vmem:[#allocation105_spill] sm:$0xff]  ;;  %v6671_v30 = vld [vmem:[#allocation2 + $0x8e4] sm:$0xf0]  ;;  %3318 = vst [vmem:[#allocation1 + $0x20] ss:$4 sm:$0xff] %v3282_v23  ;;  %vm10125_vm10 = vcmp.ge.f32.partialorder %v10123_v37, %v10124_v6  ;;  %v3204_v27 = vperm.slane %v8439_v42, 0  ;;  %v6195_v1 = vor.u32 %v6653_v29, %v6194_v25 }
 0x4d6   : > { %v8480_v57 = vsel %vm10119_vm14, %v3146_v62, 0.0  ;;  %vm10122_vm1 = vcmp.ge.f32.partialorder %v10120_v26, %v10121_v17  ;;  %v6244_v60 = vld [vmem:[#allocation2 + $0x8e0] sm:$0xf]  ;;  %v8490_v40 = vsel %vm10125_vm10, %v3147_v49, 0.0  ;;  %v3205_v46 = vperm.slane %v8465_v51, 0 }
 0x4d7   : > { %v8485_v48 = vsel %vm10122_vm1, %v3139_v53, 0.0  ;;  %v3206_v24 = vperm.slane %v8444_v55, 0  ;;  %v6190_v38 = vld [vmem:[#allocation2 + $0x7b0] sm:$0xf]  ;;  %3322 = vst [vmem:[#allocation1 + $0x22] ss:$4 sm:$0xff] %v3284_v15  ;;  %v6249_v62 = vor.u32 %v6672_v33, %v6248_v47  ;;  %v6163_v49 = vor.u32 %v6661_v56, %v6162_v41  ;;  %3537 = vmatpush.bf16.msrb.mxu3 %v6195_v1 }
 0x4d8   : > { %v3207_v34 = vperm.slane %v8470_v12, 0  ;;  %v3208_v53 = vperm.slane %v8475_v32, 0  ;;  %v3209_v2 = vperm.slane %v8480_v57, 0  ;;  %v3210_v9 = vperm.slane %v8485_v48, 0  ;;  %3316 = vst [vmem:[#allocation1 + $0x3] ss:$4 sm:$0xff] %v3281_v61 }
 0x4d9   : > { %v3211_v5 = vperm.slane %v8490_v40, 0  ;;  %vm10126_vm5 = vcmask 1041409   ;;  %3320 = vst [vmem:[#allocation1 + $0x21] ss:$4 sm:$0xff] %v3283_v36  ;;  %vm10127_vm4 = vcmask 1042434   ;;  %vm10128_vm15 = vcmask 1043459   ;;  %3619 = vmatpush.bf16.msra.mxu0 %v6249_v62  ;;  %3470 = vmatpush.bf16.msrb.mxu2 %v6163_v49 }
 0x4da   : > { %v3219_v31 = vsel %vm10126_vm5, %v3205_v46, %v3204_v27  ;;  %v6154_v58 = vld [vmem:[#allocation2 + $0x820] sm:$0xf]  ;;  %3324 = vst [vmem:[#allocation1 + $0x23] ss:$4 sm:$0xff] %v3285_v59  ;;  %v6245_v10 = vor.u32 %v6671_v30, %v6244_v60  ;;  %v6159_v35 = vor.u32 %v6660_v7, %v6158_v3  ;;  %v6659_v43 = vld [vmem:[#allocation2 + $0x824] sm:$0xf0]  ;;  %v6191_v45 = vor.u32 %v6652_v52, %v6190_v38 }
 0x4db   : > { %v3220_v19 = vsel %vm10127_vm4, %v3206_v24, %v3219_v31  ;;  %v6186_v0 = vld [vmem:[#allocation2 + $0x7a0] sm:$0xf]  ;;  %vm10129_vm7 = vcmask 1044484   ;;  %v6651_v39 = vld [vmem:[#allocation2 + $0x7a4] sm:$0xf0]  ;;  %vm10130_vm11 = vcmask 1045509   ;;  %v6241_v15 = vor.u32 %v6670_v8, %v6240_v4 }
 0x4dc   : > { %v3221_v16 = vsel %vm10128_vm15, %v3207_v34, %v3220_v19  ;;  %v6236_v13 = vld [vmem:[#allocation2 + $0x8c0] sm:$0xf]  ;;  %v6669_v63 = vld [vmem:[#allocation2 + $0x8c4] sm:$0xf0]  ;;  %v6150_v54 = vld [vmem:[#allocation2 + $0x810] sm:$0xf]  ;;  %v6155_v59 = vor.u32 %v6659_v43, %v6154_v58  ;;  %3538 = vmatpush.bf16.msrb.mxu3 %v6191_v45  ;;  %v6187_v29 = vor.u32 %v6651_v39, %v6186_v0 }
 0x4dd   : > { %v3222_v18 = vsel %vm10129_vm7, %v3208_v53, %v3221_v16  ;;  %v6658_v61 = vld [vmem:[#allocation2 + $0x814] sm:$0xf0]  ;;  %v6182_v23 = vld [vmem:[#allocation2 + $0x790] sm:$0xf]  ;;  %vm10131_vm14 = vcmask 1046534   ;;  %vm10132_vm1 = vcmask 1047559   ;;  %3620 = vmatpush.bf16.msra.mxu0 %v6245_v10  ;;  %3471 = vmatpush.bf16.msrb.mxu2 %v6159_v35  ;;  %v6237_v20 = vor.u32 %v6669_v63, %v6236_v13 }
 0x4de   : > { %v3223_v44 = vsel %vm10130_vm11, %v3209_v2, %v3222_v18  ;;  %v6650_v33 = vld [vmem:[#allocation2 + $0x794] sm:$0xf0]  ;;  %v8506_v41 = vld [vmem:[#allocation2 + $0x8b0] sm:$0xf]  ;;  %v6151_v26 = vor.u32 %v6658_v61, %v6150_v54  ;;  %vm10133_vm10 = vcmask 1040384  }
 0x4df   : > { %v3224_v47 = vsel %vm10131_vm14, %v3210_v9, %v3223_v44  ;;  %v8508_v56 = vld [vmem:[#allocation2 + $0x8b4] sm:$0xf0]  ;;  %v6183_v60 = vor.u32 %v6650_v33, %v6182_v23  ;;  %vm10134_vm5 = vmmov %vm10133_vm10  ;;  %v6667_v8 = vld [vmem:[#allocation2 + $0x8a4] sm:$0xf0] }
 0x4e0   : > { %v3225_v36 = vsel %vm10132_vm1, %v3211_v5, %v3224_v47  ;;  %v3325_v28 = vld.sshfl [vmem:[#allocation1] sm:$0xff pattern:$0x73625140]  ;;  %v6233_v30 = vor.u32 %v8508_v56, %v8506_v41  ;;  %3539 = vmatpush.bf16.msrb.mxu3 %v6187_v29  ;;  %vm10135_vm4 = vmmov %vm10134_vm5  ;;  %v6294_v58 = vld [vmem:[#allocation2 + $0xa00] sm:$0xf] }
 0x4e1   : > { %v3229_v25 = vsub.f32 %v8423_v50, %v3225_v36  ;;  %v8513_v17 = vadd.f32 %v3325_v28, %v10082_v14  ;;  %3621 = vmatpush.bf16.msra.mxu0 %v6241_v15  ;;  %3472 = vmatpush.bf16.msrb.mxu2 %v6155_v59  ;;  %v3326_v62 = vld.sshfl [vmem:[#allocation1 + $0x20] sm:$0xff pattern:$0x73625140]  ;;  %vm10136_vm15 = vmmov %vm10135_vm4  ;;  %v6689_v16 = vld [vmem:[#allocation2 + $0xa04] sm:$0xf0] }
 0x4e2   : > { %vm10137_vm7 = vmmov %vm10135_vm4  ;;  %v6326_v10 = vld [vmem:[#allocation2 + $0x980] sm:$0xf]  ;;  %v6666_v43 = vld [vmem:[#allocation2 + $0x894] sm:$0xf0]  ;;  %v6295_v18 = vor.u32 %v6689_v16, %v6294_v58 }
 0x4e3   : > { %v3239_v3 = vrot.slane %v3229_v25, 1  ;;  %v3240_v7 = vrot.slane %v3229_v25, 2  ;;  %v3242_v37 = vrot.slane %v3229_v25, 4  ;;  %v3244_v6 = vrot.slane %v3229_v25, 6  ;;  %vm10138_vm11 = vmmov %vm10135_vm4  ;;  %v6290_v45 = vld [vmem:[#allocation2 + $0x9f0] sm:$0xf] }
 0x4e4   : > { %v3254_v27 = vperm.slane %v3229_v25, 0  ;;  %v3241_v50 = vrot.slane %v3229_v25, 3  ;;  %v3243_v46 = vrot.slane %v3229_v25, 5  ;;  %v3245_v24 = vrot.slane %v3229_v25, 7  ;;  %vm10139_vm14 = vmmov %vm10135_vm4  ;;  %3540 = vmatpush.bf16.msrb.mxu3 %v6183_v60  ;;  %v6688_v63 = vld [vmem:[#allocation2 + $0x9f4] sm:$0xf0]  ;;  %3770 = vmatpush.bf16.msra.mxu1 %v6295_v18 }
 0x4e5   : > { %v3255_v38 = vperm.slane %v3239_v3, 0  ;;  %v3256_v34 = vperm.slane %v3240_v7, 0  ;;  %v3258_v53 = vperm.slane %v3242_v37, 0  ;;  %v3260_v2 = vperm.slane %v3244_v6, 0  ;;  %3622 = vmatpush.bf16.msra.mxu0 %v6237_v20  ;;  %3473 = vmatpush.bf16.msrb.mxu2 %v6151_v26  ;;  %vm10140_vm1 = vmmov %vm10135_vm4  ;;  %v6322_v44 = vld [vmem:[#allocation2 + $0x970] sm:$0xf] }
 0x4e6   : > { %v3286_v14 = vsel %vm10133_vm10, %v8439_v42, %v3254_v27  ;;  %v3257_v9 = vperm.slane %v3241_v50, 0  ;;  %v3259_v5 = vperm.slane %v3243_v46, 0  ;;  %v3261_v31 = vperm.slane %v3245_v24, 0  ;;  %vm10141_vm10 = vmmov %vm10140_vm1  ;;  %v6680_v23 = vld [vmem:[#allocation2 + $0x974] sm:$0xf0] }
 0x4e7   : > { %v3287_v49 = vsel %vm10134_vm5, %v8465_v51, %v3255_v38  ;;  %v3288_v52 = vsel %vm10135_vm4, %v8444_v55, %v3256_v34  ;;  %v3290_v19 = vsel %vm10136_vm15, %v8475_v32, %v3258_v53  ;;  %v3292_v1 = vsel %vm10137_vm7, %v8485_v48, %v3260_v2  ;;  %3327 = vst [vmem:[#allocation1] ss:$4 sm:$0xff] %v3286_v14  ;;  %v6228_v55 = vld [vmem:[#allocation2 + $0x8a0] sm:$0xf]  ;;  %vm10142_vm5 = vmmov %vm10140_vm1  ;;  %v6687_v41 = vld [vmem:[#allocation2 + $0x9e4] sm:$0xf0] }
 0x4e8   : > { %v3289_v42 = vsel %vm10138_vm11, %v8470_v12, %v3257_v9  ;;  %v3291_v4 = vsel %vm10139_vm14, %v8480_v57, %v3259_v5  ;;  %v3293_v51 = vsel %vm10140_vm1, %v8490_v40, %v3261_v31  ;;  %3328 = vst [vmem:[#allocation1 + $0x1] ss:$4 sm:$0xff] %v3287_v49  ;;  %v3342_v32 = vadd.f32 %v3326_v62, %v10084_v21  ;;  %v6224_v40 = vld [vmem:[#allocation2 + $0x890] sm:$0xf]  ;;  %v6681_v21 = vld [vmem:[#allocation2 + $0x984] sm:$0xf0]  ;;  %vm10147_vm7 = vmmov %vm10140_vm1 }
 0x4e9   : > { %3329 = vst [vmem:[#allocation1 + $0x2] ss:$4 sm:$0xff] %v3288_v52  ;;  %v3349_v48 = vrot.slane %v8513_v17, 7  ;;  %3623 = vmatpush.bf16.msra.mxu0 %v6233_v30  ;;  %v6229_v0 = vor.u32 %v6667_v8, %v6228_v55  ;;  %v6327_v13 = vor.u32 %v6681_v21, %v6326_v10  ;;  %v6291_v61 = vor.u32 %v6688_v63, %v6290_v45  ;;  %v6286_v33 = vld [vmem:[#allocation2 + $0x9e0] sm:$0xf]  ;;  %vm10148_vm11 = vmmov %vm10140_vm1  ;;  %v10163_v2 = vld [vmem:[#allocation12_spill] sm:$0xff] }
 0x4ea   : > { %3330 = vst [vmem:[#allocation1 + $0x3] ss:$4 sm:$0xff] %v3289_v42  ;;  %v3350_v12 = vrot.slane %v3342_v32, 7  ;;  %v3400_v57 = vpack.c.bf16 %v3342_v32, %v8513_v17  ;;  %v6323_v47 = vor.u32 %v6680_v23, %v6322_v44  ;;  %v6225_v36 = vor.u32 %v6666_v43, %v6224_v40  ;;  %v6368_v14 = vld [vmem:[#allocation2 + $0xa80] sm:$0xf] }
 0x4eb   : > { %3331 = vst [vmem:[#allocation1 + $0x20] ss:$4 sm:$0xff] %v3290_v19  ;;  %v3360_v35 = vsel %vm10141_vm10, 0.0, %v3349_v48  ;;  %3837 = vmatpush.bf16.msra.mxu2 %v6327_v13  ;;  %v3365_v59 = vrot.slane %v8513_v17, 1  ;;  %v3366_v25 = vrot.slane %v3342_v32, 1  ;;  %3771 = vmatpush.bf16.msra.mxu1 %v6291_v61  ;;  %v6287_v20 = vor.u32 %v6687_v41, %v6286_v33  ;;  %vm10153_vm10 = vmmov %vm10142_vm5 }
 0x4ec   : > { %3332 = vst [vmem:[#allocation1 + $0x21] ss:$4 sm:$0xff] %v3291_v4  ;;  %3474 = vmatmul.bf16.vlgmr.msrb.gmra.mxu2 %v3400_v57  ;;  %v3351_v39 = vsel %vm10142_vm5, %v3349_v48, %v3350_v12  ;;  %vm10144_vm4 = vcmask 1046528   ;;  %v6697_v9 = vld [vmem:[#allocation2 + $0xa84] sm:$0xf0] }
 0x4ed   : > { %3333 = vst [vmem:[#allocation1 + $0x22] ss:$4 sm:$0xff] %v3292_v1  ;;  %v6215_v54 = vpack.c.bf16 %v3351_v39, %v3360_v35  ;;  %3624 = vmatpush.bf16.msra.mxu0 %v6229_v0  ;;  %v3367_v60 = vsel %vm10144_vm4, %v3365_v59, %v3366_v25  ;;  %vm10145_vm15 = vmmov %vm10144_vm4  ;;  %v6318_v5 = vld [vmem:[#allocation2 + $0x960] sm:$0xf]  ;;  %v6369_v31 = vor.u32 %v6697_v9, %v6368_v14  ;;  %v6679_v62 = vld [vmem:[#allocation2 + $0x964] sm:$0xf0] }
 0x4ee   : > { %3334 = vst [vmem:[#allocation1 + $0x23] ss:$4 sm:$0xff] %v3293_v51  ;;  %vm10150_vm14 = vmmov %vm10144_vm4  ;;  %v6319_v49 = vor.u32 %v6679_v62, %v6318_v5  ;;  %v6282_v52 = vld [vmem:[#allocation2 + $0x9d0] sm:$0xf]  ;;  %v6686_v19 = vld [vmem:[#allocation2 + $0x9d4] sm:$0xf0] }
 0x4ef   : > { %6216 = vmatmul.msk.bf16.vlgmr.msrb.gmra.mxu3 %vm7925_vm3, %v6215_v54  ;;  %3838 = vmatpush.bf16.msra.mxu2 %v6323_v47  ;;  %vm10151_vm1 = vmmov %vm10144_vm4  ;;  %v6283_v1 = vor.u32 %v6686_v19, %v6282_v52  ;;  %v6364_v42 = vld [vmem:[#allocation2 + $0xa70] sm:$0xf]  ;;  %v6696_v4 = vld [vmem:[#allocation2 + $0xa74] sm:$0xf0] }
 0x4f0   : > { %3772 = vmatpush.bf16.msra.mxu1 %v6287_v20  ;;  %3922 = vmatpush.bf16.msra.mxu3 %v6369_v31  ;;  %v6314_v51 = vld [vmem:[#allocation2 + $0x950] sm:$0xf]  ;;  %v6365_v55 = vor.u32 %v6696_v4, %v6364_v42  ;;  %v6678_v8 = vld [vmem:[#allocation2 + $0x954] sm:$0xf0]  ;;  %v6278_v32 = vld [vmem:[#allocation2 + $0x9c0] sm:$0xf] }
 0x4f1   : > { %v3335_v15 = vld.sshfl [vmem:[#allocation1] sm:$0xff pattern:$0x73625140]  ;;  %3625 = vmatpush.bf16.msra.mxu0 %v6225_v36  ;;  %v6685_v48 = vld [vmem:[#allocation2 + $0x9c4] sm:$0xf0]  ;;  %v6315_v58 = vor.u32 %v6678_v8, %v6314_v51  ;;  %vm10154_vm4 = vmmov %vm10151_vm1 }
 0x4f2   : > { %v3343_v29 = vadd.f32 %v3335_v15, %v10099_v22  ;;  %v6279_v16 = vor.u32 %v6685_v48, %v6278_v32  ;;  %v6360_v10 = vld [vmem:[#allocation2 + $0xa60] sm:$0xf]  ;;  %v6677_v40 = vld [vmem:[#allocation2 + $0x944] sm:$0xf0]  ;;  %v6274_v43 = vld [vmem:[#allocation2 + $0x9b0] sm:$0xf] }
 0x4f3   : > { %3839 = vmatpush.bf16.msra.mxu2 %v6319_v49  ;;  %v6310_v57 = vld [vmem:[#allocation2 + $0x940] sm:$0xf]  ;;  %v6684_v0 = vld [vmem:[#allocation2 + $0x9b4] sm:$0xf0]  ;;  %v6356_v45 = vld [vmem:[#allocation2 + $0xa50] sm:$0xf] }
 0x4f4   : > { %v3368_v28 = vrot.slane %v3343_v29, 1  ;;  %v3352_v37 = vrot.slane %v3343_v29, 7  ;;  %3773 = vmatpush.bf16.msra.mxu1 %v6283_v1  ;;  %3923 = vmatpush.bf16.msra.mxu3 %v6365_v55  ;;  %v6311_v18 = vor.u32 %v6677_v40, %v6310_v57  ;;  %v6275_v21 = vor.u32 %v6684_v0, %v6274_v43  ;;  %v6694_v39 = vld [vmem:[#allocation2 + $0xa54] sm:$0xf0]  ;;  %v6306_v13 = vld [vmem:[#allocation2 + $0x930] sm:$0xf] }
 0x4f5   : > { %v3336_v26 = vld.sshfl [vmem:[#allocation1 + $0x20] sm:$0xff pattern:$0x73625140]  ;;  %v6357_v63 = vor.u32 %v6694_v39, %v6356_v45  ;;  %v6270_v54 = vld [vmem:[#allocation2 + $0x9a0] sm:$0xf] }
 0x4f6   : > { %v3369_v30 = vsel %vm10145_vm15, %v3366_v25, %v3368_v28  ;;  %v3344_v3 = vadd.f32 %v3336_v26, %v10105_v11  ;;  %v3353_v27 = vsel %vm10147_vm7, %v3350_v12, %v3352_v37  ;;  %v6695_v12 = vld [vmem:[#allocation2 + $0xa64] sm:$0xf0]  ;;  %v6676_v44 = vld [vmem:[#allocation2 + $0x934] sm:$0xf0]  ;;  %v6352_v33 = vld [vmem:[#allocation2 + $0xa40] sm:$0xf] }
 0x4f7   : > { %v6257_v7 = vpack.c.bf16 %v3369_v30, %v3367_v60  ;;  %v6361_v35 = vor.u32 %v6695_v12, %v6360_v10  ;;  %3840 = vmatpush.bf16.msra.mxu2 %v6315_v58  ;;  %v6683_v61 = vld [vmem:[#allocation2 + $0x9a4] sm:$0xf0]  ;;  %v6307_v23 = vor.u32 %v6676_v44, %v6306_v13  ;;  %v6302_v36 = vld [vmem:[#allocation2 + $0x920] sm:$0xf]  ;;  %v6266_v25 = vld [vmem:[#allocation2 + $0x990] sm:$0xf] }
 0x4f8   : > { %v3354_v6 = vrot.slane %v3344_v3, 7  ;;  %v3401_v22 = vpack.c.bf16 %v3344_v3, %v3343_v29  ;;  %v3370_v38 = vrot.slane %v3344_v3, 1  ;;  %3774 = vmatpush.bf16.msra.mxu1 %v6279_v16  ;;  %v6271_v47 = vor.u32 %v6683_v61, %v6270_v54  ;;  %v6693_v41 = vld [vmem:[#allocation2 + $0xa44] sm:$0xf0]  ;;  %v6682_v29 = vld [vmem:[#allocation2 + $0x994] sm:$0xf0]  ;;  %vm10155_vm15 = vmmov %vm10151_vm1 }
 0x4f9   : > { %6258 = vmatmul.msk.bf16.vlgmr.msra.gmra.mxu0 %vm7937_vm2, %v6257_v7  ;;  %3924 = vmatpush.bf16.msra.mxu3 %v6361_v35  ;;  %v6353_v15 = vor.u32 %v6693_v41, %v6352_v33  ;;  %v6675_v59 = vld [vmem:[#allocation2 + $0x924] sm:$0xf0]  ;;  %v6348_v26 = vld [vmem:[#allocation2 + $0xa30] sm:$0xf]  ;;  %v6692_v60 = vld [vmem:[#allocation2 + $0xa34] sm:$0xf0] }
 0x4fa   : > { %v3355_v50 = vsel %vm10148_vm11, %v3352_v37, %v3354_v6  ;;  %v3371_v11 = vsel %vm10150_vm14, %v3368_v28, %v3370_v38  ;;  %v3376_v34 = vsel %vm10151_vm1, %v3370_v38, 0.0  ;;  %v6303_v20 = vor.u32 %v6675_v59, %v6302_v36  ;;  %v6298_v30 = vld [vmem:[#allocation2 + $0x910] sm:$0xf]  ;;  %v6674_v37 = vld [vmem:[#allocation2 + $0x914] sm:$0xf0]  ;;  %vm10158_vm11 = vmmov %vm10151_vm1 }
 0x4fb   : > { %v6220_v46 = vpack.c.bf16 %v3355_v50, %v3353_v27  ;;  %v6262_v53 = vpack.c.bf16 %v3376_v34, %v3371_v11  ;;  %3841 = vmatpush.bf16.msra.mxu2 %v6311_v18  ;;  %v6267_v28 = vor.u32 %v6682_v29, %v6266_v25  ;;  %v6349_v7 = vor.u32 %v6692_v60, %v6348_v26  ;;  %v6344_v6 = vld [vmem:[#allocation2 + $0xa20] sm:$0xf]  ;;  %v6340_v11 = vld [vmem:[#allocation2 + $0xa10] sm:$0xf]  ;;  %v6690_v34 = vld [vmem:[#allocation2 + $0xa14] sm:$0xf0] }
 0x4fc   : > { %3479 = vmatmul.bf16.gmra.mxu2 %v3401_v22  ;;  %3775 = vmatpush.bf16.msra.mxu1 %v6275_v21  ;;  %v6691_v22 = vld [vmem:[#allocation2 + $0xa24] sm:$0xf0]  ;;  %v6299_v27 = vor.u32 %v6674_v37, %v6298_v30  ;;  %v6341_v14 = vor.u32 %v6690_v34, %v6340_v11  ;;  %v3381_v5 = vld [vmem:[#allocation5 + $0x6] ss:$0 sm:$0xff]  ;;  %vm10159_vm14 = vmmov %vm10151_vm1 }
 0x4fd   : > { %3925 = vmatpush.bf16.msra.mxu3 %v6357_v63  ;;  %v6345_v50 = vor.u32 %v6691_v22, %v6344_v6  ;;  %v10162_v11 = vld [vmem:[#allocation16_spill] sm:$0xff] }
 0x4ff   : > { %6221 = vmatmul.msk.bf16.gmra.mxu3 %vm7949_vm0, %v6220_v46  ;;  %3842 = vmatpush.bf16.msra.mxu2 %v6307_v23 }
 0x500   : > { %3776 = vmatpush.bf16.msra.mxu1 %v6271_v47 }
 0x501   : > { %3926 = vmatpush.bf16.msra.mxu3 %v6353_v15 }
 0x503   : > { %3843 = vmatpush.bf16.msra.mxu2 %v6303_v20 }
 0x504   : > { %3777 = vmatpush.bf16.msra.mxu1 %v6267_v28 }
 0x505   : > { %3927 = vmatpush.bf16.msra.mxu3 %v6349_v7  ;;  %v8571_v7 = vld [vmem:[#allocation5 + $0x7] ss:$0 sm:$0xff] }
 0x507   : > { %3844 = vmatpush.bf16.msra.mxu2 %v6299_v27 }
 0x509   : > { %6263 = vmatmul.msk.bf16.gmra.mxu0 %vm7961_vm6, %v6262_v53  ;;  %3928 = vmatpush.bf16.msra.mxu3 %v6345_v50 }
 0x50d   : > { %3929 = vmatpush.bf16.msra.mxu3 %v6341_v14 }
 0x56f   : > { %v3475_v3 = vpop.f32.mrf.mxu2 }
 0x572   : > { %v3542_v46 = vpop.f32.mrf.mxu3 }
 0x573   : > { %v3543_v38 = vadd.f32 %v3542_v46, %v3475_v3  ;;  %v10160_v46 = vld [vmem:[#allocation25_spill] sm:$0xff] }
 0x576   : > { %v3627_v53 = vpop.f32.mrf.mxu0 }
 0x577   : > { %v3637_v9 = vadd.f32 %v3627_v53, %v3543_v38  ;;  %v3477_v31 = vpop.f32.mrf.mxu2  ;;  %v10161_v38 = vld [vmem:[#allocation22_spill] sm:$0xff] }
 0x579   : > { %v3641_v62 = vadd.f32 %v3637_v9, %v3381_v5 }
 0x57a   : > { %v3544_v49 = vpop.f32.mrf.mxu3 }
 0x57b   : > { %v3545_v52 = vadd.f32 %v3544_v49, %v3477_v31  ;;  %v3645_v1 = vmax.f32 %v3641_v62, 0.0  ;;  %v10165_v31 = vld [vmem:[#allocation13_spill] sm:$0xff]  ;;  %v10166_v62 = vld [vmem:[#allocation18_spill] sm:$0xff] }
 0x57c   : > { %v10167_v49 = vld [vmem:[#allocation14_spill] sm:$0xff] }
 0x57d   : > { %v3653_v55 = vrot.slane %v3645_v1, 7  ;;  %v3669_v13 = vrot.slane %v3645_v1, 1  ;;  %vm1033_vm1 = vcmp.ge.f32.partialorder %v10167_v49, %v10166_v62 }
 0x57e   : > { %v3629_v19 = vpop.f32.mrf.mxu0 }
 0x57f   : > { %v3638_v42 = vadd.f32 %v3629_v19, %v3545_v52  ;;  %v3480_v51 = vpop.f32.mrf.mxu2  ;;  %v3664_v12 = vsel %vm10153_vm10, 0.0, %v3653_v55  ;;  %v10168_v52 = vld [vmem:[#allocation24_spill] sm:$0xff]  ;;  %v10169_v19 = vld [vmem:[#allocation19_spill] sm:$0xff] }
 0x580   : > { %vm1035_vm10 = vcmp.ge.f32.partialorder %v10169_v19, %v10168_v52 }
 0x581   : > { %v3642_v4 = vadd.f32 %v3638_v42, %v3381_v5 }
 0x582   : > { %v3547_v32 = vpop.f32.mrf.mxu3 }
 0x583   : > { %v3646_v8 = vmax.f32 %v3642_v4, 0.0  ;;  %v3548_v48 = vadd.f32 %v3547_v32, %v3480_v51  ;;  %v10170_v32 = vld [vmem:[#allocation26_spill] sm:$0xff] }
 0x585   : > { %v3654_v58 = vrot.slane %v3646_v8, 7  ;;  %v3704_v16 = vpack.c.bf16 %v3646_v8, %v3645_v1  ;;  %v3670_v0 = vrot.slane %v3646_v8, 1 }
 0x586   : > { %v3632_v10 = vpop.f32.mrf.mxu0 }
 0x587   : > { %v3655_v57 = vsel %vm10142_vm5, %v3653_v55, %v3654_v58  ;;  %v3639_v35 = vadd.f32 %v3632_v10, %v3548_v48  ;;  %3778 = vmatmul.bf16.vlgmr.msra.gmra.mxu1 %v3704_v16  ;;  %v3482_v21 = vpop.f32.mrf.mxu2  ;;  %v3671_v54 = vsel %vm10154_vm4, %v3669_v13, %v3670_v0  ;;  %v10171_v48 = vld [vmem:[#allocation23_spill] sm:$0xff] }
 0x588   : > { %v6331_v40 = vpack.c.bf16 %v3655_v57, %v3664_v12  ;;  %v10173_v16 = vld [vmem:[#allocation15_spill] sm:$0xff] }
 0x589   : > { %v3643_v43 = vadd.f32 %v3639_v35, %v3381_v5 }
 0x58a   : > { %6332 = vmatmul.msk.bf16.vlgmr.msra.gmra.mxu2 %vm7925_vm3, %v6331_v40  ;;  %v3549_v45 = vpop.f32.mrf.mxu3  ;;  %vm10156_vm3 = vmmov %vm10142_vm5  ;;  %vm1037_vm5 = vcmp.ge.f32.partialorder %v10171_v48, %v10170_v32  ;;  %v6705_v32 = vld [vmem:[#allocation2 + $0xb04] sm:$0xf0] }
 0x58b   : > { %v3647_v18 = vmax.f32 %v3643_v43, 0.0  ;;  %v3550_v39 = vadd.f32 %v3549_v45, %v3482_v21  ;;  %vm10157_vm7 = vmmov %vm10156_vm3 }
 0x58d   : > { %v3672_v63 = vrot.slane %v3647_v18, 1  ;;  %v3656_v56 = vrot.slane %v3647_v18, 7 }
 0x58e   : > { %v3634_v44 = vpop.f32.mrf.mxu0 }
 0x58f   : > { %v3673_v61 = vsel %vm10155_vm15, %v3670_v0, %v3672_v63  ;;  %v3640_v23 = vadd.f32 %v3634_v44, %v3550_v39  ;;  %v3657_v59 = vsel %vm10156_vm3, %v3654_v58, %v3656_v56  ;;  %v10172_v58 = vld [vmem:[#allocation20_spill] sm:$0xff]  ;;  %v10174_v0 = vld [vmem:[#allocation27_spill] sm:$0xff]  ;;  %vm10176_vm3 = vcmask 1041409  }
 0x590   : > { %v6373_v47 = vpack.c.bf16 %v3673_v61, %v3671_v54  ;;  %vm1034_vm4 = vcmp.ge.f32.partialorder %v10173_v16, %v10172_v58  ;;  %v6412_v58 = vld [vmem:[#allocation2 + $0xac0] sm:$0xf] }
 0x591   : > { %v3644_v33 = vadd.f32 %v3640_v23, %v3381_v5  ;;  %v10164_v5 = vld [vmem:[#allocation17_spill] sm:$0xff] }
 0x592   : > { %6374 = vmatmul.msk.bf16.vlgmr.msra.gmra.mxu3 %vm7937_vm2, %v6373_v47  ;;  %vm1036_vm2 = vcmp.ge.f32.partialorder %v10161_v38, %v10160_v46 }
 0x593   : > { %v3648_v41 = vmax.f32 %v3644_v33, 0.0 }
 0x595   : > { %v3658_v36 = vrot.slane %v3648_v41, 7  ;;  %v3705_v15 = vpack.c.bf16 %v3648_v41, %v3647_v18  ;;  %v3674_v20 = vrot.slane %v3648_v41, 1  ;;  %v10175_v18 = vld [vmem:[#allocation21_spill] sm:$0xff] }
 0x596   : > { %vm1038_vm15 = vcmp.ge.f32.partialorder %v10175_v18, %v10174_v0 }
 0x597   : > { %3783 = vmatmul.bf16.gmra.mxu1 %v3705_v15  ;;  %v3659_v25 = vsel %vm10157_vm7, %v3656_v56, %v3658_v36  ;;  %v3675_v28 = vsel %vm10158_vm11, %v3672_v63, %v3674_v20  ;;  %v3680_v26 = vsel %vm10159_vm14, %v3674_v20, 0.0  ;;  %vm10177_vm7 = vcmask 1042434  }
 0x598   : > { %v6336_v29 = vpack.c.bf16 %v3659_v25, %v3657_v59  ;;  %v6378_v17 = vpack.c.bf16 %v3680_v26, %v3675_v28  ;;  %vm10178_vm11 = vcmask 1043459   ;;  %vm10181_vm14 = vcmask 1044484  }
 0x59a   : > { %6337 = vmatmul.msk.bf16.gmra.mxu2 %vm7949_vm0, %v6336_v29  ;;  %vm1031_vm0 = vcmp.ge.f32.partialorder %v10163_v2, %v10162_v11 }
 0x5a2   : > { %6379 = vmatmul.msk.bf16.gmra.mxu3 %vm7961_vm6, %v6378_v17  ;;  %vm1032_vm6 = vcmp.ge.f32.partialorder %v10165_v31, %v10164_v5 }
 0x604   : > { %v3779_v30 = vpop.f32.mrf.mxu1 }
 0x60c   : > { %v8576_v27 = vpop.f32.mrf.mxu1 }
 0x60d   : > { %v3846_v60 = vpop.f32.mrf.mxu2 }
 0x60e   : > { %v3847_v3 = vadd.f32 %v3846_v60, %v3779_v30 }
 0x614   : > { %v3784_v56 = vpop.f32.mrf.mxu1 }
 0x615   : > { %v3931_v37 = vpop.f32.mrf.mxu3  ;;  %v8573_v22 = vpop.f32.mrf.mxu2 }
 0x616   : > { %v3941_v6 = vadd.f32 %v3931_v37, %v3847_v3 }
 0x618   : > { %v3945_v24 = vadd.f32 %v3941_v6, %v8571_v7 }
 0x61a   : > { %v3949_v50 = vmax.f32 %v3945_v24, 0.0 }
 0x61c   : > { %v3957_v34 = vrot.slane %v3949_v50, 2  ;;  %v3958_v53 = vrot.slane %v3949_v50, 4  ;;  %v3959_v14 = vrot.slane %v3949_v50, 6  ;;  %v3969_v9 = vrot.slane %v3949_v50, 1 }
 0x61d   : > { %v4017_v1 = vsel %vm1031_vm0, %v3949_v50, 0.0  ;;  %v8588_v42 = vpop.f32.mrf.mxu3  ;;  %v3851_v54 = vpop.f32.mrf.mxu2  ;;  %vm10185_vm0 = vcmask 1046534  }
 0x61e   : > { %v3970_v4 = vrot.slane %v3957_v34, 1  ;;  %v3971_v51 = vrot.slane %v3958_v53, 1  ;;  %v3972_v55 = vrot.slane %v3959_v14, 1  ;;  %v4018_v8 = vsel %vm1032_vm6, %v3969_v9, 0.0  ;;  %vm10186_vm6 = vmmov %vm10176_vm3 }
 0x61f   : > { %v4019_v10 = vsel %vm1033_vm1, %v3957_v34, 0.0  ;;  %v4021_v12 = vsel %vm1035_vm10, %v3958_v53, 0.0  ;;  %v4081_v40 = vperm.slane %v4017_v1, 0  ;;  %v4082_v43 = vperm.slane %v4018_v8, 0 }
 0x620   : > { %v4020_v57 = vsel %vm1034_vm4, %v3970_v4, 0.0  ;;  %v4022_v35 = vsel %vm1036_vm2, %v3971_v51, 0.0  ;;  %v4023_v21 = vsel %vm1037_vm5, %v3959_v14, 0.0  ;;  %v4083_v45 = vperm.slane %v4019_v10, 0  ;;  %v6394_v51 = vld [vmem:[#allocation2 + $0xb00] sm:$0xf] }
 0x621   : > { %v4084_v39 = vperm.slane %v4020_v57, 0  ;;  %v8599_v13 = vsel %vm1038_vm15, %v3972_v55, 0.0  ;;  %v4085_v63 = vperm.slane %v4021_v12, 0  ;;  %v4113_v44 = vsel %vm10176_vm3, %v4082_v43, %v4081_v40 }
 0x622   : > { %v4086_v61 = vperm.slane %v4022_v35, 0  ;;  %v4114_v23 = vsel %vm10177_vm7, %v4083_v45, %v4113_v44  ;;  %v4150_v47 = vadd.f32 %v4018_v8, %v10165_v31  ;;  %v4151_v33 = vadd.f32 %v4019_v10, %v10167_v49  ;;  %v6701_v10 = vld [vmem:[#allocation2 + $0xac4] sm:$0xf0] }
 0x623   : > { %v4087_v41 = vperm.slane %v4023_v21, 0  ;;  %v4115_v36 = vsel %vm10178_vm11, %v4084_v39, %v4114_v23  ;;  %v8607_v15 = vadd.f32 %v4020_v57, %v10173_v16  ;;  %v8610_v59 = vadd.f32 %v4021_v12, %v10169_v19  ;;  %v10192_v39 = vld [vmem:[#allocation33_spill] sm:$0xff]  ;;  %v10194_v23 = vld [vmem:[#allocation34_spill] sm:$0xff] }
 0x624   : > { %v4088_v25 = vperm.slane %v8599_v13, 0  ;;  %v4116_v29 = vsel %vm10181_vm14, %v4085_v63, %v4115_v36  ;;  %v4433_v20 = vperm.slane %v4150_v47, 0  ;;  %v4434_v28 = vperm.slane %v4151_v33, 0  ;;  %v10193_v63 = vld [vmem:[#allocation29_spill] sm:$0xff] }
 0x625   : > { %10179 = vst [vmem:[#allocation11_spill] sm:$0xff] %v8607_v15  ;;  %vm10182_vm2 = vcmask 1045509   ;;  %v4149_v17 = vadd.f32 %v4017_v1, %v10163_v2  ;;  %v8617_v60 = vadd.f32 %v4022_v35, %v10161_v38  ;;  %v8620_v30 = vadd.f32 %v4023_v21, %v10171_v48  ;;  %v3936_v24 = vpop.f32.mrf.mxu3 }
 0x626   : > { %10180 = vst [vmem:[#allocation94_spill] sm:$0xff] %v8610_v59  ;;  %v4117_v26 = vsel %vm10182_vm2, %v4086_v61, %v4116_v29  ;;  %v8624_v37 = vsel %vm10186_vm6, %v4434_v28, %v4433_v20  ;;  %v4503_v6 = vpack.c.bf16 %v4150_v47, %v4150_v47  ;;  %vm10188_vm1 = vcmask 1047559   ;;  %v3786_v61 = vpop.f32.mrf.mxu1  ;;  %v10195_v47 = vld [vmem:[#allocation30_spill] sm:$0xff]  ;;  %v6390_v20 = vld [vmem:[#allocation2 + $0xaf0] sm:$0xf]  ;;  %vm10208_vm2 = vmmov %vm10186_vm6 }
 0x627   : > { %10183 = vst [vmem:[#allocation99_spill] sm:$0xff] %v8617_v60  ;;  %v4118_v3 = vsel %vm10185_vm0, %v4087_v41, %v4117_v26  ;;  %v4504_v11 = vpack.c.bf16 %v4151_v33, %v4151_v33  ;;  %v4505_v34 = vpack.c.bf16 %v8607_v15, %v8607_v15  ;;  %v4506_v53 = vpack.c.bf16 %v8610_v59, %v8610_v59  ;;  %v10196_v33 = vld [vmem:[#allocation41_spill] sm:$0xff]  ;;  %v10197_v41 = vld [vmem:[#allocation36_spill] sm:$0xff]  ;;  %v6408_v26 = vld [vmem:[#allocation2 + $0xab0] sm:$0xf] }
 0x628   : > { %10184 = vst [vmem:[#allocation107_spill] sm:$0xff] %v8620_v30  ;;  %v4119_v46 = vsel %vm10188_vm1, %v4088_v25, %v4118_v3  ;;  %v4502_v1 = vpack.c.bf16 %v4149_v17, %v4149_v17  ;;  %v4599_v4 = vunpack.c.l.b16 %v4503_v6  ;;  %v3849_v55 = vadd.f32 %v8573_v22, %v8576_v27  ;;  %v10190_v22 = vld [vmem:[#allocation32_spill] sm:$0xff]  ;;  %v10200_v6 = vld [vmem:[#allocation35_spill] sm:$0xff]  ;;  %vm10211_vm0 = vmmov %vm10208_vm2 }
 0x629   : > { %10187 = vst [vmem:[#allocation89_spill] sm:$0xff] %v8624_v37  ;;  %v8631_v14 = vsub.f32 %v3949_v50, %v4119_v46  ;;  %v8643_v50 = vunpack.c.l.b16 %v4504_v11  ;;  %v4507_v12 = vpack.c.bf16 %v8617_v60, %v8617_v60  ;;  %v4508_v57 = vpack.c.bf16 %v8620_v30, %v8620_v30  ;;  %v10191_v27 = vld [vmem:[#allocation28_spill] sm:$0xff]  ;;  %v10201_v46 = vld [vmem:[#allocation31_spill] sm:$0xff] }
 0x62a   : > { %v8649_v35 = vunpack.c.l.b16 %v4505_v34  ;;  %v8651_v40 = vunpack.c.l.b16 %v4506_v53  ;;  %vm1039_vm10 = vcmp.ge.f32.partialorder %v10191_v27, %v10190_v22  ;;  %v4630_v21 = vrot.slane %v4599_v4, 7  ;;  %v6704_v28 = vld [vmem:[#allocation2 + $0xaf4] sm:$0xf0]  ;;  %v10203_v4 = vld [vmem:[#allocation39_spill] sm:$0xff] }
 0x62b   : > { %v8641_v8 = vadd.f32 %v8631_v14, %v10165_v31  ;;  %v3853_v31 = vpop.f32.mrf.mxu2  ;;  %v9790_v43 = vrot.slane %v8631_v14, 2  ;;  %v4197_v0 = vrot.slane %v8631_v14, 7  ;;  %v3852_v45 = vadd.f32 %v3851_v54, %v3784_v56  ;;  %v10198_v54 = vld [vmem:[#allocation43_spill] sm:$0xff]  ;;  %v10199_v56 = vld [vmem:[#allocation38_spill] sm:$0xff] }
 0x62c   : > { %vm1040_vm5 = vcmp.ge.f32.partialorder %v10193_v63, %v10192_v39  ;;  %v4598_v44 = vunpack.c.l.b16 %v4502_v1  ;;  %vm1041_vm4 = vcmp.ge.f32.partialorder %v10195_v47, %v10194_v23  ;;  %vm1043_vm15 = vcmp.ge.f32.partialorder %v10197_v41, %v10196_v33  ;;  %v10202_v1 = vld [vmem:[#allocation44_spill] sm:$0xff]  ;;  %v10227_v3 = vld [vmem:[#allocation55_spill] sm:$0xff] }
 0x62d   : > { %10189 = vst [vmem:[#allocation88_spill] sm:$0xff] %v8641_v8  ;;  %v3942_v36 = vadd.f32 %v8588_v42, %v3849_v55  ;;  %v6395_v25 = vor.u32 %v6705_v32, %v6394_v51  ;;  %v8664_v29 = vor.u32 %v6701_v10, %v6412_v58  ;;  %vm1044_vm3 = vcmp.ge.f32.partialorder %v10199_v56, %v10198_v54  ;;  %v6700_v42 = vld [vmem:[#allocation2 + $0xab4] sm:$0xf0]  ;;  %v3938_v53 = vpop.f32.mrf.mxu3  ;;  %v10204_v51 = vld [vmem:[#allocation45_spill] sm:$0xff]  ;;  %v10205_v55 = vld [vmem:[#allocation42_spill] sm:$0xff] }
 0x62e   : > { %v4535_v17 = vpack.c.bf16 %v8641_v8, %v8641_v8  ;;  %vm1042_vm7 = vcmp.ge.f32.partialorder %v10201_v46, %v10200_v6  ;;  %v3854_v11 = vadd.f32 %v3853_v31, %v3786_v61  ;;  %v3943_v34 = vadd.f32 %v3936_v24, %v3852_v45  ;;  %v10223_v32 = vld [vmem:[#allocation52_spill] sm:$0xff]  ;;  %v10243_v8 = vld [vmem:[#allocation57_spill] sm:$0xff] }
 0x62f   : > { %vm1045_vm11 = vcmp.ge.f32.partialorder %v10203_v4, %v10202_v1  ;;  %vm1046_vm14 = vcmp.ge.f32.partialorder %v10205_v55, %v10204_v51  ;;  %v3946_v58 = vadd.f32 %v3942_v36, %v8571_v7  ;;  %4722 = vmatpush.bf16.msrb.mxu0 %v6395_v25  ;;  %4771 = vmatpush.bf16.msrb.mxu1 %v8664_v29  ;;  %v8690_v62 = vrot.slane %v9790_v43, 7 }
 0x630   : > { %v6391_v10 = vor.u32 %v6704_v28, %v6390_v20  ;;  %v8680_v52 = vor.u32 %v6700_v42, %v6408_v26  ;;  %v3947_v31 = vadd.f32 %v3943_v34, %v8571_v7  ;;  %v3944_v45 = vadd.f32 %v3938_v53, %v3854_v11  ;;  %4965 = vmatpush.bf16.msrb.mxu3 %v6395_v25 }
 0x631   : > { %v8686_v61 = vadd.f32 %v8599_v13, %v10175_v18  ;;  %v8693_v36 = vadd.f32 %v4197_v0, %v10163_v2  ;;  %v8696_v28 = vmax.f32 %v3946_v58, 0.0  ;;  %v8699_v26 = vsel %vm10208_vm2, %v4630_v21, %v4598_v44  ;;  %vm10232_vm2 = vmmov %vm10211_vm0 }
 0x632   : > { %v8701_v11 = vunpack.c.l.b16 %v4535_v17  ;;  %v8703_v25 = vmax.f32 %v3947_v31, 0.0  ;;  %v8705_v13 = vunpack.c.l.b16 %v4507_v12  ;;  %v8717_v44 = vadd.f32 %v3944_v45, %v8571_v7  ;;  %v10229_v12 = vld [vmem:[#allocation47_spill] sm:$0xff] }
 0x633   : > { %10206 = vst [vmem:[#allocation95_spill] sm:$0xff] %v8686_v61  ;;  %v3960_v34 = vrot.slane %v8696_v28, 2  ;;  %v3961_v42 = vrot.slane %v8696_v28, 4  ;;  %v3962_v2 = vrot.slane %v8696_v28, 6  ;;  %v3973_v0 = vrot.slane %v8696_v28, 1  ;;  %4723 = vmatpush.bf16.msrb.mxu0 %v6391_v10  ;;  %4772 = vmatpush.bf16.msrb.mxu1 %v8680_v52 }
 0x634   : > { %10207 = vst [vmem:[#allocation90_spill] sm:$0xff] %v8693_v36  ;;  %v4025_v21 = vsel %vm1039_vm10, %v8696_v28, 0.0  ;;  %v8721_v17 = vunpack.c.l.b16 %v4508_v57  ;;  %4966 = vmatpush.bf16.msrb.mxu3 %v6391_v10  ;;  %vm10213_vm6 = vcmask 1042434   ;;  %vm10215_vm1 = vcmask 1043459   ;;  %v10246_v36 = vld [vmem:[#allocation59_spill] sm:$0xff] }
 0x635   : > { %10209 = vst [vmem:[#allocation92_spill] sm:$0xff] %v8701_v11  ;;  %v3974_v53 = vrot.slane %v3960_v34, 1  ;;  %v3975_v58 = vrot.slane %v3961_v42, 1  ;;  %v3976_v31 = vrot.slane %v3962_v2, 1  ;;  %v4026_v5 = vsel %vm1040_vm5, %v3973_v0, 0.0 }
 0x636   : > { %10210 = vst [vmem:[#allocation97_spill] sm:$0xff] %v8703_v25  ;;  %v4027_v22 = vsel %vm1041_vm4, %v3960_v34, 0.0  ;;  %v4029_v7 = vsel %vm1043_vm15, %v3961_v42, 0.0  ;;  %v4089_v0 = vperm.slane %v4025_v21, 0  ;;  %v4090_v9 = vperm.slane %v4026_v5, 0 }
 0x637   : > { %v4028_v10 = vsel %vm1042_vm7, %v3974_v53, 0.0  ;;  %v4030_v39 = vsel %vm1044_vm3, %v3975_v58, 0.0  ;;  %v4031_v23 = vsel %vm1045_vm11, %v3962_v2, 0.0  ;;  %v8746_v33 = vsel %vm1046_vm14, %v3976_v31, 0.0 }
 0x638   : > { %v4091_v34 = vperm.slane %v4027_v22, 0  ;;  %v4092_v42 = vperm.slane %v4028_v10, 0  ;;  %v4093_v20 = vperm.slane %v4029_v7, 0  ;;  %v4094_v6 = vperm.slane %v4030_v39, 0 }
 0x639   : > { %v4120_v53 = vsel %vm10211_vm0, %v4090_v9, %v4089_v0  ;;  %v8750_v54 = vadd.f32 %v4025_v21, %v10191_v27  ;;  %v4158_v43 = vadd.f32 %v4026_v5, %v10193_v63  ;;  %v4159_v1 = vadd.f32 %v4027_v22, %v10195_v47  ;;  %v10218_v21 = vld [vmem:[#allocation48_spill] sm:$0xff]  ;;  %v10219_v0 = vld [vmem:[#allocation46_spill] sm:$0xff] }
 0x63a   : > { %v4121_v58 = vsel %vm10213_vm6, %v4091_v34, %v4120_v53  ;;  %v8756_v2 = vadd.f32 %v4028_v10, %v10201_v46  ;;  %v4095_v51 = vperm.slane %v4031_v23, 0  ;;  %v8760_v24 = vadd.f32 %v4029_v7, %v10197_v41  ;;  %v10222_v53 = vld [vmem:[#allocation64_spill] sm:$0xff]  ;;  %v10226_v7 = vld [vmem:[#allocation66_spill] sm:$0xff]  ;;  %v10248_v46 = vld [vmem:[#allocation61_spill] sm:$0xff] }
 0x63b   : > { %10212 = vst [vmem:[#allocation91_spill] sm:$0xff] %v8750_v54  ;;  %v4122_v31 = vsel %vm10215_vm1, %v4092_v42, %v4121_v58  ;;  %v8763_v9 = vadd.f32 %v4030_v39, %v10199_v56  ;;  %vm1047_vm10 = vcmp.ge.f32.partialorder %v10219_v0, %v10218_v21  ;;  %vm10220_vm5 = vcmask 1044484   ;;  %v10224_v42 = vld [vmem:[#allocation65_spill] sm:$0xff]  ;;  %v10228_v39 = vld [vmem:[#allocation67_spill] sm:$0xff]  ;;  %v10245_v56 = vld [vmem:[#allocation72_spill] sm:$0xff] }
 0x63c   : > { %10214 = vst [vmem:[#allocation96_spill] sm:$0xff] %v8756_v2  ;;  %v4123_v34 = vsel %vm10220_vm5, %v4093_v20, %v4122_v31  ;;  %v8769_v5 = vadd.f32 %v4031_v23, %v10203_v4  ;;  %v4441_v22 = vperm.slane %v4158_v43, 0  ;;  %v4442_v10 = vperm.slane %v4159_v1, 0  ;;  %v10225_v58 = vld [vmem:[#allocation53_spill] sm:$0xff]  ;;  %v6699_v41 = vld [vmem:[#allocation2 + $0xaa4] sm:$0xf0] }
 0x63d   : > { %10216 = vst [vmem:[#allocation98_spill] sm:$0xff] %v8760_v24  ;;  %vm1048_vm4 = vcmp.ge.f32.partialorder %v10223_v32, %v10222_v53  ;;  %vm1049_vm15 = vcmp.ge.f32.partialorder %v10225_v58, %v10224_v42  ;;  %vm1050_vm3 = vcmp.ge.f32.partialorder %v10227_v3, %v10226_v7  ;;  %vm1051_vm7 = vcmp.ge.f32.partialorder %v10229_v12, %v10228_v39 }
 0x63e   : > { %10217 = vst [vmem:[#allocation93_spill] sm:$0xff] %v8763_v9  ;;  %v4096_v57 = vperm.slane %v8746_v33, 0  ;;  %vm10230_vm11 = vcmask 1045509   ;;  %v3977_v31 = vrot.slane %v8703_v25, 1  ;;  %vm10231_vm14 = vcmask 1046534  }
 0x63f   : > { %10221 = vst [vmem:[#allocation103_spill] sm:$0xff] %v8769_v5  ;;  %v4124_v20 = vsel %vm10230_vm11, %v4094_v6, %v4123_v34  ;;  %v8785_v30 = vsel %vm10232_vm2, %v4442_v10, %v4441_v22  ;;  %v4510_v60 = vpack.c.bf16 %v8750_v54, %v8750_v54  ;;  %v4511_v59 = vpack.c.bf16 %v4158_v43, %v4158_v43  ;;  %v10237_v10 = vld [vmem:[#allocation71_spill] sm:$0xff]  ;;  %v6386_v54 = vld [vmem:[#allocation2 + $0xae0] sm:$0xf] }
 0x640   : > { %v4125_v45 = vsel %vm10231_vm14, %v4095_v51, %v4124_v20  ;;  %10233 = vst [vmem:[#allocation100_spill] sm:$0xff] %v8785_v30  ;;  %vm10234_vm0 = vcmask 1047559   ;;  %v4512_v37 = vpack.c.bf16 %v4159_v1, %v4159_v1  ;;  %v4513_v11 = vpack.c.bf16 %v8756_v2, %v8756_v2  ;;  %v10238_v51 = vld [vmem:[#allocation49_spill] sm:$0xff] }
 0x641   : > { %v4126_v15 = vsel %vm10234_vm0, %v4096_v57, %v4125_v45  ;;  %v4514_v6 = vpack.c.bf16 %v8760_v24, %v8760_v24  ;;  %v4607_v20 = vunpack.c.l.b16 %v4511_v59  ;;  %vm1055_vm6 = vcmp.ge.f32.partialorder %v10238_v51, %v10237_v10  ;;  %v10240_v30 = vld [vmem:[#allocation73_spill] sm:$0xff]  ;;  %v10241_v59 = vld [vmem:[#allocation60_spill] sm:$0xff] }
 0x642   : > { %v8795_v34 = vsub.f32 %v8696_v28, %v4126_v15  ;;  %v8800_v43 = vunpack.c.l.b16 %v4512_v37  ;;  %v8802_v45 = vunpack.c.l.b16 %v4513_v11  ;;  %v10236_v28 = vrot.slane %v8703_v25, 2  ;;  %v6703_v37 = vld [vmem:[#allocation2 + $0xae4] sm:$0xf0] }
 0x643   : > { %v8804_v57 = vunpack.c.l.b16 %v4514_v6  ;;  %v4606_v11 = vunpack.c.l.b16 %v4510_v60  ;;  %v4644_v6 = vrot.slane %v4607_v20, 7  ;;  %vm1057_vm1 = vcmp.ge.f32.partialorder %v10241_v59, %v10240_v30  ;;  %v6404_v60 = vld [vmem:[#allocation2 + $0xaa0] sm:$0xf]  ;;  %v10242_v20 = vld [vmem:[#allocation75_spill] sm:$0xff] }
 0x644   : > { %v9800_v1 = vrot.slane %v8795_v34, 2  ;;  %v4201_v23 = vrot.slane %v8795_v34, 7  ;;  %v8810_v15 = vadd.f32 %v8795_v34, %v10193_v63  ;;  %v3978_v22 = vrot.slane %v10236_v28, 1 }
 0x645   : > { %vm1059_vm5 = vcmp.ge.f32.partialorder %v10243_v8, %v10242_v20  ;;  %v4034_v28 = vsel %vm1048_vm4, %v3977_v31, 0.0  ;;  %v10244_v2 = vrot.slane %v8703_v25, 2  ;;  %vm1056_vm11 = vcmp.ge.f32.partialorder %v10246_v36, %v10245_v56  ;;  %vm10257_vm4 = vmmov %vm10232_vm2 }
 0x646   : > { %10235 = vst [vmem:[#allocation101_spill] sm:$0xff] %v8810_v15  ;;  %v8822_v24 = vrot.slane %v9800_v1, 7  ;;  %v4543_v4 = vpack.c.bf16 %v8810_v15, %v8810_v15  ;;  %v4033_v1 = vsel %vm1047_vm10, %v8703_v25, 0.0  ;;  %v10247_v15 = vld [vmem:[#allocation74_spill] sm:$0xff]  ;;  %v8850_v21 = vadd.f32 %v4201_v23, %v10191_v27  ;;  %vm10254_vm10 = vmmov %vm10232_vm2 }
 0x647   : > { %v4035_v63 = vsel %vm1049_vm15, %v10244_v2, 0.0  ;;  %vm1058_vm14 = vcmp.ge.f32.partialorder %v10248_v46, %v10247_v15  ;;  %v10250_v48 = vrot.slane %v8703_v25, 4  ;;  %v8859_v31 = vsel %vm1050_vm3, %v3978_v22, 0.0 }
 0x648   : > { %10239 = vst [vmem:[#allocation104_spill] sm:$0xff] %v8822_v24  ;;  %v6382_v24 = vld [vmem:[#allocation2 + $0xad0] sm:$0xf]  ;;  %v4097_v47 = vperm.slane %v4033_v1, 0  ;;  %v4098_v27 = vperm.slane %v4034_v28, 0  ;;  %v4099_v23 = vperm.slane %v4035_v63, 0  ;;  %v8873_v7 = vadd.f32 %v4033_v1, %v10219_v0 }
 0x649   : > { %10249 = vst [vmem:[#allocation102_spill] sm:$0xff] %v8850_v21  ;;  %v8854_v53 = vrot.slane %v10250_v48, 1  ;;  %v10253_v2 = vmov %v10250_v48  ;;  %v4100_v21 = vperm.slane %v8859_v31, 0  ;;  %v6702_v48 = vld [vmem:[#allocation2 + $0xad4] sm:$0xf0]  ;;  %v8876_v22 = vadd.f32 %v4034_v28, %v10223_v32 }
 0x64a   : > { %10252 = vst [vmem:[#allocation106_spill] sm:$0xff] %v8859_v31  ;;  %v8866_v42 = vsel %vm1051_vm7, %v10253_v2, 0.0  ;;  %v8879_v39 = vmax.f32 %v8717_v44, 0.0  ;;  %v8881_v2 = vunpack.c.l.b16 %v4543_v4  ;;  %v4127_v12 = vsel %vm10257_vm4, %v4098_v27, %v4097_v47 }
 0x64b   : > { %10251 = vst [vmem:[#allocation105_spill] sm:$0xff] %v8854_v53  ;;  %v8870_v53 = vsel %vm10254_vm10, %v4644_v6, %v4606_v11  ;;  %v6387_v3 = vor.u32 %v6703_v37, %v6386_v54  ;;  %v8884_v25 = vor.u32 %v6699_v41, %v6404_v60  ;;  %v4101_v31 = vperm.slane %v8866_v42, 0  ;;  %v6430_v37 = vld [vmem:[#allocation2 + $0xb40] sm:$0xf] }
 0x64c   : > { %10255 = vst [vmem:[#allocation108_spill] sm:$0xff] %v8873_v7  ;;  %vm10258_vm15 = vcmask 1042434   ;;  %v4518_v1 = vpack.c.bf16 %v8873_v7, %v8873_v7  ;;  %v6383_v6 = vor.u32 %v6702_v48, %v6382_v24  ;;  %vm10259_vm3 = vcmask 1043459  }
 0x64d   : > { %10256 = vst [vmem:[#allocation84_spill] sm:$0xff] %v8876_v22  ;;  %v4128_v11 = vsel %vm10258_vm15, %v4099_v23, %v4127_v12  ;;  %v4519_v44 = vpack.c.bf16 %v8876_v22, %v8876_v22  ;;  %v3966_v4 = vrot.slane %v8879_v39, 2  ;;  %v3967_v47 = vrot.slane %v8879_v39, 4  ;;  %4724 = vmatpush.bf16.msrb.mxu0 %v6387_v3  ;;  %4773 = vmatpush.bf16.msrb.mxu1 %v8884_v25  ;;  %vm10263_vm0 = vmmov %vm10258_vm15 }
 0x64e   : > { %v4129_v28 = vsel %vm10259_vm3, %v4100_v21, %v4128_v11  ;;  %vm10260_vm7 = vcmask 1044484   ;;  %v8900_v12 = vadd.f32 %v4035_v63, %v10225_v58  ;;  %v3981_v24 = vrot.slane %v8879_v39, 1  ;;  %4967 = vmatpush.bf16.msrb.mxu3 %v6387_v3  ;;  %v6709_v63 = vld [vmem:[#allocation2 + $0xb44] sm:$0xf0]  ;;  %vm10276_vm10 = vmmov %vm10263_vm0 }
 0x64f   : > { %v8897_v41 = vsel %vm10260_vm7, %v4101_v31, %v4129_v28  ;;  %v4041_v54 = vsel %vm1055_vm6, %v8879_v39, 0.0  ;;  %v8908_v21 = vunpack.c.l.b16 %v4518_v1  ;;  %v3982_v27 = vrot.slane %v3966_v4, 1  ;;  %vm10265_vm6 = vmmov %vm10259_vm3 }
 0x650   : > { %v4043_v31 = vsel %vm1057_vm1, %v3966_v4, 0.0  ;;  %v8913_v23 = vunpack.c.l.b16 %v4519_v44  ;;  %v4042_v48 = vsel %vm1056_vm11, %v3981_v24, 0.0  ;;  %v8921_v3 = vsel %vm1059_vm5, %v3967_v47, 0.0  ;;  %vm10267_vm1 = vmmov %vm10260_vm7 }
 0x651   : > { %v4107_v10 = vperm.slane %v4043_v31, 0  ;;  %v8926_v11 = vsel %vm1058_vm14, %v3982_v27, 0.0  ;;  %v4105_v30 = vperm.slane %v4041_v54, 0  ;;  %v4106_v1 = vperm.slane %v4042_v48, 0  ;;  %4725 = vmatpush.bf16.msrb.mxu0 %v6383_v6  ;;  %vm10270_vm5 = vmmov %vm10263_vm0 }
 0x652   : > { %v8929_v28 = vadd.f32 %v4041_v54, %v10238_v51  ;;  %v8931_v44 = vrot.slane %v3967_v47, 1  ;;  %v4108_v56 = vperm.slane %v8926_v11, 0  ;;  %v8935_v20 = vadd.f32 %v4042_v48, %v10246_v36  ;;  %4968 = vmatpush.bf16.msrb.mxu3 %v6383_v6  ;;  %vm10272_vm11 = vmmov %vm10259_vm3 }
 0x653   : > { %v6431_v4 = vor.u32 %v6709_v63, %v6430_v37  ;;  %v4109_v15 = vperm.slane %v8921_v3, 0  ;;  %v4134_v24 = vsel %vm10232_vm2, %v4106_v1, %v4105_v30  ;;  %v8944_v47 = vadd.f32 %v8746_v33, %v10205_v55  ;;  %vm10274_vm14 = vmmov %vm10267_vm1 }
 0x654   : > { %10261 = vst [vmem:[#allocation85_spill] sm:$0xff] %v8929_v28  ;;  %v4526_v54 = vpack.c.bf16 %v8929_v28, %v8929_v28  ;;  %v4135_v27 = vsel %vm10263_vm0, %v4107_v10, %v4134_v24  ;;  %v8948_v48 = vadd.f32 %v4043_v31, %v10241_v59  ;;  %v10264_v6 = vpack.c.bf16 %v8686_v61, %v8686_v61  ;;  %v6698_v28 = vld [vmem:[#allocation2 + $0xa94] sm:$0xf0]  ;;  %vm10279_vm15 = vmmov %vm10259_vm3 }
 0x655   : > { %4984 = vmatpush.bf16.msra.mxu0 %v8664_v29  ;;  %10262 = vst [vmem:[#allocation86_spill] sm:$0xff] %v8944_v47  ;;  %v4527_v29 = vpack.c.bf16 %v8935_v20, %v8935_v20  ;;  %4942 = vmatpush.bf16.msrb.mxu2 %v6431_v4  ;;  %v4136_v63 = vsel %vm10265_vm6, %v4108_v56, %v4135_v27  ;;  %v10269_v56 = vrot.slane %v8643_v50, 6  ;;  %v6400_v27 = vld [vmem:[#allocation2 + $0xa90] sm:$0xf]  ;;  %vm10277_vm4 = vcmask 1045509   ;;  %vm10282_vm7 = vmmov %vm10267_vm1 }
 0x656   : > { %v4605_v37 = vunpack.c.l.b16 %v10264_v6  ;;  %v8956_v30 = vunpack.c.l.b16 %v4526_v54  ;;  %v4517_v33 = vpack.c.bf16 %v8944_v47, %v8944_v47  ;;  %v10266_v10 = vpack.c.bf16 %v8763_v9, %v8763_v9  ;;  %v6707_v47 = vld [vmem:[#allocation2 + $0xb24] sm:$0xf0]  ;;  %vm10284_vm0 = vmmov %vm10277_vm4 }
 0x657   : > { %v8964_v1 = vsel %vm10267_vm1, %v4109_v15, %v4136_v63  ;;  %v8966_v24 = vunpack.c.l.b16 %v4527_v29  ;;  %v10268_v60 = vpack.c.bf16 %v8769_v5, %v8769_v5  ;;  %v4633_v54 = vsel %vm10270_vm5, %v10269_v56, %v8699_v26  ;;  %v6426_v5 = vld [vmem:[#allocation2 + $0xb30] sm:$0xf] }
 0x658   : > { %v4611_v31 = vunpack.c.l.b16 %v10266_v10  ;;  %v4613_v22 = vunpack.c.l.b16 %v4517_v33  ;;  %v10271_v10 = vrot.slane %v8649_v35, 5  ;;  %v4638_v29 = vrot.slane %v8705_v13, 3  ;;  %v6422_v35 = vld [vmem:[#allocation2 + $0xb20] sm:$0xf] }
 0x659   : > { %v4612_v6 = vunpack.c.l.b16 %v10268_v60  ;;  %4985 = vmatpush.bf16.msra.mxu0 %v8680_v52  ;;  %v4640_v63 = vrot.slane %v8721_v17, 2  ;;  %v6708_v60 = vld [vmem:[#allocation2 + $0xb34] sm:$0xf0]  ;;  %v10273_v9 = vrot.slane %v8651_v40, 4  ;;  %v4642_v26 = vrot.slane %v4605_v37, 1 }
 0x65a   : > { %v4635_v15 = vsel %vm10272_vm11, %v10271_v10, %v4633_v54  ;;  %v10275_v56 = vrot.slane %v8800_v43, 6  ;;  %v4652_v33 = vrot.slane %v4611_v31, 3  ;;  %v10278_v13 = vrot.slane %v8802_v45, 5  ;;  %vm10303_vm11 = vmmov %vm10276_vm10 }
 0x65b   : > { %v4637_v50 = vsel %vm10274_vm14, %v10273_v9, %v4635_v15  ;;  %v4654_v10 = vrot.slane %v4612_v6, 2  ;;  %v4656_v7 = vrot.slane %v4613_v22, 1  ;;  %vm10280_vm3 = vcmask 1046534   ;;  %vm10304_vm14 = vmmov %vm10279_vm15 }
 0x65c   : > { %v4647_v52 = vsel %vm10276_vm10, %v10275_v56, %v8870_v53  ;;  %v4639_v54 = vsel %vm10277_vm4, %v4638_v29, %v4637_v50  ;;  %v10281_v9 = vrot.slane %v8804_v57, 4  ;;  %v6401_v43 = vor.u32 %v6698_v28, %v6400_v27  ;;  %vm10285_vm6 = vmmov %vm10280_vm3 }
 0x65d   : > { %v4649_v17 = vsel %vm10279_vm15, %v10278_v13, %v4647_v52  ;;  %v4641_v40 = vsel %vm10280_vm3, %v4640_v63, %v4639_v54  ;;  %v6427_v15 = vor.u32 %v6708_v60, %v6426_v5  ;;  %4986 = vmatpush.bf16.msra.mxu0 %v8884_v25  ;;  %vm10283_vm2 = vcmask 1047559   ;;  %vm10306_vm4 = vmmov %vm10282_vm7 }
 0x65e   : > { %v4651_v37 = vsel %vm10282_vm7, %v10281_v9, %v4649_v17  ;;  %v4643_v53 = vsel %vm10283_vm2, %v4642_v26, %v4641_v40  ;;  %v6423_v29 = vor.u32 %v6707_v47, %v6422_v35  ;;  %v4186_v45 = vrot.slane %v8631_v14, 4  ;;  %4774 = vmatpush.bf16.msrb.mxu1 %v6401_v43  ;;  %vm10286_vm1 = vmmov %vm10283_vm2  ;;  %v10293_v35 = vld [vmem:[#allocation31_spill] sm:$0xff] }
 0x65f   : > { %v4653_v31 = vsel %vm10284_vm0, %v4652_v33, %v4651_v37  ;;  %4943 = vmatpush.bf16.msrb.mxu2 %v6427_v15  ;;  %v4187_v22 = vrot.slane %v8631_v14, 6  ;;  %v4189_v57 = vrot.slane %v8795_v34, 4  ;;  %v4190_v28 = vrot.slane %v8795_v34, 6  ;;  %v10298_v9 = vld [vmem:[#allocation39_spill] sm:$0xff]  ;;  %vm10307_vm15 = vmmov %vm10303_vm11 }
 0x660   : > { %v4655_v6 = vsel %vm10285_vm6, %v4654_v10, %v4653_v31  ;;  %v4199_v25 = vrot.slane %v4186_v45, 7  ;;  %v9007_v27 = vadd.f32 %v8690_v62, %v10167_v49  ;;  %v10287_v47 = vrot.slane %v8631_v14, 2  ;;  %v10289_v62 = vld [vmem:[#allocation30_spill] sm:$0xff]  ;;  %v10290_v14 = vld [vmem:[#allocation104_spill] sm:$0xff]  ;;  %v6418_v31 = vld [vmem:[#allocation2 + $0xb10] sm:$0xf] }
 0x661   : > { %v4657_v5 = vsel %vm10286_vm1, %v4656_v7, %v4655_v6  ;;  %v4200_v50 = vrot.slane %v4187_v22, 7  ;;  %v4203_v26 = vrot.slane %v4189_v57, 7  ;;  %v4204_v56 = vrot.slane %v4190_v28, 7  ;;  %4987 = vmatpush.bf16.msra.mxu0 %v6401_v43  ;;  %v10297_v10 = vld [vmem:[#allocation38_spill] sm:$0xff]  ;;  %vm10308_vm3 = vmmov %vm10284_vm0 }
 0x662   : > { %v9012_v63 = vadd.f32 %v10287_v47, %v10173_v16  ;;  %5009 = vmatpush.bf16.msra.mxu1 %v6431_v4  ;;  %v9014_v60 = vpack.c.b16 %v4657_v5, %v4643_v53  ;;  %v9017_v52 = vadd.f32 %v4199_v25, %v10169_v19  ;;  %v9020_v7 = vadd.f32 %v4186_v45, %v10161_v38  ;;  %v10292_v4 = vld [vmem:[#allocation23_spill] sm:$0xff]  ;;  %v10295_v38 = vld [vmem:[#allocation36_spill] sm:$0xff]  ;;  %v10300_v47 = vld [vmem:[#allocation101_spill] sm:$0xff] }
 0x663   : > { %v9023_v49 = vadd.f32 %v4187_v22, %v10175_v18  ;;  %v9027_v16 = vadd.f32 %v10290_v14, %v10289_v62  ;;  %vm10291_vm5 = vcmask 523264   ;;  %4944 = vmatpush.bf16.msrb.mxu2 %v6423_v29  ;;  %v9032_v33 = vadd.f32 %v4200_v50, %v10292_v4  ;;  %v10296_v18 = vld [vmem:[#allocation90_spill] sm:$0xff]  ;;  %v6706_v5 = vld [vmem:[#allocation2 + $0xb14] sm:$0xf0]  ;;  %vm10309_vm7 = vmmov %vm10304_vm14 }
 0x664   : > { %10288 = vst [vmem:[#allocation87_spill] sm:$0xff] %v9014_v60  ;;  %6396 = vmatmul.msk.bf16.vlgmr.msrb.gmra.mxu0 %vm10291_vm5, %v9014_v60  ;;  %v10294_v19 = vrot.slane %v8795_v34, 2  ;;  %v9040_v13 = vadd.f32 %v4203_v26, %v10295_v38  ;;  %v4333_v17 = vperm.slane %v10296_v18, 1  ;;  %v9044_v40 = vadd.f32 %v4189_v57, %v10297_v10  ;;  %v10299_v57 = vld [vmem:[#allocation102_spill] sm:$0xff]  ;;  %v10301_v4 = vld [vmem:[#allocation88_spill] sm:$0xff]  ;;  %vm10310_vm2 = vmmov %vm10285_vm6 }
 0x665   : > { %v9047_v37 = vadd.f32 %v4204_v56, %v10298_v9  ;;  %v4335_v43 = vperm.slane %v9007_v27, 1  ;;  %v4336_v53 = vperm.slane %v9012_v63, 1  ;;  %v4337_v34 = vperm.slane %v9017_v52, 1  ;;  %vm10311_vm0 = vmmov %vm10306_vm4 }
 0x666   : > { %v9037_v54 = vadd.f32 %v10294_v19, %v10293_v35  ;;  %5010 = vmatpush.bf16.msra.mxu1 %v6427_v15  ;;  %v4338_v45 = vperm.slane %v9020_v7, 1  ;;  %v4339_v6 = vperm.slane %v9032_v33, 1  ;;  %v4340_v22 = vperm.slane %v9023_v49, 1  ;;  %vm10312_vm6 = vmmov %vm10286_vm1 }
 0x667   : > { %v4341_v25 = vperm.slane %v10299_v57, 1  ;;  %v4342_v50 = vperm.slane %v10300_v47, 1  ;;  %v4343_v26 = vperm.slane %v9027_v16, 1  ;;  %v4345_v62 = vperm.slane %v9040_v13, 1  ;;  %vm10313_vm1 = vmmov %vm10308_vm3 }
 0x668   : > { %v4344_v56 = vperm.slane %v9037_v54, 1  ;;  %v4346_v15 = vperm.slane %v9044_v40, 1  ;;  %v4347_v14 = vperm.slane %v9047_v37, 1  ;;  %v10302_v35 = vperm.slane %v10301_v4, 1  ;;  %vm10314_vm5 = vmmov %vm10310_vm2 }
 0x669   : > { %vm10305_vm10 = vcmask 1041409   ;;  %v6419_v9 = vor.u32 %v6706_v5, %v6418_v31  ;;  %v9068_v47 = vadd.f32 %v4190_v28, %v10205_v55  ;;  %v4534_v36 = vpack.c.bf16 %v10296_v18, %v10296_v18 }
 0x66a   : > { %v4364_v19 = vsel %vm10303_vm11, %v10302_v35, %v4333_v17  ;;  %v4370_v10 = vsel %vm10305_vm10, %v4341_v25, %v4340_v22  ;;  %5011 = vmatpush.bf16.msra.mxu1 %v6423_v29  ;;  %v4536_v4 = vpack.c.bf16 %v9007_v27, %v9007_v27  ;;  %v4537_v55 = vpack.c.bf16 %v9012_v63, %v9012_v63 }
 0x66b   : > { %v4365_v38 = vsel %vm10304_vm14, %v4335_v43, %v4364_v19  ;;  %v4371_v60 = vsel %vm10307_vm15, %v4342_v50, %v4370_v10  ;;  %4945 = vmatpush.bf16.msrb.mxu2 %v6419_v9  ;;  %v4538_v29 = vpack.c.bf16 %v9017_v52, %v9017_v52  ;;  %v4539_v18 = vpack.c.bf16 %v9020_v7, %v9020_v7  ;;  %vm10316_vm14 = vmmov %vm10312_vm6 }
 0x66c   : > { %v4366_v61 = vsel %vm10306_vm4, %v4336_v53, %v4365_v38  ;;  %v4372_v43 = vsel %vm10309_vm7, %v4343_v26, %v4371_v60  ;;  %v4540_v27 = vpack.c.bf16 %v9032_v33, %v9032_v33  ;;  %v4541_v63 = vpack.c.bf16 %v9023_v49, %v9023_v49  ;;  %v10319_v26 = vld [vmem:[#allocation68_spill] sm:$0xff] }
 0x66d   : > { %v4367_v17 = vsel %vm10308_vm3, %v4337_v34, %v4366_v61  ;;  %v4373_v53 = vsel %vm10311_vm0, %v4344_v56, %v4372_v43  ;;  %v4542_v52 = vpack.c.bf16 %v10299_v57, %v10299_v57  ;;  %vm10315_vm11 = vcmask 1040384   ;;  %v10320_v56 = vld [vmem:[#allocation56_spill] sm:$0xff]  ;;  %v10325_v43 = vld [vmem:[#allocation77_spill] sm:$0xff] }
 0x66e   : > { %v4368_v28 = vsel %vm10310_vm2, %v4338_v45, %v4367_v17  ;;  %v4374_v60 = vsel %vm10313_vm1, %v4345_v62, %v4373_v53  ;;  %5012 = vmatpush.bf16.msra.mxu1 %v6419_v9  ;;  %v4544_v7 = vpack.c.bf16 %v9027_v16, %v9027_v16  ;;  %v4545_v33 = vpack.c.bf16 %v9037_v54, %v9037_v54  ;;  %v10321_v62 = vld [vmem:[#allocation76_spill] sm:$0xff]  ;;  %v10323_v17 = vld [vmem:[#allocation69_spill] sm:$0xff] }
 0x66f   : > { %v4369_v61 = vsel %vm10312_vm6, %v4339_v6, %v4368_v28  ;;  %v4375_v31 = vsel %vm10314_vm5, %v4346_v15, %v4374_v60  ;;  %v4546_v49 = vpack.c.bf16 %v9040_v13, %v9040_v13  ;;  %v4547_v5 = vpack.c.bf16 %v9044_v40, %v9044_v40  ;;  %v10322_v15 = vld [vmem:[#allocation62_spill] sm:$0xff]  ;;  %v10326_v28 = vld [vmem:[#allocation63_spill] sm:$0xff]  ;;  %v10332_v57 = vld [vmem:[#allocation92_spill] sm:$0xff] }
 0x670   : > { %v4395_v34 = vsel %vm10315_vm11, 0.0, %v4369_v61  ;;  %v4376_v45 = vsel %vm10316_vm14, %v4347_v14, %v4375_v31  ;;  %v4548_v16 = vpack.c.bf16 %v9047_v37, %v9047_v37  ;;  %v4549_v54 = vpack.c.bf16 %v9068_v47, %v9068_v47  ;;  %v10324_v37 = vld [vmem:[#allocation58_spill] sm:$0xff]  ;;  %v10328_v31 = vld [vmem:[#allocation81_spill] sm:$0xff] }
 0x671   : > { %v4396_v22 = vsel %vm7438_vm8, 0.0, %v4395_v34  ;;  %v4397_v25 = vsel %vm7460_vm9, 0.0, %v4376_v45  ;;  %v4818_v50 = vunpack.c.l.b16 %v4534_v36  ;;  %vm1052_vm10 = vcmp.ge.f32.partialorder %v10320_v56, %v10319_v26 }
 0x672   : > { %vm1060_vm4 = vcmp.ge.f32.partialorder %v10322_v15, %v10321_v62  ;;  %v4400_v13 = vpack.c.bf16 %v4397_v25, %v4396_v22  ;;  %v4820_v14 = vunpack.c.l.b16 %v4536_v4  ;;  %v4821_v35 = vunpack.c.l.b16 %v4537_v55  ;;  %v10329_v4 = vld [vmem:[#allocation79_spill] sm:$0xff] }
 0x673   : > { %v4822_v40 = vunpack.c.l.b16 %v4538_v29  ;;  %v4823_v19 = vunpack.c.l.b16 %v4539_v18  ;;  %v4824_v38 = vunpack.c.l.b16 %v4540_v27  ;;  %v4825_v10 = vunpack.c.l.b16 %v4541_v63  ;;  %v10330_v63 = vld [vmem:[#allocation70_spill] sm:$0xff] }
 0x674   : > { %v4826_v9 = vunpack.c.l.b16 %v4542_v52  ;;  %vm1053_vm15 = vcmp.ge.f32.partialorder %v10324_v37, %v10323_v17  ;;  %vm1061_vm3 = vcmp.ge.f32.partialorder %v10326_v28, %v10325_v43  ;;  %vm10327_vm7 = vcmask 523264   ;;  %v10331_v52 = vld [vmem:[#allocation54_spill] sm:$0xff] }
 0x675   : > { %6414 = vmatmul.msk.bf16.vlgmr.msrb.gmra.mxu1 %vm10327_vm7, %v4400_v13  ;;  %v4828_v36 = vunpack.c.l.b16 %v4544_v7  ;;  %v4829_v53 = vunpack.c.l.b16 %v4545_v33  ;;  %v4830_v61 = vunpack.c.l.b16 %v4546_v49  ;;  %v4831_v60 = vunpack.c.l.b16 %v4547_v5 }
 0x676   : > { %vm1062_vm2 = vcmp.ge.f32.partialorder %v10329_v4, %v10328_v31  ;;  %v4832_v55 = vunpack.c.l.b16 %v4548_v16  ;;  %v4833_v29 = vunpack.c.l.b16 %v4549_v54  ;;  %v4850_v18 = vrot.slane %v4818_v50, 1  ;;  %v10353_v31 = vld [vmem:[#allocation106_spill] sm:$0xff] }
 0x677   : > { %v4852_v27 = vrot.slane %v4820_v14, 7  ;;  %vm1054_vm0 = vcmp.ge.f32.partialorder %v10331_v52, %v10330_v63  ;;  %v4854_v34 = vrot.slane %v4821_v35, 6  ;;  %v4856_v45 = vrot.slane %v4822_v40, 5 }
 0x678   : > { %v4858_v22 = vrot.slane %v4823_v19, 4  ;;  %v4860_v25 = vrot.slane %v4824_v38, 3  ;;  %vm10333_vm6 = vcmask 1041409   ;;  %v4862_v33 = vrot.slane %v4825_v10, 2 }
 0x679   : > { %v4851_v7 = vsel %vm10333_vm6, %v10332_v57, %v4850_v18  ;;  %v4864_v49 = vrot.slane %v4826_v9, 1  ;;  %v4866_v5 = vrot.slane %v4828_v36, 7  ;;  %vm10334_vm1 = vcmask 1042434   ;;  %vm10336_vm11 = vmmov %vm10333_vm6  ;;  %v10339_v57 = vld [vmem:[#allocation97_spill] sm:$0xff] }
 0x67a   : > { %v4853_v13 = vsel %vm10334_vm1, %v4852_v27, %v4851_v7  ;;  %v4868_v6 = vrot.slane %v4829_v53, 6  ;;  %v4870_v16 = vrot.slane %v4830_v61, 5  ;;  %v4872_v54 = vrot.slane %v4831_v60, 4  ;;  %vm10338_vm7 = vmmov %vm10334_vm1  ;;  %v10342_v61 = vld [vmem:[#allocation105_spill] sm:$0xff] }
 0x67b   : > { %vm10335_vm5 = vcmask 1043459   ;;  %v4865_v14 = vsel %vm10336_vm11, %v8881_v2, %v4864_v49  ;;  %v4874_v35 = vrot.slane %v4832_v55, 3  ;;  %v4876_v40 = vrot.slane %v4833_v29, 2 }
 0x67c   : > { %v4855_v50 = vsel %vm10335_vm5, %v4854_v34, %v4853_v13  ;;  %vm10337_vm14 = vcmask 1044484   ;;  %v4867_v38 = vsel %vm10338_vm7, %v4866_v5, %v4865_v14  ;;  %v3965_v10 = vrot.slane %v10339_v57, 6  ;;  %vm10341_vm1 = vmmov %vm10335_vm5 }
 0x67d   : > { %v4857_v19 = vsel %vm10337_vm14, %v4856_v45, %v4855_v50  ;;  %v3968_v9 = vrot.slane %v8879_v39, 6  ;;  %vm10340_vm6 = vcmask 1045509   ;;  %v4869_v53 = vsel %vm10341_vm1, %v4868_v6, %v4867_v38  ;;  %vm10344_vm11 = vmmov %vm10337_vm14  ;;  %v10352_v50 = vld [vmem:[#allocation55_spill] sm:$0xff] }
 0x67e   : > { %v4859_v36 = vsel %vm10340_vm6, %v4858_v22, %v4857_v19  ;;  %v4038_v60 = vsel %vm1052_vm10, %v10342_v61, 0.0  ;;  %v4046_v2 = vsel %vm1060_vm4, %v8931_v44, 0.0  ;;  %vm10343_vm5 = vcmask 1046534   ;;  %vm10346_vm7 = vmmov %vm10340_vm6 }
 0x67f   : > { %v4861_v55 = vsel %vm10343_vm5, %v4860_v25, %v4859_v36  ;;  %v4871_v29 = vsel %vm10344_vm11, %v4870_v16, %v4869_v53  ;;  %v3980_v18 = vrot.slane %v3965_v10, 1  ;;  %v3984_v27 = vrot.slane %v3968_v9, 1  ;;  %vm10347_vm10 = vmmov %vm10343_vm5 }
 0x680   : > { %vm10345_vm14 = vcmask 1047559   ;;  %v4873_v6 = vsel %vm10346_vm7, %v4872_v54, %v4871_v29  ;;  %v4039_v26 = vsel %vm1053_vm15, %v3965_v10, 0.0  ;;  %v4047_v45 = vsel %vm1061_vm3, %v3968_v9, 0.0  ;;  %vm10349_vm15 = vmmov %vm10340_vm6 }
 0x681   : > { %v4863_v34 = vsel %vm10345_vm14, %v4862_v33, %v4861_v55  ;;  %v4875_v44 = vsel %vm10347_vm10, %v4874_v35, %v4873_v6  ;;  %v4040_v62 = vsel %vm1054_vm0, %v3980_v18, 0.0  ;;  %v4048_v22 = vsel %vm1062_vm2, %v3984_v27, 0.0  ;;  %vm10348_vm4 = vmmov %vm10345_vm14  ;;  %v10354_v35 = vld [vmem:[#allocation47_spill] sm:$0xff] }
 0x682   : > { %v4102_v25 = vperm.slane %v4038_v60, 0  ;;  %v4877_v7 = vsel %vm10348_vm4, %v4876_v40, %v4875_v44  ;;  %v4103_v33 = vperm.slane %v4039_v26, 0  ;;  %v4104_v17 = vperm.slane %v4040_v62, 0  ;;  %vm10350_vm3 = vmmov %vm10343_vm5 }
 0x683   : > { %v4110_v49 = vperm.slane %v4046_v2, 0  ;;  %v4906_v5 = vpack.c.b16 %v4877_v7, %v4863_v34  ;;  %v4111_v13 = vperm.slane %v4047_v45, 0  ;;  %v4112_v43 = vperm.slane %v4048_v22, 0  ;;  %vm10351_vm0 = vmmov %vm10340_vm6 }
 0x684   : > { %v4131_v16 = vsel %vm10349_vm15, %v4102_v25, %v8897_v41  ;;  %v9171_v14 = vadd.f32 %v10353_v31, %v10352_v50  ;;  %v9175_v40 = vadd.f32 %v8866_v42, %v10354_v35  ;;  %vm10355_vm2 = vcmask 523264   ;;  %vm10357_vm1 = vmmov %vm10348_vm4 }
 0x685   : > { %v4132_v54 = vsel %vm10350_vm3, %v4103_v33, %v4131_v16  ;;  %v4138_v63 = vsel %vm10351_vm0, %v4110_v49, %v8964_v1  ;;  %6432 = vmatmul.msk.bf16.vlgmr.msrb.gmra.mxu2 %vm10355_vm2, %v4906_v5  ;;  %vm10356_vm6 = vmmov %vm10355_vm2  ;;  %v9182_v38 = vadd.f32 %v4038_v60, %v10320_v56  ;;  %v4658_v1 = vrot.slane %v8913_v23, 7 }
 0x686   : > { %6434 = vmatmul.msk.bf16.vlgmr.msrb.gmra.mxu3 %vm10356_vm6, %v4906_v5  ;;  %v4133_v19 = vsel %vm10357_vm1, %v4104_v17, %v4132_v54  ;;  %vm10358_vm5 = vmmov %vm10350_vm3  ;;  %v9190_v42 = vadd.f32 %v4039_v26, %v10324_v37  ;;  %v9193_v36 = vadd.f32 %v4040_v62, %v10331_v52  ;;  %v9200_v61 = vadd.f32 %v8926_v11, %v10248_v46 }
 0x687   : > { %v4139_v41 = vsel %vm10358_vm5, %v4111_v13, %v4138_v63  ;;  %vm10359_vm11 = vmmov %vm10357_vm1  ;;  %v9187_v9 = vsub.f32 %v10339_v57, %v4133_v19  ;;  %v9204_v23 = vadd.f32 %v8921_v3, %v10243_v8  ;;  %v9207_v57 = vadd.f32 %v4046_v2, %v10322_v15 }
 0x688   : > { %v4140_v10 = vsel %vm10359_vm11, %v4112_v43, %v4139_v41  ;;  %v9210_v60 = vadd.f32 %v4047_v45, %v10326_v28  ;;  %v9213_v55 = vadd.f32 %v4048_v22, %v10329_v4  ;;  %v4521_v11 = vpack.c.bf16 %v9171_v14, %v9171_v14  ;;  %vm10366_vm3 = vmmov %vm10351_vm0 }
 0x689   : > { %v9196_v53 = vsub.f32 %v8879_v39, %v4140_v10  ;;  %v4520_v39 = vpack.c.bf16 %v8900_v12, %v8900_v12  ;;  %v4522_v29 = vpack.c.bf16 %v9175_v40, %v9175_v40  ;;  %v4523_v3 = vpack.c.bf16 %v9182_v38, %v9182_v38  ;;  %vm10368_vm2 = vmmov %vm10358_vm5 }
 0x68a   : > { %10360 = vst [vmem:[#allocation25_spill] sm:$0xff] %v9213_v55  ;;  %v4524_v2 = vpack.c.bf16 %v9190_v42, %v9190_v42  ;;  %v4525_v18 = vpack.c.bf16 %v9193_v36, %v9193_v36  ;;  %v4528_v27 = vpack.c.bf16 %v8948_v48, %v8948_v48  ;;  %v4529_v34 = vpack.c.bf16 %v9200_v61, %v9200_v61  ;;  %vm10371_vm11 = vmmov %vm10366_vm3 }
 0x68b   : > { %v4530_v6 = vpack.c.bf16 %v9204_v23, %v9204_v23  ;;  %v4531_v26 = vpack.c.bf16 %v9207_v57, %v9207_v57  ;;  %v4532_v45 = vpack.c.bf16 %v9210_v60, %v9210_v60  ;;  %v4533_v44 = vpack.c.bf16 %v9213_v55, %v9213_v55 }
 0x68c   : > { %v4616_v62 = vunpack.c.l.b16 %v4520_v39  ;;  %v4617_v22 = vunpack.c.l.b16 %v4521_v11  ;;  %v4618_v25 = vunpack.c.l.b16 %v4522_v29  ;;  %v4619_v7 = vunpack.c.l.b16 %v4523_v3 }
 0x68d   : > { %v4620_v33 = vunpack.c.l.b16 %v4524_v2  ;;  %v4621_v17 = vunpack.c.l.b16 %v4525_v18  ;;  %v4624_v49 = vunpack.c.l.b16 %v4528_v27  ;;  %v4625_v5 = vunpack.c.l.b16 %v4529_v34 }
 0x68e   : > { %v4626_v13 = vunpack.c.l.b16 %v4530_v6  ;;  %v4627_v43 = vunpack.c.l.b16 %v4531_v26  ;;  %v4628_v16 = vunpack.c.l.b16 %v4532_v45  ;;  %v4629_v54 = vunpack.c.l.b16 %v4533_v44 }
 0x68f   : > { %vm10361_vm14 = vcmask 1041409   ;;  %v4660_v31 = vrot.slane %v4616_v62, 6  ;;  %v4662_v19 = vrot.slane %v4617_v22, 5  ;;  %v4664_v41 = vrot.slane %v4618_v25, 4 }
 0x690   : > { %v4659_v63 = vsel %vm10361_vm14, %v4658_v1, %v8908_v21  ;;  %v4666_v10 = vrot.slane %v4619_v7, 3  ;;  %v4668_v55 = vrot.slane %v4620_v33, 2  ;;  %vm10362_vm7 = vcmask 1042434   ;;  %vm10365_vm15 = vmmov %vm10361_vm14 }
 0x691   : > { %v4661_v39 = vsel %vm10362_vm7, %v4660_v31, %v4659_v63  ;;  %v4670_v11 = vrot.slane %v4621_v17, 1  ;;  %v4672_v29 = vrot.slane %v8966_v24, 7  ;;  %v4674_v3 = vrot.slane %v4624_v49, 6  ;;  %vm10367_vm0 = vmmov %vm10362_vm7 }
 0x692   : > { %vm10363_vm10 = vcmask 1043459   ;;  %v4676_v18 = vrot.slane %v4625_v5, 5  ;;  %v4678_v27 = vrot.slane %v4626_v13, 4  ;;  %v4680_v34 = vrot.slane %v4627_v43, 3  ;;  %vm10372_vm14 = vmmov %vm10368_vm2 }
 0x693   : > { %v4663_v2 = vsel %vm10363_vm10, %v4662_v19, %v4661_v39  ;;  %vm10364_vm4 = vcmask 1044484   ;;  %v4673_v21 = vsel %vm10365_vm15, %v4672_v29, %v8956_v30  ;;  %v4682_v1 = vrot.slane %v4628_v16, 2  ;;  %vm10369_vm6 = vmmov %vm10363_vm10 }
 0x694   : > { %v4665_v6 = vsel %vm10364_vm4, %v4664_v41, %v4663_v2  ;;  %v4684_v26 = vrot.slane %v4629_v54, 1  ;;  %v4675_v44 = vsel %vm10367_vm0, %v4674_v3, %v4673_v21  ;;  %v4191_v62 = vrot.slane %v9187_v9, 2  ;;  %vm10370_vm5 = vmmov %vm10364_vm4 }
 0x695   : > { %v4667_v45 = vsel %vm10366_vm3, %v4666_v10, %v4665_v6  ;;  %v4192_v24 = vrot.slane %v9187_v9, 4  ;;  %v4677_v25 = vsel %vm10369_vm6, %v4676_v18, %v4675_v44  ;;  %v4193_v7 = vrot.slane %v9187_v9, 6  ;;  %vm10373_vm7 = vmmov %vm10357_vm1 }
 0x696   : > { %v4669_v22 = vsel %vm10368_vm2, %v4668_v55, %v4667_v45  ;;  %v4194_v33 = vrot.slane %v9196_v53, 2  ;;  %v4679_v17 = vsel %vm10370_vm5, %v4678_v27, %v4677_v25  ;;  %v4195_v49 = vrot.slane %v9196_v53, 4  ;;  %vm10376_vm4 = vmmov %vm10365_vm15 }
 0x697   : > { %v4671_v30 = vsel %vm10357_vm1, %v4670_v11, %v4669_v22  ;;  %v4196_v5 = vrot.slane %v9196_v53, 6  ;;  %v4681_v13 = vsel %vm10371_vm11, %v4680_v34, %v4679_v17  ;;  %v4205_v43 = vrot.slane %v9187_v9, 7  ;;  %vm10377_vm15 = vmmov %vm10367_vm0 }
 0x698   : > { %v4206_v16 = vrot.slane %v4191_v62, 7  ;;  %v4207_v55 = vrot.slane %v4192_v24, 7  ;;  %v4683_v54 = vsel %vm10372_vm14, %v4682_v1, %v4681_v13  ;;  %v4208_v63 = vrot.slane %v4193_v7, 7  ;;  %vm10378_vm3 = vmmov %vm10376_vm4 }
 0x699   : > { %v4209_v31 = vrot.slane %v9196_v53, 7  ;;  %v4210_v19 = vrot.slane %v4194_v33, 7  ;;  %v4450_v41 = vperm.slane %v8900_v12, 0  ;;  %v4457_v10 = vperm.slane %v8935_v20, 0  ;;  %vm10379_vm0 = vmmov %vm10369_vm6 }
 0x69a   : > { %v4685_v39 = vsel %vm10373_vm7, %v4684_v26, %v4683_v54  ;;  %v4211_v11 = vrot.slane %v4195_v49, 7  ;;  %v4212_v3 = vrot.slane %v4196_v5, 7  ;;  %v9269_v2 = vadd.f32 %v4205_v43, %v10219_v0  ;;  %vm10380_vm2 = vmmov %vm10377_vm15 }
 0x69b   : > { %v9266_v29 = vpack.c.b16 %v4685_v39, %v4671_v30  ;;  %v9273_v18 = vadd.f32 %v9187_v9, %v10223_v32  ;;  %v9276_v27 = vadd.f32 %v4206_v16, %v10225_v58  ;;  %v9279_v34 = vadd.f32 %v4191_v62, %v10352_v50  ;;  %vm10381_vm6 = vmmov %vm10370_vm5 }
 0x69c   : > { %v9282_v6 = vadd.f32 %v4207_v55, %v10354_v35  ;;  %v9285_v21 = vadd.f32 %v4192_v24, %v10320_v56  ;;  %vm10374_vm10 = vcmask 523264   ;;  %v9290_v0 = vadd.f32 %v4208_v63, %v10324_v37  ;;  %v10375_v35 = vld [vmem:[#allocation59_spill] sm:$0xff]  ;;  %vm10382_vm1 = vmmov %vm10379_vm0 }
 0x69d   : > { %6397 = vmatmul.msk.bf16.gmra.mxu0 %vm10374_vm10, %v9266_v29  ;;  %v9293_v32 = vadd.f32 %v4193_v7, %v10331_v52  ;;  %v9296_v58 = vadd.f32 %v4209_v31, %v10238_v51  ;;  %v9299_v50 = vadd.f32 %v4210_v19, %v10241_v59  ;;  %v9303_v9 = vadd.f32 %v9196_v53, %v10375_v35  ;;  %vm10383_vm5 = vmmov %vm10371_vm11 }
 0x69e   : > { %v9306_v56 = vadd.f32 %v4194_v33, %v10248_v46  ;;  %v9309_v1 = vadd.f32 %v4211_v11, %v10243_v8  ;;  %v9312_v37 = vadd.f32 %v4195_v49, %v10322_v15  ;;  %v9315_v52 = vadd.f32 %v4212_v3, %v10326_v28  ;;  %vm10384_vm11 = vmmov %vm10381_vm6 }
 0x69f   : > { %v4348_v51 = vperm.slane %v9068_v47, 1  ;;  %v4349_v59 = vperm.slane %v9269_v2, 1  ;;  %v4350_v26 = vperm.slane %v9273_v18, 1  ;;  %v4351_v53 = vperm.slane %v9276_v27, 1  ;;  %vm10385_vm7 = vmmov %vm10383_vm5 }
 0x6a0   : > { %v4352_v46 = vperm.slane %v9279_v34, 1  ;;  %v4353_v45 = vperm.slane %v9282_v6, 1  ;;  %v4354_v8 = vperm.slane %v9285_v21, 1  ;;  %v4355_v15 = vperm.slane %v9290_v0, 1 }
 0x6a1   : > { %v4356_v44 = vperm.slane %v9293_v32, 1  ;;  %v4357_v28 = vperm.slane %v9296_v58, 1  ;;  %v4359_v47 = vperm.slane %v9299_v50, 1  ;;  %v4358_v62 = vperm.slane %v9303_v9, 1 }
 0x6a2   : > { %v4360_v24 = vperm.slane %v9306_v56, 1  ;;  %v4361_v22 = vperm.slane %v9309_v1, 1  ;;  %v4377_v25 = vsel %vm10376_vm4, %v4349_v59, %v4348_v51  ;;  %v4362_v7 = vperm.slane %v9312_v37, 1  ;;  %vm10387_vm4 = vmmov %vm10372_vm14 }
 0x6a3   : > { %v4363_v33 = vperm.slane %v9315_v52, 1  ;;  %v4378_v30 = vsel %vm10377_vm15, %v4350_v26, %v4377_v25  ;;  %v4384_v17 = vsel %vm10378_vm3, %v4357_v28, %v4356_v44  ;;  %v4276_v43 = vadd.f32 %v4196_v5, %v10329_v4 }
 0x6a4   : > { %v4379_v49 = vsel %vm10379_vm0, %v4351_v53, %v4378_v30  ;;  %v4385_v13 = vsel %vm10380_vm2, %v4358_v62, %v4384_v17  ;;  %v4550_v16 = vpack.c.bf16 %v9269_v2, %v9269_v2  ;;  %v4551_v63 = vpack.c.bf16 %v9273_v18, %v9273_v18 }
 0x6a5   : > { %v4380_v55 = vsel %vm10381_vm6, %v4352_v46, %v4379_v49  ;;  %v4386_v54 = vsel %vm10382_vm1, %v4359_v47, %v4385_v13  ;;  %v4552_v31 = vpack.c.bf16 %v9276_v27, %v9276_v27  ;;  %v4553_v4 = vpack.c.bf16 %v9279_v34, %v9279_v34 }
 0x6a6   : > { %v4381_v19 = vsel %vm10383_vm5, %v4353_v45, %v4380_v55  ;;  %v4387_v39 = vsel %vm10384_vm11, %v4360_v24, %v4386_v54  ;;  %v4554_v5 = vpack.c.bf16 %v9282_v6, %v9282_v6  ;;  %v4555_v2 = vpack.c.bf16 %v9285_v21, %v9285_v21 }
 0x6a7   : > { %v4382_v11 = vsel %vm10372_vm14, %v4354_v8, %v4381_v19  ;;  %v4388_v3 = vsel %vm10385_vm7, %v4361_v22, %v4387_v39  ;;  %v4556_v18 = vpack.c.bf16 %v9290_v0, %v9290_v0  ;;  %vm10386_vm10 = vcmask 1047559  }
 0x6a8   : > { %v4383_v27 = vsel %vm10386_vm10, %v4355_v15, %v4382_v11  ;;  %v4389_v35 = vsel %vm10387_vm4, %v4362_v7, %v4388_v3  ;;  %v4557_v34 = vpack.c.bf16 %v9293_v32, %v9293_v32  ;;  %v4558_v6 = vpack.c.bf16 %v9296_v58, %v9296_v58  ;;  %vm10388_vm15 = vmmov %vm10386_vm10 }
 0x6a9   : > { %v4390_v51 = vsel %vm10388_vm15, %v4363_v33, %v4389_v35  ;;  %v4398_v26 = vsel %vm7826_vm13, 0.0, %v4383_v27  ;;  %v4559_v21 = vpack.c.bf16 %v9303_v9, %v9303_v9  ;;  %v4560_v0 = vpack.c.bf16 %v9299_v50, %v9299_v50  ;;  %vm10399_vm10 = vmmov %vm10382_vm1 }
 0x6aa   : > { %v4399_v46 = vsel %vm7814_vm12, 0.0, %v4390_v51  ;;  %v4561_v32 = vpack.c.bf16 %v9306_v56, %v9306_v56  ;;  %v4562_v58 = vpack.c.bf16 %v9309_v1, %v9309_v1  ;;  %v4563_v45 = vpack.c.bf16 %v9312_v37, %v9312_v37  ;;  %v10392_v1 = vld [vmem:[#allocation87_spill] sm:$0xff] }
 0x6ab   : > { %v4401_v8 = vpack.c.bf16 %v4399_v46, %v4398_v26  ;;  %v4564_v15 = vpack.c.bf16 %v9315_v52, %v9315_v52  ;;  %v4834_v9 = vunpack.c.l.b16 %v4550_v16  ;;  %v4836_v44 = vunpack.c.l.b16 %v4552_v31  ;;  %v10398_v26 = vld [vmem:[#allocation95_spill] sm:$0xff] }
 0x6ac   : > { %v4565_v28 = vpack.c.bf16 %v4276_v43, %v4276_v43  ;;  %v4837_v50 = vunpack.c.l.b16 %v4553_v4  ;;  %v4838_v47 = vunpack.c.l.b16 %v4554_v5  ;;  %v4839_v62 = vunpack.c.l.b16 %v4555_v2 }
 0x6ad   : > { %vm10391_vm3 = vcmask 523264   ;;  %v4835_v24 = vunpack.c.l.b16 %v4551_v63  ;;  %v4840_v56 = vunpack.c.l.b16 %v4556_v18  ;;  %v4842_v22 = vunpack.c.l.b16 %v4558_v6 }
 0x6ae   : > { %6415 = vmatmul.msk.bf16.gmra.mxu1 %vm10391_vm3, %v4401_v8  ;;  %v4844_v25 = vunpack.c.l.b16 %v4560_v0  ;;  %vm10393_vm0 = vmmov %vm10391_vm3  ;;  %v4841_v37 = vunpack.c.l.b16 %v4557_v34  ;;  %v4843_v7 = vunpack.c.l.b16 %v4559_v21  ;;  %v4845_v33 = vunpack.c.l.b16 %v4561_v32  ;;  %v10400_v32 = vld [vmem:[#allocation91_spill] sm:$0xff] }
 0x6af   : > { %6436 = vmatmul.msk.bf16.vlgmr.msra.gmra.mxu0 %vm10393_vm0, %v10392_v1  ;;  %v4846_v30 = vunpack.c.l.b16 %v4562_v58  ;;  %v4847_v52 = vunpack.c.l.b16 %v4563_v45  ;;  %v4848_v17 = vunpack.c.l.b16 %v4564_v15  ;;  %v4878_v49 = vrot.slane %v4834_v9, 1  ;;  %v10401_v45 = vld [vmem:[#allocation89_spill] sm:$0xff]  ;;  %v10402_v8 = vld [vmem:[#allocation11_spill] sm:$0xff]  ;;  %vm10406_vm3 = vmmov %vm10384_vm11 }
 0x6b0   : > { %v4880_v13 = vrot.slane %v4836_v44, 7  ;;  %v4849_v43 = vunpack.c.l.b16 %v4565_v28  ;;  %v4882_v16 = vrot.slane %v4837_v50, 6  ;;  %v4884_v55 = vrot.slane %v4838_v47, 5  ;;  %v10407_v50 = vld [vmem:[#allocation94_spill] sm:$0xff]  ;;  %vm10409_vm0 = vmmov %vm10382_vm1 }
 0x6b1   : > { %v4886_v54 = vrot.slane %v4839_v62, 4  ;;  %vm10394_vm2 = vcmask 1041409   ;;  %v4888_v31 = vrot.slane %v4840_v56, 3  ;;  %v4892_v19 = vrot.slane %v4842_v22, 1  ;;  %v10411_v56 = vld [vmem:[#allocation96_spill] sm:$0xff] }
 0x6b2   : > { %v4879_v63 = vsel %vm10394_vm2, %v4835_v24, %v4878_v49  ;;  %v4894_v39 = vrot.slane %v4844_v25, 7  ;;  %vm10395_vm6 = vcmask 1042434   ;;  %v4890_v5 = vrot.slane %v4841_v37, 2  ;;  %vm10396_vm5 = vmmov %vm10394_vm2  ;;  %v10410_v24 = vld [vmem:[#allocation100_spill] sm:$0xff] }
 0x6b3   : > { %v4881_v4 = vsel %vm10395_vm6, %v4880_v13, %v4879_v63  ;;  %v4896_v11 = vrot.slane %v4845_v33, 6  ;;  %v4898_v3 = vrot.slane %v4846_v30, 5  ;;  %v4893_v18 = vsel %vm10396_vm5, %v4843_v7, %v4892_v19  ;;  %vm10397_vm14 = vmmov %vm10395_vm6  ;;  %v10415_v37 = vld [vmem:[#allocation108_spill] sm:$0xff]  ;;  %v10416_v33 = vld [vmem:[#allocation99_spill] sm:$0xff] }
 0x6b4   : > { %v4883_v2 = vsel %vm10382_vm1, %v4882_v16, %v4881_v4  ;;  %v4900_v27 = vrot.slane %v4847_v52, 4  ;;  %v4902_v35 = vrot.slane %v4848_v17, 3  ;;  %v4895_v6 = vsel %vm10397_vm14, %v4894_v39, %v4893_v18  ;;  %vm10404_vm4 = vmmov %vm10395_vm6  ;;  %v10419_v17 = vld [vmem:[#allocation98_spill] sm:$0xff]  ;;  %v10427_v19 = vld [vmem:[#allocation93_spill] sm:$0xff] }
 0x6b5   : > { %v4885_v34 = vsel %vm10384_vm11, %v4884_v55, %v4883_v2  ;;  %v4904_v51 = vrot.slane %v4849_v43, 2  ;;  %v4439_v21 = vperm.slane %v10398_v26, 0  ;;  %v4897_v46 = vsel %vm10399_vm10, %v4896_v11, %v4895_v6  ;;  %vm10413_vm2 = vmmov %vm10404_vm4  ;;  %v10423_v16 = vld [vmem:[#allocation86_spill] sm:$0xff]  ;;  %v10433_v18 = vld [vmem:[#allocation103_spill] sm:$0xff] }
 0x6b6   : > { %v4887_v0 = vsel %vm10385_vm7, %v4886_v54, %v4885_v34  ;;  %v4440_v58 = vperm.slane %v10400_v32, 0  ;;  %v10403_v15 = vperm.slane %v10402_v8, 0  ;;  %vm10405_vm15 = vcmask 1046534   ;;  %vm10414_vm6 = vmmov %vm10385_vm7  ;;  %v10424_v54 = vld [vmem:[#allocation107_spill] sm:$0xff] }
 0x6b7   : > { %v4889_v44 = vsel %vm10405_vm15, %v4888_v31, %v4887_v0  ;;  %v4899_v28 = vsel %vm10406_vm3, %v4898_v3, %v4897_v46  ;;  %v10408_v47 = vperm.slane %v10407_v50, 0  ;;  %v10412_v22 = vperm.slane %v10411_v56, 0  ;;  %vm10418_vm1 = vmmov %vm10406_vm3  ;;  %v10453_v50 = vld [vmem:[#allocation85_spill] sm:$0xff] }
 0x6b8   : > { %v4465_v9 = vsel %vm10404_vm4, %v10403_v15, %v10401_v45  ;;  %v4901_v1 = vsel %vm10414_vm6, %v4900_v27, %v4899_v28  ;;  %v4448_v7 = vperm.slane %v10415_v37, 0  ;;  %v10417_v30 = vperm.slane %v10416_v33, 0  ;;  %vm10421_vm5 = vmmov %vm10409_vm0  ;;  %v10467_v33 = vld [vmem:[#allocation83_spill] sm:$0xff] }
 0x6b9   : > { %v4466_v62 = vsel %vm10409_vm0, %v10408_v47, %v4465_v9  ;;  %v4472_v25 = vsel %vm10413_vm2, %v10412_v22, %v10410_v24  ;;  %v10420_v49 = vperm.slane %v10419_v17, 0  ;;  %vm10422_vm11 = vmmov %vm10405_vm15  ;;  %v4447_v55 = vperm.slane %v10423_v16, 0  ;;  %v10446_v9 = vld [vmem:[#allocation84_spill] sm:$0xff]  ;;  %v6454_v17 = vld [vmem:[#allocation2 + $0xbc0] sm:$0xf] }
 0x6ba   : > { %v4467_v52 = vsel %vm10418_vm1, %v10417_v30, %v4466_v62  ;;  %v4903_v43 = vsel %vm10422_vm11, %v4902_v35, %v4901_v1  ;;  %v10425_v63 = vperm.slane %v10424_v54, 0  ;;  %vm10426_vm14 = vmmov %vm10414_vm6  ;;  %v10428_v39 = vperm.slane %v10427_v19, 0  ;;  %v10456_v62 = vld [vmem:[#allocation25_spill] sm:$0xff] }
 0x6bb   : > { %v4473_v13 = vsel %vm10421_vm5, %v10420_v49, %v4472_v25  ;;  %vm10429_vm7 = vmmov %vm10418_vm1  ;;  %vm10430_vm10 = vcmask 1047559   ;;  %v10434_v27 = vperm.slane %v10433_v18, 0  ;;  %v4458_v34 = vperm.slane %v8948_v48, 0  ;;  %v6717_v49 = vld [vmem:[#allocation2 + $0xbc4] sm:$0xf0] }
 0x6bc   : > { %v4468_v31 = vsel %vm10426_vm14, %v10425_v63, %v4467_v52  ;;  %v4474_v4 = vsel %vm10429_vm7, %v10428_v39, %v4473_v13  ;;  %v4891_v11 = vsel %vm10430_vm10, %v4890_v5, %v4889_v44  ;;  %vm10431_vm4 = vmmov %vm10430_vm10  ;;  %v4451_v32 = vperm.slane %v9171_v14, 0  ;;  %v10441_v5 = vld [vmem:[#allocation50_spill] sm:$0xff]  ;;  %v6450_v63 = vld [vmem:[#allocation2 + $0xbb0] sm:$0xf] }
 0x6bd   : > { %v4905_v3 = vsel %vm10431_vm4, %v4904_v51, %v4903_v43  ;;  %vm10432_vm15 = vmmov %vm10422_vm11  ;;  %vm10439_vm1 = vcmask 523264   ;;  %v4459_v48 = vperm.slane %v9200_v61, 0  ;;  %v4453_v14 = vperm.slane %v9182_v38, 0  ;;  %v6446_v19 = vld [vmem:[#allocation2 + $0xba0] sm:$0xf] }
 0x6be   : > { %v4469_v2 = vsel %vm10432_vm15, %v4439_v21, %v4468_v31  ;;  %vm10435_vm3 = vmmov %vm10414_vm6  ;;  %v4907_v6 = vpack.c.b16 %v4905_v3, %v4891_v11  ;;  %v10443_v21 = vld [vmem:[#allocation51_spill] sm:$0xff]  ;;  %v4460_v15 = vperm.slane %v9204_v23, 0  ;;  %v10447_v44 = vperm.slane %v10446_v9, 0  ;;  %v6716_v31 = vld [vmem:[#allocation2 + $0xbb4] sm:$0xf0] }
 0x6bf   : > { %v4475_v35 = vsel %vm10435_vm3, %v10434_v27, %v4474_v4  ;;  %vm10436_vm0 = vmmov %vm10431_vm4  ;;  %vm10444_vm14 = vnez %v10443_v21  ;;  %vm10448_vm10 = vcmask 1041409   ;;  %vm10451_vm3 = vcmask 1042434   ;;  %v6715_v4 = vld [vmem:[#allocation2 + $0xba4] sm:$0xf0]  ;;  %v6472_v11 = vld [vmem:[#allocation2 + $0xb80] sm:$0xf] }
 0x6c0   : > { %v4470_v26 = vsel %vm10436_vm0, %v4440_v58, %v4469_v2  ;;  %vm10437_vm2 = vmmov %vm10422_vm11  ;;  %6433 = vmatmul.msk.bf16.gmra.mxu2 %vm10439_vm1, %v4907_v6  ;;  %vm10442_vm11 = vnez %v10441_v5  ;;  %v4452_v58 = vperm.slane %v9175_v40, 0  ;;  %v4478_v28 = vsel %vm10448_vm10, %v4450_v41, %v10447_v44  ;;  %v6713_v3 = vld [vmem:[#allocation2 + $0xb84] sm:$0xf0] }
 0x6c1   : > { %v4476_v0 = vsel %vm10437_vm2, %v4447_v55, %v4475_v35  ;;  %vm10438_vm6 = vmmov %vm10436_vm0  ;;  %v4496_v51 = vsel %vm10442_vm11, 0.0, %v4470_v26  ;;  %v4461_v40 = vperm.slane %v9207_v57, 0  ;;  %v4479_v38 = vsel %vm10451_vm3, %v4451_v32, %v4478_v28  ;;  %v9479_v35 = vld [vmem:[#allocation5 + $0x10] ss:$0 sm:$0xff] }
 0x6c2   : > { %v4477_v46 = vsel %vm10438_vm6, %v4448_v7, %v4476_v0  ;;  %vm10440_vm5 = vmmov %vm10439_vm1  ;;  %v4456_v47 = vperm.slane %v10453_v50, 0  ;;  %v4462_v12 = vperm.slane %v9210_v60, 0  ;;  %vm10454_vm2 = vcmask 1043459   ;;  %v10465_v7 = vld [vmem:[#allocation82_spill] sm:$0xff] }
 0x6c3   : > { %6435 = vmatmul.msk.bf16.gmra.mxu3 %vm10440_vm5, %v4907_v6  ;;  %v4497_v45 = vsel %vm10444_vm14, 0.0, %v4477_v46  ;;  %vm10445_vm7 = vmmov %vm10439_vm1  ;;  %v4480_v41 = vsel %vm10454_vm2, %v4452_v58, %v4479_v38  ;;  %v4463_v24 = vperm.slane %v10456_v62, 0  ;;  %v6455_v13 = vor.u32 %v6717_v49, %v6454_v17  ;;  %v6468_v38 = vld [vmem:[#allocation2 + $0xb70] sm:$0xf]  ;;  %v6718_v49 = vld [vmem:[#allocation2 + $0xbd4] sm:$0xf0] }
 0x6c4   : > { %v4500_v8 = vpack.c.bf16 %v4497_v45, %v4496_v51  ;;  %6437 = vmatmul.msk.bf16.gmra.mxu0 %vm10445_vm7, %v9266_v29  ;;  %vm10449_vm4 = vmmov %vm10448_vm10  ;;  %v4454_v29 = vperm.slane %v9190_v42, 0  ;;  %vm10459_vm7 = vcmask 1045509   ;;  %v6451_v39 = vor.u32 %v6716_v31, %v6450_v63  ;;  %v6442_v51 = vld [vmem:[#allocation2 + $0xb90] sm:$0xf]  ;;  %v6714_v45 = vld [vmem:[#allocation2 + $0xb94] sm:$0xf0] }
 0x6c5   : > { %v4485_v61 = vsel %vm10449_vm4, %v4458_v34, %v4457_v10  ;;  %vm10450_vm15 = vmmov %vm10439_vm1  ;;  %v4455_v10 = vperm.slane %v9193_v36, 0  ;;  %vm10457_vm1 = vcmask 1044484   ;;  %vm10461_vm4 = vcmask 1046534   ;;  %5151 = vmatpush.bf16.msra.mxu2 %v6455_v13  ;;  %5272 = vmatpush.bf16.msrb.mxu1 %v6455_v13  ;;  %v6478_v17 = vld [vmem:[#allocation2 + $0xbd0] sm:$0xf] }
 0x6c6   : > { %6438 = vmatmul.msk.bf16.vlgmr.msra.gmra.mxu1 %vm10450_vm15, %v4500_v8  ;;  %vm10452_vm0 = vmmov %vm10451_vm3  ;;  %v4481_v42 = vsel %vm10457_vm1, %v4453_v14, %v4480_v41  ;;  %vm10463_vm3 = vcmask 1047559   ;;  %v6473_v18 = vor.u32 %v6713_v3, %v6472_v11  ;;  %v6447_v34 = vor.u32 %v6715_v4, %v6446_v19  ;;  %v6464_v41 = vld [vmem:[#allocation2 + $0xb60] sm:$0xf] }
 0x6c7   : > { %v4486_v23 = vsel %vm10452_vm0, %v4459_v48, %v4485_v61  ;;  %vm10455_vm6 = vmmov %vm10454_vm2  ;;  %v4482_v56 = vsel %vm10459_vm7, %v4454_v29, %v4481_v42  ;;  %vm10464_vm0 = vcmask 1046528   ;;  %vm10466_vm2 = vnez %v10465_v7  ;;  %v6486_v42 = vld [vmem:[#allocation2 + $0xbf0] sm:$0xf] }
 0x6c8   : > { %v4487_v20 = vsel %vm10455_vm6, %v4460_v15, %v4486_v23  ;;  %vm10458_vm5 = vmmov %vm10457_vm1  ;;  %v4483_v25 = vsel %vm10461_vm4, %v4455_v10, %v4482_v56  ;;  %vm10468_vm6 = vnez %v10467_v33  ;;  %vm10469_vm1 = vcmask 523264   ;;  %5200 = vmatpush.bf16.msra.mxu3 %v6473_v18  ;;  %v6712_v23 = vld [vmem:[#allocation2 + $0xb74] sm:$0xf0] }
 0x6c9   : > { %v4488_v57 = vsel %vm10458_vm5, %v4461_v40, %v4487_v20  ;;  %vm10460_vm10 = vmmov %vm10459_vm7  ;;  %v4484_v1 = vsel %vm10463_vm3, %v4456_v47, %v4483_v25  ;;  %5152 = vmatpush.bf16.msra.mxu2 %v6451_v39  ;;  %5273 = vmatpush.bf16.msrb.mxu1 %v6451_v39  ;;  %v6443_v48 = vor.u32 %v6714_v45, %v6442_v51  ;;  %v6490_v47 = vld [vmem:[#allocation2 + $0xc00] sm:$0xf] }
 0x6ca   : > { %v4489_v22 = vsel %vm10460_vm10, %v4462_v12, %v4488_v57  ;;  %vm10462_vm15 = vmmov %vm10461_vm4  ;;  %v4498_v36 = vsel %vm10466_vm2, 0.0, %v4484_v1  ;;  %v6469_v50 = vor.u32 %v6712_v23, %v6468_v38  ;;  %v6721_v12 = vld [vmem:[#allocation2 + $0xc04] sm:$0xf0]  ;;  %v6720_v57 = vld [vmem:[#allocation2 + $0xbf4] sm:$0xf0]  ;;  %vm10473_vm4 = vcmask 1040384  }
 0x6cb   : > { %v4490_v60 = vsel %vm10462_vm15, %v4463_v24, %v4489_v22  ;;  %vm10470_vm5 = vmmov %vm10464_vm0  ;;  %v6491_v62 = vor.u32 %v6721_v12, %v6490_v47  ;;  %v6711_v24 = vld [vmem:[#allocation2 + $0xb64] sm:$0xf0]  ;;  %v6460_v22 = vld [vmem:[#allocation2 + $0xb50] sm:$0xf] }
 0x6cc   : > { %v4495_v37 = vsel %vm10464_vm0, %v4490_v60, 0.0  ;;  %vm10471_vm7 = vmmov %vm10469_vm1  ;;  %5201 = vmatpush.bf16.msra.mxu3 %v6469_v50  ;;  %v6465_v56 = vor.u32 %v6711_v24, %v6464_v41  ;;  %v6487_v60 = vor.u32 %v6720_v57, %v6486_v42  ;;  %v6710_v1 = vld [vmem:[#allocation2 + $0xb54] sm:$0xf0] }
 0x6cd   : > { %v4499_v30 = vsel %vm10468_vm6, 0.0, %v4495_v37  ;;  %5153 = vmatpush.bf16.msra.mxu2 %v6447_v34  ;;  %5274 = vmatpush.bf16.msrb.mxu1 %v6447_v34  ;;  %v6482_v37 = vld [vmem:[#allocation2 + $0xbe0] sm:$0xf]  ;;  %vm10472_vm10 = vmmov %vm10464_vm0 }
 0x6ce   : > { %v4501_v52 = vpack.c.bf16 %v4499_v30, %v4498_v36  ;;  %5249 = vmatpush.bf16.msrb.mxu0 %v6491_v62  ;;  %v6719_v36 = vld [vmem:[#allocation2 + $0xbe4] sm:$0xf0]  ;;  %v6461_v30 = vor.u32 %v6710_v1, %v6460_v22  ;;  %vm10474_vm15 = vmmov %vm10473_vm4 }
 0x6cf   : > { %vm10475_vm3 = vmmov %vm10469_vm1 }
 0x6d0   : > { %5202 = vmatpush.bf16.msra.mxu3 %v6465_v56  ;;  %vm10480_vm0 = vmmov %vm10469_vm1 }
 0x6d1   : > { %5154 = vmatpush.bf16.msra.mxu2 %v6443_v48  ;;  %5275 = vmatpush.bf16.msrb.mxu1 %v6443_v48 }
 0x6d2   : > { %5250 = vmatpush.bf16.msrb.mxu0 %v6487_v60 }
 0x6d4   : > { %5203 = vmatpush.bf16.msra.mxu3 %v6461_v30 }
 0x6d5   : > { %5291 = vmatpush.bf16.msrb.mxu2 %v6473_v18 }
 0x6d6   : > { %6439 = vmatmul.msk.bf16.gmra.mxu1 %vm10469_vm1, %v4501_v52  ;;  %v6483_v52 = vor.u32 %v6719_v36, %v6482_v37 }
 0x6d8   : > { %5316 = vmatpush.bf16.msrb.mxu3 %v6491_v62  ;;  %5251 = vmatpush.bf16.msrb.mxu0 %v6483_v52 }
 0x6d9   : > { %5292 = vmatpush.bf16.msrb.mxu2 %v6469_v50 }
 0x6dc   : > { %5317 = vmatpush.bf16.msrb.mxu3 %v6487_v60 }
 0x6dd   : > { %5293 = vmatpush.bf16.msrb.mxu2 %v6465_v56 }
 0x6e0   : > { %5318 = vmatpush.bf16.msrb.mxu3 %v6483_v52 }
 0x6e1   : > { %v4727_v16 = vpop.f32.mrf.mxu0  ;;  %5294 = vmatpush.bf16.msrb.mxu2 %v6461_v30 }
 0x6e9   : > { %v4729_v6 = vpop.f32.mrf.mxu0 }
 0x6f2   : > { %v4776_v43 = vpop.f32.mrf.mxu1 }
 0x6f3   : > { %v4777_v54 = vadd.f32 %v4776_v43, %v4727_v16 }
 0x6fa   : > { %v4778_v27 = vpop.f32.mrf.mxu1 }
 0x6fb   : > { %v4779_v26 = vadd.f32 %v4778_v27, %v4729_v6 }
 0x708   : > { %v4947_v55 = vpop.f32.mrf.mxu2 }
 0x709   : > { %v4957_v2 = vadd.f32 %v4947_v55, %v4777_v54  ;;  %v4970_v25 = vpop.f32.mrf.mxu3  ;;  %v6479_v55 = vor.u32 %v6718_v49, %v6478_v17 }
 0x70b   : > { %v5028_v0 = vadd.f32 %v4957_v2, %v9479_v35  ;;  %5252 = vmatpush.bf16.msrb.mxu0 %v6479_v55  ;;  %5319 = vmatpush.bf16.msrb.mxu3 %v6479_v55 }
 0x70d   : > { %v5032_v8 = vmax.f32 %v5028_v0, 0.0 }
 0x70f   : > { %v5095_v15 = vrot.slane %v5032_v8, 1 }
 0x710   : > { %v4949_v46 = vpop.f32.mrf.mxu2 }
 0x711   : > { %v4958_v32 = vadd.f32 %v4949_v46, %v4779_v26  ;;  %v4972_v31 = vpop.f32.mrf.mxu3 }
 0x713   : > { %v5029_v58 = vadd.f32 %v4958_v32, %v9479_v35 }
 0x715   : > { %v5033_v14 = vmax.f32 %v5029_v58, 0.0 }
 0x717   : > { %v9483_v9 = vrot.slane %v5033_v14, 1  ;;  %v9485_v44 = vpack.c.bf16 %v5033_v14, %v5032_v8 }
 0x719   : > { %v9489_v28 = vsel %vm10470_vm5, %v5095_v15, %v9483_v9  ;;  %6456 = vmatmul.msk.bf16.vlgmr.msra.gmra.mxu2 %vm10471_vm7, %v9485_v44  ;;  %vm10484_vm5 = vmmov %vm10473_vm4 }
 0x71a   : > { %v4732_v61 = vpop.f32.mrf.mxu0  ;;  %v5107_v58 = vsel %vm10442_vm11, 0.0, %v9489_v28  ;;  %vm10476_vm11 = vmmov %vm10469_vm1 }
 0x71b   : > { %vm10485_vm7 = vmmov %vm10480_vm0 }
 0x722   : > { %v4734_v29 = vpop.f32.mrf.mxu0 }
 0x72b   : > { %v4781_v40 = vpop.f32.mrf.mxu1 }
 0x72c   : > { %v4989_v20 = vpop.f32.mrf.mxu0  ;;  %v4782_v63 = vadd.f32 %v4781_v40, %v4732_v61 }
 0x72d   : > { %v4990_v13 = vadd.f32 %v4989_v20, %v4970_v25 }
 0x733   : > { %v4783_v10 = vpop.f32.mrf.mxu1 }
 0x734   : > { %v4991_v43 = vpop.f32.mrf.mxu0  ;;  %v4784_v6 = vadd.f32 %v4783_v10, %v4734_v29 }
 0x735   : > { %v4992_v3 = vadd.f32 %v4991_v43, %v4972_v31 }
 0x741   : > { %v4994_v0 = vpop.f32.mrf.mxu0 }
 0x743   : > { %v5014_v16 = vpop.f32.mrf.mxu1  ;;  %v4952_v19 = vpop.f32.mrf.mxu2 }
 0x744   : > { %v5024_v54 = vadd.f32 %v5014_v16, %v4990_v13  ;;  %v4959_v4 = vadd.f32 %v4952_v19, %v4782_v63 }
 0x746   : > { %v5036_v39 = vadd.f32 %v5024_v54, %v9479_v35  ;;  %v5030_v11 = vadd.f32 %v4959_v4, %v9479_v35  ;;  %v4975_v48 = vpop.f32.mrf.mxu3 }
 0x747   : > { %v4995_v38 = vadd.f32 %v4994_v0, %v4975_v48 }
 0x748   : > { %v5040_v2 = vmax.f32 %v5036_v39, 0.0  ;;  %v5034_v18 = vmax.f32 %v5030_v11, 0.0 }
 0x749   : > { %v4996_v42 = vpop.f32.mrf.mxu0 }
 0x74a   : > { %v5098_v26 = vrot.slane %v5034_v18, 1  ;;  %v5073_v46 = vrot.slane %v5040_v2, 7 }
 0x74b   : > { %v5016_v27 = vpop.f32.mrf.mxu1  ;;  %v4954_v32 = vpop.f32.mrf.mxu2 }
 0x74c   : > { %v5025_v34 = vadd.f32 %v5016_v27, %v4992_v3  ;;  %v5099_v45 = vsel %vm10472_vm10, %v9483_v9, %v5098_v26  ;;  %v4960_v8 = vadd.f32 %v4954_v32, %v4784_v6  ;;  %v5084_v40 = vsel %vm10473_vm4, 0.0, %v5073_v46  ;;  %vm10486_vm10 = vmmov %vm10480_vm0  ;;  %v5068_v3 = vld [vmem:[#allocation5 + $0x11] ss:$0 sm:$0xff] }
 0x74d   : > { %v5108_v14 = vsel %vm10444_vm14, 0.0, %v5099_v45  ;;  %v5085_v21 = vsel %vm7438_vm8, 0.0, %v5084_v40  ;;  %vm10479_vm14 = vmmov %vm10469_vm1 }
 0x74e   : > { %v5037_v51 = vadd.f32 %v5025_v34, %v9479_v35  ;;  %v5111_v61 = vpack.c.bf16 %v5108_v14, %v5107_v58  ;;  %v5031_v29 = vadd.f32 %v4960_v8, %v9479_v35  ;;  %v4977_v57 = vpop.f32.mrf.mxu3  ;;  %vm10481_vm8 = vmmov %vm10473_vm4 }
 0x74f   : > { %v4997_v56 = vadd.f32 %v4996_v42, %v4977_v57  ;;  %vm10483_vm1 = vmmov %vm10480_vm0 }
 0x750   : > { %v5041_v15 = vmax.f32 %v5037_v51, 0.0  ;;  %v5035_v47 = vmax.f32 %v5031_v29, 0.0  ;;  %vm10487_vm4 = vmmov %vm10480_vm0 }
 0x752   : > { %v5074_v23 = vrot.slane %v5041_v15, 7  ;;  %v5115_v50 = vpack.c.bf16 %v5041_v15, %v5040_v2  ;;  %v5114_v28 = vpack.c.bf16 %v5035_v47, %v5034_v18 }
 0x753   : > { %v5019_v9 = vpop.f32.mrf.mxu1 }
 0x754   : > { %v5075_v12 = vsel %vm10474_vm15, %v5073_v46, %v5074_v23  ;;  %v5026_v41 = vadd.f32 %v5019_v9, %v4995_v38  ;;  %6492 = vmatmul.msk.bf16.vlgmr.msrb.gmra.mxu0 %vm10475_vm3, %v5115_v50  ;;  %6494 = vmatmul.msk.bf16.vlgmr.msrb.gmra.mxu1 %vm10476_vm11, %v5115_v50  ;;  %vm10488_vm15 = vmmov %vm10480_vm0  ;;  %vm10489_vm3 = vcmask 1046528  }
 0x755   : > { %v5086_v10 = vsel %vm7460_vm9, 0.0, %v5075_v12  ;;  %6457 = vmatmul.msk.bf16.gmra.mxu2 %vm10479_vm14, %v5114_v28  ;;  %vm10482_vm9 = vmmov %vm10480_vm0 }
 0x756   : > { %v5089_v62 = vpack.c.bf16 %v5086_v10, %v5085_v21  ;;  %v5038_v24 = vadd.f32 %v5026_v41, %v9479_v35  ;;  %vm10490_vm11 = vmmov %vm10489_vm3 }
 0x757   : > { %vm10495_vm14 = vmmov %vm10480_vm0 }
 0x758   : > { %6474 = vmatmul.msk.bf16.vlgmr.msra.gmra.mxu3 %vm10480_vm0, %v5089_v62  ;;  %v5042_v22 = vmax.f32 %v5038_v24, 0.0 }
 0x75a   : > { %v5076_v1 = vrot.slane %v5042_v22, 7 }
 0x75b   : > { %v5021_v25 = vpop.f32.mrf.mxu1 }
 0x75c   : > { %v5027_v60 = vadd.f32 %v5021_v25, %v4997_v56  ;;  %v5077_v17 = vsel %vm10481_vm8, %v5074_v23, %v5076_v1 }
 0x75d   : > { %v5087_v13 = vsel %vm7826_vm13, 0.0, %v5077_v17  ;;  %vm10492_vm13 = vmmov %vm10480_vm0 }
 0x75e   : > { %v5039_v37 = vadd.f32 %v5027_v60, %v9479_v35  ;;  %v5100_v35 = vrot.slane %v5035_v47, 1 }
 0x760   : > { %v5043_v36 = vmax.f32 %v5039_v37, 0.0  ;;  %v5106_v55 = vsel %vm10489_vm3, %v5100_v35, 0.0  ;;  %v5101_v54 = vsel %vm10490_vm11, %v5098_v26, %v5100_v35 }
 0x761   : > { %v5110_v59 = vsel %vm10468_vm6, 0.0, %v5106_v55  ;;  %v5109_v53 = vsel %vm10466_vm2, 0.0, %v5101_v54  ;;  %vm10493_vm2 = vmmov %vm10480_vm0 }
 0x762   : > { %v5078_v30 = vrot.slane %v5043_v36, 7  ;;  %v5116_v52 = vpack.c.bf16 %v5043_v36, %v5042_v22  ;;  %v5112_v63 = vpack.c.bf16 %v5110_v59, %v5109_v53  ;;  %vm10494_vm6 = vmmov %vm10480_vm0 }
 0x764   : > { %6493 = vmatmul.msk.bf16.gmra.mxu0 %vm10482_vm9, %v5116_v52  ;;  %6495 = vmatmul.msk.bf16.gmra.mxu1 %vm10483_vm1, %v5116_v52  ;;  %v5079_v49 = vsel %vm10484_vm5, %v5076_v1, %v5078_v30 }
 0x765   : > { %v5088_v43 = vsel %vm7814_vm12, 0.0, %v5079_v49  ;;  %6496 = vmatmul.msk.bf16.vlgmr.msrb.gmra.mxu2 %vm10485_vm7, %v9485_v44  ;;  %vm10491_vm12 = vmmov %vm10480_vm0 }
 0x766   : > { %v5090_v16 = vpack.c.bf16 %v5088_v43, %v5087_v13 }
 0x768   : > { %6475 = vmatmul.msk.bf16.gmra.mxu3 %vm10486_vm10, %v5090_v16 }
 0x775   : > { %6497 = vmatmul.msk.bf16.gmra.mxu2 %vm10487_vm4, %v5114_v28 }
 0x778   : > { %6498 = vmatmul.msk.bf16.vlgmr.msrb.gmra.mxu3 %vm10488_vm15, %v5111_v61 }
 0x788   : > { %6499 = vmatmul.msk.bf16.gmra.mxu3 %vm10491_vm12, %v5112_v63 }
 0x79c   : > { %v5156_v44 = vpop.f32.mrf.mxu2 }
 0x7a4   : > { %v5158_v31 = vpop.f32.mrf.mxu2 }
 0x7d1   : > { %v5254_v19 = vpop.f32.mrf.mxu0  ;;  %v5277_v8 = vpop.f32.mrf.mxu1 }
 0x7d8   : > { %v5161_v11 = vpop.f32.mrf.mxu2 }
 0x7d9   : > { %v5256_v27 = vpop.f32.mrf.mxu0  ;;  %v5279_v47 = vpop.f32.mrf.mxu1 }
 0x7db   : > { %v5205_v39 = vpop.f32.mrf.mxu3 }
 0x7dc   : > { %v5206_v4 = vadd.f32 %v5205_v39, %v5156_v44 }
 0x7de   : > { %v5264_v2 = vadd.f32 %v5254_v19, %v5206_v4 }
 0x7e0   : > { %v5335_v18 = vadd.f32 %v5264_v2, %v5068_v3  ;;  %v5163_v26 = vpop.f32.mrf.mxu2 }
 0x7e1   : > { %v5259_v7 = vpop.f32.mrf.mxu0  ;;  %v5282_v10 = vpop.f32.mrf.mxu1 }
 0x7e2   : > { %v5339_v17 = vmax.f32 %v5335_v18, 0.0 }
 0x7e3   : > { %v5207_v34 = vpop.f32.mrf.mxu3 }
 0x7e4   : > { %v5208_v6 = vadd.f32 %v5207_v34, %v5158_v31 }
 0x7e6   : > { %v5265_v33 = vadd.f32 %v5256_v27, %v5208_v6 }
 0x7e8   : > { %v5336_v0 = vadd.f32 %v5265_v33, %v5068_v3  ;;  %v5296_v48 = vpop.f32.mrf.mxu2 }
 0x7e9   : > { %v5261_v15 = vpop.f32.mrf.mxu0  ;;  %v5297_v40 = vadd.f32 %v5296_v48, %v5277_v8  ;;  %v5284_v60 = vpop.f32.mrf.mxu1 }
 0x7ea   : > { %v5340_v55 = vmax.f32 %v5336_v0, 0.0 }
 0x7eb   : > { %v5210_v46 = vpop.f32.mrf.mxu3 }
 0x7ec   : > { %v5211_v32 = vadd.f32 %v5210_v46, %v5161_v11 }
 0x7ee   : > { %v5266_v51 = vadd.f32 %v5259_v7, %v5211_v32 }
 0x7f0   : > { %v9536_v45 = vadd.f32 %v5266_v51, %v5068_v3  ;;  %v5298_v38 = vpop.f32.mrf.mxu2 }
 0x7f1   : > { %v5299_v41 = vadd.f32 %v5298_v38, %v5279_v47 }
 0x7f2   : > { %v5341_v53 = vmax.f32 %v9536_v45, 0.0 }
 0x7f3   : > { %v5212_v58 = vpop.f32.mrf.mxu3 }
 0x7f4   : > { %v5213_v14 = vadd.f32 %v5212_v58, %v5163_v26 }
 0x7f6   : > { %v5267_v61 = vadd.f32 %v5261_v15, %v5213_v14 }
 0x7f8   : > { %v5338_v29 = vadd.f32 %v5267_v61, %v5068_v3  ;;  %v5301_v28 = vpop.f32.mrf.mxu2 }
 0x7f9   : > { %v5302_v24 = vadd.f32 %v5301_v28, %v5282_v10 }
 0x7fa   : > { %v5342_v43 = vmax.f32 %v5338_v29, 0.0 }
 0x7fb   : > { %v5321_v23 = vpop.f32.mrf.mxu3 }
 0x7fc   : > { %v5331_v50 = vadd.f32 %v5321_v23, %v5297_v40 }
 0x7fe   : > { %v5343_v9 = vadd.f32 %v5331_v50, %v5068_v3 }
 0x800   : > { %v5347_v12 = vmax.f32 %v5343_v9, 0.0  ;;  %v5303_v22 = vpop.f32.mrf.mxu2 }
 0x801   : > { %v5304_v1 = vadd.f32 %v5303_v22, %v5284_v60 }
 0x802   : > { %5355 = vrot.lane.b32.xlu2 %v5347_v12, %s6975_s28 }
 0x803   : > { %v5323_v5 = vpop.f32.mrf.mxu3 }
 0x804   : > { %v5332_v21 = vadd.f32 %v5323_v5, %v5299_v41 }
 0x806   : > { %v5344_v20 = vadd.f32 %v5332_v21, %v5068_v3 }
 0x808   : > { %v5348_v62 = vmax.f32 %v5344_v20, 0.0 }
 0x80a   : > { %5357 = vrot.lane.b32.xlu0 %v5348_v62, %s6975_s28 }
 0x80b   : > { %v5326_v42 = vpop.f32.mrf.mxu3 }
 0x80c   : > { %v5333_v57 = vadd.f32 %v5326_v42, %v5302_v24 }
 0x80e   : > { %v5345_v56 = vadd.f32 %v5333_v57, %v5068_v3 }
 0x810   : > { %v5349_v25 = vmax.f32 %v5345_v56, 0.0 }
 0x812   : > { %5359 = vrot.lane.b32.xlu1 %v5349_v25, %s6975_s28 }
 0x813   : > { %v5328_v37 = vpop.f32.mrf.mxu3 }
 0x814   : > { %v5334_v36 = vadd.f32 %v5328_v37, %v5304_v1 }
 0x816   : > { %v5346_v30 = vadd.f32 %v5334_v36, %v5068_v3 }
 0x818   : > { %v5350_v52 = vmax.f32 %v5346_v30, 0.0 }
 0x81a   : > { %5361 = vrot.lane.b32.xlu2 %v5350_v52, %s6975_s28 }
 0x85c   : > { %v5356_v49 = vpop.permute.xlu2 %5355 }
 0x85d   : > { %v5367_v13 = vsel %vm10492_vm13, %v5339_v17, %v5356_v49 }
 0x85e   : > { %5371 = vst [vmem:[%s198_s4] sm:$0xff] %v5367_v13 }
 0x874   : > { %v5362_v16 = vpop.permute.xlu2 %5361 }
 0x875   : > { %v5370_v35 = vsel %vm10493_vm2, %v5342_v43, %v5362_v16 }
 0x876   : > { %5374 = vst [vmem:[%s198_s4 + $0x18] sm:$0xff] %v5370_v35 }
 0x87c   : > { %v5358_v54 = vpop.permute.xlu0 %5357 }
 0x87d   : > { %v5368_v59 = vsel %vm10494_vm6, %v5340_v55, %v5358_v54 }
 0x87e   : > { %5372 = vst [vmem:[%s198_s4 + $0x8] sm:$0xff] %v5368_v59 }
 0x884   : > { %v5360_v63 = vpop.permute.xlu1 %5359 }
 0x885   : > { %v5369_v44 = vsel %vm10495_vm14, %v5341_v53, %v5360_v63 }
 0x886   : > { %5373 = vst [vmem:[%s198_s4 + $0x10] sm:$0xff] %v5369_v44 }
 0x887   : > { %6922 = shalt.err (!%p6919_p8)
}
 0x888   : > { %s6976_s28 = smov 128  }
 0x889   : > { %6735 = dma.vmem_to_hbm [thread:$0]  (%p7035_p5), %s5389_s9, 512, %s5391_s10, %s5376_s16, %s6976_s28, %s6976_s28, %s6974_s27  }
 0x88a PF: > { %p6752_p9 = scmp.ge.s32.totalorder %s6965_s15, 2  ;;  %s5405_s29 = sand.u32 1, %s6953_s12  }
 0x88b   : > { %s5406_s30 = scalar_lea.sflag [#allocation4], %s5405_s29 }
 0x88c   : > { %p6745_p10 = pnand %p6752_p9, %p7039_p6 }
 0x88e   : > { %p6746_p11 = pneg %p6745_p10 }
 0x890   : > { %6948 = dma.done.wait (%p6746_p11), %s5406_s30, 512  }
 0x891   : > { %6950 = vsyncadd (%p6746_p11), %s5406_s30, 4294966784  ;;  %p15_p12 = scmp.ge.s32.totalorder %s7022_s18, 4   ;;  %s10496_s12 = smov %s6957_s13 }
 0x892   : > { %s10497_s13 = smov %s6961_s14  ;;  %s10498_s14 = smov %s7033_s21 }
 0x893   : > { %s10499_s15 = smov %s7022_s18  ;;  %17 = sbr.rel (!%p15_p12) target bundleno = 5 (0x5), region = 84 }
 0x898   :  { %5412 = vsyncpa [#allocation3], 1 }
 0x899   :  { %5414 = vsyncpa [#allocation3 + $0x1], 1 }
 0x89a   :  { %5415 = vsyncpa [#allocation6], 1 }
 0x89b   :  { %5416 = vsyncpa [#allocation4], 1 }
 0x89c   :  { %5418 = vsyncpa [#allocation4 + $0x1], 1 }

</bundles_post_ra>
